<compile_context>
chip_gen: v7x
topology: tpu7x:2x2x1
jax: 0.10.0
libtpu: 0.0.40
codegen_flags: <defaults>
</compile_context>

<pallas_src>
import functools
import math

import jax
import jax.numpy as jnp
from jax.experimental import pallas as pl
from jax.experimental.pallas import tpu as pltpu

# Finite large-negative mask value (avoids exp(-inf - (-inf)) NaNs if a whole
# block-row ever ends up masked, e.g. for future ragged/cross-attention reuse).
_MASK_VALUE = -0.7 * float(jnp.finfo(jnp.float32).max)


def _flash_fwd_kernel(q_ref, k_ref, v_ref, o_ref, m_sc, l_sc, acc_sc, *,
                      softmax_scale, causal, num_heads, head_dim, tq, tk):
    qi = pl.program_id(1)
    kv = pl.program_id(2)

    @pl.when(kv == 0)
    def _init():
        m_sc[...] = jnp.full_like(m_sc, _MASK_VALUE)
        l_sc[...] = jnp.zeros_like(l_sc)
        acc_sc[...] = jnp.zeros_like(acc_sc)

    def compute(apply_mask):
        # Loads live inside the (possibly skipped) branch, so fully-masked
        # causal tiles issue no vector loads and no MXU/EUP work.
        q = q_ref[0]                                   # (tq, H*D), input dtype
        k = k_ref[0]                                   # (tk, H*D)
        v = v_ref[0]                                   # (tk, H*D)
        # Fold the softmax scale into q once per block (tq*H*D elements)
        # instead of scaling every (tq, tk) score tile per head.
        q = q * jnp.asarray(softmax_scale, dtype=q.dtype)

        if apply_mask:
            row = qi * tq + jax.lax.broadcasted_iota(jnp.int32, (tq, tk), 0)
            col = kv * tk + jax.lax.broadcasted_iota(jnp.int32, (tq, tk), 1)
            mask = col <= row                          # shared across all heads

        for h in range(num_heads):
            lo, hi = h * head_dim, (h + 1) * head_dim
            qh = q[:, lo:hi]                           # (tq, D)
            kh = k[:, lo:hi]                           # (tk, D)
            vh = v[:, lo:hi]                           # (tk, D)

            # QK^T expressed as a last-dim contraction: the MXU takes K
            # untransposed, no explicit transpose of the K tile per kv step.
            s = jax.lax.dot_general(
                qh, kh, (((1,), (1,)), ((), ())),
                preferred_element_type=jnp.float32)    # (tq, tk) f32

            if apply_mask:
                s = jnp.where(mask, s, _MASK_VALUE)

            m_prev = m_sc[h]                                         # (tq, 1)
            m_new = jnp.maximum(m_prev, s.max(axis=-1, keepdims=True))
            alpha = jnp.exp(m_prev - m_new)
            p = jnp.exp(s - m_new)                                   # (tq, tk)
            # TODO(synk): on v6e/v7x the exp could run in bf16 (2x EUP); kept
            # f32 so the same kernel stays efficient on v5e (no bf16 EUP).

            l_sc[h] = alpha * l_sc[h] + p.sum(axis=-1, keepdims=True)
            acc_sc[h] = alpha * acc_sc[h] + jnp.dot(
                p.astype(vh.dtype), vh, preferred_element_type=jnp.float32)
            m_sc[h] = m_new

    if causal:
        row_min = qi * tq
        row_max = qi * tq + (tq - 1)
        col_min = kv * tk
        col_max = kv * tk + (tk - 1)

        fully_visible = col_max <= row_min     # strictly below the diagonal
        straddles = jnp.logical_and(col_min <= row_max, col_max > row_min)
        # Tiles with col_min > row_max are fully masked: neither branch runs.

        @pl.when(fully_visible)
        def _():
            compute(apply_mask=False)

        @pl.when(straddles)
        def _():
            compute(apply_mask=True)
    else:
        compute(apply_mask=False)

    @pl.when(kv == pl.num_programs(2) - 1)
    def _finalize():
        outs = []
        for h in range(num_heads):
            inv_l = pl.reciprocal(l_sc[h], approx=True)   # EUP slot, ~free
            outs.append(acc_sc[h] * inv_l)                # (tq, D) f32
        # Single lane-dense (tq, H*D) result -> one unmasked full-width store.
        o_ref[0] = jnp.concatenate(outs, axis=-1).astype(o_ref.dtype)


def _pick_tile(seq_len, cap):
    """Largest divisor of seq_len that is <= cap and a multiple of 8 (or seq_len)."""
    cap = max(1, min(cap, seq_len))
    for t in range(cap, 0, -1):
        if seq_len % t == 0 and (t % 8 == 0 or t == seq_len):
            return t
    return seq_len


def _flash_attention(q, k, v, *, softmax_scale, causal, tq=None, tk=None):
    """q, k, v: (B, S, H, D) -> out (B, S, H, D). No host-side transposes."""
    B, S, H, D = q.shape
    HD = H * D

    # Bigger tiles amortize the ~0.35us/step pipeline overhead and cut K/V
    # HBM re-streaming (traffic ~ S/tq); the caps keep the double-buffered
    # blocks well inside v7x's 64 MiB VMEM even for long sequences.
    if tq is None:
        tq = _pick_tile(S, 256)
    if tk is None:
        tk = _pick_tile(S, 512)
    assert S % tq == 0 and S % tk == 0

    # Free reshape (row-major contiguous): the DMA'd slabs become H*D lane-dense.
    q2 = q.reshape(B, S, HD)
    k2 = k.reshape(B, S, HD)
    v2 = v.reshape(B, S, HD)

    kernel = functools.partial(
        _flash_fwd_kernel, softmax_scale=softmax_scale, causal=causal,
        num_heads=H, head_dim=D, tq=tq, tk=tk)

    # Grid: (batch, q-tile, kv-tile). kv is the (sequential) reduction axis.
    # B * (S // tq) should be >= 2 so v7x's two TensorCores both get work.
    grid = (B, S // tq, S // tk)

    itemsize = jnp.dtype(q.dtype).itemsize
    block_bytes = 2 * (2 * tq * HD + 2 * tk * HD) * itemsize   # dbl-buffered q,o,k,v
    scratch_bytes = 3 * H * tq * max(D, 128) * 4               # padded-lane estimate
    vmem_limit = int(min(56 * 1024 * 1024,
                         max(32 * 1024 * 1024,
                             block_bytes + scratch_bytes + 16 * 1024 * 1024)))

    out = pl.pallas_call(
        kernel,
        out_shape=jax.ShapeDtypeStruct((B, S, HD), q.dtype),
        grid_spec=pltpu.PrefetchScalarGridSpec(
            num_scalar_prefetch=0,
            grid=grid,
            in_specs=[
                pl.BlockSpec((1, tq, HD), lambda b, i, j: (b, i, 0)),
                # TODO(synk): add pipeline_mode=pl.Buffered(3) on k/v if a
                # profile shows exposed HBM DMA after tile enlargement.
                pl.BlockSpec((1, tk, HD), lambda b, i, j: (b, j, 0)),
                pl.BlockSpec((1, tk, HD), lambda b, i, j: (b, j, 0)),
            ],
            out_specs=pl.BlockSpec((1, tq, HD), lambda b, i, j: (b, i, 0)),
            scratch_shapes=[
                pltpu.VMEM((H, tq, 1), jnp.float32),   # running max m (per head)
                pltpu.VMEM((H, tq, 1), jnp.float32),   # running denom l (per head)
                pltpu.VMEM((H, tq, D), jnp.float32),   # per-head output accumulator
            ],
        ),
        compiler_params=pltpu.CompilerParams(
            dimension_semantics=("parallel", "parallel", "arbitrary"),
            vmem_limit_bytes=vmem_limit),
    )(q2, k2, v2)

    return out.reshape(B, S, H, D)


def _seq_all_to_all_4d(x, scatter_idx, gather_idx, world_size=1):
    # With a single-device ulysses / ring process group the all-to-all is identity.
    # TODO(synk): multi-device SeqAllToAll4D via pltpu.make_async_remote_copy.
    del scatter_idx, gather_idx, world_size
    return x


class HybridAttention:
    """JAX/Pallas port of HybridAttention forward (single-device sequence parallel)."""

    def __init__(self, scatter_idx: int = 2, gather_idx: int = 1,
                 use_pack_qkv: bool = False):
        if use_pack_qkv:
            raise NotImplementedError("Packed qkv is not supported yet.")
        self.scatter_idx = scatter_idx
        self.gather_idx = gather_idx

    def __call__(self, query, key, value, *, attention_mask=None, dropout_p=0.0,
                 softmax_scale=None, causal=False, window_size=(-1, -1),
                 alibi_slopes=None, deterministic=False, return_attn_probs=False):
        assert dropout_p == 0.0, "inference-style forward; no dropout RNG"
        assert attention_mask is None   # TODO(synk): varlen / attention-mask path
        assert tuple(window_size) == (-1, -1)   # TODO(synk): sliding-window attention
        assert alibi_slopes is None             # TODO(synk): alibi bias
        del deterministic, return_attn_probs    # output-only path, matches torch module

        # ulysses all-to-all (identity at world_size == 1)
        q = _seq_all_to_all_4d(query, self.scatter_idx, self.gather_idx)
        k = _seq_all_to_all_4d(key, self.scatter_idx, self.gather_idx)
        v = _seq_all_to_all_4d(value, self.scatter_idx, self.gather_idx)

        D = q.shape[-1]
        if softmax_scale is None:
            softmax_scale = 1.0 / math.sqrt(D)

        out = _flash_attention(q, k, v, softmax_scale=softmax_scale, causal=causal)

        # reverse all-to-all (identity at world_size == 1)
        return _seq_all_to_all_4d(out, self.gather_idx, self.scatter_idx)


def _reference_attention(q, k, v, softmax_scale, causal):
    # q, k, v: (B, S, H, D); math in f32.
    qf = q.astype(jnp.float32)
    kf = k.astype(jnp.float32)
    vf = v.astype(jnp.float32)
    s = jnp.einsum("bqhd,bkhd->bhqk", qf, kf) * softmax_scale
    if causal:
        S = q.shape[1]
        mask = jnp.tril(jnp.ones((S, S), dtype=bool))
        s = jnp.where(mask[None, None], s, -jnp.inf)
    p = jax.nn.softmax(s, axis=-1)
    return jnp.einsum("bhqk,bkhd->bqhd", p, vf).astype(q.dtype)


if __name__ == "__main__":
    B, S, H, D = 2, 128, 4, 32   # (batch, seqlen, num_heads, head_dim)
    key0 = jax.random.PRNGKey(0)
    kq, kk, kv = jax.random.split(key0, 3)
    q32 = jax.random.normal(kq, (B, S, H, D), dtype=jnp.float32)
    k32 = jax.random.normal(kk, (B, S, H, D), dtype=jnp.float32)
    v32 = jax.random.normal(kv, (B, S, H, D), dtype=jnp.float32)
    scale = 1.0 / math.sqrt(D)

    attn = HybridAttention(scatter_idx=2, gather_idx=1)

    # 1) f32, non-causal.
    out = jax.block_until_ready(attn(q32, k32, v32, causal=False))
    ref = _reference_attention(q32, k32, v32, scale, causal=False)
    assert out.shape == (B, S, H, D)
    assert jnp.allclose(out, ref, atol=5e-3, rtol=1e-2)

    # 2) bf16, causal (exercises bf16 MXU operands + causal tile handling).
    qb, kb, vb = (x.astype(jnp.bfloat16) for x in (q32, k32, v32))
    out_b = jax.block_until_ready(attn(qb, kb, vb, causal=True))
    ref_b = _reference_attention(qb, kb, vb, scale, causal=True)
    assert jnp.allclose(out_b.astype(jnp.float32), ref_b.astype(jnp.float32),
                        atol=4e-2, rtol=4e-2)

    # 3) bf16, causal, longer sequence with explicit small tiles so the grid has
    #    multiple kv steps: exercises the online-softmax accumulation and all
    #    three causal branches (skip / unmasked / masked diagonal).
    S2 = 256
    kq2, kk2, kv2 = jax.random.split(jax.random.PRNGKey(0), 3)
    q2 = jax.random.normal(kq2, (B, S2, H, D), dtype=jnp.bfloat16)
    k2 = jax.random.normal(kk2, (B, S2, H, D), dtype=jnp.bfloat16)
    v2 = jax.random.normal(kv2, (B, S2, H, D), dtype=jnp.bfloat16)
    out2 = jax.block_until_ready(
        _flash_attention(q2, k2, v2, softmax_scale=scale, causal=True,
                         tq=128, tk=128))
    ref2 = _reference_attention(q2, k2, v2, scale, causal=True)
    assert jnp.allclose(out2.astype(jnp.float32), ref2.astype(jnp.float32),
                        atol=4e-2, rtol=4e-2)

    print("KERNEL_OK")
</pallas_src>

<mosaic_0001>
module attributes {stable_mosaic.version = 11 : i64} {
  func.func @_flash_fwd_kernel(%arg0: i32, %arg1: i32, %arg2: i32, %arg3: memref<1x128x128xf32, #tpu.memory_space<vmem>>, %arg4: memref<1x128x128xf32, #tpu.memory_space<vmem>>, %arg5: memref<1x128x128xf32, #tpu.memory_space<vmem>>, %arg6: memref<1x128x128xf32, #tpu.memory_space<vmem>>, %arg7: memref<4x128x1xf32, #tpu.memory_space<vmem>>, %arg8: memref<4x128x1xf32, #tpu.memory_space<vmem>>, %arg9: memref<4x128x32xf32, #tpu.memory_space<vmem>>) attributes {dimension_semantics = [#tpu.dimension_semantics<parallel>, #tpu.dimension_semantics<parallel>, #tpu.dimension_semantics<arbitrary>], iteration_bounds = array<i64: 2, 1, 1>, scalar_prefetch = 0 : i64, scratch_operands = 3 : i64, tpu.core_type = #tpu.core_type<tc>, window_params = [{transform_indices = @transform_0, window_bounds = array<i64: 1, 128, 128>}, {transform_indices = @transform_1, window_bounds = array<i64: 1, 128, 128>}, {transform_indices = @transform_2, window_bounds = array<i64: 1, 128, 128>}, {transform_indices = @transform_3, window_bounds = array<i64: 1, 128, 128>}]} {
    %c0_i32 = arith.constant 0 : i32
    %0 = arith.cmpi eq, %arg2, %c0_i32 : i32
    %1 = arith.extui %0 : i1 to i32
    %c0_i32_0 = arith.constant 0 : i32
    %2 = arith.cmpi ne, %1, %c0_i32_0 : i32
    scf.if %2 {
      %cst_96 = arith.constant -2.38197633E+38 : f32
      %154 = vector.broadcast %cst_96 : f32 to vector<4x128x1xf32>
      %c0_97 = arith.constant 0 : index
      %c0_98 = arith.constant 0 : index
      %c0_99 = arith.constant 0 : index
      %155 = vector.load %arg7[%c0_97, %c0_98, %c0_99] : memref<4x128x1xf32, #tpu.memory_space<vmem>>, vector<4x128x1xf32>
      tpu.vector_store %arg7[%c0_97, %c0_98, %c0_99], %154 {strides = array<i32>} : memref<4x128x1xf32, #tpu.memory_space<vmem>>, vector<4x128x1xf32>,
      %cst_100 = arith.constant 0.000000e+00 : f32
      %156 = vector.broadcast %cst_100 : f32 to vector<4x128x1xf32>
      %c0_101 = arith.constant 0 : index
      %c0_102 = arith.constant 0 : index
      %c0_103 = arith.constant 0 : index
      %157 = vector.load %arg8[%c0_101, %c0_102, %c0_103] : memref<4x128x1xf32, #tpu.memory_space<vmem>>, vector<4x128x1xf32>
      tpu.vector_store %arg8[%c0_101, %c0_102, %c0_103], %156 {strides = array<i32>} : memref<4x128x1xf32, #tpu.memory_space<vmem>>, vector<4x128x1xf32>,
      %cst_104 = arith.constant 0.000000e+00 : f32
      %158 = vector.broadcast %cst_104 : f32 to vector<4x128x32xf32>
      %c0_105 = arith.constant 0 : index
      %c0_106 = arith.constant 0 : index
      %c0_107 = arith.constant 0 : index
      %159 = vector.load %arg9[%c0_105, %c0_106, %c0_107] : memref<4x128x32xf32, #tpu.memory_space<vmem>>, vector<4x128x32xf32>
      tpu.vector_store %arg9[%c0_105, %c0_106, %c0_107], %158 {strides = array<i32>} : memref<4x128x32xf32, #tpu.memory_space<vmem>>, vector<4x128x32xf32>,
    } else {
    }
    %c0 = arith.constant 0 : index
    %c0_1 = arith.constant 0 : index
    %c0_2 = arith.constant 0 : index
    %3 = vector.load %arg3[%c0, %c0_1, %c0_2] : memref<1x128x128xf32, #tpu.memory_space<vmem>>, vector<1x128x128xf32>
    %4 = vector.shape_cast %3 : vector<1x128x128xf32> to vector<128x128xf32>
    %c0_3 = arith.constant 0 : index
    %c0_4 = arith.constant 0 : index
    %c0_5 = arith.constant 0 : index
    %5 = vector.load %arg4[%c0_3, %c0_4, %c0_5] : memref<1x128x128xf32, #tpu.memory_space<vmem>>, vector<1x128x128xf32>
    %6 = vector.shape_cast %5 : vector<1x128x128xf32> to vector<128x128xf32>
    %c0_6 = arith.constant 0 : index
    %c0_7 = arith.constant 0 : index
    %c0_8 = arith.constant 0 : index
    %7 = vector.load %arg5[%c0_6, %c0_7, %c0_8] : memref<1x128x128xf32, #tpu.memory_space<vmem>>, vector<1x128x128xf32>
    %8 = vector.shape_cast %7 : vector<1x128x128xf32> to vector<128x128xf32>
    %cst = arith.constant 0.176776692 : f32
    %9 = vector.broadcast %cst : f32 to vector<128x128xf32>
    %10 = arith.mulf %4, %9 : vector<128x128xf32>
    %11 = vector.extract_strided_slice %10 {offsets = [0, 0], sizes = [128, 32], strides = [1, 1]} : vector<128x128xf32> to vector<128x32xf32>
    %12 = vector.extract_strided_slice %6 {offsets = [0, 0], sizes = [128, 32], strides = [1, 1]} : vector<128x128xf32> to vector<128x32xf32>
    %13 = vector.extract_strided_slice %8 {offsets = [0, 0], sizes = [128, 32], strides = [1, 1]} : vector<128x128xf32> to vector<128x32xf32>
    %cst_9 = arith.constant dense<0.000000e+00> : vector<128x128xf32>
    %14 = tpu.matmul %11, %12, %cst_9 {dimension_numbers = #tpu.dot_dimension_numbers<[1], [1], [0], [0], [0, 0, 1, 0], [], []>} : vector<128x32xf32>, vector<128x32xf32>, vector<128x128xf32> -> vector<128x128xf32>
    %c0_10 = arith.constant 0 : index
    %c0_11 = arith.constant 0 : index
    %c0_12 = arith.constant 0 : index
    %15 = vector.load %arg7[%c0_10, %c0_11, %c0_12] : memref<4x128x1xf32, #tpu.memory_space<vmem>>, vector<1x128x1xf32>
    %16 = vector.shape_cast %15 : vector<1x128x1xf32> to vector<128x1xf32>
    %cst_13 = arith.constant dense<0xFF800000> : vector<128xf32>
    %17 = vector.multi_reduction <maximumf>, %14, %cst_13 [1] : vector<128x128xf32> to vector<128xf32>
    %18 = vector.shape_cast %17 : vector<128xf32> to vector<128x1xf32>
    %19 = arith.maximumf %16, %18 : vector<128x1xf32>
    %20 = arith.subf %16, %19 : vector<128x1xf32>
    %21 = math.exp %20 : vector<128x1xf32>
    %22 = vector.broadcast %19 : vector<128x1xf32> to vector<128x128xf32>
    %23 = arith.subf %14, %22 : vector<128x128xf32>
    %24 = math.exp %23 : vector<128x128xf32>
    %c0_14 = arith.constant 0 : index
    %c0_15 = arith.constant 0 : index
    %c0_16 = arith.constant 0 : index
    %25 = vector.load %arg8[%c0_14, %c0_15, %c0_16] : memref<4x128x1xf32, #tpu.memory_space<vmem>>, vector<1x128x1xf32>
    %26 = vector.shape_cast %25 : vector<1x128x1xf32> to vector<128x1xf32>
    %27 = arith.mulf %21, %26 : vector<128x1xf32>
    %cst_17 = arith.constant dense<0.000000e+00> : vector<128xf32>
    %28 = vector.multi_reduction <add>, %24, %cst_17 [1] : vector<128x128xf32> to vector<128xf32>
    %29 = vector.shape_cast %28 : vector<128xf32> to vector<128x1xf32>
    %30 = arith.addf %27, %29 : vector<128x1xf32>
    %c0_18 = arith.constant 0 : index
    %c0_19 = arith.constant 0 : index
    %c0_20 = arith.constant 0 : index
    %31 = vector.load %arg8[%c0_18, %c0_19, %c0_20] : memref<4x128x1xf32, #tpu.memory_space<vmem>>, vector<1x128x1xf32>
    %32 = vector.shape_cast %31 : vector<1x128x1xf32> to vector<128x1xf32>
    %33 = vector.shape_cast %30 : vector<128x1xf32> to vector<1x128x1xf32>
    tpu.vector_store %arg8[%c0_18, %c0_19, %c0_20], %33 {strides = array<i32>} : memref<4x128x1xf32, #tpu.memory_space<vmem>>, vector<1x128x1xf32>,
    %c0_21 = arith.constant 0 : index
    %c0_22 = arith.constant 0 : index
    %c0_23 = arith.constant 0 : index
    %34 = vector.load %arg9[%c0_21, %c0_22, %c0_23] : memref<4x128x32xf32, #tpu.memory_space<vmem>>, vector<1x128x32xf32>
    %35 = vector.shape_cast %34 : vector<1x128x32xf32> to vector<128x32xf32>
    %36 = vector.broadcast %21 : vector<128x1xf32> to vector<128x32xf32>
    %37 = arith.mulf %36, %35 : vector<128x32xf32>
    %cst_24 = arith.constant dense<0.000000e+00> : vector<128x32xf32>
    %38 = tpu.matmul %24, %13, %cst_24 {dimension_numbers = #tpu.dot_dimension_numbers<[1], [0], [0], [1], [0, 0, 1, 1], [], []>} : vector<128x128xf32>, vector<128x32xf32>, vector<128x32xf32> -> vector<128x32xf32>
    %39 = arith.addf %37, %38 : vector<128x32xf32>
    %c0_25 = arith.constant 0 : index
    %c0_26 = arith.constant 0 : index
    %c0_27 = arith.constant 0 : index
    %40 = vector.load %arg9[%c0_25, %c0_26, %c0_27] : memref<4x128x32xf32, #tpu.memory_space<vmem>>, vector<1x128x32xf32>
    %41 = vector.shape_cast %40 : vector<1x128x32xf32> to vector<128x32xf32>
    %42 = vector.shape_cast %39 : vector<128x32xf32> to vector<1x128x32xf32>
    tpu.vector_store %arg9[%c0_25, %c0_26, %c0_27], %42 {strides = array<i32>} : memref<4x128x32xf32, #tpu.memory_space<vmem>>, vector<1x128x32xf32>,
    %c0_28 = arith.constant 0 : index
    %c0_29 = arith.constant 0 : index
    %c0_30 = arith.constant 0 : index
    %43 = vector.load %arg7[%c0_28, %c0_29, %c0_30] : memref<4x128x1xf32, #tpu.memory_space<vmem>>, vector<1x128x1xf32>
    %44 = vector.shape_cast %43 : vector<1x128x1xf32> to vector<128x1xf32>
    %45 = vector.shape_cast %19 : vector<128x1xf32> to vector<1x128x1xf32>
    tpu.vector_store %arg7[%c0_28, %c0_29, %c0_30], %45 {strides = array<i32>} : memref<4x128x1xf32, #tpu.memory_space<vmem>>, vector<1x128x1xf32>,
    %46 = vector.extract_strided_slice %10 {offsets = [0, 32], sizes = [128, 32], strides = [1, 1]} : vector<128x128xf32> to vector<128x32xf32>
    %47 = vector.extract_strided_slice %6 {offsets = [0, 32], sizes = [128, 32], strides = [1, 1]} : vector<128x128xf32> to vector<128x32xf32>
    %48 = vector.extract_strided_slice %8 {offsets = [0, 32], sizes = [128, 32], strides = [1, 1]} : vector<128x128xf32> to vector<128x32xf32>
    %cst_31 = arith.constant dense<0.000000e+00> : vector<128x128xf32>
    %49 = tpu.matmul %46, %47, %cst_31 {dimension_numbers = #tpu.dot_dimension_numbers<[1], [1], [0], [0], [0, 0, 1, 0], [], []>} : vector<128x32xf32>, vector<128x32xf32>, vector<128x128xf32> -> vector<128x128xf32>
    %c1 = arith.constant 1 : index
    %c0_32 = arith.constant 0 : index
    %c0_33 = arith.constant 0 : index
    %50 = vector.load %arg7[%c1, %c0_32, %c0_33] : memref<4x128x1xf32, #tpu.memory_space<vmem>>, vector<1x128x1xf32>
    %51 = vector.shape_cast %50 : vector<1x128x1xf32> to vector<128x1xf32>
    %cst_34 = arith.constant dense<0xFF800000> : vector<128xf32>
    %52 = vector.multi_reduction <maximumf>, %49, %cst_34 [1] : vector<128x128xf32> to vector<128xf32>
    %53 = vector.shape_cast %52 : vector<128xf32> to vector<128x1xf32>
    %54 = arith.maximumf %51, %53 : vector<128x1xf32>
    %55 = arith.subf %51, %54 : vector<128x1xf32>
    %56 = math.exp %55 : vector<128x1xf32>
    %57 = vector.broadcast %54 : vector<128x1xf32> to vector<128x128xf32>
    %58 = arith.subf %49, %57 : vector<128x128xf32>
    %59 = math.exp %58 : vector<128x128xf32>
    %c1_35 = arith.constant 1 : index
    %c0_36 = arith.constant 0 : index
    %c0_37 = arith.constant 0 : index
    %60 = vector.load %arg8[%c1_35, %c0_36, %c0_37] : memref<4x128x1xf32, #tpu.memory_space<vmem>>, vector<1x128x1xf32>
    %61 = vector.shape_cast %60 : vector<1x128x1xf32> to vector<128x1xf32>
    %62 = arith.mulf %56, %61 : vector<128x1xf32>
    %cst_38 = arith.constant dense<0.000000e+00> : vector<128xf32>
    %63 = vector.multi_reduction <add>, %59, %cst_38 [1] : vector<128x128xf32> to vector<128xf32>
    %64 = vector.shape_cast %63 : vector<128xf32> to vector<128x1xf32>
    %65 = arith.addf %62, %64 : vector<128x1xf32>
    %c1_39 = arith.constant 1 : index
    %c0_40 = arith.constant 0 : index
    %c0_41 = arith.constant 0 : index
    %66 = vector.load %arg8[%c1_39, %c0_40, %c0_41] : memref<4x128x1xf32, #tpu.memory_space<vmem>>, vector<1x128x1xf32>
    %67 = vector.shape_cast %66 : vector<1x128x1xf32> to vector<128x1xf32>
    %68 = vector.shape_cast %65 : vector<128x1xf32> to vector<1x128x1xf32>
    tpu.vector_store %arg8[%c1_39, %c0_40, %c0_41], %68 {strides = array<i32>} : memref<4x128x1xf32, #tpu.memory_space<vmem>>, vector<1x128x1xf32>,
    %c1_42 = arith.constant 1 : index
    %c0_43 = arith.constant 0 : index
    %c0_44 = arith.constant 0 : index
    %69 = vector.load %arg9[%c1_42, %c0_43, %c0_44] : memref<4x128x32xf32, #tpu.memory_space<vmem>>, vector<1x128x32xf32>
    %70 = vector.shape_cast %69 : vector<1x128x32xf32> to vector<128x32xf32>
    %71 = vector.broadcast %56 : vector<128x1xf32> to vector<128x32xf32>
    %72 = arith.mulf %71, %70 : vector<128x32xf32>
    %cst_45 = arith.constant dense<0.000000e+00> : vector<128x32xf32>
    %73 = tpu.matmul %59, %48, %cst_45 {dimension_numbers = #tpu.dot_dimension_numbers<[1], [0], [0], [1], [0, 0, 1, 1], [], []>} : vector<128x128xf32>, vector<128x32xf32>, vector<128x32xf32> -> vector<128x32xf32>
    %74 = arith.addf %72, %73 : vector<128x32xf32>
    %c1_46 = arith.constant 1 : index
    %c0_47 = arith.constant 0 : index
    %c0_48 = arith.constant 0 : index
    %75 = vector.load %arg9[%c1_46, %c0_47, %c0_48] : memref<4x128x32xf32, #tpu.memory_space<vmem>>, vector<1x128x32xf32>
    %76 = vector.shape_cast %75 : vector<1x128x32xf32> to vector<128x32xf32>
    %77 = vector.shape_cast %74 : vector<128x32xf32> to vector<1x128x32xf32>
    tpu.vector_store %arg9[%c1_46, %c0_47, %c0_48], %77 {strides = array<i32>} : memref<4x128x32xf32, #tpu.memory_space<vmem>>, vector<1x128x32xf32>,
    %c1_49 = arith.constant 1 : index
    %c0_50 = arith.constant 0 : index
    %c0_51 = arith.constant 0 : index
    %78 = vector.load %arg7[%c1_49, %c0_50, %c0_51] : memref<4x128x1xf32, #tpu.memory_space<vmem>>, vector<1x128x1xf32>
    %79 = vector.shape_cast %78 : vector<1x128x1xf32> to vector<128x1xf32>
    %80 = vector.shape_cast %54 : vector<128x1xf32> to vector<1x128x1xf32>
    tpu.vector_store %arg7[%c1_49, %c0_50, %c0_51], %80 {strides = array<i32>} : memref<4x128x1xf32, #tpu.memory_space<vmem>>, vector<1x128x1xf32>,
    %81 = vector.extract_strided_slice %10 {offsets = [0, 64], sizes = [128, 32], strides = [1, 1]} : vector<128x128xf32> to vector<128x32xf32>
    %82 = vector.extract_strided_slice %6 {offsets = [0, 64], sizes = [128, 32], strides = [1, 1]} : vector<128x128xf32> to vector<128x32xf32>
    %83 = vector.extract_strided_slice %8 {offsets = [0, 64], sizes = [128, 32], strides = [1, 1]} : vector<128x128xf32> to vector<128x32xf32>
    %cst_52 = arith.constant dense<0.000000e+00> : vector<128x128xf32>
    %84 = tpu.matmul %81, %82, %cst_52 {dimension_numbers = #tpu.dot_dimension_numbers<[1], [1], [0], [0], [0, 0, 1, 0], [], []>} : vector<128x32xf32>, vector<128x32xf32>, vector<128x128xf32> -> vector<128x128xf32>
    %c2 = arith.constant 2 : index
    %c0_53 = arith.constant 0 : index
    %c0_54 = arith.constant 0 : index
    %85 = vector.load %arg7[%c2, %c0_53, %c0_54] : memref<4x128x1xf32, #tpu.memory_space<vmem>>, vector<1x128x1xf32>
    %86 = vector.shape_cast %85 : vector<1x128x1xf32> to vector<128x1xf32>
    %cst_55 = arith.constant dense<0xFF800000> : vector<128xf32>
    %87 = vector.multi_reduction <maximumf>, %84, %cst_55 [1] : vector<128x128xf32> to vector<128xf32>
    %88 = vector.shape_cast %87 : vector<128xf32> to vector<128x1xf32>
    %89 = arith.maximumf %86, %88 : vector<128x1xf32>
    %90 = arith.subf %86, %89 : vector<128x1xf32>
    %91 = math.exp %90 : vector<128x1xf32>
    %92 = vector.broadcast %89 : vector<128x1xf32> to vector<128x128xf32>
    %93 = arith.subf %84, %92 : vector<128x128xf32>
    %94 = math.exp %93 : vector<128x128xf32>
    %c2_56 = arith.constant 2 : index
    %c0_57 = arith.constant 0 : index
    %c0_58 = arith.constant 0 : index
    %95 = vector.load %arg8[%c2_56, %c0_57, %c0_58] : memref<4x128x1xf32, #tpu.memory_space<vmem>>, vector<1x128x1xf32>
    %96 = vector.shape_cast %95 : vector<1x128x1xf32> to vector<128x1xf32>
    %97 = arith.mulf %91, %96 : vector<128x1xf32>
    %cst_59 = arith.constant dense<0.000000e+00> : vector<128xf32>
    %98 = vector.multi_reduction <add>, %94, %cst_59 [1] : vector<128x128xf32> to vector<128xf32>
    %99 = vector.shape_cast %98 : vector<128xf32> to vector<128x1xf32>
    %100 = arith.addf %97, %99 : vector<128x1xf32>
    %c2_60 = arith.constant 2 : index
    %c0_61 = arith.constant 0 : index
    %c0_62 = arith.constant 0 : index
    %101 = vector.load %arg8[%c2_60, %c0_61, %c0_62] : memref<4x128x1xf32, #tpu.memory_space<vmem>>, vector<1x128x1xf32>
    %102 = vector.shape_cast %101 : vector<1x128x1xf32> to vector<128x1xf32>
    %103 = vector.shape_cast %100 : vector<128x1xf32> to vector<1x128x1xf32>
    tpu.vector_store %arg8[%c2_60, %c0_61, %c0_62], %103 {strides = array<i32>} : memref<4x128x1xf32, #tpu.memory_space<vmem>>, vector<1x128x1xf32>,
    %c2_63 = arith.constant 2 : index
    %c0_64 = arith.constant 0 : index
    %c0_65 = arith.constant 0 : index
    %104 = vector.load %arg9[%c2_63, %c0_64, %c0_65] : memref<4x128x32xf32, #tpu.memory_space<vmem>>, vector<1x128x32xf32>
    %105 = vector.shape_cast %104 : vector<1x128x32xf32> to vector<128x32xf32>
    %106 = vector.broadcast %91 : vector<128x1xf32> to vector<128x32xf32>
    %107 = arith.mulf %106, %105 : vector<128x32xf32>
    %cst_66 = arith.constant dense<0.000000e+00> : vector<128x32xf32>
    %108 = tpu.matmul %94, %83, %cst_66 {dimension_numbers = #tpu.dot_dimension_numbers<[1], [0], [0], [1], [0, 0, 1, 1], [], []>} : vector<128x128xf32>, vector<128x32xf32>, vector<128x32xf32> -> vector<128x32xf32>
    %109 = arith.addf %107, %108 : vector<128x32xf32>
    %c2_67 = arith.constant 2 : index
    %c0_68 = arith.constant 0 : index
    %c0_69 = arith.constant 0 : index
    %110 = vector.load %arg9[%c2_67, %c0_68, %c0_69] : memref<4x128x32xf32, #tpu.memory_space<vmem>>, vector<1x128x32xf32>
    %111 = vector.shape_cast %110 : vector<1x128x32xf32> to vector<128x32xf32>
    %112 = vector.shape_cast %109 : vector<128x32xf32> to vector<1x128x32xf32>
    tpu.vector_store %arg9[%c2_67, %c0_68, %c0_69], %112 {strides = array<i32>} : memref<4x128x32xf32, #tpu.memory_space<vmem>>, vector<1x128x32xf32>,
    %c2_70 = arith.constant 2 : index
    %c0_71 = arith.constant 0 : index
    %c0_72 = arith.constant 0 : index
    %113 = vector.load %arg7[%c2_70, %c0_71, %c0_72] : memref<4x128x1xf32, #tpu.memory_space<vmem>>, vector<1x128x1xf32>
    %114 = vector.shape_cast %113 : vector<1x128x1xf32> to vector<128x1xf32>
    %115 = vector.shape_cast %89 : vector<128x1xf32> to vector<1x128x1xf32>
    tpu.vector_store %arg7[%c2_70, %c0_71, %c0_72], %115 {strides = array<i32>} : memref<4x128x1xf32, #tpu.memory_space<vmem>>, vector<1x128x1xf32>,
    %116 = vector.extract_strided_slice %10 {offsets = [0, 96], sizes = [128, 32], strides = [1, 1]} : vector<128x128xf32> to vector<128x32xf32>
    %117 = vector.extract_strided_slice %6 {offsets = [0, 96], sizes = [128, 32], strides = [1, 1]} : vector<128x128xf32> to vector<128x32xf32>
    %118 = vector.extract_strided_slice %8 {offsets = [0, 96], sizes = [128, 32], strides = [1, 1]} : vector<128x128xf32> to vector<128x32xf32>
    %cst_73 = arith.constant dense<0.000000e+00> : vector<128x128xf32>
    %119 = tpu.matmul %116, %117, %cst_73 {dimension_numbers = #tpu.dot_dimension_numbers<[1], [1], [0], [0], [0, 0, 1, 0], [], []>} : vector<128x32xf32>, vector<128x32xf32>, vector<128x128xf32> -> vector<128x128xf32>
    %c3 = arith.constant 3 : index
    %c0_74 = arith.constant 0 : index
    %c0_75 = arith.constant 0 : index
    %120 = vector.load %arg7[%c3, %c0_74, %c0_75] : memref<4x128x1xf32, #tpu.memory_space<vmem>>, vector<1x128x1xf32>
    %121 = vector.shape_cast %120 : vector<1x128x1xf32> to vector<128x1xf32>
    %cst_76 = arith.constant dense<0xFF800000> : vector<128xf32>
    %122 = vector.multi_reduction <maximumf>, %119, %cst_76 [1] : vector<128x128xf32> to vector<128xf32>
    %123 = vector.shape_cast %122 : vector<128xf32> to vector<128x1xf32>
    %124 = arith.maximumf %121, %123 : vector<128x1xf32>
    %125 = arith.subf %121, %124 : vector<128x1xf32>
    %126 = math.exp %125 : vector<128x1xf32>
    %127 = vector.broadcast %124 : vector<128x1xf32> to vector<128x128xf32>
    %128 = arith.subf %119, %127 : vector<128x128xf32>
    %129 = math.exp %128 : vector<128x128xf32>
    %c3_77 = arith.constant 3 : index
    %c0_78 = arith.constant 0 : index
    %c0_79 = arith.constant 0 : index
    %130 = vector.load %arg8[%c3_77, %c0_78, %c0_79] : memref<4x128x1xf32, #tpu.memory_space<vmem>>, vector<1x128x1xf32>
    %131 = vector.shape_cast %130 : vector<1x128x1xf32> to vector<128x1xf32>
    %132 = arith.mulf %126, %131 : vector<128x1xf32>
    %cst_80 = arith.constant dense<0.000000e+00> : vector<128xf32>
    %133 = vector.multi_reduction <add>, %129, %cst_80 [1] : vector<128x128xf32> to vector<128xf32>
    %134 = vector.shape_cast %133 : vector<128xf32> to vector<128x1xf32>
    %135 = arith.addf %132, %134 : vector<128x1xf32>
    %c3_81 = arith.constant 3 : index
    %c0_82 = arith.constant 0 : index
    %c0_83 = arith.constant 0 : index
    %136 = vector.load %arg8[%c3_81, %c0_82, %c0_83] : memref<4x128x1xf32, #tpu.memory_space<vmem>>, vector<1x128x1xf32>
    %137 = vector.shape_cast %136 : vector<1x128x1xf32> to vector<128x1xf32>
    %138 = vector.shape_cast %135 : vector<128x1xf32> to vector<1x128x1xf32>
    tpu.vector_store %arg8[%c3_81, %c0_82, %c0_83], %138 {strides = array<i32>} : memref<4x128x1xf32, #tpu.memory_space<vmem>>, vector<1x128x1xf32>,
    %c3_84 = arith.constant 3 : index
    %c0_85 = arith.constant 0 : index
    %c0_86 = arith.constant 0 : index
    %139 = vector.load %arg9[%c3_84, %c0_85, %c0_86] : memref<4x128x32xf32, #tpu.memory_space<vmem>>, vector<1x128x32xf32>
    %140 = vector.shape_cast %139 : vector<1x128x32xf32> to vector<128x32xf32>
    %141 = vector.broadcast %126 : vector<128x1xf32> to vector<128x32xf32>
    %142 = arith.mulf %141, %140 : vector<128x32xf32>
    %cst_87 = arith.constant dense<0.000000e+00> : vector<128x32xf32>
    %143 = tpu.matmul %129, %118, %cst_87 {dimension_numbers = #tpu.dot_dimension_numbers<[1], [0], [0], [1], [0, 0, 1, 1], [], []>} : vector<128x128xf32>, vector<128x32xf32>, vector<128x32xf32> -> vector<128x32xf32>
    %144 = arith.addf %142, %143 : vector<128x32xf32>
    %c3_88 = arith.constant 3 : index
    %c0_89 = arith.constant 0 : index
    %c0_90 = arith.constant 0 : index
    %145 = vector.load %arg9[%c3_88, %c0_89, %c0_90] : memref<4x128x32xf32, #tpu.memory_space<vmem>>, vector<1x128x32xf32>
    %146 = vector.shape_cast %145 : vector<1x128x32xf32> to vector<128x32xf32>
    %147 = vector.shape_cast %144 : vector<128x32xf32> to vector<1x128x32xf32>
    tpu.vector_store %arg9[%c3_88, %c0_89, %c0_90], %147 {strides = array<i32>} : memref<4x128x32xf32, #tpu.memory_space<vmem>>, vector<1x128x32xf32>,
    %c3_91 = arith.constant 3 : index
    %c0_92 = arith.constant 0 : index
    %c0_93 = arith.constant 0 : index
    %148 = vector.load %arg7[%c3_91, %c0_92, %c0_93] : memref<4x128x1xf32, #tpu.memory_space<vmem>>, vector<1x128x1xf32>
    %149 = vector.shape_cast %148 : vector<1x128x1xf32> to vector<128x1xf32>
    %150 = vector.shape_cast %124 : vector<128x1xf32> to vector<1x128x1xf32>
    tpu.vector_store %arg7[%c3_91, %c0_92, %c0_93], %150 {strides = array<i32>} : memref<4x128x1xf32, #tpu.memory_space<vmem>>, vector<1x128x1xf32>,
    %c0_i32_94 = arith.constant 0 : i32
    %151 = arith.cmpi eq, %arg2, %c0_i32_94 : i32
    %152 = arith.extui %151 : i1 to i32
    %c0_i32_95 = arith.constant 0 : i32
    %153 = arith.cmpi ne, %152, %c0_i32_95 : i32
    scf.if %153 {
      %c0_96 = arith.constant 0 : index
      %c0_97 = arith.constant 0 : index
      %c0_98 = arith.constant 0 : index
      %154 = vector.load %arg8[%c0_96, %c0_97, %c0_98] : memref<4x128x1xf32, #tpu.memory_space<vmem>>, vector<1x128x1xf32>
      %155 = vector.shape_cast %154 : vector<1x128x1xf32> to vector<128x1xf32>
      %156 = tpu.reciprocal %155 {approx = true} : vector<128x1xf32> -> vector<128x1xf32>
      %c0_99 = arith.constant 0 : index
      %c0_100 = arith.constant 0 : index
      %c0_101 = arith.constant 0 : index
      %157 = vector.load %arg9[%c0_99, %c0_100, %c0_101] : memref<4x128x32xf32, #tpu.memory_space<vmem>>, vector<1x128x32xf32>
      %158 = vector.shape_cast %157 : vector<1x128x32xf32> to vector<128x32xf32>
      %159 = vector.broadcast %156 : vector<128x1xf32> to vector<128x32xf32>
      %160 = arith.mulf %158, %159 : vector<128x32xf32>
      %c1_102 = arith.constant 1 : index
      %c0_103 = arith.constant 0 : index
      %c0_104 = arith.constant 0 : index
      %161 = vector.load %arg8[%c1_102, %c0_103, %c0_104] : memref<4x128x1xf32, #tpu.memory_space<vmem>>, vector<1x128x1xf32>
      %162 = vector.shape_cast %161 : vector<1x128x1xf32> to vector<128x1xf32>
      %163 = tpu.reciprocal %162 {approx = true} : vector<128x1xf32> -> vector<128x1xf32>
      %c1_105 = arith.constant 1 : index
      %c0_106 = arith.constant 0 : index
      %c0_107 = arith.constant 0 : index
      %164 = vector.load %arg9[%c1_105, %c0_106, %c0_107] : memref<4x128x32xf32, #tpu.memory_space<vmem>>, vector<1x128x32xf32>
      %165 = vector.shape_cast %164 : vector<1x128x32xf32> to vector<128x32xf32>
      %166 = vector.broadcast %163 : vector<128x1xf32> to vector<128x32xf32>
      %167 = arith.mulf %165, %166 : vector<128x32xf32>
      %c2_108 = arith.constant 2 : index
      %c0_109 = arith.constant 0 : index
      %c0_110 = arith.constant 0 : index
      %168 = vector.load %arg8[%c2_108, %c0_109, %c0_110] : memref<4x128x1xf32, #tpu.memory_space<vmem>>, vector<1x128x1xf32>
      %169 = vector.shape_cast %168 : vector<1x128x1xf32> to vector<128x1xf32>
      %170 = tpu.reciprocal %169 {approx = true} : vector<128x1xf32> -> vector<128x1xf32>
      %c2_111 = arith.constant 2 : index
      %c0_112 = arith.constant 0 : index
      %c0_113 = arith.constant 0 : index
      %171 = vector.load %arg9[%c2_111, %c0_112, %c0_113] : memref<4x128x32xf32, #tpu.memory_space<vmem>>, vector<1x128x32xf32>
      %172 = vector.shape_cast %171 : vector<1x128x32xf32> to vector<128x32xf32>
      %173 = vector.broadcast %170 : vector<128x1xf32> to vector<128x32xf32>
      %174 = arith.mulf %172, %173 : vector<128x32xf32>
      %c3_114 = arith.constant 3 : index
      %c0_115 = arith.constant 0 : index
      %c0_116 = arith.constant 0 : index
      %175 = vector.load %arg8[%c3_114, %c0_115, %c0_116] : memref<4x128x1xf32, #tpu.memory_space<vmem>>, vector<1x128x1xf32>
      %176 = vector.shape_cast %175 : vector<1x128x1xf32> to vector<128x1xf32>
      %177 = tpu.reciprocal %176 {approx = true} : vector<128x1xf32> -> vector<128x1xf32>
      %c3_117 = arith.constant 3 : index
      %c0_118 = arith.constant 0 : index
      %c0_119 = arith.constant 0 : index
      %178 = vector.load %arg9[%c3_117, %c0_118, %c0_119] : memref<4x128x32xf32, #tpu.memory_space<vmem>>, vector<1x128x32xf32>
      %179 = vector.shape_cast %178 : vector<1x128x32xf32> to vector<128x32xf32>
      %180 = vector.broadcast %177 : vector<128x1xf32> to vector<128x32xf32>
      %181 = arith.mulf %179, %180 : vector<128x32xf32>
      %182 = tpu.concatenate %160, %167, %174, %181 in 1 : vector<128x32xf32>, vector<128x32xf32>, vector<128x32xf32>, vector<128x32xf32> -> vector<128x128xf32>
      %c0_120 = arith.constant 0 : index
      %c0_121 = arith.constant 0 : index
      %c0_122 = arith.constant 0 : index
      %183 = vector.load %arg6[%c0_120, %c0_121, %c0_122] : memref<1x128x128xf32, #tpu.memory_space<vmem>>, vector<1x128x128xf32>
      %184 = vector.shape_cast %183 : vector<1x128x128xf32> to vector<128x128xf32>
      %185 = vector.shape_cast %182 : vector<128x128xf32> to vector<1x128x128xf32>
      tpu.vector_store %arg6[%c0_120, %c0_121, %c0_122], %185 {strides = array<i32>} : memref<1x128x128xf32, #tpu.memory_space<vmem>>, vector<1x128x128xf32>,
    } else {
    }
    return
  }
  func.func @transform_0(%arg0: i32, %arg1: i32, %arg2: i32) -> (i32, i32, i32) {
    %c0_i32 = arith.constant 0 : i32
    %c0_i32_0 = arith.constant 0 : i32
    return %arg0, %arg1, %c0_i32 : i32, i32, i32
  }
  func.func @transform_1(%arg0: i32, %arg1: i32, %arg2: i32) -> (i32, i32, i32) {
    %c0_i32 = arith.constant 0 : i32
    %c0_i32_0 = arith.constant 0 : i32
    return %arg0, %arg2, %c0_i32 : i32, i32, i32
  }
  func.func @transform_2(%arg0: i32, %arg1: i32, %arg2: i32) -> (i32, i32, i32) {
    %c0_i32 = arith.constant 0 : i32
    %c0_i32_0 = arith.constant 0 : i32
    return %arg0, %arg2, %c0_i32 : i32, i32, i32
  }
  func.func @transform_3(%arg0: i32, %arg1: i32, %arg2: i32) -> (i32, i32, i32) {
    %c0_i32 = arith.constant 0 : i32
    %c0_i32_0 = arith.constant 0 : i32
    return %arg0, %arg1, %c0_i32 : i32, i32, i32
  }
}

</mosaic_0001>

<bundles_post_ra>
// kernel: tpu_custom_call.1
= control target key start
LH: loop header
LB: loop body
LE: loop exit
PB: predicated region body
PF: predicated region fallthrough
CT: control target
= control target key end

     0   :  { %s10716_s0 = inlined_call_operand.hbm [shape: f32[2,128,128], index: 0, kind: input, shape index: {}]   ;;  %s10717_s1 = inlined_call_operand.hbm [shape: f32[2,128,128], index: 1, kind: input, shape index: {}]   ;;  %s10718_s2 = inlined_call_operand.hbm [shape: f32[2,128,128], index: 2, kind: input, shape index: {}]   ;;  %s10719_s3 = inlined_call_operand.hbm [shape: f32[2,128,128], index: 3, kind: output, shape index: {}]  }
   0x1   :  { %10774 = sst [smem:[#allocation38_spill]] %s10717_s1 }
   0x2   :  { %8 = vsyncpa [#allocation6], 0 }
   0x3   :  { %10 = vsyncpa [#allocation6 + $0x1], 0 }
   0x4   :  { %11 = vsyncpa [#allocation9], 0 }
   0x5   :  { %13 = vsyncpa [#allocation9 + $0x1], 0 }
   0x6   :  { %14 = vsyncpa [#allocation7], 0 }
   0x7   :  { %16 = vsyncpa [#allocation7 + $0x1], 0  ;;  %s7515_s12 = smov 0   ;;  %s7517_s13 = smov 0  }
   0x8   :  { %s7519_s14 = smov 0   ;;  %s7521_s15 = smov 0  }
   0x9   :  { %s7523_s16 = smov 0   ;;  %s7525_s17 = smov 0  }
   0xa LB: > { %10775 = sst [smem:[#allocation15_spill]] %s7475_s16  ;;  %s7546_s18 = sadd.s32 4294967295, %s7479_s17   ;;  %s7479_s17 = sphi %s7525_s17, %s22_s17   ;;  %s7475_s16 = sphi %s7523_s16, %s10938_s16   ;;  %s7471_s15 = sphi %s7521_s15, %s10937_s15   ;;  %s7467_s14 = sphi %s7519_s14, %s10941_s14   ;;  %s7463_s13 = sphi %s7517_s13, %s10940_s13   ;;  %s7459_s12 = sphi %s7515_s12, %s10939_s12  }
   0xb   : > { %s5353_s19 = sadd.s32 4294967294, %s7479_s17   ;;  %s41_s20 = sadd.s32 1, %s7475_s16 }
   0xc   : > { %s50_s21 = sadd.s32 1, %s7467_s14  ;;  %p43_p0 = scmp.ge.s32.totalorder %s41_s20, 2 }
   0xd   : > { %p57_p1 = scmp.ne.s32.totalorder %s7467_s14, %s7463_s13  ;;  %p58_p2 = scmp.eq.s32.totalorder %s7479_s17, 0 }
   0xe   : > { %p63_p3 = scmp.ne.s32.totalorder %s7463_s13, %s7459_s12  ;;  %s10943_s20 = smov (%p43_p0, %s41_s20), 0 }
   0xf   : > { %10776 = sst [smem:[#allocation16_spill]] %s10943_s20  ;;  %p7558_p4 = por %p58_p2, %p57_p1 }
  0x10   : > { %p64_p5 = scmp.eq.s32.totalorder %s7546_s18, 0  ;;  %s45_s23 = ssub.s32 %s7475_s16, %s10943_s20 }
  0x11   : > { %p145_p6 = scmp.eq.s32.totalorder %s7546_s18, 1  ;;  %p48_p7 = scmp.eq.s32.totalorder %s45_s23, 0 }
  0x12   : > { %p7566_p8 = por %p64_p5, %p63_p3  ;;  %p151_p10 = scmp.eq.s32.totalorder %s5353_s19, 1 }
  0x13   : > { %p7570_p9 = por %p145_p6, %p57_p1  ;;  %p6553_p13 = scmp.lt.s32.totalorder %s7479_s17, 2 }
  0x14   : > { %s10778_s24 = scalar_select %p7566_p8, 1, 0 }
  0x15   : > { %s10779_s25 = scalar_select %p7570_p9, 1, 0 }
  0x16   : > { %s7575_s26 = scalar_select %p48_p7, %s7467_s14, %s50_s21  }
  0x17   : > { %p7577_p11 = por %p151_p10, %p63_p3  ;;  %s10722_s28 = sand.u32 1, %s7467_s14  }
  0x18   : > { %10780 = sst [smem:[#allocation17_spill]] %s7575_s26  ;;  %s7586_s29 = sshll.u32 %s10722_s28, 7 }
  0x19   : > { %s10781_s27 = scalar_select %p7577_p11, 1, 0 }
  0x1a   : > { %s7589_s30 = sshll.u32 %s7475_s16, 11  ;;  %p7593_p0 = pnand %p6553_p13, %p7558_p4 }
  0x1b   : > { %s194_s5 = sand.u32 1, %s7479_s17   ;;  %s10783_s1 = sld [smem:[#allocation38_spill]] }
  0x1c   : > { %s198_s9 = scalar_lea.vmem [#allocation8], %s7586_s29  ;;  %s7609_s11 = scalar_lea.sflag [#allocation9], %s194_s5 }
  0x1d   : > { %s207_s10 = sshll.u32 %s198_s9, 4  ;;  %p7615_p4 = pneg %p7593_p0  ;;  %s7606_s10 = int_to_ptr.vmem [resolvable:$true] %s207_s10 }
  0x21   : > { %s7602_s8 = scalar_lea.hbm %s10783_s1, %s7589_s30  ;;  %s7308_s6 = scalar_lea.hbm %s10783_s1, 4096 }
  0x22   : > { %s7303_s19 = scalar_lea.hbm %s7602_s8, 2048  ;;  %p7309_p7 = scmp.lt.u32.totalorder %s7602_s8, %s10783_s1 }
  0x23   : > { %p7304_p3 = scmp.ne.s32.totalorder %s7602_s8, %s7303_s19  ;;  %p7310_p10 = scmp.lt.u32.totalorder %s7308_s6, %s7303_s19 }
  0x24   : > { %p7312_p12 = scmp.lt.u32.totalorder %s7303_s19, %s7602_s8 }
  0x25   : > { %p7306_p5 = pnand %p7615_p4, %p7304_p3  ;;  %p7311_p13 = por %p7310_p10, %p7309_p7 }
  0x27   : > { %p7307_p6 = pneg %p7306_p5  ;;  %p7313_p1 = por %p7312_p12, %p7311_p13 }
  0x29   : > { %p7314_p2 = pnand %p7313_p1, %p7307_p6 }
  0x2b   : > { %7317 = shalt.err (!%p7314_p2)
}
  0x2c   : > { %s7318_s5 = scalar_lea.vmem %s7606_s10, 2048  ;;  %s7481_s22 = smov [#allocation8]  }
  0x2d   : > { %p7319_p3 = scmp.ne.s32.totalorder %s7606_s10, %s7318_s5  ;;  %s7323_s23 = sshll.u32 %s7481_s22, 4  ;;  %s7324_s23 = int_to_ptr.vmem [resolvable:$false] %s7323_s23 }
  0x2e   : > { %s7325_s7 = scalar_lea.vmem %s7324_s23, 4096  ;;  %p7326_p9 = scmp.lt.s32.totalorder %s7606_s10, %s7324_s23 }
  0x2f   : > { %p7321_p5 = pnand %p7319_p3, %p7615_p4  ;;  %p7327_p8 = scmp.lt.s32.totalorder %s7325_s7, %s7318_s5 }
  0x31   : > { %p7322_p11 = pneg %p7321_p5  ;;  %p7328_p7 = por %p7327_p8, %p7326_p9 }
  0x33   : > { %p7329_p10 = pnand %p7328_p7, %p7322_p11 }
  0x35   : > { %7332 = shalt.err (!%p7329_p10)
}
  0x36   : > { %s10723_s19 = smov 128   ;;  %s10725_s6 = smov 8  }
  0x37   : > { %6545 = dma.hbm_to_vmem [thread:$0]  (!%p7593_p0), %s7602_s8, 2048, %s7606_s10, %s7609_s11, %s10723_s19, %s10723_s19, %s10725_s6  }
  0x38   : > { %p10785_p8 = scmp.lt.s32.totalorder %s7479_s17, 3  ;;  %p10786_p9 = scmp.ge.s32.totalorder %s7479_s17, 1 }
  0x39   : > { %s7654_s23 = scalar_lea.hbm %s10716_s0, %s7589_s30  ;;  %s175_s7 = scalar_lea.vmem [#allocation5], %s7586_s29 }
  0x3a   : > { %p7646_p11 = pnand %p10786_p9, %p10785_p8  ;;  %s184_s28 = sshll.u32 %s175_s7, 4  ;;  %s7657_s28 = int_to_ptr.vmem [resolvable:$true] %s184_s28 }
  0x3b   : > { %s7663_s19 = scalar_lea.hbm %s10718_s2, %s7589_s30  ;;  %s10788_s6 = sand.u32 1, %s7467_s14  }
  0x3c   : > { %s10787_s9 = scalar_select %p7646_p11, 1, 0 }
  0x3d   : > { %s7667_s1 = scalar_lea.sflag [#allocation6], %s10788_s6  ;;  %s7333_s20 = scalar_lea.hbm %s7654_s23, 2048 }
  0x3e   : > { %p7334_p12 = scmp.ne.s32.totalorder %s7654_s23, %s7333_s20  ;;  %s7338_s16 = scalar_lea.hbm %s10716_s0, 4096 }
  0x3f   : > { %p7339_p6 = scmp.lt.u32.totalorder %s7654_s23, %s10716_s0  ;;  %p7340_p13 = scmp.lt.u32.totalorder %s7338_s16, %s7333_s20 }
  0x40   : > { %p7336_p1 = pnand %p7334_p12, %p7615_p4  ;;  %p7342_p5 = scmp.lt.u32.totalorder %s7333_s20, %s7654_s23 }
  0x41   : > { %p7341_p3 = por %p7340_p13, %p7339_p6 }
  0x42   : > { %p7337_p2 = pneg %p7336_p1 }
  0x43   : > { %p7343_p7 = por %p7342_p5, %p7341_p3 }
  0x45   : > { %p7344_p10 = pnand %p7343_p7, %p7337_p2 }
  0x47   : > { %7347 = shalt.err (!%p7344_p10)
}
  0x48   : > { %s7348_s30 = scalar_lea.vmem %s7657_s28, 2048  ;;  %s7484_s6 = smov [#allocation5]  }
  0x49   : > { %p7349_p8 = scmp.ne.s32.totalorder %s7657_s28, %s7348_s30  ;;  %s7353_s8 = sshll.u32 %s7484_s6, 4  ;;  %s7354_s8 = int_to_ptr.vmem [resolvable:$false] %s7353_s8 }
  0x4a   : > { %s7355_s26 = scalar_lea.vmem %s7354_s8, 4096  ;;  %p7356_p1 = scmp.lt.s32.totalorder %s7657_s28, %s7354_s8 }
  0x4b   : > { %p7351_p9 = pnand %p7349_p8, %p7615_p4  ;;  %p7357_p11 = scmp.lt.s32.totalorder %s7355_s26, %s7348_s30 }
  0x4d   : > { %p7352_p12 = pneg %p7351_p9  ;;  %p7358_p6 = por %p7357_p11, %p7356_p1 }
  0x4f   : > { %p7359_p13 = pnand %p7358_p6, %p7352_p12 }
  0x51   : > { %7362 = shalt.err (!%p7359_p13)
}
  0x52   : > { %s10789_s16 = smov 8   ;;  %s10790_s20 = smov 128  }
  0x53   : > { %6542 = dma.hbm_to_vmem [thread:$0]  (!%p7593_p0), %s7654_s23, 2048, %s7657_s28, %s7667_s1, %s10790_s20, %s10790_s20, %s10789_s16  }
  0x54   : > { %s221_s10 = scalar_lea.vmem [#allocation10], %s7586_s29  ;;  %s7363_s22 = scalar_lea.hbm %s7663_s19, 2048 }
  0x55   : > { %s230_s5 = sshll.u32 %s221_s10, 4  ;;  %p7364_p11 = scmp.ne.s32.totalorder %s7663_s19, %s7363_s22  ;;  %s7695_s5 = int_to_ptr.vmem [resolvable:$true] %s230_s5 }
  0x56   : > { %s7368_s6 = scalar_lea.hbm %s10718_s2, 4096  ;;  %p7369_p5 = scmp.lt.u32.totalorder %s7663_s19, %s10718_s2 }
  0x57   : > { %p7366_p2 = pnand %p7364_p11, %p7615_p4  ;;  %p7370_p7 = scmp.lt.u32.totalorder %s7368_s6, %s7363_s22 }
  0x58   : > { %p7372_p8 = scmp.lt.u32.totalorder %s7363_s22, %s7663_s19 }
  0x59   : > { %p7367_p3 = pneg %p7366_p2  ;;  %p7371_p10 = por %p7370_p7, %p7369_p5 }
  0x5b   : > { %p7373_p9 = por %p7372_p8, %p7371_p10 }
  0x5d   : > { %p7374_p12 = pnand %p7373_p9, %p7367_p3 }
  0x5f   : > { %7377 = shalt.err (!%p7374_p12)
}
  0x60   : > { %s7378_s1 = scalar_lea.vmem %s7695_s5, 2048  ;;  %s7485_s28 = smov [#allocation10]  }
  0x61   : > { %p7379_p1 = scmp.ne.s32.totalorder %s7695_s5, %s7378_s1  ;;  %s7383_s29 = sshll.u32 %s7485_s28, 4  ;;  %s7384_s29 = int_to_ptr.vmem [resolvable:$false] %s7383_s29 }
  0x62   : > { %s7385_s23 = scalar_lea.vmem %s7384_s29, 4096  ;;  %p7386_p11 = scmp.lt.s32.totalorder %s7695_s5, %s7384_s29 }
  0x63   : > { %p7381_p6 = pnand %p7379_p1, %p7615_p4  ;;  %p7387_p2 = scmp.lt.s32.totalorder %s7385_s23, %s7378_s1 }
  0x65   : > { %p7382_p13 = pneg %p7381_p6  ;;  %p7388_p5 = por %p7387_p2, %p7386_p11 }
  0x67   : > { %p7389_p7 = pnand %p7388_p5, %p7382_p13 }
  0x69   : > { %7392 = shalt.err (!%p7389_p7)
}
  0x6a   : > { %6548 = dma.hbm_to_vmem [thread:$0]  (!%p7593_p0), %s7663_s19, 2048, %s7695_s5, %s7609_s11, %s10790_s20, %s10790_s20, %s10789_s16  }
  0x6b   : > { %p10791_p4 = scmp.ne.s32.totalorder %s10787_s9, 0 }
  0x6d   : > { %242 = sbr.rel (%p10791_p4) target bundleno = 2962 (0xb92), region = 32 }
  0x74   : > { %s7725_s21 = sand.u32 1, %s7463_s13   ;;  %p10792_p3 = scmp.ne.s32.totalorder %s10778_s24, 0 }
  0x75   : > { %s7728_s10 = sshll.u32 %s7725_s21, 7  ;;  %s245_s4 = scalar_lea.sflag [#allocation6], %s7725_s21 }
  0x76   : > { %s7732_s22 = scalar_lea.vmem [#allocation5], %s7728_s10 }
  0x77   : > { %7446 = dma.done.wait (%p10792_p3), %s245_s4, 2048  }
  0x78   : > { %7448 = vsyncadd (%p10792_p3), %s245_s4, 4294965248  ;;  %s253_s11 = sand.u32 1, %s7546_s18   ;;  %s7740_s9 = scalar_lea.vmem [#allocation8], %s7728_s10 }
  0x79   : > { %s254_s19 = scalar_lea.sflag [#allocation9], %s253_s11 }
  0x7a   : > { %7450 = dma.done.wait (%p10792_p3), %s254_s19, 4096  }
  0x7b   : > { %7452 = vsyncadd (%p10792_p3), %s254_s19, 4294963200  ;;  %vm436_vm0 = vcmask 261120   ;;  %v10793_v0 = vmov 0  ;;  %v7753_v1 = vld [vmem:[%s7740_s9] sm:$0xff]  ;;  %v7756_v2 = vld [vmem:[%s7740_s9 + $0x8] sm:$0xff]  ;;  %vm307_vm2 = vcmask 7168  }
  0x7c   : > { %vm7748_vm1 = vmpackc.low %vm436_vm0, %vm436_vm0  ;;  %v7759_v3 = vld [vmem:[%s7740_s9 + $0x10] sm:$0xff]  ;;  %v6211_v4 = vpack.c.bf16 %v7756_v2, %v7753_v1  ;;  %v7764_v5 = vld [vmem:[%s7740_s9 + $0x18] sm:$0xff]  ;;  %v7486_v57 = vmov -2.3819763e+38   ;;  %s8361_s18 = scalar_lea.vmem [#allocation10], %s7728_s10  ;;  %s7489_s24 = smov 96  }
  0x7d   : > { %v10794_v0 = vsel %vm7748_vm1, 4294967295, %v10793_v0  ;;  %v6217_v6 = vpack.c.bf16 %v7764_v5, %v7759_v3  ;;  %v501_v7 = vld [vmem:[%s7732_s22] sm:$0xff]  ;;  %v7779_v9 = vld [vmem:[%s7740_s9 + $0x28] sm:$0xff]  ;;  %v7792_v12 = vld [vmem:[%s7740_s9 + $0x30] sm:$0xff]  ;;  %308 = vst.msk [vmem:[#allocation2] sm:$0xff] %vm307_vm2, %v7486_v57  ;;  %s7490_s16 = smov 64  }
  0x7e   : > { %10795 = vst [vmem:[#allocation18_spill] sm:$0xff] %v10794_v0  ;;  %6213 = vmatprep.subr.msk.bf16.mxu0 %vm7748_vm1, %v6211_v4  ;;  %v7776_v8 = vld [vmem:[%s7740_s9 + $0x20] sm:$0xff]  ;;  %v7781_v10 = vmul.f32 0.17677669, %v501_v7  ;;  %v7795_v13 = vld [vmem:[%s7740_s9 + $0x38] sm:$0xff]  ;;  %v7807_v16 = vld [vmem:[%s7740_s9 + $0x48] sm:$0xff] }
  0x7f   : > { %6216 = vmatpush3.bf16.xpose.msk.msra.mxu0 %vm7748_vm1, %v6211_v4  ;;  %v6223_v11 = vpack.c.bf16 %v7779_v9, %v7776_v8  ;;  %v6229_v14 = vpack.c.bf16 %v7795_v13, %v7792_v12  ;;  %v7804_v15 = vld [vmem:[%s7740_s9 + $0x40] sm:$0xff]  ;;  %v7816_v18 = vld [vmem:[%s7740_s9 + $0x50] sm:$0xff]  ;;  %v7819_v19 = vld [vmem:[%s7740_s9 + $0x58] sm:$0xff]  ;;  %309 = vst.msk [vmem:[#allocation2 + $0x8] sm:$0xff] %vm307_vm2, %v7486_v57  ;;  %s7491_s20 = smov 32   ;;  %vm5147_vm3 = vcmask 523264  }
  0x80   : > { %6219 = vmatprep.subr.msk.bf16.mxu0 %vm7748_vm1, %v6217_v6  ;;  %5795 = vmatprep.mubr.msk.f32.mxu0 %vm436_vm0, %v7781_v10  ;;  %v6235_v17 = vpack.c.bf16 %v7807_v16, %v7804_v15  ;;  %v6241_v20 = vpack.c.bf16 %v7819_v19, %v7816_v18  ;;  %v7828_v21 = vld [vmem:[%s7740_s9 + $0x60] sm:$0xff]  ;;  %v7831_v22 = vld [vmem:[%s7740_s9 + $0x68] sm:$0xff]  ;;  %v7840_v24 = vld [vmem:[%s7740_s9 + $0x70] sm:$0xff]  ;;  %310 = vst.msk [vmem:[#allocation2 + $0x10] sm:$0xff] %vm307_vm2, %v7486_v57  ;;  %vm5164_vm4 = vcmask 785408   ;;  %s10552_s5 = scalar_lea.vmem [#allocation11], %s7728_s10 }
  0x81   : > { %v6247_v23 = vpack.c.bf16 %v7831_v22, %v7828_v21  ;;  %v7843_v25 = vld [vmem:[%s7740_s9 + $0x78] sm:$0xff]  ;;  %v502_v27 = vld [vmem:[%s7732_s22 + $0x8] sm:$0xff]  ;;  %v503_v28 = vld [vmem:[%s7732_s22 + $0x10] sm:$0xff]  ;;  %311 = vst.msk [vmem:[#allocation2 + $0x18] sm:$0xff] %vm307_vm2, %v7486_v57  ;;  %s5506_s7 = sshll.u32 %s7471_s15, 11  ;;  %s5213_s30 = sshll.u32 %s10552_s5, 4  ;;  %s10663_s30 = int_to_ptr.vmem [resolvable:$true] %s5213_s30 }
  0x82   : > { %v6253_v26 = vpack.c.bf16 %v7843_v25, %v7840_v24  ;;  %v7855_v29 = vmul.f32 0.17677669, %v502_v27  ;;  %v7857_v30 = vmul.f32 0.17677669, %v503_v28  ;;  %v504_v31 = vld [vmem:[%s7732_s22 + $0x18] sm:$0xff]  ;;  %v505_v32 = vld [vmem:[%s7732_s22 + $0x20] sm:$0xff]  ;;  %s10661_s26 = scalar_lea.hbm %s10719_s3, %s5506_s7 }
  0x83   : > { %v7863_v33 = vmul.f32 0.17677669, %v504_v31  ;;  %v7867_v34 = vmul.f32 0.17677669, %v505_v32  ;;  %v506_v35 = vld [vmem:[%s7732_s22 + $0x28] sm:$0xff]  ;;  %v507_v36 = vld [vmem:[%s7732_s22 + $0x30] sm:$0xff] }
  0x84   : > { %v7873_v37 = vmul.f32 0.17677669, %v506_v35  ;;  %v7877_v38 = vmul.f32 0.17677669, %v507_v36  ;;  %v508_v39 = vld [vmem:[%s7732_s22 + $0x38] sm:$0xff]  ;;  %v509_v40 = vld [vmem:[%s7732_s22 + $0x40] sm:$0xff] }
  0x85   : > { %v7883_v41 = vmul.f32 0.17677669, %v508_v39  ;;  %v7887_v42 = vmul.f32 0.17677669, %v509_v40  ;;  %v510_v43 = vld [vmem:[%s7732_s22 + $0x48] sm:$0xff]  ;;  %v511_v44 = vld [vmem:[%s7732_s22 + $0x50] sm:$0xff] }
  0x86   : > { %v7893_v45 = vmul.f32 0.17677669, %v510_v43  ;;  %v7897_v46 = vmul.f32 0.17677669, %v511_v44  ;;  %v512_v47 = vld [vmem:[%s7732_s22 + $0x58] sm:$0xff]  ;;  %v513_v48 = vld [vmem:[%s7732_s22 + $0x60] sm:$0xff] }
  0x87   : > { %6222 = vmatpush3.bf16.xpose.msk.msra.mxu0 %vm7748_vm1, %v6217_v6  ;;  %v7903_v49 = vmul.f32 0.17677669, %v512_v47  ;;  %v7907_v50 = vmul.f32 0.17677669, %v513_v48  ;;  %v514_v51 = vld [vmem:[%s7732_s22 + $0x68] sm:$0xff]  ;;  %v515_v52 = vld [vmem:[%s7732_s22 + $0x70] sm:$0xff] }
  0x88   : > { %6225 = vmatprep.subr.msk.bf16.mxu0 %vm7748_vm1, %v6223_v11  ;;  %v7913_v53 = vmul.f32 0.17677669, %v514_v51  ;;  %v7917_v54 = vmul.f32 0.17677669, %v515_v52  ;;  %v516_v55 = vld [vmem:[%s7732_s22 + $0x78] sm:$0xff]  ;;  %312 = vst.msk [vmem:[#allocation2 + $0x20] sm:$0xff] %vm307_vm2, %v7486_v57 }
  0x89   : > { %10796 = vst [vmem:[#allocation19_spill] sm:$0xff] %v7907_v50  ;;  %v7922_v56 = vmul.f32 0.17677669, %v516_v55  ;;  %313 = vst.msk [vmem:[#allocation2 + $0x28] sm:$0xff] %vm307_vm2, %v7486_v57  ;;  %v7488_v27 = vmov 0.0   ;;  %v8364_v32 = vld [vmem:[%s8361_s18] sm:$0xff] }
  0x8a   : > { %10797 = vst [vmem:[#allocation20_spill] sm:$0xff] %v7913_v53  ;;  %10798 = vst [vmem:[#allocation21_spill] sm:$0xff] %v7917_v54  ;;  %v8367_v35 = vld [vmem:[%s8361_s18 + $0x8] sm:$0xff]  ;;  %v8372_v39 = vld [vmem:[%s8361_s18 + $0x10] sm:$0xff]  ;;  %s5198_s15 = scalar_lea.sflag [#allocation7], %s7725_s21  ;;  %s7393_s1 = scalar_lea.vmem %s10663_s30, 2048 }
  0x8b   : > { %10799 = vst [vmem:[#allocation22_spill] sm:$0xff] %v7922_v56  ;;  %314 = vst.msk [vmem:[#allocation2 + $0x30] sm:$0xff] %vm307_vm2, %v7486_v57  ;;  %v6259_v36 = vpack.c.bf16 %v8367_v35, %v8364_v32  ;;  %v8375_v40 = vld [vmem:[%s8361_s18 + $0x18] sm:$0xff]  ;;  %v537_v44 = vld [vmem:[%s8361_s18 + $0x20] sm:$0xff]  ;;  %p7394_p0 = scmp.ne.s32.totalorder %s10663_s30, %s7393_s1  ;;  %p10933_p10 = scmp.ne.s32.totalorder %s10779_s25, 0 }
  0x8c   : > { %315 = vst.msk [vmem:[#allocation2 + $0x38] sm:$0xff] %vm307_vm2, %v7486_v57  ;;  %316 = vst.msk [vmem:[#allocation2 + $0x40] sm:$0xff] %vm307_vm2, %v7486_v57  ;;  %v6263_v43 = vpack.c.bf16 %v8375_v40, %v8372_v39  ;;  %v538_v47 = vld [vmem:[%s8361_s18 + $0x28] sm:$0xff]  ;;  %v539_v51 = vld [vmem:[%s8361_s18 + $0x30] sm:$0xff]  ;;  %s7492_s28 = smov [#allocation11]  }
  0x8d   : > { %317 = vst.msk [vmem:[#allocation2 + $0x48] sm:$0xff] %vm307_vm2, %v7486_v57  ;;  %318 = vst.msk [vmem:[#allocation2 + $0x50] sm:$0xff] %vm307_vm2, %v7486_v57  ;;  %6260 = vmatprep.subr.bf16.mxu1 %v6259_v36  ;;  %v6267_v48 = vpack.c.bf16 %v538_v47, %v537_v44  ;;  %v540_v52 = vld [vmem:[%s8361_s18 + $0x38] sm:$0xff]  ;;  %v543_v47 = vld [vmem:[%s8361_s18 + $0x50] sm:$0xff]  ;;  %p7395_p8 = pnand %p7394_p0, %p10933_p10  ;;  %s7397_s29 = sshll.u32 %s7492_s28, 4  ;;  %s7398_s29 = int_to_ptr.vmem [resolvable:$false] %s7397_s29 }
  0x8e   : > { %319 = vst.msk [vmem:[#allocation2 + $0x58] sm:$0xff] %vm307_vm2, %v7486_v57  ;;  %320 = vst.msk [vmem:[#allocation2 + $0x60] sm:$0xff] %vm307_vm2, %v7486_v57  ;;  %6262 = vmatpush3.bf16.msra.mxu1 %v6259_v36  ;;  %v6271_v55 = vpack.c.bf16 %v540_v52, %v539_v51  ;;  %v8390_v44 = vld [vmem:[#allocation2 + $0x18] sm:$0xff]  ;;  %v8394_v51 = vld [vmem:[#allocation2 + $0x8] sm:$0xff]  ;;  %s7399_s23 = scalar_lea.vmem %s7398_s29, 4096  ;;  %p7400_p12 = scmp.lt.s32.totalorder %s10663_s30, %s7398_s29 }
  0x8f   : > { %6228 = vmatpush3.bf16.xpose.msk.msra.mxu0 %vm7748_vm1, %v6223_v11  ;;  %321 = vst.msk [vmem:[#allocation2 + $0x68] sm:$0xff] %vm307_vm2, %v7486_v57  ;;  %322 = vst.msk [vmem:[#allocation2 + $0x70] sm:$0xff] %vm307_vm2, %v7486_v57  ;;  %6264 = vmatprep.subr.bf16.mxu1 %v6263_v43  ;;  %p7396_p9 = pneg %p7395_p8  ;;  %p7401_p1 = scmp.lt.s32.totalorder %s7399_s23, %s7393_s1 }
  0x90   : > { %6231 = vmatprep.subr.msk.bf16.mxu0 %vm7748_vm1, %v6229_v14  ;;  %323 = vst.msk [vmem:[#allocation2 + $0x78] sm:$0xff] %vm307_vm2, %v7486_v57  ;;  %324 = vst.msk [vmem:[#allocation2 + $0x80] sm:$0xff] %vm307_vm2, %v7486_v57 }
  0x91   : > { %325 = vst.msk [vmem:[#allocation2 + $0x88] sm:$0xff] %vm307_vm2, %v7486_v57  ;;  %326 = vst.msk [vmem:[#allocation2 + $0x90] sm:$0xff] %vm307_vm2, %v7486_v57  ;;  %p7402_p6 = por %p7401_p1, %p7400_p12 }
  0x92   : > { %327 = vst.msk [vmem:[#allocation2 + $0x98] sm:$0xff] %vm307_vm2, %v7486_v57  ;;  %328 = vst.msk [vmem:[#allocation2 + $0xa0] sm:$0xff] %vm307_vm2, %v7486_v57  ;;  %6266 = vmatpush3.bf16.msra.mxu1 %v6263_v43 }
  0x93   : > { %329 = vst.msk [vmem:[#allocation2 + $0xa8] sm:$0xff] %vm307_vm2, %v7486_v57  ;;  %330 = vst.msk [vmem:[#allocation2 + $0xb0] sm:$0xff] %vm307_vm2, %v7486_v57  ;;  %6268 = vmatprep.subr.bf16.mxu1 %v6267_v48  ;;  %p7403_p13 = pnand %p7402_p6, %p7396_p9 }
  0x94   : > { %331 = vst.msk [vmem:[#allocation2 + $0xb8] sm:$0xff] %vm307_vm2, %v7486_v57  ;;  %332 = vst.msk [vmem:[#allocation2 + $0xc0] sm:$0xff] %vm307_vm2, %v7486_v57 }
  0x95   : > { %333 = vst.msk [vmem:[#allocation2 + $0xc8] sm:$0xff] %vm307_vm2, %v7486_v57  ;;  %334 = vst.msk [vmem:[#allocation2 + $0xd0] sm:$0xff] %vm307_vm2, %v7486_v57 }
  0x96   : > { %335 = vst.msk [vmem:[#allocation2 + $0xd8] sm:$0xff] %vm307_vm2, %v7486_v57  ;;  %336 = vst.msk [vmem:[#allocation2 + $0xe0] sm:$0xff] %vm307_vm2, %v7486_v57  ;;  %6270 = vmatpush3.bf16.msra.mxu1 %v6267_v48  ;;  %v544_v48 = vld [vmem:[%s8361_s18 + $0x58] sm:$0xff] }
  0x97   : > { %6234 = vmatpush3.bf16.xpose.msk.msra.mxu0 %vm7748_vm1, %v6229_v14  ;;  %337 = vst.msk [vmem:[#allocation2 + $0xe8] sm:$0xff] %vm307_vm2, %v7486_v57  ;;  %338 = vst.msk [vmem:[#allocation2 + $0xf0] sm:$0xff] %vm307_vm2, %v7486_v57  ;;  %v7487_v14 = vmov 0   ;;  %6272 = vmatprep.subr.bf16.mxu1 %v6271_v55  ;;  %v6279_v52 = vpack.c.bf16 %v544_v48, %v543_v47  ;;  %v545_v47 = vld [vmem:[%s8361_s18 + $0x60] sm:$0xff]  ;;  %v546_v48 = vld [vmem:[%s8361_s18 + $0x68] sm:$0xff] }
  0x98   : > { %6237 = vmatprep.subr.msk.bf16.mxu0 %vm7748_vm1, %v6235_v17  ;;  %339 = vst.msk [vmem:[#allocation2 + $0xf8] sm:$0xff] %vm307_vm2, %v7486_v57  ;;  %340 = vst.msk [vmem:[#allocation2 + $0x100] sm:$0xff] %vm307_vm2, %v7486_v57  ;;  %6613 = vset.pattern.permute.xlu0 %v7487_v14  ;;  %v8525_v0 = vld [vmem:[#allocation2 + $0x78] sm:$0xff] }
  0x99   : > { %341 = vst.msk [vmem:[#allocation2 + $0x108] sm:$0xff] %vm307_vm2, %v7486_v57  ;;  %342 = vst.msk [vmem:[#allocation2 + $0x110] sm:$0xff] %vm307_vm2, %v7486_v57  ;;  %6614 = vset.pattern.permute.xlu1 %v7487_v14  ;;  %v542_v14 = vld [vmem:[%s8361_s18 + $0x48] sm:$0xff] }
  0x9a   : > { %343 = vst.msk [vmem:[#allocation2 + $0x118] sm:$0xff] %vm307_vm2, %v7486_v57  ;;  %344 = vst.msk [vmem:[#allocation2 + $0x120] sm:$0xff] %vm307_vm2, %v7486_v57  ;;  %6274 = vmatpush3.bf16.msra.mxu1 %v6271_v55 }
  0x9b   : > { %345 = vst.msk [vmem:[#allocation2 + $0x128] sm:$0xff] %vm307_vm2, %v7486_v57  ;;  %346 = vst.msk [vmem:[#allocation2 + $0x130] sm:$0xff] %vm307_vm2, %v7486_v57 }
  0x9c   : > { %347 = vst.msk [vmem:[#allocation2 + $0x138] sm:$0xff] %vm307_vm2, %v7486_v57  ;;  %348 = vst.msk [vmem:[#allocation2 + $0x140] sm:$0xff] %vm307_vm2, %v7486_v57 }
  0x9d   : > { %349 = vst.msk [vmem:[#allocation2 + $0x148] sm:$0xff] %vm307_vm2, %v7486_v57  ;;  %350 = vst.msk [vmem:[#allocation2 + $0x150] sm:$0xff] %vm307_vm2, %v7486_v57 }
  0x9e   : > { %351 = vst.msk [vmem:[#allocation2 + $0x158] sm:$0xff] %vm307_vm2, %v7486_v57  ;;  %352 = vst.msk [vmem:[#allocation2 + $0x160] sm:$0xff] %vm307_vm2, %v7486_v57 }
  0x9f   : > { %6240 = vmatpush3.bf16.xpose.msk.msra.mxu0 %vm7748_vm1, %v6235_v17  ;;  %353 = vst.msk [vmem:[#allocation2 + $0x168] sm:$0xff] %vm307_vm2, %v7486_v57  ;;  %354 = vst.msk [vmem:[#allocation2 + $0x170] sm:$0xff] %vm307_vm2, %v7486_v57 }
  0xa0   : > { %6243 = vmatprep.subr.msk.bf16.mxu0 %vm7748_vm1, %v6241_v20  ;;  %355 = vst.msk [vmem:[#allocation2 + $0x178] sm:$0xff] %vm307_vm2, %v7486_v57  ;;  %356 = vst.msk [vmem:[#allocation2 + $0x180] sm:$0xff] %vm307_vm2, %v7486_v57 }
  0xa1   : > { %357 = vst.msk [vmem:[#allocation2 + $0x188] sm:$0xff] %vm307_vm2, %v7486_v57  ;;  %358 = vst.msk [vmem:[#allocation2 + $0x190] sm:$0xff] %vm307_vm2, %v7486_v57 }
  0xa2   : > { %359 = vst.msk [vmem:[#allocation2 + $0x198] sm:$0xff] %vm307_vm2, %v7486_v57  ;;  %360 = vst.msk [vmem:[#allocation2 + $0x1a0] sm:$0xff] %vm307_vm2, %v7486_v57 }
  0xa3   : > { %361 = vst.msk [vmem:[#allocation2 + $0x1a8] sm:$0xff] %vm307_vm2, %v7486_v57  ;;  %362 = vst.msk [vmem:[#allocation2 + $0x1b0] sm:$0xff] %vm307_vm2, %v7486_v57 }
  0xa4   : > { %363 = vst.msk [vmem:[#allocation2 + $0x1b8] sm:$0xff] %vm307_vm2, %v7486_v57  ;;  %364 = vst.msk [vmem:[#allocation2 + $0x1c0] sm:$0xff] %vm307_vm2, %v7486_v57 }
  0xa5   : > { %365 = vst.msk [vmem:[#allocation2 + $0x1c8] sm:$0xff] %vm307_vm2, %v7486_v57  ;;  %366 = vst.msk [vmem:[#allocation2 + $0x1d0] sm:$0xff] %vm307_vm2, %v7486_v57 }
  0xa6   : > { %367 = vst.msk [vmem:[#allocation2 + $0x1d8] sm:$0xff] %vm307_vm2, %v7486_v57  ;;  %368 = vst.msk [vmem:[#allocation2 + $0x1e0] sm:$0xff] %vm307_vm2, %v7486_v57 }
  0xa7   : > { %6246 = vmatpush3.bf16.xpose.msk.msra.mxu0 %vm7748_vm1, %v6241_v20  ;;  %369 = vst.msk [vmem:[#allocation2 + $0x1e8] sm:$0xff] %vm307_vm2, %v7486_v57  ;;  %370 = vst.msk [vmem:[#allocation2 + $0x1f0] sm:$0xff] %vm307_vm2, %v7486_v57 }
  0xa8   : > { %6249 = vmatprep.subr.msk.bf16.mxu0 %vm7748_vm1, %v6247_v23  ;;  %371 = vst.msk [vmem:[#allocation2 + $0x1f8] sm:$0xff] %vm307_vm2, %v7486_v57  ;;  %372 = vst.msk [vmem:[#allocation3] sm:$0xff] %vm307_vm2, %v7488_v27  ;;  %v541_v57 = vld [vmem:[%s8361_s18 + $0x40] sm:$0xff] }
  0xa9   : > { %437 = vst.msk [vmem:[#allocation4] sm:$0xff] %vm436_vm0, %v7488_v27  ;;  %438 = vst.msk [vmem:[#allocation4 + $0x8] sm:$0xff] %vm436_vm0, %v7488_v27  ;;  %v6275_v36 = vpack.c.bf16 %v542_v14, %v541_v57 }
  0xaa   : > { %373 = vst.msk [vmem:[#allocation3 + $0x8] sm:$0xff] %vm307_vm2, %v7488_v27  ;;  %374 = vst.msk [vmem:[#allocation3 + $0x10] sm:$0xff] %vm307_vm2, %v7488_v27 }
  0xab   : > { %375 = vst.msk [vmem:[#allocation3 + $0x18] sm:$0xff] %vm307_vm2, %v7488_v27  ;;  %376 = vst.msk [vmem:[#allocation3 + $0x20] sm:$0xff] %vm307_vm2, %v7488_v27  ;;  %6276 = vmatprep.subr.bf16.mxu1 %v6275_v36 }
  0xac   : > { %377 = vst.msk [vmem:[#allocation3 + $0x28] sm:$0xff] %vm307_vm2, %v7488_v27  ;;  %378 = vst.msk [vmem:[#allocation3 + $0x30] sm:$0xff] %vm307_vm2, %v7488_v27  ;;  %6278 = vmatpush3.bf16.msra.mxu1 %v6275_v36 }
  0xad   : > { %379 = vst.msk [vmem:[#allocation3 + $0x38] sm:$0xff] %vm307_vm2, %v7488_v27  ;;  %380 = vst.msk [vmem:[#allocation3 + $0x40] sm:$0xff] %vm307_vm2, %v7488_v27  ;;  %6280 = vmatprep.subr.bf16.mxu1 %v6279_v52 }
  0xae   : > { %381 = vst.msk [vmem:[#allocation3 + $0x48] sm:$0xff] %vm307_vm2, %v7488_v27  ;;  %382 = vst.msk [vmem:[#allocation3 + $0x50] sm:$0xff] %vm307_vm2, %v7488_v27 }
  0xaf   : > { %6252 = vmatpush3.bf16.xpose.msk.msra.mxu0 %vm7748_vm1, %v6247_v23  ;;  %383 = vst.msk [vmem:[#allocation3 + $0x58] sm:$0xff] %vm307_vm2, %v7488_v27  ;;  %384 = vst.msk [vmem:[#allocation3 + $0x60] sm:$0xff] %vm307_vm2, %v7488_v27 }
  0xb0   : > { %6255 = vmatprep.subr.msk.bf16.mxu0 %vm7748_vm1, %v6253_v26  ;;  %385 = vst.msk [vmem:[#allocation3 + $0x68] sm:$0xff] %vm307_vm2, %v7488_v27  ;;  %386 = vst.msk [vmem:[#allocation3 + $0x70] sm:$0xff] %vm307_vm2, %v7488_v27  ;;  %6282 = vmatpush3.bf16.msra.mxu1 %v6279_v52  ;;  %v6615_v52 = vpack.i.bf16 %v7756_v2, %v7753_v1  ;;  %v8437_v1 = vld [vmem:[#allocation2 + $0x30] sm:$0xff] }
  0xb1   : > { %387 = vst.msk [vmem:[#allocation3 + $0x78] sm:$0xff] %vm307_vm2, %v7488_v27  ;;  %388 = vst.msk [vmem:[#allocation3 + $0x80] sm:$0xff] %vm307_vm2, %v7488_v27 }
  0xb2   : > { %389 = vst.msk [vmem:[#allocation3 + $0x88] sm:$0xff] %vm307_vm2, %v7488_v27  ;;  %390 = vst.msk [vmem:[#allocation3 + $0x90] sm:$0xff] %vm307_vm2, %v7488_v27 }
  0xb3   : > { %391 = vst.msk [vmem:[#allocation3 + $0x98] sm:$0xff] %vm307_vm2, %v7488_v27  ;;  %392 = vst.msk [vmem:[#allocation3 + $0xa0] sm:$0xff] %vm307_vm2, %v7488_v27 }
  0xb4   : > { %393 = vst.msk [vmem:[#allocation3 + $0xa8] sm:$0xff] %vm307_vm2, %v7488_v27  ;;  %394 = vst.msk [vmem:[#allocation3 + $0xb0] sm:$0xff] %vm307_vm2, %v7488_v27 }
  0xb5   : > { %395 = vst.msk [vmem:[#allocation3 + $0xb8] sm:$0xff] %vm307_vm2, %v7488_v27  ;;  %396 = vst.msk [vmem:[#allocation3 + $0xc0] sm:$0xff] %vm307_vm2, %v7488_v27 }
  0xb6   : > { %397 = vst.msk [vmem:[#allocation3 + $0xc8] sm:$0xff] %vm307_vm2, %v7488_v27  ;;  %398 = vst.msk [vmem:[#allocation3 + $0xd0] sm:$0xff] %vm307_vm2, %v7488_v27 }
  0xb7   : > { %6258 = vmatpush3.bf16.xpose.msk.msra.mxu0 %vm7748_vm1, %v6253_v26  ;;  %399 = vst.msk [vmem:[#allocation3 + $0xd8] sm:$0xff] %vm307_vm2, %v7488_v27  ;;  %400 = vst.msk [vmem:[#allocation3 + $0xe0] sm:$0xff] %vm307_vm2, %v7488_v27 }
  0xb8   : > { %401 = vst.msk [vmem:[#allocation3 + $0xe8] sm:$0xff] %vm307_vm2, %v7488_v27  ;;  %402 = vst.msk [vmem:[#allocation3 + $0xf0] sm:$0xff] %vm307_vm2, %v7488_v27 }
  0xb9   : > { %403 = vst.msk [vmem:[#allocation3 + $0xf8] sm:$0xff] %vm307_vm2, %v7488_v27  ;;  %404 = vst.msk [vmem:[#allocation3 + $0x100] sm:$0xff] %vm307_vm2, %v7488_v27 }
  0xba   : > { %405 = vst.msk [vmem:[#allocation3 + $0x108] sm:$0xff] %vm307_vm2, %v7488_v27  ;;  %406 = vst.msk [vmem:[#allocation3 + $0x110] sm:$0xff] %vm307_vm2, %v7488_v27 }
  0xbb   : > { %407 = vst.msk [vmem:[#allocation3 + $0x118] sm:$0xff] %vm307_vm2, %v7488_v27  ;;  %408 = vst.msk [vmem:[#allocation3 + $0x120] sm:$0xff] %vm307_vm2, %v7488_v27 }
  0xbc   : > { %409 = vst.msk [vmem:[#allocation3 + $0x128] sm:$0xff] %vm307_vm2, %v7488_v27  ;;  %410 = vst.msk [vmem:[#allocation3 + $0x130] sm:$0xff] %vm307_vm2, %v7488_v27 }
  0xbd   : > { %411 = vst.msk [vmem:[#allocation3 + $0x138] sm:$0xff] %vm307_vm2, %v7488_v27  ;;  %412 = vst.msk [vmem:[#allocation3 + $0x140] sm:$0xff] %vm307_vm2, %v7488_v27 }
  0xbe   : > { %5796 = vmatmul.mubr.msk.f32.vlgmr.msra.gmra.mrb[0].mxu0 %vm436_vm0, %v7855_v29  ;;  %413 = vst.msk [vmem:[#allocation3 + $0x148] sm:$0xff] %vm307_vm2, %v7488_v27  ;;  %414 = vst.msk [vmem:[#allocation3 + $0x150] sm:$0xff] %vm307_vm2, %v7488_v27 }
  0xbf   : > { %5798 = vmatprep.mubr.msk.f32.mxu0 %vm436_vm0, %v7857_v30  ;;  %415 = vst.msk [vmem:[#allocation3 + $0x158] sm:$0xff] %vm307_vm2, %v7488_v27  ;;  %416 = vst.msk [vmem:[#allocation3 + $0x160] sm:$0xff] %vm307_vm2, %v7488_v27 }
  0xc0   : > { %417 = vst.msk [vmem:[#allocation3 + $0x168] sm:$0xff] %vm307_vm2, %v7488_v27  ;;  %418 = vst.msk [vmem:[#allocation3 + $0x170] sm:$0xff] %vm307_vm2, %v7488_v27 }
  0xc1   : > { %419 = vst.msk [vmem:[#allocation3 + $0x178] sm:$0xff] %vm307_vm2, %v7488_v27  ;;  %420 = vst.msk [vmem:[#allocation3 + $0x180] sm:$0xff] %vm307_vm2, %v7488_v27 }
  0xc2   : > { %5799 = vmatmul.mubr.msk.f32.gmra.mrb[2].mxu0 %vm436_vm0, %v7863_v33  ;;  %421 = vst.msk [vmem:[#allocation3 + $0x188] sm:$0xff] %vm307_vm2, %v7488_v27  ;;  %422 = vst.msk [vmem:[#allocation3 + $0x190] sm:$0xff] %vm307_vm2, %v7488_v27 }
  0xc3   : > { %5801 = vmatprep.mubr.msk.f32.mxu0 %vm436_vm0, %v7867_v34  ;;  %423 = vst.msk [vmem:[#allocation3 + $0x198] sm:$0xff] %vm307_vm2, %v7488_v27  ;;  %424 = vst.msk [vmem:[#allocation3 + $0x1a0] sm:$0xff] %vm307_vm2, %v7488_v27 }
  0xc4   : > { %425 = vst.msk [vmem:[#allocation3 + $0x1a8] sm:$0xff] %vm307_vm2, %v7488_v27  ;;  %426 = vst.msk [vmem:[#allocation3 + $0x1b0] sm:$0xff] %vm307_vm2, %v7488_v27 }
  0xc5   : > { %427 = vst.msk [vmem:[#allocation3 + $0x1b8] sm:$0xff] %vm307_vm2, %v7488_v27  ;;  %428 = vst.msk [vmem:[#allocation3 + $0x1c0] sm:$0xff] %vm307_vm2, %v7488_v27 }
  0xc6   : > { %5802 = vmatmul.mubr.msk.f32.gmra.mrb[4].mxu0 %vm436_vm0, %v7873_v37  ;;  %429 = vst.msk [vmem:[#allocation3 + $0x1c8] sm:$0xff] %vm307_vm2, %v7488_v27  ;;  %430 = vst.msk [vmem:[#allocation3 + $0x1d0] sm:$0xff] %vm307_vm2, %v7488_v27 }
  0xc7   : > { %5804 = vmatprep.mubr.msk.f32.mxu0 %vm436_vm0, %v7877_v38  ;;  %431 = vst.msk [vmem:[#allocation3 + $0x1d8] sm:$0xff] %vm307_vm2, %v7488_v27  ;;  %432 = vst.msk [vmem:[#allocation3 + $0x1e0] sm:$0xff] %vm307_vm2, %v7488_v27 }
  0xc8   : > { %433 = vst.msk [vmem:[#allocation3 + $0x1e8] sm:$0xff] %vm307_vm2, %v7488_v27  ;;  %434 = vst.msk [vmem:[#allocation3 + $0x1f0] sm:$0xff] %vm307_vm2, %v7488_v27 }
  0xc9   : > { %435 = vst.msk [vmem:[#allocation3 + $0x1f8] sm:$0xff] %vm307_vm2, %v7488_v27 }
  0xca   : > { %5805 = vmatmul.mubr.msk.f32.gmra.mrb[6].mxu0 %vm436_vm0, %v7883_v41  ;;  %439 = vst.msk [vmem:[#allocation4 + $0x10] sm:$0xff] %vm436_vm0, %v7488_v27  ;;  %440 = vst.msk [vmem:[#allocation4 + $0x18] sm:$0xff] %vm436_vm0, %v7488_v27 }
  0xcb   : > { %5807 = vmatprep.mubr.msk.f32.mxu0 %vm436_vm0, %v7887_v42  ;;  %441 = vst.msk [vmem:[#allocation4 + $0x20] sm:$0xff] %vm436_vm0, %v7488_v27  ;;  %442 = vst.msk [vmem:[#allocation4 + $0x28] sm:$0xff] %vm436_vm0, %v7488_v27 }
  0xcc   : > { %443 = vst.msk [vmem:[#allocation4 + $0x30] sm:$0xff] %vm436_vm0, %v7488_v27  ;;  %444 = vst.msk [vmem:[#allocation4 + $0x38] sm:$0xff] %vm436_vm0, %v7488_v27 }
  0xcd   : > { %445 = vst.msk [vmem:[#allocation4 + $0x40] sm:$0xff] %vm436_vm0, %v7488_v27  ;;  %446 = vst.msk [vmem:[#allocation4 + $0x48] sm:$0xff] %vm436_vm0, %v7488_v27 }
  0xce   : > { %5808 = vmatmul.mubr.msk.f32.gmra.mrb[8].mxu0 %vm436_vm0, %v7893_v45  ;;  %447 = vst.msk [vmem:[#allocation4 + $0x50] sm:$0xff] %vm436_vm0, %v7488_v27  ;;  %448 = vst.msk [vmem:[#allocation4 + $0x58] sm:$0xff] %vm436_vm0, %v7488_v27 }
  0xcf   : > { %5810 = vmatprep.mubr.msk.f32.mxu0 %vm436_vm0, %v7897_v46  ;;  %449 = vst.msk [vmem:[#allocation4 + $0x60] sm:$0xff] %vm436_vm0, %v7488_v27  ;;  %450 = vst.msk [vmem:[#allocation4 + $0x68] sm:$0xff] %vm436_vm0, %v7488_v27 }
  0xd0   : > { %451 = vst.msk [vmem:[#allocation4 + $0x70] sm:$0xff] %vm436_vm0, %v7488_v27  ;;  %452 = vst.msk [vmem:[#allocation4 + $0x78] sm:$0xff] %vm436_vm0, %v7488_v27 }
  0xd1   : > { %453 = vst.msk [vmem:[#allocation4 + $0x80] sm:$0xff] %vm436_vm0, %v7488_v27  ;;  %454 = vst.msk [vmem:[#allocation4 + $0x88] sm:$0xff] %vm436_vm0, %v7488_v27 }
  0xd2   : > { %5811 = vmatmul.mubr.msk.f32.gmra.mrb[10].mxu0 %vm436_vm0, %v7903_v49  ;;  %455 = vst.msk [vmem:[#allocation4 + $0x90] sm:$0xff] %vm436_vm0, %v7488_v27  ;;  %456 = vst.msk [vmem:[#allocation4 + $0x98] sm:$0xff] %vm436_vm0, %v7488_v27 }
  0xd3   : > { %5813 = vmatprep.mubr.msk.f32.mxu0 %vm436_vm0, %v7907_v50  ;;  %457 = vst.msk [vmem:[#allocation4 + $0xa0] sm:$0xff] %vm436_vm0, %v7488_v27  ;;  %458 = vst.msk [vmem:[#allocation4 + $0xa8] sm:$0xff] %vm436_vm0, %v7488_v27 }
  0xd4   : > { %459 = vst.msk [vmem:[#allocation4 + $0xb0] sm:$0xff] %vm436_vm0, %v7488_v27  ;;  %460 = vst.msk [vmem:[#allocation4 + $0xb8] sm:$0xff] %vm436_vm0, %v7488_v27 }
  0xd5   : > { %461 = vst.msk [vmem:[#allocation4 + $0xc0] sm:$0xff] %vm436_vm0, %v7488_v27  ;;  %462 = vst.msk [vmem:[#allocation4 + $0xc8] sm:$0xff] %vm436_vm0, %v7488_v27 }
  0xd6   : > { %5814 = vmatmul.mubr.msk.f32.gmra.mrb[12].mxu0 %vm436_vm0, %v7913_v53  ;;  %463 = vst.msk [vmem:[#allocation4 + $0xd0] sm:$0xff] %vm436_vm0, %v7488_v27  ;;  %464 = vst.msk [vmem:[#allocation4 + $0xd8] sm:$0xff] %vm436_vm0, %v7488_v27 }
  0xd7   : > { %5816 = vmatprep.mubr.msk.f32.mxu0 %vm436_vm0, %v7917_v54  ;;  %465 = vst.msk [vmem:[#allocation4 + $0xe0] sm:$0xff] %vm436_vm0, %v7488_v27  ;;  %466 = vst.msk [vmem:[#allocation4 + $0xe8] sm:$0xff] %vm436_vm0, %v7488_v27 }
  0xd8   : > { %467 = vst.msk [vmem:[#allocation4 + $0xf0] sm:$0xff] %vm436_vm0, %v7488_v27  ;;  %468 = vst.msk [vmem:[#allocation4 + $0xf8] sm:$0xff] %vm436_vm0, %v7488_v27 }
  0xd9   : > { %469 = vst.msk [vmem:[#allocation4 + $0x100] sm:$0xff] %vm436_vm0, %v7488_v27  ;;  %470 = vst.msk [vmem:[#allocation4 + $0x108] sm:$0xff] %vm436_vm0, %v7488_v27 }
  0xda   : > { %5817 = vmatmul.mubr.msk.f32.gmra.mrb[14].mxu0 %vm436_vm0, %v7922_v56  ;;  %471 = vst.msk [vmem:[#allocation4 + $0x110] sm:$0xff] %vm436_vm0, %v7488_v27  ;;  %472 = vst.msk [vmem:[#allocation4 + $0x118] sm:$0xff] %vm436_vm0, %v7488_v27 }
  0xdb   : > { %473 = vst.msk [vmem:[#allocation4 + $0x120] sm:$0xff] %vm436_vm0, %v7488_v27  ;;  %474 = vst.msk [vmem:[#allocation4 + $0x128] sm:$0xff] %vm436_vm0, %v7488_v27 }
  0xdc   : > { %475 = vst.msk [vmem:[#allocation4 + $0x130] sm:$0xff] %vm436_vm0, %v7488_v27  ;;  %476 = vst.msk [vmem:[#allocation4 + $0x138] sm:$0xff] %vm436_vm0, %v7488_v27 }
  0xdd   : > { %477 = vst.msk [vmem:[#allocation4 + $0x140] sm:$0xff] %vm436_vm0, %v7488_v27  ;;  %478 = vst.msk [vmem:[#allocation4 + $0x148] sm:$0xff] %vm436_vm0, %v7488_v27 }
  0xde   : > { %479 = vst.msk [vmem:[#allocation4 + $0x150] sm:$0xff] %vm436_vm0, %v7488_v27  ;;  %480 = vst.msk [vmem:[#allocation4 + $0x158] sm:$0xff] %vm436_vm0, %v7488_v27 }
  0xdf   : > { %481 = vst.msk [vmem:[#allocation4 + $0x160] sm:$0xff] %vm436_vm0, %v7488_v27  ;;  %482 = vst.msk [vmem:[#allocation4 + $0x168] sm:$0xff] %vm436_vm0, %v7488_v27 }
  0xe0   : > { %483 = vst.msk [vmem:[#allocation4 + $0x170] sm:$0xff] %vm436_vm0, %v7488_v27  ;;  %484 = vst.msk [vmem:[#allocation4 + $0x178] sm:$0xff] %vm436_vm0, %v7488_v27 }
  0xe1   : > { %485 = vst.msk [vmem:[#allocation4 + $0x180] sm:$0xff] %vm436_vm0, %v7488_v27  ;;  %486 = vst.msk [vmem:[#allocation4 + $0x188] sm:$0xff] %vm436_vm0, %v7488_v27 }
  0xe2   : > { %487 = vst.msk [vmem:[#allocation4 + $0x190] sm:$0xff] %vm436_vm0, %v7488_v27  ;;  %488 = vst.msk [vmem:[#allocation4 + $0x198] sm:$0xff] %vm436_vm0, %v7488_v27 }
  0xe3   : > { %489 = vst.msk [vmem:[#allocation4 + $0x1a0] sm:$0xff] %vm436_vm0, %v7488_v27  ;;  %490 = vst.msk [vmem:[#allocation4 + $0x1a8] sm:$0xff] %vm436_vm0, %v7488_v27 }
  0xe4   : > { %491 = vst.msk [vmem:[#allocation4 + $0x1b0] sm:$0xff] %vm436_vm0, %v7488_v27  ;;  %492 = vst.msk [vmem:[#allocation4 + $0x1b8] sm:$0xff] %vm436_vm0, %v7488_v27 }
  0xe5   : > { %493 = vst.msk [vmem:[#allocation4 + $0x1c0] sm:$0xff] %vm436_vm0, %v7488_v27  ;;  %494 = vst.msk [vmem:[#allocation4 + $0x1c8] sm:$0xff] %vm436_vm0, %v7488_v27 }
  0xe6   : > { %495 = vst.msk [vmem:[#allocation4 + $0x1d0] sm:$0xff] %vm436_vm0, %v7488_v27  ;;  %496 = vst.msk [vmem:[#allocation4 + $0x1d8] sm:$0xff] %vm436_vm0, %v7488_v27 }
  0xe7   : > { %497 = vst.msk [vmem:[#allocation4 + $0x1e0] sm:$0xff] %vm436_vm0, %v7488_v27  ;;  %498 = vst.msk [vmem:[#allocation4 + $0x1e8] sm:$0xff] %vm436_vm0, %v7488_v27 }
  0xe8   : > { %499 = vst.msk [vmem:[#allocation4 + $0x1f0] sm:$0xff] %vm436_vm0, %v7488_v27  ;;  %500 = vst.msk [vmem:[#allocation4 + $0x1f8] sm:$0xff] %vm436_vm0, %v7488_v27  ;;  %v8385_v27 = vld [vmem:[#allocation2] sm:$0xff] }
 0x191   : > { %v8056_v58 = vpop.f32.mrb[0].mxu0 }
 0x192   : > { %10800 = vst [vmem:[#allocation23_spill] sm:$0xff] %v8056_v58  ;;  %v8058_v59 = vpop.f32.mrb[1].mxu0 }
 0x193   : > { %823 = vmax.xlane.f32.xlu0 %v8058_v59 }
 0x195   : > { %v8061_v60 = vpop.f32.mrb[2].mxu0 }
 0x196   : > { %10801 = vst [vmem:[#allocation24_spill] sm:$0xff] %v8061_v60  ;;  %829 = vmax.xlane.f32.xlu1 %v8061_v60  ;;  %v8064_v61 = vpop.f32.mrb[3].mxu0 }
 0x197   : > { %10802 = vst [vmem:[#allocation25_spill] sm:$0xff] %v8064_v61  ;;  %825 = vmax.xlane.f32.xlu0 %v8056_v58 }
 0x199   : > { %v8067_v62 = vpop.f32.mrb[4].mxu0 }
 0x19a   : > { %10803 = vst [vmem:[#allocation26_spill] sm:$0xff] %v8067_v62  ;;  %827 = vmax.xlane.f32.xlu1 %v8064_v61  ;;  %v8070_v63 = vpop.f32.mrb[5].mxu0 }
 0x19b   : > { %10804 = vst [vmem:[#allocation27_spill] sm:$0xff] %v8070_v63  ;;  %831 = vmax.xlane.f32.xlu0 %v8070_v63 }
 0x19d   : > { %v8073_v4 = vpop.f32.mrb[6].mxu0 }
 0x19e   : > { %10805 = vst [vmem:[#allocation28_spill] sm:$0xff] %v8073_v4  ;;  %833 = vmax.xlane.f32.xlu1 %v8067_v62  ;;  %v8076_v6 = vpop.f32.mrb[7].mxu0  ;;  %v6650_v62 = vpack.i.bf16 %v7843_v25, %v7840_v24 }
 0x19f   : > { %10806 = vst [vmem:[#allocation29_spill] sm:$0xff] %v8076_v6  ;;  %835 = vmax.xlane.f32.xlu0 %v8076_v6  ;;  %v8507_v6 = vld [vmem:[#allocation2 + $0x68] sm:$0xff] }
 0x1a1   : > { %v8079_v7 = vpop.f32.mrb[8].mxu0 }
 0x1a2   : > { %10807 = vst [vmem:[#allocation30_spill] sm:$0xff] %v8079_v7  ;;  %837 = vmax.xlane.f32.xlu1 %v8073_v4  ;;  %v8082_v11 = vpop.f32.mrb[9].mxu0  ;;  %v8494_v4 = vld [vmem:[#allocation2 + $0x60] sm:$0xff] }
 0x1a3   : > { %10808 = vst [vmem:[#allocation31_spill] sm:$0xff] %v8082_v11  ;;  %839 = vmax.xlane.f32.xlu0 %v8082_v11 }
 0x1a5   : > { %v8085_v17 = vpop.f32.mrb[10].mxu0 }
 0x1a6   : > { %10809 = vst [vmem:[#allocation32_spill] sm:$0xff] %v8085_v17  ;;  %841 = vmax.xlane.f32.xlu1 %v8079_v7  ;;  %v8088_v20 = vpop.f32.mrb[11].mxu0 }
 0x1a7   : > { %10810 = vst [vmem:[#allocation33_spill] sm:$0xff] %v8088_v20  ;;  %843 = vmax.xlane.f32.xlu0 %v8088_v20 }
 0x1a9   : > { %v8091_v23 = vpop.f32.mrb[12].mxu0 }
 0x1aa   : > { %10811 = vst [vmem:[#allocation34_spill] sm:$0xff] %v8091_v23  ;;  %845 = vmax.xlane.f32.xlu1 %v8085_v17  ;;  %v8094_v26 = vpop.f32.mrb[13].mxu0 }
 0x1ab   : > { %10812 = vst [vmem:[#allocation35_spill] sm:$0xff] %v8094_v26  ;;  %847 = vmax.xlane.f32.xlu0 %v8094_v26  ;;  %v548_v26 = vld [vmem:[%s8361_s18 + $0x78] sm:$0xff] }
 0x1ad   : > { %v8353_v28 = vpop.f32.mrb[14].mxu0 }
 0x1ae   : > { %10813 = vst [vmem:[#allocation36_spill] sm:$0xff] %v8353_v28  ;;  %v8355_v31 = vpop.f32.mrb[15].mxu0  ;;  %849 = vmax.xlane.f32.xlu1 %v8091_v23  ;;  %v8407_v23 = vld [vmem:[#allocation2 + $0x10] sm:$0xff] }
 0x1af   : > { %10814 = vst [vmem:[#allocation37_spill] sm:$0xff] %v8355_v31  ;;  %851 = vmax.xlane.f32.xlu0 %v8355_v31  ;;  %v8413_v31 = vld [vmem:[#allocation2 + $0x20] sm:$0xff] }
 0x1b2   : > { %853 = vmax.xlane.f32.xlu1 %v8353_v28 }
 0x220   : > { %v824_v28 = vpop.xlane.xlu0 %823 }
 0x221   : > { %v8388_v43 = vmax.f32 %v8385_v27, %v824_v28  ;;  %v6630_v28 = vpack.i.bf16 %v7795_v13, %v7792_v12  ;;  %v6283_v12 = vpack.c.bf16 %v546_v48, %v545_v47  ;;  %v8429_v48 = vld [vmem:[#allocation2 + $0x28] sm:$0xff]  ;;  %v547_v13 = vld [vmem:[%s8361_s18 + $0x70] sm:$0xff] }
 0x222   : > { %v6287_v2 = vpack.c.bf16 %v548_v26, %v547_v13  ;;  %v8452_v26 = vld [vmem:[#allocation2 + $0x38] sm:$0xff]  ;;  %v8456_v13 = vld [vmem:[#allocation2 + $0x40] sm:$0xff] }
 0x223   : > { %1433 = vst.msk [vmem:[#allocation2] sm:$0xff] %vm307_vm2, %v8388_v43  ;;  %v830_v55 = vpop.xlane.xlu1 %829  ;;  %921 = vperm.xlu0 %6613, %v8388_v43   ;;  %6284 = vmatprep.subr.bf16.mxu1 %v6283_v12 }
 0x224   : > { %v8402_v57 = vmax.f32 %v8390_v44, %v830_v55  ;;  %v826_v14 = vpop.xlane.xlu0 %825  ;;  %6286 = vmatpush3.bf16.msra.mxu1 %v6283_v12  ;;  %v6620_v12 = vpack.i.bf16 %v7764_v5, %v7759_v3  ;;  %v6625_v5 = vpack.i.bf16 %v7779_v9, %v7776_v8 }
 0x225   : > { %v8405_v36 = vmax.f32 %v8394_v51, %v826_v14  ;;  %6288 = vmatprep.subr.bf16.mxu1 %v6287_v2 }
 0x226   : > { %1436 = vst.msk [vmem:[#allocation2 + $0x18] sm:$0xff] %vm307_vm2, %v8402_v57  ;;  %v874_v24 = vsub.f32 %v8390_v44, %v8402_v57 }
 0x227   : > { %1434 = vst.msk [vmem:[#allocation2 + $0x8] sm:$0xff] %vm307_vm2, %v8405_v36  ;;  %v828_v55 = vpop.xlane.xlu1 %827  ;;  %926 = vperm.xlu1 %6614, %v8405_v36   ;;  %6631 = vrot.lane.b32.xlu0 %v6630_v28, %s7489_s24 }
 0x228   : > { %v8424_v14 = vmax.f32 %v8407_v23, %v828_v55  ;;  %v832_v20 = vpop.xlane.xlu0 %831  ;;  %6290 = vmatpush3.bf16.msra.mxu1 %v6287_v2  ;;  %v893_v25 = vmul.f32 1.442695, %v874_v24 }
 0x229   : > { %v8427_v47 = vmax.f32 %v8413_v31, %v832_v20 }
 0x22a   : > { %1435 = vst.msk [vmem:[#allocation2 + $0x10] sm:$0xff] %vm307_vm2, %v8424_v14 }
 0x22b   : > { %1437 = vst.msk [vmem:[#allocation2 + $0x20] sm:$0xff] %vm307_vm2, %v8427_v47  ;;  %v834_v20 = vpop.xlane.xlu1 %833  ;;  %6616 = vrot.lane.b32.xlu1 %v6615_v52, %s7489_s24  ;;  %v8476_v52 = vld [vmem:[#allocation2 + $0x50] sm:$0xff] }
 0x22c   : > { %v8447_v55 = vmax.f32 %v8429_v48, %v834_v20  ;;  %v836_v11 = vpop.xlane.xlu0 %835  ;;  %v8469_v20 = vld [vmem:[#allocation2 + $0x48] sm:$0xff] }
 0x22d   : > { %v8450_v17 = vmax.f32 %v8437_v1, %v836_v11 }
 0x22e   : > { %1438 = vst.msk [vmem:[#allocation2 + $0x28] sm:$0xff] %vm307_vm2, %v8447_v55 }
 0x22f   : > { %1439 = vst.msk [vmem:[#allocation2 + $0x30] sm:$0xff] %vm307_vm2, %v8450_v17  ;;  %v838_v3 = vpop.xlane.xlu1 %837  ;;  %6621 = vrot.lane.b32.xlu1 %v6620_v12, %s7489_s24  ;;  %951 = vperm.xlu0 %6613, %v8450_v17  }
 0x230   : > { %v8467_v11 = vmax.f32 %v8452_v26, %v838_v3  ;;  %v840_v2 = vpop.xlane.xlu0 %839  ;;  %v8486_v3 = vld [vmem:[#allocation2 + $0x58] sm:$0xff] }
 0x231   : > { %v8472_v28 = vmax.f32 %v8456_v13, %v840_v2 }
 0x232   : > { %1440 = vst.msk [vmem:[#allocation2 + $0x38] sm:$0xff] %vm307_vm2, %v8467_v11 }
 0x233   : > { %v842_v12 = vpop.xlane.xlu1 %841  ;;  %1441 = vst.msk [vmem:[#allocation2 + $0x40] sm:$0xff] %vm307_vm2, %v8472_v28  ;;  %6626 = vrot.lane.b32.xlu1 %v6625_v5, %s7489_s24  ;;  %v8512_v5 = vld [vmem:[#allocation2 + $0x70] sm:$0xff] }
 0x234   : > { %v8484_v8 = vmax.f32 %v8469_v20, %v842_v12  ;;  %v844_v9 = vpop.xlane.xlu0 %843 }
 0x235   : > { %v8489_v2 = vmax.f32 %v8476_v52, %v844_v9 }
 0x236   : > { %1442 = vst.msk [vmem:[#allocation2 + $0x48] sm:$0xff] %vm307_vm2, %v8484_v8  ;;  %966 = vperm.xlu0 %6613, %v8484_v8   ;;  %v880_v44 = vsub.f32 %v8469_v20, %v8484_v8 }
 0x237   : > { %v846_v7 = vpop.xlane.xlu1 %845  ;;  %1443 = vst.msk [vmem:[#allocation2 + $0x50] sm:$0xff] %vm307_vm2, %v8489_v2  ;;  %936 = vperm.xlu1 %6614, %v8402_v57  }
 0x238   : > { %v8502_v12 = vmax.f32 %v8486_v3, %v846_v7  ;;  %v848_v9 = vpop.xlane.xlu0 %847 }
 0x239   : > { %v8505_v63 = vmax.f32 %v8494_v4, %v848_v9 }
 0x23a   : > { %1444 = vst.msk [vmem:[#allocation2 + $0x58] sm:$0xff] %vm307_vm2, %v8502_v12  ;;  %976 = vperm.xlu0 %6613, %v8502_v12  }
 0x23b   : > { %1445 = vst.msk [vmem:[#allocation2 + $0x60] sm:$0xff] %vm307_vm2, %v8505_v63  ;;  %931 = vperm.xlu1 %6614, %v8424_v14   ;;  %v850_v7 = vpop.xlane.xlu1 %849 }
 0x23c   : > { %v852_v9 = vpop.xlane.xlu0 %851  ;;  %v8520_v61 = vmax.f32 %v8507_v6, %v850_v7 }
 0x23d   : > { %v8523_v60 = vmax.f32 %v8512_v5, %v852_v9  ;;  %v6640_v9 = vpack.i.bf16 %v7819_v19, %v7816_v18  ;;  %v6635_v18 = vpack.i.bf16 %v7807_v16, %v7804_v15  ;;  %v871_v19 = vsub.f32 %v8385_v27, %v8388_v43 }
 0x23e   : > { %981 = vperm.xlu0 %6613, %v8505_v63   ;;  %1446 = vst.msk [vmem:[#allocation2 + $0x68] sm:$0xff] %vm307_vm2, %v8520_v61  ;;  %v6645_v15 = vpack.i.bf16 %v7831_v22, %v7828_v21  ;;  %v878_v22 = vsub.f32 %v8452_v26, %v8467_v11  ;;  %v10815_v26 = vsub.f32 %v8394_v51, %v8405_v36 }
 0x23f   : > { %1447 = vst.msk [vmem:[#allocation2 + $0x70] sm:$0xff] %vm307_vm2, %v8523_v60  ;;  %946 = vperm.xlu1 %6614, %v8447_v55   ;;  %v854_v7 = vpop.xlane.xlu1 %853  ;;  %v887_v16 = vmul.f32 1.442695, %v871_v19  ;;  %v884_v8 = vsub.f32 %v8507_v6, %v8520_v61  ;;  %v6660_v51 = vpack.i.bf16 %v8375_v40, %v8372_v39  ;;  %v10817_v6 = vsub.f32 %v8413_v31, %v8427_v47 }
 0x240   : > { %v8536_v58 = vmax.f32 %v8525_v0, %v854_v7  ;;  %v901_v27 = vmul.f32 1.442695, %v878_v22  ;;  %v10818_v39 = vsub.f32 %v8437_v1, %v8450_v17  ;;  %v10819_v17 = vsub.f32 %v8456_v13, %v8472_v28 }
 0x241   : > { %6855 = vpow2.f32 %v887_v16  ;;  %v913_v36 = vmul.f32 1.442695, %v884_v8  ;;  %v10821_v13 = vsub.f32 %v8494_v4, %v8505_v63 }
 0x242   : > { %991 = vperm.xlu0 %6613, %v8523_v60   ;;  %1448 = vst.msk [vmem:[#allocation2 + $0x78] sm:$0xff] %vm307_vm2, %v8536_v58  ;;  %6857 = vpow2.f32 %v893_v25  ;;  %v903_v1 = vmul.f32 1.442695, %v10819_v17  ;;  %v10825_v17 = vld [vmem:[#allocation24_spill] sm:$0xff] }
 0x243   : > { %941 = vperm.xlu1 %6614, %v8427_v47  }
 0x246   : > { %6641 = vrot.lane.b32.xlu0 %v6640_v9, %s7489_s24 }
 0x247   : > { %956 = vperm.xlu1 %6614, %v8467_v11   ;;  %v889_v11 = vmul.f32 1.442695, %v10815_v26 }
 0x24a   : > { %6651 = vrot.lane.b32.xlu0 %v6650_v62, %s7489_s24  ;;  %v876_v62 = vsub.f32 %v8429_v48, %v8447_v55  ;;  %v905_v48 = vmul.f32 1.442695, %v880_v44  ;;  %v882_v55 = vsub.f32 %v8486_v3, %v8502_v12  ;;  %v10816_v3 = vsub.f32 %v8407_v23, %v8424_v14 }
 0x24b   : > { %961 = vperm.xlu1 %6614, %v8472_v28   ;;  %v8589_v43 = vpop.eup %6855  ;;  %v895_v23 = vmul.f32 1.442695, %v10817_v6  ;;  %v6655_v28 = vpack.i.bf16 %v8367_v35, %v8364_v32 }
 0x24c   : > { %v897_v21 = vmul.f32 1.442695, %v876_v62  ;;  %v8596_v57 = vpop.eup %6857  ;;  %v909_v20 = vmul.f32 1.442695, %v882_v55  ;;  %v891_v12 = vmul.f32 1.442695, %v10816_v3 }
 0x24d   : > { %v911_v62 = vmul.f32 1.442695, %v10821_v13  ;;  %v10826_v13 = vld [vmem:[#allocation25_spill] sm:$0xff] }
 0x24e   : > { %1451 = vrot.lane.b32.xlu0 %v7855_v29, %s7489_s24  ;;  %6859 = vpow2.f32 %v897_v21 }
 0x24f   : > { %971 = vperm.xlu1 %6614, %v8489_v2   ;;  %6861 = vpow2.f32 %v901_v27  ;;  %v10823_v27 = vld [vmem:[#allocation23_spill] sm:$0xff] }
 0x250   : > { %6863 = vpow2.f32 %v905_v48 }
 0x251   : > { %6865 = vpow2.f32 %v889_v11 }
 0x252   : > { %1455 = vrot.lane.b32.xlu0 %v7863_v33, %s7489_s24  ;;  %6867 = vpow2.f32 %v909_v20 }
 0x253   : > { %6636 = vrot.lane.b32.xlu1 %v6635_v18, %s7489_s24  ;;  %6869 = vpow2.f32 %v891_v12 }
 0x254   : > { %6871 = vpow2.f32 %v913_v36 }
 0x255   : > { %6873 = vpow2.f32 %v895_v23 }
 0x256   : > { %1459 = vrot.lane.b32.xlu0 %v7873_v37, %s7489_s24 }
 0x257   : > { %986 = vperm.xlu1 %6614, %v8520_v61   ;;  %v886_v61 = vsub.f32 %v8525_v0, %v8536_v58  ;;  %v899_v0 = vmul.f32 1.442695, %v10818_v39 }
 0x258   : > { %v8606_v7 = vpop.eup %6859 }
 0x259   : > { %v8616_v9 = vpop.eup %6861  ;;  %v917_v14 = vmul.f32 1.442695, %v886_v61 }
 0x25a   : > { %1463 = vrot.lane.b32.xlu0 %v7883_v41, %s7489_s24 }
 0x25b   : > { %996 = vperm.xlu1 %6614, %v8536_v58   ;;  %v8634_v58 = vpop.eup %6863  ;;  %6875 = vpow2.f32 %v917_v14 }
 0x25c   : > { %v8636_v40 = vpop.eup %6865  ;;  %6877 = vpow2.f32 %v899_v0 }
 0x25d   : > { %v8640_v31 = vpop.eup %6867  ;;  %6879 = vpow2.f32 %v903_v1 }
 0x25e   : > { %1467 = vrot.lane.b32.xlu0 %v7893_v45, %s7489_s24  ;;  %v8642_v47 = vpop.eup %6869 }
 0x25f   : > { %6646 = vrot.lane.b32.xlu1 %v6645_v15, %s7489_s24  ;;  %v8649_v18 = vpop.eup %6871  ;;  %v10820_v15 = vsub.f32 %v8476_v52, %v8489_v2  ;;  %v10822_v52 = vsub.f32 %v8512_v5, %v8523_v60 }
 0x260   : > { %v8651_v19 = vpop.eup %6873 }
 0x261   : > { %v907_v16 = vmul.f32 1.442695, %v10820_v15  ;;  %v915_v2 = vmul.f32 1.442695, %v10822_v52 }
 0x262   : > { %1471 = vrot.lane.b32.xlu0 %v7903_v49, %s7489_s24 }
 0x263   : > { %1449 = vrot.lane.b32.xlu1 %v7781_v10, %s7489_s24  ;;  %6881 = vpow2.f32 %v907_v16 }
 0x264   : > { %6883 = vpow2.f32 %v911_v62 }
 0x265   : > { %v8658_v24 = vpop.eup %6875  ;;  %6885 = vpow2.f32 %v915_v2 }
 0x266   : > { %1475 = vrot.lane.b32.xlu0 %v7913_v53, %s7489_s24  ;;  %v8660_v25 = vpop.eup %6877 }
 0x267   : > { %1453 = vrot.lane.b32.xlu1 %v7857_v30, %s7489_s24  ;;  %v8673_v21 = vpop.eup %6879 }
 0x26a   : > { %1479 = vrot.lane.b32.xlu0 %v7922_v56, %s7489_s24 }
 0x26b   : > { %1457 = vrot.lane.b32.xlu1 %v7867_v34, %s7489_s24 }
 0x26d   : > { %v8676_v22 = vpop.eup %6881 }
 0x26e   : > { %1162 = vperm.xlu0 %6613, %v8589_v43   ;;  %v8679_v32 = vpop.eup %6883 }
 0x26f   : > { %1461 = vrot.lane.b32.xlu1 %v7877_v38, %s7489_s24  ;;  %v8682_v63 = vpop.eup %6885 }
 0x272   : > { %1177 = vperm.xlu0 %6613, %v8596_v57  }
 0x273   : > { %1465 = vrot.lane.b32.xlu1 %v7887_v42, %s7489_s24 }
 0x276   : > { %1187 = vperm.xlu0 %6613, %v8606_v7  }
 0x277   : > { %1469 = vrot.lane.b32.xlu1 %v7897_v46, %s7489_s24 }
 0x27a   : > { %1197 = vperm.xlu0 %6613, %v8616_v9  }
 0x27b   : > { %1473 = vrot.lane.b32.xlu1 %v7907_v50, %s7489_s24 }
 0x27e   : > { %6661 = vrot.lane.b32.xlu0 %v6660_v51, %s7489_s24 }
 0x27f   : > { %1477 = vrot.lane.b32.xlu1 %v7917_v54, %s7489_s24 }
 0x282   : > { %1207 = vperm.xlu0 %6613, %v8634_v58  }
 0x283   : > { %1167 = vperm.xlu1 %6614, %v8636_v40  }
 0x286   : > { %1217 = vperm.xlu0 %6613, %v8640_v31  }
 0x287   : > { %1172 = vperm.xlu1 %6614, %v8642_v47  }
 0x28a   : > { %1227 = vperm.xlu0 %6613, %v8649_v18  }
 0x28b   : > { %1182 = vperm.xlu1 %6614, %v8651_v19  }
 0x28e   : > { %1237 = vperm.xlu0 %6613, %v8658_v24  }
 0x28f   : > { %1192 = vperm.xlu1 %6614, %v8660_v25  }
 0x293   : > { %6656 = vrot.lane.b32.xlu1 %v6655_v28, %s7489_s24 }
 0x297   : > { %1202 = vperm.xlu1 %6614, %v8673_v21  }
 0x29b   : > { %1212 = vperm.xlu1 %6614, %v8676_v22  }
 0x29f   : > { %1222 = vperm.xlu1 %6614, %v8679_v32  }
 0x2a2   : > { %v922_v4 = vpop.permute.xlu0 %921 }
 0x2a3   : > { %v999_v35 = vsub.f32 %v8058_v59, %v922_v4  ;;  %1232 = vperm.xlu1 %6614, %v8682_v63  }
 0x2a5   : > { %v1015_v60 = vmul.f32 1.442695, %v999_v35 }
 0x2a6   : > { %v927_v5 = vpop.permute.xlu1 %926  ;;  %v6632_v8 = vpop.permute.xlu0 %6631 }
 0x2a7   : > { %6887 = vpow2.f32 %v1015_v60  ;;  %v1000_v44 = vsub.f32 %v10823_v27, %v927_v5  ;;  %v10827_v5 = vld [vmem:[#allocation26_spill] sm:$0xff] }
 0x2a9   : > { %v1017_v48 = vmul.f32 1.442695, %v1000_v44  ;;  %v10828_v44 = vld [vmem:[#allocation29_spill] sm:$0xff] }
 0x2aa   : > { %v6617_v55 = vpop.permute.xlu1 %6616 }
 0x2ab   : > { %6889 = vpow2.f32 %v1017_v48  ;;  %v6619_v26 = vunpack.i.h.bf16 %v6617_v55  ;;  %v6618_v11 = vunpack.i.l.bf16 %v6617_v55 }
 0x2ad   : > { %v6291_v20 = vpack.c.bf16 %v6619_v26, %v6618_v11  ;;  %v6634_v26 = vunpack.i.h.bf16 %v6632_v8  ;;  %v6633_v11 = vunpack.i.l.bf16 %v6632_v8 }
 0x2ae   : > { %v6622_v3 = vpop.permute.xlu1 %6621  ;;  %v952_v6 = vpop.permute.xlu0 %951 }
 0x2af   : > { %6293 = vmatprep.subr.msk.bf16.mxu1 %vm7748_vm1, %v6291_v20  ;;  %v6624_v59 = vunpack.i.h.bf16 %v6622_v3  ;;  %v6623_v36 = vunpack.i.l.bf16 %v6622_v3  ;;  %v1005_v48 = vsub.f32 %v10828_v44, %v952_v6  ;;  %v10829_v3 = vld [vmem:[#allocation27_spill] sm:$0xff] }
 0x2b1   : > { %v6888_v51 = vpop.eup %6887  ;;  %v6297_v14 = vpack.c.bf16 %v6624_v59, %v6623_v36 }
 0x2b2   : > { %v6627_v61 = vpop.permute.xlu1 %6626  ;;  %5851 = vmatprep.mubr.f32.mxu1 %v6888_v51 }
 0x2b3   : > { %v6629_v15 = vunpack.i.h.bf16 %v6627_v61  ;;  %v6628_v16 = vunpack.i.l.bf16 %v6627_v61  ;;  %v1027_v61 = vmul.f32 1.442695, %v1005_v48 }
 0x2b5   : > { %v6890_v23 = vpop.eup %6889  ;;  %v967_v0 = vpop.permute.xlu0 %966  ;;  %v6303_v4 = vpack.c.bf16 %v6629_v15, %v6628_v16  ;;  %v10831_v15 = vld [vmem:[#allocation28_spill] sm:$0xff] }
 0x2b6   : > { %v937_v39 = vpop.permute.xlu1 %936  ;;  %5852 = vmatmul.mubr.f32.vlgmr.msra.gmra.mrb[0].mxu1 %v6890_v23  ;;  %1081 = vadd.xlane.f32.xlu0 %v6890_v23 }
 0x2b7   : > { %6296 = vmatpush3.bf16.xpose.msk.msra.mxu1 %vm7748_vm1, %v6291_v20  ;;  %v1002_v1 = vsub.f32 %v10825_v17, %v937_v39  ;;  %v6309_v39 = vpack.c.bf16 %v6634_v26, %v6633_v11  ;;  %v10830_v17 = vld [vmem:[#allocation30_spill] sm:$0xff]  ;;  %v10835_v26 = vld [vmem:[#allocation33_spill] sm:$0xff] }
 0x2b8   : > { %6299 = vmatprep.subr.msk.bf16.mxu1 %vm7748_vm1, %v6297_v14 }
 0x2b9   : > { %v1021_v52 = vmul.f32 1.442695, %v1002_v1  ;;  %v977_v35 = vpop.permute.xlu0 %976  ;;  %v1008_v1 = vsub.f32 %v10830_v17, %v967_v0 }
 0x2ba   : > { %v932_v28 = vpop.permute.xlu1 %931 }
 0x2bb   : > { %v1001_v62 = vsub.f32 %v10826_v13, %v932_v28  ;;  %v1033_v13 = vmul.f32 1.442695, %v1008_v1 }
 0x2bd   : > { %v1019_v2 = vmul.f32 1.442695, %v1001_v62  ;;  %v982_v36 = vpop.permute.xlu0 %981  ;;  %v10832_v62 = vld [vmem:[#allocation32_spill] sm:$0xff] }
 0x2be   : > { %v947_v60 = vpop.permute.xlu1 %946 }
 0x2bf   : > { %6891 = vpow2.f32 %v1019_v2  ;;  %v1004_v27 = vsub.f32 %v10827_v5, %v947_v60  ;;  %6302 = vmatpush3.bf16.xpose.msk.msra.mxu1 %vm7748_vm1, %v6297_v14  ;;  %v10833_v60 = vld [vmem:[#allocation31_spill] sm:$0xff] }
 0x2c0   : > { %6893 = vpow2.f32 %v1021_v52  ;;  %6305 = vmatprep.subr.msk.bf16.mxu1 %vm7748_vm1, %v6303_v4  ;;  %v1010_v52 = vsub.f32 %v10832_v62, %v977_v35 }
 0x2c1   : > { %v1025_v55 = vmul.f32 1.442695, %v1004_v27  ;;  %v992_v2 = vpop.permute.xlu0 %991 }
 0x2c2   : > { %v942_v20 = vpop.permute.xlu1 %941  ;;  %v1037_v48 = vmul.f32 1.442695, %v1010_v52 }
 0x2c3   : > { %6895 = vpow2.f32 %v1025_v55  ;;  %v1003_v59 = vsub.f32 %v10829_v3, %v942_v20 }
 0x2c5   : > { %v1023_v23 = vmul.f32 1.442695, %v1003_v59  ;;  %v6642_v35 = vpop.permute.xlu0 %6641 }
 0x2c6   : > { %v957_v14 = vpop.permute.xlu1 %956  ;;  %v6644_v59 = vunpack.i.h.bf16 %v6642_v35 }
 0x2c7   : > { %6897 = vpow2.f32 %v1023_v23  ;;  %v1006_v16 = vsub.f32 %v10831_v15, %v957_v14  ;;  %6308 = vmatpush3.bf16.xpose.msk.msra.mxu1 %vm7748_vm1, %v6303_v4  ;;  %1079 = vadd.xlane.f32.xlu1 %v6888_v51  ;;  %v10834_v4 = vld [vmem:[#allocation35_spill] sm:$0xff]  ;;  %v10836_v15 = vld [vmem:[#allocation37_spill] sm:$0xff] }
 0x2c8   : > { %6311 = vmatprep.subr.msk.bf16.mxu1 %vm7748_vm1, %v6309_v39  ;;  %6899 = vpow2.f32 %v1027_v61  ;;  %v1011_v27 = vsub.f32 %v10834_v4, %v982_v36  ;;  %v6643_v61 = vunpack.i.l.bf16 %v6642_v35  ;;  %v10838_v4 = vld [vmem:[#allocation36_spill] sm:$0xff] }
 0x2c9   : > { %v6892_v8 = vpop.eup %6891  ;;  %v1029_v6 = vmul.f32 1.442695, %v1006_v16  ;;  %v1013_v16 = vsub.f32 %v10836_v15, %v992_v2 }
 0x2ca   : > { %v6894_v28 = vpop.eup %6893  ;;  %v962_v0 = vpop.permute.xlu1 %961  ;;  %5854 = vmatprep.mubr.f32.mxu1 %v6892_v8  ;;  %1083 = vadd.xlane.f32.xlu0 %v6892_v8  ;;  %v1039_v3 = vmul.f32 1.442695, %v1011_v27  ;;  %v6321_v8 = vpack.c.bf16 %v6644_v59, %v6643_v61 }
 0x2cb   : > { %6901 = vpow2.f32 %v1029_v6  ;;  %v1007_v5 = vsub.f32 %v10833_v60, %v962_v0  ;;  %1085 = vadd.xlane.f32.xlu1 %v6894_v28  ;;  %5855 = vmatmul.mubr.f32.gmra.mrb[2].mxu1 %v6894_v28  ;;  %v1043_v0 = vmul.f32 1.442695, %v1013_v16  ;;  %v6652_v60 = vpop.permute.xlu0 %6651 }
 0x2cc   : > { %6903 = vpow2.f32 %v1033_v13  ;;  %v10837_v13 = vld [vmem:[#allocation34_spill] sm:$0xff]  ;;  %v6654_v59 = vunpack.i.h.bf16 %v6652_v60  ;;  %v6653_v61 = vunpack.i.l.bf16 %v6652_v60 }
 0x2cd   : > { %v6896_v51 = vpop.eup %6895  ;;  %v1031_v44 = vmul.f32 1.442695, %v1007_v5 }
 0x2ce   : > { %v972_v55 = vpop.permute.xlu1 %971 }
 0x2cf   : > { %6905 = vpow2.f32 %v1031_v44  ;;  %v1009_v11 = vsub.f32 %v10835_v26, %v972_v55  ;;  %6314 = vmatpush3.bf16.xpose.msk.msra.mxu1 %vm7748_vm1, %v6309_v39  ;;  %1089 = vadd.xlane.f32.xlu1 %v6896_v51  ;;  %v1452_v35 = vpop.permute.xlu0 %1451 }
 0x2d0   : > { %6907 = vpow2.f32 %v1037_v48 }
 0x2d1   : > { %v6898_v20 = vpop.eup %6897  ;;  %v1035_v23 = vmul.f32 1.442695, %v1009_v11 }
 0x2d2   : > { %v6637_v17 = vpop.permute.xlu1 %6636  ;;  %5857 = vmatprep.mubr.f32.mxu1 %v6898_v20  ;;  %1087 = vadd.xlane.f32.xlu0 %v6898_v20  ;;  %v6900_v36 = vpop.eup %6899 }
 0x2d3   : > { %6909 = vpow2.f32 %v1035_v23  ;;  %v6639_v1 = vunpack.i.h.bf16 %v6637_v17  ;;  %v6638_v14 = vunpack.i.l.bf16 %v6637_v17  ;;  %5858 = vmatmul.mubr.f32.gmra.mrb[4].mxu1 %v6896_v51 }
 0x2d4   : > { %5860 = vmatprep.mubr.f32.mxu1 %v6900_v36  ;;  %6911 = vpow2.f32 %v1039_v3 }
 0x2d5   : > { %v6902_v39 = vpop.eup %6901  ;;  %v6315_v6 = vpack.c.bf16 %v6639_v1, %v6638_v14  ;;  %v1456_v1 = vpop.permute.xlu0 %1455 }
 0x2d6   : > { %v987_v28 = vpop.permute.xlu1 %986  ;;  %1093 = vadd.xlane.f32.xlu1 %v6902_v39  ;;  %1091 = vadd.xlane.f32.xlu0 %v6900_v36  ;;  %v6904_v52 = vpop.eup %6903  ;;  %v6333_v36 = vpack.c.bf16 %v6654_v59, %v6653_v61 }
 0x2d7   : > { %v1012_v62 = vsub.f32 %v10837_v13, %v987_v28  ;;  %5861 = vmatmul.mubr.f32.gmra.mrb[6].mxu1 %v6902_v39  ;;  %6317 = vmatprep.subr.msk.bf16.mxu1 %vm7748_vm1, %v6315_v6 }
 0x2d8   : > { %6320 = vmatpush3.bf16.xpose.msk.msra.mxu1 %vm7748_vm1, %v6315_v6 }
 0x2d9   : > { %v6906_v2 = vpop.eup %6905  ;;  %v1041_v5 = vmul.f32 1.442695, %v1012_v62  ;;  %6323 = vmatprep.subr.msk.bf16.mxu1 %vm7748_vm1, %v6321_v8  ;;  %v1460_v39 = vpop.permute.xlu0 %1459 }
 0x2da   : > { %v997_v51 = vpop.permute.xlu1 %996  ;;  %5863 = vmatprep.mubr.f32.mxu1 %v6906_v2  ;;  %1097 = vadd.xlane.f32.xlu1 %v6904_v52  ;;  %v6908_v44 = vpop.eup %6907 }
 0x2db   : > { %6913 = vpow2.f32 %v1041_v5  ;;  %v1014_v27 = vsub.f32 %v10838_v4, %v997_v51  ;;  %1095 = vadd.xlane.f32.xlu0 %v6906_v2  ;;  %5864 = vmatmul.mubr.f32.gmra.mrb[8].mxu1 %v6904_v52 }
 0x2dc   : > { %6915 = vpow2.f32 %v1043_v0 }
 0x2dd   : > { %v6910_v48 = vpop.eup %6909  ;;  %v1045_v55 = vmul.f32 1.442695, %v1014_v27  ;;  %v1464_v6 = vpop.permute.xlu0 %1463 }
 0x2de   : > { %v6647_v26 = vpop.permute.xlu1 %6646  ;;  %5866 = vmatprep.mubr.f32.mxu1 %v6910_v48  ;;  %1101 = vadd.xlane.f32.xlu1 %v6908_v44  ;;  %v6912_v11 = vpop.eup %6911 }
 0x2df   : > { %6917 = vpow2.f32 %v1045_v55  ;;  %v6649_v20 = vunpack.i.h.bf16 %v6647_v26  ;;  %v6648_v3 = vunpack.i.l.bf16 %v6647_v26  ;;  %1099 = vadd.xlane.f32.xlu0 %v6910_v48  ;;  %5867 = vmatmul.mubr.f32.gmra.mrb[10].mxu1 %v6908_v44 }
 0x2e0   : > { %5869 = vmatprep.mubr.f32.mxu1 %v6912_v11  ;;  %6326 = vmatpush3.bf16.xpose.msk.msra.mxu1 %vm7748_vm1, %v6321_v8 }
 0x2e1   : > { %v6327_v23 = vpack.c.bf16 %v6649_v20, %v6648_v3  ;;  %v1468_v13 = vpop.permute.xlu0 %1467 }
 0x2e2   : > { %v1450_v14 = vpop.permute.xlu1 %1449 }
 0x2e3   : > { %1103 = vadd.xlane.f32.xlu0 %v6912_v11  ;;  %6329 = vmatprep.subr.msk.bf16.mxu1 %vm7748_vm1, %v6327_v23 }
 0x2e5   : > { %v6914_v17 = vpop.eup %6913  ;;  %v1472_v52 = vpop.permute.xlu0 %1471 }
 0x2e6   : > { %v6916_v15 = vpop.eup %6915  ;;  %1105 = vadd.xlane.f32.xlu1 %v6914_v17  ;;  %5870 = vmatmul.mubr.f32.gmra.mrb[12].mxu1 %v6914_v17  ;;  %v1454_v8 = vpop.permute.xlu1 %1453 }
 0x2e7   : > { %1107 = vadd.xlane.f32.xlu0 %v6916_v15  ;;  %5872 = vmatprep.mubr.f32.mxu1 %v6916_v15 }
 0x2e8   : > { %6332 = vmatpush3.bf16.xpose.msk.msra.mxu1 %vm7748_vm1, %v6327_v23 }
 0x2e9   : > { %v6918_v16 = vpop.eup %6917  ;;  %6335 = vmatprep.subr.msk.bf16.mxu1 %vm7748_vm1, %v6333_v36  ;;  %v1476_v2 = vpop.permute.xlu0 %1475 }
 0x2ea   : > { %1109 = vadd.xlane.f32.xlu1 %v6918_v16  ;;  %5873 = vmatmul.mubr.f32.gmra.mrb[14].mxu1 %v6918_v16  ;;  %v1458_v28 = vpop.permute.xlu1 %1457 }
 0x2eb   : > { %5907 = vmatprep.mubr.msk.f32.mxu1 %vm436_vm0, %v1450_v14  ;;  %v1048_v14 = vld [vmem:[#allocation3 + $0x8] sm:$0xff] }
 0x2ec   : > { %v1064_v15 = vmul.f32 %v8636_v40, %v1048_v14 }
 0x2ed   : > { %v1480_v5 = vpop.permute.xlu0 %1479 }
 0x2ee   : > { %v1462_v62 = vpop.permute.xlu1 %1461 }
 0x2f0   : > { %6338 = vmatpush3.bf16.xpose.msk.msra.mxu1 %vm7748_vm1, %v6333_v36 }
 0x2f1   : > { %v8746_v4 = vpop.permute.xlu0 %1162 }
 0x2f2   : > { %v1466_v0 = vpop.permute.xlu1 %1465 }
 0x2f5   : > { %v8751_v44 = vpop.permute.xlu0 %1177 }
 0x2f6   : > { %v1470_v60 = vpop.permute.xlu1 %1469 }
 0x2f7   : > { %5908 = vmatmul.mubr.msk.f32.vlgmr.msra.gmra.mrb[16].mxu1 %vm436_vm0, %v1452_v35 }
 0x2f8   : > { %5910 = vmatprep.mubr.msk.f32.mxu1 %vm436_vm0, %v1454_v8 }
 0x2f9   : > { %v8753_v48 = vpop.permute.xlu0 %1187 }
 0x2fa   : > { %v1474_v51 = vpop.permute.xlu1 %1473 }
 0x2fb   : > { %5911 = vmatmul.mubr.msk.f32.gmra.mrb[18].mxu1 %vm436_vm0, %v1456_v1 }
 0x2fc   : > { %5913 = vmatprep.mubr.msk.f32.mxu1 %vm436_vm0, %v1458_v28 }
 0x2fd   : > { %v8757_v26 = vpop.permute.xlu0 %1197 }
 0x2fe   : > { %v1478_v27 = vpop.permute.xlu1 %1477 }
 0x2ff   : > { %5914 = vmatmul.mubr.msk.f32.gmra.mrb[20].mxu1 %vm436_vm0, %v1460_v39 }
 0x300   : > { %5916 = vmatprep.mubr.msk.f32.mxu1 %vm436_vm0, %v1462_v62 }
 0x301   : > { %v6662_v35 = vpop.permute.xlu0 %6661 }
 0x302   : > { %v8755_v55 = vpop.permute.xlu1 %1167 }
 0x303   : > { %5917 = vmatmul.mubr.msk.f32.gmra.mrb[22].mxu1 %vm436_vm0, %v1464_v6 }
 0x304   : > { %5919 = vmatprep.mubr.msk.f32.mxu1 %vm436_vm0, %v1466_v0 }
 0x305   : > { %v8763_v3 = vpop.permute.xlu0 %1207 }
 0x306   : > { %v8759_v11 = vpop.permute.xlu1 %1172 }
 0x307   : > { %5920 = vmatmul.mubr.msk.f32.gmra.mrb[24].mxu1 %vm436_vm0, %v1468_v13  ;;  %v1047_v13 = vld [vmem:[#allocation3] sm:$0xff] }
 0x308   : > { %5922 = vmatprep.mubr.msk.f32.mxu1 %vm436_vm0, %v1470_v60  ;;  %v1063_v62 = vmul.f32 %v8589_v43, %v1047_v13  ;;  %v6664_v13 = vunpack.i.h.bf16 %v6662_v35 }
 0x309   : > { %v8767_v61 = vpop.permute.xlu0 %1217 }
 0x30a   : > { %v8761_v20 = vpop.permute.xlu1 %1182 }
 0x30b   : > { %5923 = vmatmul.mubr.msk.f32.gmra.mrb[26].mxu1 %vm436_vm0, %v1472_v52  ;;  %v1049_v52 = vld [vmem:[#allocation3 + $0x10] sm:$0xff] }
 0x30c   : > { %5925 = vmatprep.mubr.msk.f32.mxu1 %vm436_vm0, %v1474_v51 }
 0x30d   : > { %v8769_v17 = vpop.permute.xlu0 %1227 }
 0x30e   : > { %v8765_v59 = vpop.permute.xlu1 %1192 }
 0x30f   : > { %5926 = vmatmul.mubr.msk.f32.gmra.mrb[28].mxu1 %vm436_vm0, %v1476_v2  ;;  %v1050_v2 = vld [vmem:[#allocation3 + $0x18] sm:$0xff] }
 0x310   : > { %5928 = vmatprep.mubr.msk.f32.mxu1 %vm436_vm0, %v1478_v27  ;;  %v1066_v51 = vmul.f32 %v8596_v57, %v1050_v2  ;;  %v1054_v2 = vld [vmem:[#allocation3 + $0x38] sm:$0xff] }
 0x311   : > { %v8773_v1 = vpop.permute.xlu0 %1237 }
 0x312   : > { %v6657_v23 = vpop.permute.xlu1 %6656 }
 0x313   : > { %5929 = vmatmul.mubr.msk.f32.gmra.mrb[30].mxu1 %vm436_vm0, %v1480_v5  ;;  %v1065_v5 = vmul.f32 %v8642_v47, %v1049_v52  ;;  %v6659_v47 = vunpack.i.h.bf16 %v6657_v23  ;;  %v6658_v52 = vunpack.i.l.bf16 %v6657_v23  ;;  %v1056_v23 = vld [vmem:[#allocation3 + $0x48] sm:$0xff] }
 0x316   : > { %v8771_v36 = vpop.permute.xlu1 %1202 }
 0x31a   : > { %v8776_v39 = vpop.permute.xlu1 %1212 }
 0x31e   : > { %v8779_v6 = vpop.permute.xlu1 %1222 }
 0x322   : > { %v8781_v28 = vpop.permute.xlu1 %1232 }
 0x343   : > { %v1082_v16 = vpop.xlane.xlu0 %1081 }
 0x344   : > { %v1112_v8 = vadd.f32 %v1082_v16, %v1064_v15  ;;  %v1052_v15 = vld [vmem:[#allocation3 + $0x28] sm:$0xff] }
 0x345   : > { %v1068_v43 = vmul.f32 %v8606_v7, %v1052_v15  ;;  %v1070_v7 = vmul.f32 %v8616_v9, %v1054_v2 }
 0x346   : > { %1129 = vst.msk [vmem:[#allocation3 + $0x8] sm:$0xff] %vm307_vm2, %v1112_v8  ;;  %v1051_v8 = vld [vmem:[#allocation3 + $0x20] sm:$0xff] }
 0x347   : > { %v1067_v12 = vmul.f32 %v8651_v19, %v1051_v8 }
 0x354   : > { %v1080_v0 = vpop.xlane.xlu1 %1079 }
 0x355   : > { %v1111_v60 = vadd.f32 %v1080_v0, %v1063_v62  ;;  %v6663_v0 = vunpack.i.l.bf16 %v6662_v35 }
 0x357   : > { %1128 = vst.msk [vmem:[#allocation3] sm:$0xff] %vm307_vm2, %v1111_v60  ;;  %v1084_v40 = vpop.xlane.xlu0 %1083 }
 0x358   : > { %v1113_v27 = vadd.f32 %v1084_v40, %v1065_v5  ;;  %v1086_v14 = vpop.xlane.xlu1 %1085  ;;  %v1053_v5 = vld [vmem:[#allocation3 + $0x30] sm:$0xff] }
 0x359   : > { %v1114_v16 = vadd.f32 %v1086_v14, %v1066_v51  ;;  %v6339_v51 = vpack.c.bf16 %v6659_v47, %v6658_v52  ;;  %v1069_v14 = vmul.f32 %v8660_v25, %v1053_v5  ;;  %v1059_v5 = vld [vmem:[#allocation3 + $0x60] sm:$0xff] }
 0x35a   : > { %1130 = vst.msk [vmem:[#allocation3 + $0x10] sm:$0xff] %vm307_vm2, %v1113_v27  ;;  %v6343_v27 = vpack.c.bf16 %v6664_v13, %v6663_v0  ;;  %v1058_v13 = vld [vmem:[#allocation3 + $0x58] sm:$0xff]  ;;  %v1057_v0 = vld [vmem:[#allocation3 + $0x50] sm:$0xff] }
 0x35b   : > { %1131 = vst.msk [vmem:[#allocation3 + $0x18] sm:$0xff] %vm307_vm2, %v1114_v16  ;;  %6340 = vmatprep.subr.bf16.mxu0 %v6339_v51  ;;  %v1074_v52 = vmul.f32 %v8640_v31, %v1058_v13 }
 0x35c   : > { %v1090_v62 = vpop.xlane.xlu1 %1089  ;;  %6342 = vmatpush3.bf16.msra.mxu0 %v6339_v51  ;;  %v1060_v51 = vld [vmem:[#allocation3 + $0x68] sm:$0xff] }
 0x35d   : > { %v1116_v60 = vadd.f32 %v1090_v62, %v1068_v43  ;;  %v1055_v43 = vld [vmem:[#allocation3 + $0x40] sm:$0xff]  ;;  %6344 = vmatprep.subr.bf16.mxu0 %v6343_v27  ;;  %v1076_v31 = vmul.f32 %v8649_v18, %v1060_v51  ;;  %v1145_v18 = vld [vmem:[#allocation4 + $0x8] sm:$0xff] }
 0x35e   : > { %v1071_v9 = vmul.f32 %v8673_v21, %v1055_v43  ;;  %v1075_v21 = vmul.f32 %v8679_v32, %v1059_v5  ;;  %v1148_v5 = vld [vmem:[#allocation4 + $0x20] sm:$0xff] }
 0x35f   : > { %1133 = vst.msk [vmem:[#allocation3 + $0x28] sm:$0xff] %vm307_vm2, %v1116_v60  ;;  %v1088_v57 = vpop.xlane.xlu0 %1087  ;;  %v1244_v51 = vmul.f32 %v8761_v20, %v1148_v5 }
 0x360   : > { %v1115_v40 = vadd.f32 %v1088_v57, %v1067_v12  ;;  %v1072_v12 = vmul.f32 %v8634_v58, %v1056_v23  ;;  %6346 = vmatpush3.bf16.msra.mxu0 %v6343_v27  ;;  %v1073_v57 = vmul.f32 %v8676_v22, %v1057_v0 }
 0x362   : > { %1132 = vst.msk [vmem:[#allocation3 + $0x20] sm:$0xff] %vm307_vm2, %v1115_v40 }
 0x363   : > { %v1094_v35 = vpop.xlane.xlu1 %1093  ;;  %v1092_v15 = vpop.xlane.xlu0 %1091 }
 0x364   : > { %v1118_v16 = vadd.f32 %v1094_v35, %v1070_v7  ;;  %v1117_v19 = vadd.f32 %v1092_v15, %v1069_v14  ;;  %v1061_v7 = vld [vmem:[#allocation3 + $0x70] sm:$0xff]  ;;  %v1062_v15 = vld [vmem:[#allocation3 + $0x78] sm:$0xff] }
 0x365   : > { %v1077_v22 = vmul.f32 %v8682_v63, %v1061_v7  ;;  %v1078_v43 = vmul.f32 %v8658_v24, %v1062_v15  ;;  %v1147_v24 = vld [vmem:[#allocation4 + $0x18] sm:$0xff]  ;;  %v1150_v7 = vld [vmem:[#allocation4 + $0x30] sm:$0xff] }
 0x366   : > { %1135 = vst.msk [vmem:[#allocation3 + $0x38] sm:$0xff] %vm307_vm2, %v1118_v16  ;;  %1134 = vst.msk [vmem:[#allocation3 + $0x30] sm:$0xff] %vm307_vm2, %v1117_v19 }
 0x367   : > { %v1098_v8 = vpop.xlane.xlu1 %1097 }
 0x368   : > { %v1120_v25 = vadd.f32 %v1098_v8, %v1072_v12  ;;  %v1096_v62 = vpop.xlane.xlu0 %1095  ;;  %v1144_v8 = vld [vmem:[#allocation4] sm:$0xff] }
 0x369   : > { %v1119_v47 = vadd.f32 %v1096_v62, %v1071_v9  ;;  %v1241_v9 = vmul.f32 %v8755_v55, %v1145_v18  ;;  %v1240_v63 = vmul.f32 %v8746_v4, %v1144_v8  ;;  %v1149_v4 = vld [vmem:[#allocation4 + $0x28] sm:$0xff] }
 0x36a   : > { %1137 = vst.msk [vmem:[#allocation3 + $0x48] sm:$0xff] %vm307_vm2, %v1120_v25 }
 0x36b   : > { %1136 = vst.msk [vmem:[#allocation3 + $0x40] sm:$0xff] %vm307_vm2, %v1119_v47  ;;  %v1102_v60 = vpop.xlane.xlu1 %1101  ;;  %v1146_v47 = vld [vmem:[#allocation4 + $0x10] sm:$0xff] }
 0x36c   : > { %v1122_v2 = vadd.f32 %v1102_v60, %v1074_v52  ;;  %v1100_v58 = vpop.xlane.xlu0 %1099  ;;  %v1243_v52 = vmul.f32 %v8751_v44, %v1147_v24  ;;  %v1242_v60 = vmul.f32 %v8759_v11, %v1146_v47  ;;  %v1159_v47 = vld [vmem:[#allocation4 + $0x78] sm:$0xff] }
 0x36d   : > { %v1121_v40 = vadd.f32 %v1100_v58, %v1073_v57 }
 0x36e   : > { %1139 = vst.msk [vmem:[#allocation3 + $0x58] sm:$0xff] %vm307_vm2, %v1122_v2 }
 0x36f   : > { %1138 = vst.msk [vmem:[#allocation3 + $0x50] sm:$0xff] %vm307_vm2, %v1121_v40  ;;  %v1245_v40 = vmul.f32 %v8753_v48, %v1149_v4 }
 0x370   : > { %v1104_v27 = vpop.xlane.xlu0 %1103 }
 0x371   : > { %v1123_v14 = vadd.f32 %v1104_v27, %v1075_v21  ;;  %v1151_v21 = vld [vmem:[#allocation4 + $0x38] sm:$0xff] }
 0x373   : > { %1140 = vst.msk [vmem:[#allocation3 + $0x60] sm:$0xff] %vm307_vm2, %v1123_v14  ;;  %v1106_v35 = vpop.xlane.xlu1 %1105 }
 0x374   : > { %v1124_v23 = vadd.f32 %v1106_v35, %v1076_v31  ;;  %v1108_v16 = vpop.xlane.xlu0 %1107  ;;  %v1247_v31 = vmul.f32 %v8757_v26, %v1151_v21  ;;  %v1153_v35 = vld [vmem:[#allocation4 + $0x48] sm:$0xff] }
 0x375   : > { %v1125_v19 = vadd.f32 %v1108_v16, %v1077_v22  ;;  %v1246_v22 = vmul.f32 %v8765_v59, %v1150_v7  ;;  %v1249_v20 = vmul.f32 %v8763_v3, %v1153_v35 }
 0x376   : > { %1141 = vst.msk [vmem:[#allocation3 + $0x68] sm:$0xff] %vm307_vm2, %v1124_v23  ;;  %v1152_v23 = vld [vmem:[#allocation4 + $0x40] sm:$0xff] }
 0x377   : > { %1142 = vst.msk [vmem:[#allocation3 + $0x70] sm:$0xff] %vm307_vm2, %v1125_v19  ;;  %v1110_v32 = vpop.xlane.xlu1 %1109 }
 0x378   : > { %v1126_v12 = vadd.f32 %v1110_v32, %v1078_v43  ;;  %v1155_v43 = vld [vmem:[#allocation4 + $0x58] sm:$0xff]  ;;  %v1248_v32 = vmul.f32 %v8771_v36, %v1152_v23  ;;  %v1157_v36 = vld [vmem:[#allocation4 + $0x68] sm:$0xff] }
 0x379   : > { %v1253_v24 = vmul.f32 %v8769_v17, %v1157_v36  ;;  %v7242_v23 = vld [vmem:[%s8361_s18 + $0x38] sm:$0xff]  ;;  %v9051_v36 = vld [vmem:[#allocation2 + $0xf0] sm:$0xff] }
 0x37a   : > { %1143 = vst.msk [vmem:[#allocation3 + $0x78] sm:$0xff] %vm307_vm2, %v1126_v12  ;;  %v1154_v12 = vld [vmem:[#allocation4 + $0x50] sm:$0xff] }
 0x389   : > { %v5853_v13 = vpop.f32.mrb[0].mxu1 }
 0x38a   : > { %v1402_v25 = vadd.f32 %v5853_v13, %v1241_v9  ;;  %v1322_v62 = vpop.f32.mrb[1].mxu1  ;;  %v1251_v9 = vmul.f32 %v8767_v61, %v1155_v43 }
 0x38b   : > { %v1401_v0 = vadd.f32 %v1322_v62, %v1240_v63  ;;  %v1250_v63 = vmul.f32 %v8776_v39, %v1154_v12  ;;  %v8905_v12 = vld [vmem:[#allocation2 + $0x88] sm:$0xff] }
 0x38c   : > { %1418 = vst.msk [vmem:[#allocation4 + $0x8] sm:$0xff] %vm436_vm0, %v1402_v25 }
 0x38d   : > { %1417 = vst.msk [vmem:[#allocation4] sm:$0xff] %vm436_vm0, %v1401_v0  ;;  %v1156_v0 = vld [vmem:[#allocation4 + $0x60] sm:$0xff] }
 0x38e   : > { %v1252_v61 = vmul.f32 %v8779_v6, %v1156_v0 }
 0x39e   : > { %v5856_v57 = vpop.f32.mrb[2].mxu1 }
 0x39f   : > { %v1404_v2 = vadd.f32 %v5856_v57, %v1243_v52  ;;  %v1332_v58 = vpop.f32.mrb[3].mxu1 }
 0x3a0   : > { %v1403_v55 = vadd.f32 %v1332_v58, %v1242_v60  ;;  %v1158_v60 = vld [vmem:[#allocation4 + $0x70] sm:$0xff]  ;;  %v1255_v58 = vmul.f32 %v8773_v1, %v1159_v47  ;;  %v7246_v47 = vld [vmem:[%s8361_s18 + $0x58] sm:$0xff] }
 0x3a1   : > { %1420 = vst.msk [vmem:[#allocation4 + $0x18] sm:$0xff] %vm436_vm0, %v1404_v2 }
 0x3a2   : > { %1419 = vst.msk [vmem:[#allocation4 + $0x10] sm:$0xff] %vm436_vm0, %v1403_v55  ;;  %v1254_v55 = vmul.f32 %v8781_v28, %v1158_v60 }
 0x3a6   : > { %v5859_v27 = vpop.f32.mrb[4].mxu1 }
 0x3a7   : > { %v1406_v44 = vadd.f32 %v5859_v27, %v1245_v40  ;;  %v1342_v14 = vpop.f32.mrb[5].mxu1 }
 0x3a8   : > { %v1405_v11 = vadd.f32 %v1342_v14, %v1244_v51  ;;  %v7239_v14 = vld [vmem:[%s8361_s18 + $0x20] sm:$0xff] }
 0x3a9   : > { %1422 = vst.msk [vmem:[#allocation4 + $0x28] sm:$0xff] %vm436_vm0, %v1406_v44 }
 0x3aa   : > { %1421 = vst.msk [vmem:[#allocation4 + $0x20] sm:$0xff] %vm436_vm0, %v1405_v11  ;;  %v5862_v15 = vpop.f32.mrb[6].mxu1  ;;  %v7240_v11 = vld [vmem:[%s8361_s18 + $0x28] sm:$0xff] }
 0x3ab   : > { %v1408_v48 = vadd.f32 %v5862_v15, %v1247_v31  ;;  %v1352_v16 = vpop.f32.mrb[7].mxu1  ;;  %v8865_v31 = vpack.i.bf16 %v7240_v11, %v7239_v14  ;;  %v7241_v15 = vld [vmem:[%s8361_s18 + $0x30] sm:$0xff] }
 0x3ac   : > { %v1407_v19 = vadd.f32 %v1352_v16, %v1246_v22 }
 0x3ad   : > { %1424 = vst.msk [vmem:[#allocation4 + $0x38] sm:$0xff] %vm436_vm0, %v1408_v48  ;;  %v8875_v48 = vpack.i.bf16 %v7242_v23, %v7241_v15  ;;  %v7251_v15 = vld [vmem:[%s7740_s9] sm:$0xff]  ;;  %v7252_v23 = vld [vmem:[%s7740_s9 + $0x8] sm:$0xff] }
 0x3ae   : > { %1423 = vst.msk [vmem:[#allocation4 + $0x30] sm:$0xff] %vm436_vm0, %v1407_v19  ;;  %v5865_v26 = vpop.f32.mrb[8].mxu1 }
 0x3af   : > { %v1410_v18 = vadd.f32 %v5865_v26, %v1249_v20  ;;  %v1362_v59 = vpop.f32.mrb[9].mxu1 }
 0x3b0   : > { %v1409_v8 = vadd.f32 %v1362_v59, %v1248_v32 }
 0x3b1   : > { %1426 = vst.msk [vmem:[#allocation4 + $0x48] sm:$0xff] %vm436_vm0, %v1410_v18  ;;  %v8907_v18 = vld [vmem:[#allocation2 + $0x80] sm:$0xff] }
 0x3b2   : > { %1425 = vst.msk [vmem:[#allocation4 + $0x40] sm:$0xff] %vm436_vm0, %v1409_v8  ;;  %v5868_v3 = vpop.f32.mrb[10].mxu1 }
 0x3b3   : > { %v1412_v13 = vadd.f32 %v5868_v3, %v1251_v9  ;;  %v1372_v25 = vpop.f32.mrb[11].mxu1 }
 0x3b4   : > { %v1411_v62 = vadd.f32 %v1372_v25, %v1250_v63  ;;  %v7244_v25 = vld [vmem:[%s8361_s18 + $0x48] sm:$0xff] }
 0x3b5   : > { %1428 = vst.msk [vmem:[#allocation4 + $0x58] sm:$0xff] %vm436_vm0, %v1412_v13  ;;  %v7243_v13 = vld [vmem:[%s8361_s18 + $0x40] sm:$0xff] }
 0x3b6   : > { %1427 = vst.msk [vmem:[#allocation4 + $0x50] sm:$0xff] %vm436_vm0, %v1411_v62  ;;  %v8922_v62 = vpack.i.bf16 %v7244_v25, %v7243_v13  ;;  %v7254_v13 = vld [vmem:[%s7740_s9 + $0x18] sm:$0xff] }
 0x3b9   : > { %v5871_v52 = vpop.f32.mrb[12].mxu1 }
 0x3ba   : > { %v1414_v39 = vadd.f32 %v5871_v52, %v1253_v24  ;;  %v1382_v57 = vpop.f32.mrb[13].mxu1  ;;  %v7245_v24 = vld [vmem:[%s8361_s18 + $0x50] sm:$0xff] }
 0x3bb   : > { %v1413_v2 = vadd.f32 %v1382_v57, %v1252_v61  ;;  %v8931_v61 = vpack.i.bf16 %v7246_v47, %v7245_v24  ;;  %v7256_v24 = vld [vmem:[%s7740_s9 + $0x28] sm:$0xff] }
 0x3bc   : > { %1430 = vst.msk [vmem:[#allocation4 + $0x68] sm:$0xff] %vm436_vm0, %v1414_v39 }
 0x3bd   : > { %1429 = vst.msk [vmem:[#allocation4 + $0x60] sm:$0xff] %vm436_vm0, %v1413_v2  ;;  %v5874_v4 = vpop.f32.mrb[14].mxu1 }
 0x3be   : > { %v1416_v5 = vadd.f32 %v5874_v4, %v1255_v58  ;;  %v1392_v17 = vpop.f32.mrb[15].mxu1  ;;  %v7247_v58 = vld [vmem:[%s8361_s18 + $0x60] sm:$0xff] }
 0x3bf   : > { %v1415_v40 = vadd.f32 %v1392_v17, %v1254_v55  ;;  %v7248_v55 = vld [vmem:[%s8361_s18 + $0x68] sm:$0xff]  ;;  %v7249_v17 = vld [vmem:[%s8361_s18 + $0x70] sm:$0xff] }
 0x3c0   : > { %1432 = vst.msk [vmem:[#allocation4 + $0x78] sm:$0xff] %vm436_vm0, %v1416_v5  ;;  %v6685_v4 = vpack.i.bf16 %v7248_v55, %v7247_v58 }
 0x3c1   : > { %1431 = vst.msk [vmem:[#allocation4 + $0x70] sm:$0xff] %vm436_vm0, %v1415_v40  ;;  %v7250_v40 = vld [vmem:[%s8361_s18 + $0x78] sm:$0xff] }
 0x3c2   : > { %v6690_v14 = vpack.i.bf16 %v7250_v40, %v7249_v17  ;;  %v8965_v17 = vld [vmem:[#allocation2 + $0xa0] sm:$0xff]  ;;  %v8969_v40 = vld [vmem:[#allocation2 + $0xa8] sm:$0xff] }
 0x3ca   : > { %v8845_v6 = vpop.f32.mrb[16].mxu1 }
 0x3cb   : > { %v8847_v1 = vpop.f32.mrb[17].mxu1  ;;  %1741 = vmax.xlane.f32.xlu0 %v8845_v6 }
 0x3cc   : > { %1739 = vmax.xlane.f32.xlu1 %v8847_v1 }
 0x3ce   : > { %v8851_v28 = vpop.f32.mrb[18].mxu1 }
 0x3cf   : > { %10839 = vst [vmem:[#allocation23_spill] sm:$0xff] %v8851_v28  ;;  %v8853_v21 = vpop.f32.mrb[19].mxu1 }
 0x3d0   : > { %10840 = vst [vmem:[#allocation24_spill] sm:$0xff] %v8853_v21 }
 0x3d2   : > { %v8855_v51 = vpop.f32.mrb[20].mxu1 }
 0x3d3   : > { %10841 = vst [vmem:[#allocation25_spill] sm:$0xff] %v8855_v51  ;;  %v8857_v27 = vpop.f32.mrb[21].mxu1 }
 0x3d4   : > { %10842 = vst [vmem:[#allocation26_spill] sm:$0xff] %v8857_v27 }
 0x3d6   : > { %v8859_v7 = vpop.f32.mrb[22].mxu1 }
 0x3d7   : > { %10843 = vst [vmem:[#allocation29_spill] sm:$0xff] %v8859_v7  ;;  %v8861_v44 = vpop.f32.mrb[23].mxu1 }
 0x3d8   : > { %10844 = vst [vmem:[#allocation27_spill] sm:$0xff] %v8861_v44 }
 0x3da   : > { %v8867_v35 = vpop.f32.mrb[24].mxu1 }
 0x3db   : > { %10845 = vst [vmem:[#allocation30_spill] sm:$0xff] %v8867_v35  ;;  %v8869_v22 = vpop.f32.mrb[25].mxu1 }
 0x3dc   : > { %10846 = vst [vmem:[#allocation28_spill] sm:$0xff] %v8869_v22 }
 0x3dd   : > { %6666 = vrot.lane.b32.xlu1 %v8865_v31, %s7489_s24 }
 0x3de   : > { %v8877_v16 = vpop.f32.mrb[26].mxu1 }
 0x3df   : > { %10847 = vst [vmem:[#allocation32_spill] sm:$0xff] %v8877_v16  ;;  %v8879_v19 = vpop.f32.mrb[27].mxu1 }
 0x3e0   : > { %10848 = vst [vmem:[#allocation31_spill] sm:$0xff] %v8879_v19 }
 0x3e1   : > { %6671 = vrot.lane.b32.xlu0 %v8875_v48, %s7489_s24 }
 0x3e2   : > { %v8883_v20 = vpop.f32.mrb[28].mxu1 }
 0x3e3   : > { %10849 = vst [vmem:[#allocation35_spill] sm:$0xff] %v8883_v20  ;;  %v8885_v43 = vpop.f32.mrb[29].mxu1 }
 0x3e4   : > { %10850 = vst [vmem:[#allocation33_spill] sm:$0xff] %v8885_v43 }
 0x3e6   : > { %v8887_v32 = vpop.f32.mrb[30].mxu1 }
 0x3e7   : > { %10851 = vst [vmem:[#allocation37_spill] sm:$0xff] %v8887_v32  ;;  %v8889_v26 = vpop.f32.mrb[31].mxu1 }
 0x3e8   : > { %10852 = vst [vmem:[#allocation34_spill] sm:$0xff] %v8889_v26 }
 0x400   : > { %1743 = vmax.xlane.f32.xlu0 %v8853_v21 }
 0x401   : > { %1745 = vmax.xlane.f32.xlu1 %v8851_v28 }
 0x404   : > { %1747 = vmax.xlane.f32.xlu0 %v8857_v27  ;;  %v7262_v27 = vld [vmem:[%s7740_s9 + $0x58] sm:$0xff] }
 0x405   : > { %1749 = vmax.xlane.f32.xlu1 %v8855_v51  ;;  %v7264_v51 = vld [vmem:[%s7740_s9 + $0x78] sm:$0xff] }
 0x408   : > { %1751 = vmax.xlane.f32.xlu0 %v8861_v44 }
 0x409   : > { %1753 = vmax.xlane.f32.xlu1 %v8859_v7 }
 0x40c   : > { %1755 = vmax.xlane.f32.xlu0 %v8869_v22  ;;  %v7263_v22 = vld [vmem:[%s7740_s9 + $0x70] sm:$0xff] }
 0x40d   : > { %1757 = vmax.xlane.f32.xlu1 %v8867_v35  ;;  %v7260_v35 = vld [vmem:[%s7740_s9 + $0x48] sm:$0xff]  ;;  %v6730_v21 = vpack.i.bf16 %v7264_v51, %v7263_v22 }
 0x410   : > { %1759 = vmax.xlane.f32.xlu0 %v8879_v19 }
 0x411   : > { %1761 = vmax.xlane.f32.xlu1 %v8877_v16 }
 0x414   : > { %1763 = vmax.xlane.f32.xlu0 %v8885_v43  ;;  %v9057_v43 = vld [vmem:[#allocation2 + $0xf8] sm:$0xff] }
 0x415   : > { %1765 = vmax.xlane.f32.xlu1 %v8883_v20 }
 0x418   : > { %1767 = vmax.xlane.f32.xlu0 %v8889_v26 }
 0x419   : > { %1769 = vmax.xlane.f32.xlu1 %v8887_v32  ;;  %v9039_v32 = vld [vmem:[#allocation2 + $0xe8] sm:$0xff] }
 0x458   : > { %v1742_v59 = vpop.xlane.xlu0 %1741 }
 0x459   : > { %v8910_v8 = vmax.f32 %v8905_v12, %v1742_v59  ;;  %v1740_v9 = vpop.xlane.xlu1 %1739  ;;  %v6695_v59 = vpack.i.bf16 %v7252_v23, %v7251_v15 }
 0x45a   : > { %v8913_v63 = vmax.f32 %v8907_v18, %v1740_v9  ;;  %v7253_v9 = vld [vmem:[%s7740_s9 + $0x10] sm:$0xff] }
 0x45b   : > { %2415 = vst.msk [vmem:[#allocation2 + $0x88] sm:$0xff] %vm307_vm2, %v8910_v8  ;;  %1842 = vperm.xlu1 %6614, %v8910_v8   ;;  %v6700_v25 = vpack.i.bf16 %v7254_v13, %v7253_v9  ;;  %v8986_v13 = vld [vmem:[#allocation2 + $0xb8] sm:$0xff] }
 0x45c   : > { %2414 = vst.msk [vmem:[#allocation2 + $0x80] sm:$0xff] %vm307_vm2, %v8913_v63  ;;  %1837 = vperm.xlu0 %6613, %v8913_v63   ;;  %v6672_v0 = vpop.permute.xlu0 %6671 }
 0x45d   : > { %v6667_v52 = vpop.permute.xlu1 %6666  ;;  %v6674_v60 = vunpack.i.h.bf16 %v6672_v0  ;;  %v6673_v39 = vunpack.i.l.bf16 %v6672_v0  ;;  %v7255_v0 = vld [vmem:[%s7740_s9 + $0x20] sm:$0xff] }
 0x45e   : > { %v6669_v57 = vunpack.i.h.bf16 %v6667_v52  ;;  %v6668_v2 = vunpack.i.l.bf16 %v6667_v52  ;;  %v6705_v47 = vpack.i.bf16 %v7256_v24, %v7255_v0  ;;  %v7257_v52 = vld [vmem:[%s7740_s9 + $0x30] sm:$0xff] }
 0x45f   : > { %6676 = vrot.lane.b32.xlu1 %v8922_v62, %s7489_s24  ;;  %v6351_v11 = vpack.c.bf16 %v6674_v60, %v6673_v39  ;;  %v7258_v60 = vld [vmem:[%s7740_s9 + $0x38] sm:$0xff] }
 0x460   : > { %v6347_v5 = vpack.c.bf16 %v6669_v57, %v6668_v2  ;;  %6681 = vrot.lane.b32.xlu0 %v8931_v61, %s7489_s24  ;;  %v6710_v39 = vpack.i.bf16 %v7258_v60, %v7257_v52  ;;  %v8955_v57 = vld [vmem:[#allocation2 + $0x90] sm:$0xff]  ;;  %v8957_v2 = vld [vmem:[#allocation2 + $0x98] sm:$0xff]  ;;  %v8997_v52 = vld [vmem:[#allocation2 + $0xc0] sm:$0xff] }
 0x461   : > { %v9021_v60 = vld [vmem:[#allocation2 + $0xd8] sm:$0xff] }
 0x462   : > { %6348 = vmatprep.subr.bf16.mxu0 %v6347_v5 }
 0x463   : > { %6350 = vmatpush3.bf16.msra.mxu0 %v6347_v5  ;;  %6686 = vrot.lane.b32.xlu1 %v6685_v4, %s7489_s24 }
 0x464   : > { %6352 = vmatprep.subr.bf16.mxu0 %v6351_v11  ;;  %6691 = vrot.lane.b32.xlu0 %v6690_v14, %s7489_s24 }
 0x467   : > { %6354 = vmatpush3.bf16.msra.mxu0 %v6351_v11 }
 0x468   : > { %6696 = vrot.lane.b32.xlu0 %v6695_v59, %s7490_s16  ;;  %v8980_v59 = vld [vmem:[#allocation2 + $0xb0] sm:$0xff] }
 0x46c   : > { %6701 = vrot.lane.b32.xlu0 %v6700_v25, %s7490_s16 }
 0x470   : > { %6706 = vrot.lane.b32.xlu0 %v6705_v47, %s7490_s16 }
 0x474   : > { %6711 = vrot.lane.b32.xlu0 %v6710_v39, %s7490_s16  ;;  %v9004_v39 = vld [vmem:[#allocation2 + $0xc8] sm:$0xff] }
 0x48d   : > { %v1744_v58 = vpop.xlane.xlu0 %1743 }
 0x48e   : > { %v8960_v55 = vmax.f32 %v8955_v57, %v1744_v58  ;;  %v1746_v4 = vpop.xlane.xlu1 %1745 }
 0x48f   : > { %v8963_v5 = vmax.f32 %v8957_v2, %v1746_v4 }
 0x490   : > { %2416 = vst.msk [vmem:[#allocation2 + $0x90] sm:$0xff] %vm307_vm2, %v8960_v55 }
 0x491   : > { %2417 = vst.msk [vmem:[#allocation2 + $0x98] sm:$0xff] %vm307_vm2, %v8963_v5  ;;  %1852 = vperm.xlu1 %6614, %v8963_v5   ;;  %v1748_v14 = vpop.xlane.xlu0 %1747  ;;  %v1790_v51 = vsub.f32 %v8957_v2, %v8963_v5 }
 0x492   : > { %v8975_v11 = vmax.f32 %v8965_v17, %v1748_v14  ;;  %v1750_v15 = vpop.xlane.xlu1 %1749 }
 0x493   : > { %v8978_v23 = vmax.f32 %v8969_v40, %v1750_v15  ;;  %v1809_v22 = vmul.f32 1.442695, %v1790_v51  ;;  %v10854_v51 = vsub.f32 %v8905_v12, %v8910_v8 }
 0x494   : > { %2418 = vst.msk [vmem:[#allocation2 + $0xa0] sm:$0xff] %vm307_vm2, %v8975_v11 }
 0x495   : > { %2419 = vst.msk [vmem:[#allocation2 + $0xa8] sm:$0xff] %vm307_vm2, %v8978_v23  ;;  %1847 = vperm.xlu1 %6614, %v8960_v55   ;;  %v1752_v25 = vpop.xlane.xlu0 %1751 }
 0x496   : > { %v8992_v0 = vmax.f32 %v8980_v59, %v1752_v25  ;;  %v1754_v24 = vpop.xlane.xlu1 %1753  ;;  %v9015_v25 = vld [vmem:[#allocation2 + $0xd0] sm:$0xff] }
 0x497   : > { %v8995_v47 = vmax.f32 %v8986_v13, %v1754_v24  ;;  %v9033_v24 = vld [vmem:[#allocation2 + $0xe0] sm:$0xff] }
 0x498   : > { %2420 = vst.msk [vmem:[#allocation2 + $0xb0] sm:$0xff] %vm307_vm2, %v8992_v0  ;;  %1867 = vperm.xlu0 %6613, %v8992_v0  }
 0x499   : > { %2421 = vst.msk [vmem:[#allocation2 + $0xb8] sm:$0xff] %vm307_vm2, %v8995_v47  ;;  %1862 = vperm.xlu1 %6614, %v8978_v23   ;;  %v1756_v58 = vpop.xlane.xlu0 %1755 }
 0x49a   : > { %v1758_v4 = vpop.xlane.xlu1 %1757  ;;  %v9010_v14 = vmax.f32 %v8997_v52, %v1756_v58 }
 0x49b   : > { %v9013_v15 = vmax.f32 %v9004_v39, %v1758_v4 }
 0x49c   : > { %2422 = vst.msk [vmem:[#allocation2 + $0xc0] sm:$0xff] %vm307_vm2, %v9010_v14 }
 0x49d   : > { %2423 = vst.msk [vmem:[#allocation2 + $0xc8] sm:$0xff] %vm307_vm2, %v9013_v15  ;;  %1857 = vperm.xlu1 %6614, %v8975_v11   ;;  %1882 = vperm.xlu0 %6613, %v9013_v15   ;;  %v1760_v58 = vpop.xlane.xlu0 %1759 }
 0x49e   : > { %v1762_v4 = vpop.xlane.xlu1 %1761  ;;  %v9028_v9 = vmax.f32 %v9015_v25, %v1760_v58 }
 0x49f   : > { %v9031_v3 = vmax.f32 %v9021_v60, %v1762_v4 }
 0x4a0   : > { %2424 = vst.msk [vmem:[#allocation2 + $0xd0] sm:$0xff] %vm307_vm2, %v9028_v9 }
 0x4a1   : > { %2425 = vst.msk [vmem:[#allocation2 + $0xd8] sm:$0xff] %vm307_vm2, %v9031_v3  ;;  %1872 = vperm.xlu1 %6614, %v8995_v47   ;;  %1892 = vperm.xlu0 %6613, %v9031_v3   ;;  %v1764_v58 = vpop.xlane.xlu0 %1763 }
 0x4a2   : > { %v9046_v4 = vmax.f32 %v9033_v24, %v1764_v58  ;;  %v1766_v20 = vpop.xlane.xlu1 %1765 }
 0x4a3   : > { %v9049_v26 = vmax.f32 %v9039_v32, %v1766_v20 }
 0x4a4   : > { %2426 = vst.msk [vmem:[#allocation2 + $0xe0] sm:$0xff] %vm307_vm2, %v9046_v4 }
 0x4a5   : > { %2427 = vst.msk [vmem:[#allocation2 + $0xe8] sm:$0xff] %vm307_vm2, %v9049_v26  ;;  %1877 = vperm.xlu1 %6614, %v9010_v14   ;;  %1897 = vperm.xlu0 %6613, %v9046_v4   ;;  %v1768_v20 = vpop.xlane.xlu0 %1767 }
 0x4a6   : > { %v9064_v58 = vmax.f32 %v9051_v36, %v1768_v20  ;;  %v1770_v19 = vpop.xlane.xlu1 %1769  ;;  %v7259_v20 = vld [vmem:[%s7740_s9 + $0x40] sm:$0xff] }
 0x4a7   : > { %v9067_v16 = vmax.f32 %v9057_v43, %v1770_v19  ;;  %v6715_v7 = vpack.i.bf16 %v7260_v35, %v7259_v20  ;;  %v7261_v19 = vld [vmem:[%s7740_s9 + $0x50] sm:$0xff]  ;;  %v7265_v35 = vld [vmem:[%s7740_s9 + $0x60] sm:$0xff]  ;;  %v7266_v20 = vld [vmem:[%s7740_s9 + $0x68] sm:$0xff] }
 0x4a8   : > { %2428 = vst.msk [vmem:[#allocation2 + $0xf0] sm:$0xff] %vm307_vm2, %v9064_v58  ;;  %v6720_v44 = vpack.i.bf16 %v7262_v27, %v7261_v19  ;;  %v6725_v28 = vpack.i.bf16 %v7266_v20, %v7265_v35  ;;  %v10853_v27 = vsub.f32 %v8907_v18, %v8913_v63  ;;  %v1792_v18 = vsub.f32 %v8969_v40, %v8978_v23  ;;  %v7268_v19 = vld [vmem:[%s8361_s18 + $0x18] sm:$0xff] }
 0x4a9   : > { %2429 = vst.msk [vmem:[#allocation2 + $0xf8] sm:$0xff] %vm307_vm2, %v9067_v16  ;;  %1887 = vperm.xlu1 %6614, %v9028_v9   ;;  %1907 = vperm.xlu0 %6613, %v9064_v58   ;;  %v1794_v63 = vsub.f32 %v8986_v13, %v8995_v47  ;;  %v1796_v23 = vsub.f32 %v9004_v39, %v9013_v15  ;;  %v7267_v47 = vld [vmem:[%s8361_s18 + $0x10] sm:$0xff] }
 0x4aa   : > { %v6740_v35 = vpack.i.bf16 %v7268_v19, %v7267_v47  ;;  %v1800_v15 = vsub.f32 %v9039_v32, %v9049_v26 }
 0x4ab   : > { %v1817_v2 = vmul.f32 1.442695, %v1794_v63  ;;  %v1821_v20 = vmul.f32 1.442695, %v1796_v23 }
 0x4ad   : > { %6716 = vrot.lane.b32.xlu1 %v6715_v7, %s7490_s16  ;;  %6721 = vrot.lane.b32.xlu0 %v6720_v44, %s7490_s16  ;;  %v1803_v7 = vmul.f32 1.442695, %v10853_v27  ;;  %v1789_v44 = vsub.f32 %v8955_v57, %v8960_v55  ;;  %v1798_v27 = vsub.f32 %v9021_v60, %v9031_v3  ;;  %v1829_v3 = vmul.f32 1.442695, %v1800_v15 }
 0x4ae   : > { %v1802_v60 = vsub.f32 %v9057_v43, %v9067_v16 }
 0x4af   : > { %6919 = vpow2.f32 %v1803_v7  ;;  %v1825_v39 = vmul.f32 1.442695, %v1798_v27 }
 0x4b0   : > { %v1833_v43 = vmul.f32 1.442695, %v1802_v60 }
 0x4b1   : > { %1902 = vperm.xlu1 %6614, %v9049_v26   ;;  %6731 = vrot.lane.b32.xlu0 %v6730_v21, %s7490_s16  ;;  %v1807_v21 = vmul.f32 1.442695, %v1789_v44 }
 0x4b3   : > { %6921 = vpow2.f32 %v1807_v21 }
 0x4b4   : > { %6923 = vpow2.f32 %v1809_v22  ;;  %v1805_v22 = vmul.f32 1.442695, %v10854_v51 }
 0x4b5   : > { %1912 = vperm.xlu1 %6614, %v9067_v16   ;;  %2432 = vrot.lane.b32.xlu0 %v7855_v29, %s7490_s16 }
 0x4b9   : > { %6726 = vrot.lane.b32.xlu1 %v6725_v28, %s7490_s16  ;;  %2434 = vrot.lane.b32.xlu0 %v7857_v30, %s7490_s16  ;;  %v1813_v28 = vmul.f32 1.442695, %v1792_v18  ;;  %v9114_v57 = vpop.eup %6919 }
 0x4bb   : > { %6925 = vpow2.f32 %v1813_v28 }
 0x4bc   : > { %6927 = vpow2.f32 %v1817_v2 }
 0x4bd   : > { %2430 = vrot.lane.b32.xlu1 %v7781_v10, %s7490_s16  ;;  %2436 = vrot.lane.b32.xlu0 %v7863_v33, %s7490_s16  ;;  %v9119_v55 = vpop.eup %6921  ;;  %6929 = vpow2.f32 %v1821_v20 }
 0x4be   : > { %v9124_v5 = vpop.eup %6923  ;;  %6931 = vpow2.f32 %v1825_v39 }
 0x4c1   : > { %2452 = vrot.lane.b32.xlu1 %v7903_v49, %s7490_s16  ;;  %2438 = vrot.lane.b32.xlu0 %v7867_v34, %s7490_s16 }
 0x4c5   : > { %2079 = vperm.xlu1 %6614, %v9114_v57   ;;  %2440 = vrot.lane.b32.xlu0 %v7873_v37, %s7490_s16  ;;  %v9129_v40 = vpop.eup %6925 }
 0x4c6   : > { %v9136_v13 = vpop.eup %6927 }
 0x4c7   : > { %v9168_v20 = vpop.eup %6929 }
 0x4c9   : > { %2089 = vperm.xlu1 %6614, %v9119_v55   ;;  %2442 = vrot.lane.b32.xlu0 %v7877_v38, %s7490_s16 }
 0x4cd   : > { %2094 = vperm.xlu1 %6614, %v9124_v5   ;;  %2444 = vrot.lane.b32.xlu0 %v7883_v41, %s7490_s16 }
 0x4d1   : > { %2104 = vperm.xlu1 %6614, %v9129_v40   ;;  %2446 = vrot.lane.b32.xlu0 %v7887_v42, %s7490_s16 }
 0x4d5   : > { %2114 = vperm.xlu1 %6614, %v9136_v13   ;;  %2448 = vrot.lane.b32.xlu0 %v7893_v45, %s7490_s16 }
 0x4d9   : > { %6741 = vrot.lane.b32.xlu1 %v6740_v35, %s7490_s16  ;;  %2450 = vrot.lane.b32.xlu0 %v7897_v46, %s7490_s16 }
 0x4da   : > { %v1843_v7 = vpop.permute.xlu1 %1842 }
 0x4db   : > { %v1838_v44 = vpop.permute.xlu0 %1837  ;;  %v1916_v63 = vsub.f32 %v8845_v6, %v1843_v7 }
 0x4dc   : > { %v1915_v21 = vsub.f32 %v8847_v1, %v1838_v44  ;;  %v9176_v44 = vpop.eup %6931 }
 0x4dd   : > { %6751 = vrot.lane.b32.xlu1 %v8875_v48, %s7490_s16  ;;  %2454 = vrot.lane.b32.xlu0 %v7907_v50, %s7490_s16  ;;  %v10855_v48 = vsub.f32 %v8965_v17, %v8975_v11  ;;  %v1933_v27 = vmul.f32 1.442695, %v1916_v63 }
 0x4de   : > { %v1931_v32 = vmul.f32 1.442695, %v1915_v21  ;;  %v6677_v26 = vpop.permute.xlu1 %6676 }
 0x4df   : > { %v6679_v18 = vunpack.i.h.bf16 %v6677_v26  ;;  %v6678_v28 = vunpack.i.l.bf16 %v6677_v26  ;;  %v6682_v1 = vpop.permute.xlu0 %6681  ;;  %v1811_v2 = vmul.f32 1.442695, %v10855_v48  ;;  %v7269_v48 = vld [vmem:[%s8361_s18] sm:$0xff] }
 0x4e0   : > { %6933 = vpow2.f32 %v1931_v32  ;;  %v6684_v12 = vunpack.i.h.bf16 %v6682_v1  ;;  %v6683_v8 = vunpack.i.l.bf16 %v6682_v1 }
 0x4e1   : > { %6935 = vpow2.f32 %v1805_v22  ;;  %6761 = vrot.lane.b32.xlu1 %v8931_v61, %s7490_s16  ;;  %2456 = vrot.lane.b32.xlu0 %v7913_v53, %s7490_s16  ;;  %v6355_v16 = vpack.c.bf16 %v6679_v18, %v6678_v28  ;;  %v10856_v61 = vsub.f32 %v8980_v59, %v8992_v0 }
 0x4e2   : > { %6937 = vpow2.f32 %v1829_v3  ;;  %v6687_v23 = vpop.permute.xlu1 %6686  ;;  %v6359_v47 = vpack.c.bf16 %v6684_v12, %v6683_v8 }
 0x4e3   : > { %6356 = vmatprep.subr.bf16.mxu0 %v6355_v16  ;;  %v6689_v6 = vunpack.i.h.bf16 %v6687_v23  ;;  %v6688_v19 = vunpack.i.l.bf16 %v6687_v23  ;;  %v6692_v35 = vpop.permute.xlu0 %6691  ;;  %6939 = vpow2.f32 %v1811_v2  ;;  %v1815_v17 = vmul.f32 1.442695, %v10856_v61  ;;  %v7270_v2 = vld [vmem:[%s8361_s18 + $0x8] sm:$0xff] }
 0x4e4   : > { %6358 = vmatpush3.bf16.msra.mxu0 %v6355_v16  ;;  %6941 = vpow2.f32 %v1833_v43  ;;  %v6694_v11 = vunpack.i.h.bf16 %v6692_v35  ;;  %v6693_v39 = vunpack.i.l.bf16 %v6692_v35  ;;  %v6735_v16 = vpack.i.bf16 %v7270_v2, %v7269_v48  ;;  %v10864_v2 = vld [vmem:[#allocation25_spill] sm:$0xff] }
 0x4e5   : > { %2124 = vperm.xlu1 %6614, %v9168_v20   ;;  %2458 = vrot.lane.b32.xlu0 %v7917_v54, %s7490_s16  ;;  %v6363_v15 = vpack.c.bf16 %v6689_v6, %v6688_v19  ;;  %6943 = vpow2.f32 %v1933_v27  ;;  %v10858_v43 = vsub.f32 %v8997_v52, %v9010_v14  ;;  %v10859_v19 = vsub.f32 %v9015_v25, %v9028_v9 }
 0x4e6   : > { %6360 = vmatprep.subr.bf16.mxu0 %v6359_v47  ;;  %6945 = vpow2.f32 %v1815_v17  ;;  %v6367_v0 = vpack.c.bf16 %v6694_v11, %v6693_v39  ;;  %v10860_v52 = vsub.f32 %v9033_v24, %v9046_v4  ;;  %v10861_v9 = vsub.f32 %v9051_v36, %v9064_v58 }
 0x4e7   : > { %v6697_v7 = vpop.permute.xlu0 %6696  ;;  %v1819_v23 = vmul.f32 1.442695, %v10858_v43  ;;  %v1823_v35 = vmul.f32 1.442695, %v10859_v19  ;;  %v10865_v43 = vld [vmem:[#allocation27_spill] sm:$0xff]  ;;  %v10866_v19 = vld [vmem:[#allocation26_spill] sm:$0xff] }
 0x4e8   : > { %6362 = vmatpush3.bf16.msra.mxu0 %v6359_v47  ;;  %v6699_v21 = vunpack.i.h.bf16 %v6697_v7  ;;  %v6698_v51 = vunpack.i.l.bf16 %v6697_v7  ;;  %v1827_v14 = vmul.f32 1.442695, %v10860_v52  ;;  %v1831_v25 = vmul.f32 1.442695, %v10861_v9  ;;  %v10862_v7 = vld [vmem:[#allocation23_spill] sm:$0xff] }
 0x4e9   : > { %2134 = vperm.xlu1 %6614, %v9176_v44   ;;  %2460 = vrot.lane.b32.xlu0 %v7922_v56, %s7490_s16  ;;  %6947 = vpow2.f32 %v1819_v23  ;;  %v1967_v56 = vld [vmem:[#allocation3 + $0x98] sm:$0xff] }
 0x4ea   : > { %v9181_v59 = vpop.eup %6933  ;;  %6364 = vmatprep.subr.bf16.mxu0 %v6363_v15  ;;  %v6371_v60 = vpack.c.bf16 %v6699_v21, %v6698_v51  ;;  %6949 = vpow2.f32 %v1823_v35  ;;  %v10863_v51 = vld [vmem:[#allocation24_spill] sm:$0xff] }
 0x4eb   : > { %v9183_v22 = vpop.eup %6935  ;;  %5963 = vmatprep.mubr.f32.mxu0 %v9181_v59  ;;  %v6702_v26 = vpop.permute.xlu0 %6701  ;;  %6951 = vpow2.f32 %v1827_v14 }
 0x4ec   : > { %v9186_v3 = vpop.eup %6937  ;;  %6366 = vmatpush3.bf16.msra.mxu0 %v6363_v15  ;;  %v6704_v63 = vunpack.i.h.bf16 %v6702_v26  ;;  %v6703_v12 = vunpack.i.l.bf16 %v6702_v26  ;;  %6953 = vpow2.f32 %v1831_v25 }
 0x4ed   : > { %2144 = vperm.xlu1 %6614, %v9186_v3   ;;  %2084 = vperm.xlu0 %6613, %v9183_v22   ;;  %v9190_v32 = vpop.eup %6939 }
 0x4ee   : > { %6368 = vmatprep.subr.bf16.mxu0 %v6367_v0  ;;  %v9192_v18 = vpop.eup %6941  ;;  %v6377_v47 = vpack.c.bf16 %v6704_v63, %v6703_v12 }
 0x4ef   : > { %v6944_v28 = vpop.eup %6943  ;;  %v6707_v6 = vpop.permute.xlu0 %6706 }
 0x4f0   : > { %6370 = vmatpush3.bf16.msra.mxu0 %v6367_v0  ;;  %v9198_v8 = vpop.eup %6945  ;;  %v6709_v27 = vunpack.i.h.bf16 %v6707_v6  ;;  %v6708_v61 = vunpack.i.l.bf16 %v6707_v6 }
 0x4f1   : > { %2154 = vperm.xlu1 %6614, %v9192_v18   ;;  %2099 = vperm.xlu0 %6613, %v9190_v32  }
 0x4f2   : > { %6373 = vmatprep.subr.msk.bf16.mxu0 %vm7748_vm1, %v6371_v60  ;;  %v6383_v17 = vpack.c.bf16 %v6709_v27, %v6708_v61 }
 0x4f3   : > { %5964 = vmatmul.mubr.f32.vlgmr.msra.gmra.mrb[16].mxu0 %v6944_v28  ;;  %v6712_v11 = vpop.permute.xlu0 %6711  ;;  %v9228_v24 = vpop.eup %6947 }
 0x4f4   : > { %v6713_v39 = vunpack.i.l.bf16 %v6712_v11 }
 0x4f5   : > { %2109 = vperm.xlu0 %6613, %v9198_v8  }
 0x4f9   : > { %6736 = vrot.lane.b32.xlu0 %v6735_v16, %s7490_s16  ;;  %6376 = vmatpush3.bf16.xpose.msk.msra.mxu0 %vm7748_vm1, %v6371_v60 }
 0x4fa   : > { %6379 = vmatprep.subr.msk.bf16.mxu0 %vm7748_vm1, %v6377_v47 }
 0x4fd   : > { %6746 = vrot.lane.b32.xlu0 %v8865_v31, %s7490_s16  ;;  %v6714_v31 = vunpack.i.h.bf16 %v6712_v11 }
 0x4ff   : > { %v6389_v4 = vpack.c.bf16 %v6714_v31, %v6713_v39 }
 0x501   : > { %6756 = vrot.lane.b32.xlu0 %v8922_v62, %s7490_s16  ;;  %6382 = vmatpush3.bf16.xpose.msk.msra.mxu0 %vm7748_vm1, %v6377_v47  ;;  %v9231_v62 = vpop.eup %6949 }
 0x502   : > { %6385 = vmatprep.subr.msk.bf16.mxu0 %vm7748_vm1, %v6383_v17  ;;  %v9238_v36 = vpop.eup %6951 }
 0x503   : > { %v9241_v58 = vpop.eup %6953 }
 0x505   : > { %2119 = vperm.xlu0 %6613, %v9228_v24  }
 0x509   : > { %2129 = vperm.xlu0 %6613, %v9231_v62   ;;  %6388 = vmatpush3.bf16.xpose.msk.msra.mxu0 %vm7748_vm1, %v6383_v17  ;;  %v10867_v17 = vld [vmem:[#allocation29_spill] sm:$0xff] }
 0x50a   : > { %6391 = vmatprep.subr.msk.bf16.mxu0 %vm7748_vm1, %v6389_v4 }
 0x50d   : > { %2139 = vperm.xlu0 %6613, %v9238_v36  }
 0x510   : > { %v1853_v15 = vpop.permute.xlu1 %1852 }
 0x511   : > { %2149 = vperm.xlu0 %6613, %v9241_v58   ;;  %6394 = vmatpush3.bf16.xpose.msk.msra.mxu0 %vm7748_vm1, %v6389_v4  ;;  %v1918_v0 = vsub.f32 %v10862_v7, %v1853_v15  ;;  %v10869_v7 = vld [vmem:[#allocation28_spill] sm:$0xff] }
 0x513   : > { %v1937_v26 = vmul.f32 1.442695, %v1918_v0 }
 0x514   : > { %v1848_v21 = vpop.permute.xlu1 %1847 }
 0x515   : > { %v1917_v60 = vsub.f32 %v10863_v51, %v1848_v21  ;;  %1998 = vadd.xlane.f32.xlu1 %v6944_v28  ;;  %v10870_v51 = vld [vmem:[#allocation32_spill] sm:$0xff] }
 0x517   : > { %v1935_v63 = vmul.f32 1.442695, %v1917_v60  ;;  %v1868_v12 = vpop.permute.xlu0 %1867 }
 0x518   : > { %v1863_v48 = vpop.permute.xlu1 %1862  ;;  %v1921_v23 = vsub.f32 %v10865_v43, %v1868_v12 }
 0x519   : > { %6955 = vpow2.f32 %v1935_v63  ;;  %1996 = vadd.xlane.f32.xlu1 %v9181_v59  ;;  %v1920_v16 = vsub.f32 %v10864_v2, %v1863_v48  ;;  %v10868_v59 = vld [vmem:[#allocation30_spill] sm:$0xff]  ;;  %v10871_v63 = vld [vmem:[#allocation33_spill] sm:$0xff] }
 0x51a   : > { %6957 = vpow2.f32 %v1937_v26  ;;  %v1943_v61 = vmul.f32 1.442695, %v1921_v23 }
 0x51b   : > { %v1941_v27 = vmul.f32 1.442695, %v1920_v16  ;;  %v10872_v16 = vld [vmem:[#allocation31_spill] sm:$0xff] }
 0x51c   : > { %v1858_v47 = vpop.permute.xlu1 %1857  ;;  %v1883_v6 = vpop.permute.xlu0 %1882 }
 0x51d   : > { %v1919_v35 = vsub.f32 %v10866_v19, %v1858_v47  ;;  %v1924_v25 = vsub.f32 %v10868_v59, %v1883_v6 }
 0x51f   : > { %v1939_v52 = vmul.f32 1.442695, %v1919_v35  ;;  %v1949_v21 = vmul.f32 1.442695, %v1924_v25 }
 0x520   : > { %v1873_v28 = vpop.permute.xlu1 %1872  ;;  %v1893_v14 = vpop.permute.xlu0 %1892 }
 0x521   : > { %6959 = vpow2.f32 %v1939_v52  ;;  %v1922_v11 = vsub.f32 %v10867_v17, %v1873_v28  ;;  %v1926_v60 = vsub.f32 %v10870_v51, %v1893_v14  ;;  %v10874_v51 = vld [vmem:[#allocation35_spill] sm:$0xff] }
 0x522   : > { %6961 = vpow2.f32 %v1941_v27  ;;  %v10873_v27 = vld [vmem:[#allocation34_spill] sm:$0xff] }
 0x523   : > { %v6956_v9 = vpop.eup %6955  ;;  %6963 = vpow2.f32 %v1943_v61  ;;  %v1945_v31 = vmul.f32 1.442695, %v1922_v11  ;;  %v1953_v47 = vmul.f32 1.442695, %v1926_v60 }
 0x524   : > { %v6958_v39 = vpop.eup %6957  ;;  %v1878_v4 = vpop.permute.xlu1 %1877  ;;  %5966 = vmatprep.mubr.f32.mxu0 %v6956_v9 }
 0x525   : > { %v1898_v15 = vpop.permute.xlu0 %1897  ;;  %6965 = vpow2.f32 %v1945_v31  ;;  %v1923_v0 = vsub.f32 %v10869_v7, %v1878_v4  ;;  %5967 = vmatmul.mubr.f32.gmra.mrb[18].mxu0 %v6958_v39 }
 0x526   : > { %v1927_v12 = vsub.f32 %v10871_v63, %v1898_v15 }
 0x527   : > { %v1947_v26 = vmul.f32 1.442695, %v1923_v0 }
 0x528   : > { %v1888_v48 = vpop.permute.xlu1 %1887  ;;  %v1955_v35 = vmul.f32 1.442695, %v1927_v12 }
 0x529   : > { %v1908_v2 = vpop.permute.xlu0 %1907  ;;  %6967 = vpow2.f32 %v1947_v26  ;;  %v1925_v43 = vsub.f32 %v10872_v16, %v1888_v48 }
 0x52a   : > { %6969 = vpow2.f32 %v1949_v21  ;;  %v1929_v61 = vsub.f32 %v10873_v27, %v1908_v2  ;;  %v10875_v2 = vld [vmem:[#allocation37_spill] sm:$0xff] }
 0x52b   : > { %v6960_v23 = vpop.eup %6959  ;;  %v1951_v6 = vmul.f32 1.442695, %v1925_v43 }
 0x52c   : > { %v6962_v19 = vpop.eup %6961  ;;  %v6717_v52 = vpop.permute.xlu1 %6716  ;;  %2004 = vadd.xlane.f32.xlu1 %v6960_v23  ;;  %5969 = vmatprep.mubr.f32.mxu0 %v6960_v23  ;;  %v1959_v15 = vmul.f32 1.442695, %v1929_v61 }
 0x52d   : > { %v6722_v28 = vpop.permute.xlu0 %6721  ;;  %v6964_v14 = vpop.eup %6963  ;;  %6971 = vpow2.f32 %v1951_v6  ;;  %v6719_v17 = vunpack.i.h.bf16 %v6717_v52  ;;  %v6718_v11 = vunpack.i.l.bf16 %v6717_v52  ;;  %5970 = vmatmul.mubr.f32.gmra.mrb[20].mxu0 %v6962_v19 }
 0x52e   : > { %v6724_v59 = vunpack.i.h.bf16 %v6722_v28  ;;  %v6723_v25 = vunpack.i.l.bf16 %v6722_v28  ;;  %5972 = vmatprep.mubr.f32.mxu0 %v6964_v14  ;;  %6973 = vpow2.f32 %v1953_v47 }
 0x52f   : > { %v6966_v31 = vpop.eup %6965  ;;  %v6395_v4 = vpack.c.bf16 %v6719_v17, %v6718_v11  ;;  %6975 = vpow2.f32 %v1955_v35 }
 0x530   : > { %v6401_v7 = vpack.c.bf16 %v6724_v59, %v6723_v25  ;;  %v1903_v0 = vpop.permute.xlu1 %1902  ;;  %2002 = vadd.xlane.f32.xlu0 %v6958_v39  ;;  %2008 = vadd.xlane.f32.xlu1 %v6964_v14  ;;  %6977 = vpow2.f32 %v1959_v15 }
 0x531   : > { %v6732_v21 = vpop.permute.xlu0 %6731  ;;  %v1928_v60 = vsub.f32 %v10874_v51, %v1903_v0  ;;  %5973 = vmatmul.mubr.f32.gmra.mrb[22].mxu0 %v6966_v31  ;;  %6397 = vmatprep.subr.msk.bf16.mxu0 %vm7748_vm1, %v6395_v4 }
 0x532   : > { %6400 = vmatpush3.bf16.xpose.msk.msra.mxu0 %vm7748_vm1, %v6395_v4  ;;  %v6734_v14 = vunpack.i.h.bf16 %v6732_v21  ;;  %v6733_v17 = vunpack.i.l.bf16 %v6732_v21 }
 0x533   : > { %v6968_v26 = vpop.eup %6967  ;;  %v1957_v63 = vmul.f32 1.442695, %v1928_v60  ;;  %6403 = vmatprep.subr.msk.bf16.mxu0 %vm7748_vm1, %v6401_v7 }
 0x534   : > { %v1913_v12 = vpop.permute.xlu1 %1912  ;;  %2000 = vadd.xlane.f32.xlu0 %v6956_v9  ;;  %2012 = vadd.xlane.f32.xlu1 %v6968_v26  ;;  %v6970_v48 = vpop.eup %6969  ;;  %v6413_v25 = vpack.c.bf16 %v6734_v14, %v6733_v17 }
 0x535   : > { %v2433_v39 = vpop.permute.xlu0 %2432  ;;  %6979 = vpow2.f32 %v1957_v63  ;;  %v1930_v16 = vsub.f32 %v10875_v2, %v1913_v12  ;;  %5975 = vmatprep.mubr.f32.mxu0 %v6968_v26 }
 0x536   : > { %5976 = vmatmul.mubr.f32.gmra.mrb[24].mxu0 %v6970_v48 }
 0x537   : > { %v6972_v43 = vpop.eup %6971  ;;  %v1961_v23 = vmul.f32 1.442695, %v1930_v16 }
 0x538   : > { %v6727_v47 = vpop.permute.xlu1 %6726  ;;  %2006 = vadd.xlane.f32.xlu0 %v6962_v19  ;;  %2016 = vadd.xlane.f32.xlu1 %v6972_v43  ;;  %v6974_v35 = vpop.eup %6973 }
 0x539   : > { %v2435_v6 = vpop.permute.xlu0 %2434  ;;  %6981 = vpow2.f32 %v1961_v23  ;;  %v6729_v27 = vunpack.i.h.bf16 %v6727_v47  ;;  %v6728_v61 = vunpack.i.l.bf16 %v6727_v47  ;;  %5978 = vmatprep.mubr.f32.mxu0 %v6972_v43  ;;  %v6976_v9 = vpop.eup %6975 }
 0x53a   : > { %5979 = vmatmul.mubr.f32.gmra.mrb[26].mxu0 %v6974_v35  ;;  %v6978_v19 = vpop.eup %6977 }
 0x53b   : > { %v6407_v52 = vpack.c.bf16 %v6729_v27, %v6728_v61  ;;  %5981 = vmatprep.mubr.f32.mxu0 %v6976_v9  ;;  %6406 = vmatpush3.bf16.xpose.msk.msra.mxu0 %vm7748_vm1, %v6401_v7 }
 0x53c   : > { %2010 = vadd.xlane.f32.xlu0 %v6966_v31  ;;  %2020 = vadd.xlane.f32.xlu1 %v6976_v9  ;;  %v2431_v15 = vpop.permute.xlu1 %2430 }
 0x53d   : > { %v2437_v28 = vpop.permute.xlu0 %2436  ;;  %6409 = vmatprep.subr.msk.bf16.mxu0 %vm7748_vm1, %v6407_v52 }
 0x53f   : > { %v6980_v11 = vpop.eup %6979 }
 0x540   : > { %2014 = vadd.xlane.f32.xlu0 %v6970_v48  ;;  %2024 = vadd.xlane.f32.xlu1 %v6978_v19  ;;  %v2453_v60 = vpop.permute.xlu1 %2452 }
 0x541   : > { %v2439_v59 = vpop.permute.xlu0 %2438  ;;  %5982 = vmatmul.mubr.f32.gmra.mrb[28].mxu0 %v6980_v11 }
 0x542   : > { %5984 = vmatprep.mubr.f32.mxu0 %v6978_v19 }
 0x543   : > { %v6982_v4 = vpop.eup %6981  ;;  %6412 = vmatpush3.bf16.xpose.msk.msra.mxu0 %vm7748_vm1, %v6407_v52 }
 0x544   : > { %6415 = vmatprep.subr.msk.bf16.mxu0 %vm7748_vm1, %v6413_v25  ;;  %2018 = vadd.xlane.f32.xlu0 %v6974_v35  ;;  %v9284_v63 = vpop.permute.xlu1 %2079 }
 0x545   : > { %v2441_v31 = vpop.permute.xlu0 %2440  ;;  %5985 = vmatmul.mubr.f32.gmra.mrb[30].mxu0 %v6982_v4 }
 0x546   : > { %6019 = vmatprep.mubr.msk.f32.mxu0 %vm436_vm0, %v2431_v15 }
 0x548   : > { %2022 = vadd.xlane.f32.xlu0 %v6980_v11  ;;  %v9288_v48 = vpop.permute.xlu1 %2089 }
 0x549   : > { %v2443_v7 = vpop.permute.xlu0 %2442 }
 0x54b   : > { %6418 = vmatpush3.bf16.xpose.msk.msra.mxu0 %vm7748_vm1, %v6413_v25  ;;  %v1965_v25 = vld [vmem:[#allocation3 + $0x88] sm:$0xff] }
 0x54c   : > { %2026 = vadd.xlane.f32.xlu0 %v6982_v4  ;;  %v9294_v16 = vpop.permute.xlu1 %2094 }
 0x54d   : > { %v2445_v0 = vpop.permute.xlu0 %2444 }
 0x550   : > { %v9298_v23 = vpop.permute.xlu1 %2104 }
 0x551   : > { %v2447_v21 = vpop.permute.xlu0 %2446 }
 0x552   : > { %6020 = vmatmul.mubr.msk.f32.vlgmr.msra.gmra.mrb[32].mxu0 %vm436_vm0, %v2433_v39 }
 0x553   : > { %6022 = vmatprep.mubr.msk.f32.mxu0 %vm436_vm0, %v2435_v6 }
 0x554   : > { %v9301_v47 = vpop.permute.xlu1 %2114 }
 0x555   : > { %v2449_v51 = vpop.permute.xlu0 %2448 }
 0x556   : > { %6023 = vmatmul.mubr.msk.f32.gmra.mrb[34].mxu0 %vm436_vm0, %v2437_v28 }
 0x557   : > { %6025 = vmatprep.mubr.msk.f32.mxu0 %vm436_vm0, %v2439_v59 }
 0x558   : > { %v6742_v6 = vpop.permute.xlu1 %6741 }
 0x559   : > { %v2451_v26 = vpop.permute.xlu0 %2450  ;;  %v6743_v1 = vunpack.i.l.bf16 %v6742_v6 }
 0x55a   : > { %6026 = vmatmul.mubr.msk.f32.gmra.mrb[36].mxu0 %vm436_vm0, %v2441_v31  ;;  %v1981_v31 = vmul.f32 %v9183_v22, %v1965_v25  ;;  %v1968_v22 = vld [vmem:[#allocation3 + $0xa0] sm:$0xff]  ;;  %v6744_v25 = vunpack.i.h.bf16 %v6742_v6  ;;  %v1983_v6 = vmul.f32 %v9124_v5, %v1967_v56 }
 0x55b   : > { %6028 = vmatprep.mubr.msk.f32.mxu0 %vm436_vm0, %v2443_v7  ;;  %v1964_v7 = vld [vmem:[#allocation3 + $0x80] sm:$0xff] }
 0x55c   : > { %v9303_v35 = vpop.permute.xlu1 %6751  ;;  %v6423_v54 = vpack.c.bf16 %v6744_v25, %v6743_v1  ;;  %v1974_v25 = vld [vmem:[#allocation3 + $0xd0] sm:$0xff] }
 0x55d   : > { %v2455_v12 = vpop.permute.xlu0 %2454 }
 0x55e   : > { %6029 = vmatmul.mubr.msk.f32.gmra.mrb[38].mxu0 %vm436_vm0, %v2445_v0 }
 0x55f   : > { %6031 = vmatprep.mubr.msk.f32.mxu0 %vm436_vm0, %v2447_v21  ;;  %v1980_v21 = vmul.f32 %v9114_v57, %v1964_v7  ;;  %v1970_v7 = vld [vmem:[#allocation3 + $0xb0] sm:$0xff] }
 0x560   : > { %v9307_v61 = vpop.permute.xlu1 %6761 }
 0x561   : > { %v2457_v39 = vpop.permute.xlu0 %2456 }
 0x562   : > { %6032 = vmatmul.mubr.msk.f32.gmra.mrb[40].mxu0 %vm436_vm0, %v2449_v51 }
 0x563   : > { %6034 = vmatprep.mubr.msk.f32.mxu0 %vm436_vm0, %v2451_v26 }
 0x564   : > { %v9311_v52 = vpop.permute.xlu1 %2124 }
 0x565   : > { %v2459_v2 = vpop.permute.xlu0 %2458 }
 0x566   : > { %6035 = vmatmul.mubr.msk.f32.gmra.mrb[42].mxu0 %vm436_vm0, %v2453_v60 }
 0x567   : > { %6037 = vmatprep.mubr.msk.f32.mxu0 %vm436_vm0, %v2455_v12 }
 0x568   : > { %v9315_v19 = vpop.permute.xlu1 %2134 }
 0x569   : > { %v2461_v43 = vpop.permute.xlu0 %2460 }
 0x56a   : > { %6038 = vmatmul.mubr.msk.f32.gmra.mrb[44].mxu0 %vm436_vm0, %v2457_v39 }
 0x56b   : > { %6040 = vmatprep.mubr.msk.f32.mxu0 %vm436_vm0, %v2459_v2 }
 0x56c   : > { %v9317_v17 = vpop.permute.xlu1 %2144 }
 0x56d   : > { %v9305_v27 = vpop.permute.xlu0 %2084 }
 0x56e   : > { %6041 = vmatmul.mubr.msk.f32.gmra.mrb[46].mxu0 %vm436_vm0, %v2461_v43 }
 0x570   : > { %v9319_v59 = vpop.permute.xlu1 %2154 }
 0x571   : > { %v9309_v9 = vpop.permute.xlu0 %2099 }
 0x575   : > { %v9313_v28 = vpop.permute.xlu0 %2109 }
 0x579   : > { %v6737_v14 = vpop.permute.xlu0 %6736 }
 0x57a   : > { %v6739_v39 = vunpack.i.h.bf16 %v6737_v14  ;;  %v6738_v2 = vunpack.i.l.bf16 %v6737_v14  ;;  %v1986_v14 = vmul.f32 %v9198_v8, %v1970_v7  ;;  %v2062_v7 = vld [vmem:[#allocation4 + $0x88] sm:$0xff] }
 0x57d   : > { %v6747_v11 = vpop.permute.xlu0 %6746 }
 0x581   : > { %v9321_v4 = vpop.permute.xlu0 %6756 }
 0x585   : > { %v9326_v60 = vpop.permute.xlu0 %2119 }
 0x589   : > { %v9329_v12 = vpop.permute.xlu0 %2129 }
 0x58d   : > { %v9331_v43 = vpop.permute.xlu0 %2139 }
 0x5a2   : > { %v1999_v15 = vpop.xlane.xlu1 %1998 }
 0x5a3   : > { %v2029_v0 = vadd.f32 %v1999_v15, %v1981_v31  ;;  %v6419_v31 = vpack.c.bf16 %v6739_v39, %v6738_v2  ;;  %v1984_v15 = vmul.f32 %v9190_v32, %v1968_v22  ;;  %v1972_v32 = vld [vmem:[#allocation3 + $0xc0] sm:$0xff]  ;;  %v1966_v22 = vld [vmem:[#allocation3 + $0x90] sm:$0xff] }
 0x5a4   : > { %v1988_v1 = vmul.f32 %v9228_v24, %v1972_v32  ;;  %v1982_v56 = vmul.f32 %v9119_v55, %v1966_v22  ;;  %v6758_v24 = vunpack.i.l.bf16 %v9321_v4  ;;  %v1990_v55 = vmul.f32 %v9231_v62, %v1974_v25  ;;  %v1976_v32 = vld [vmem:[#allocation3 + $0xe0] sm:$0xff]  ;;  %v1971_v22 = vld [vmem:[#allocation3 + $0xb8] sm:$0xff]  ;;  %v1978_v25 = vld [vmem:[#allocation3 + $0xf0] sm:$0xff] }
 0x5a5   : > { %2045 = vst.msk [vmem:[#allocation3 + $0x88] sm:$0xff] %vm307_vm2, %v2029_v0  ;;  %v9334_v0 = vpop.permute.xlu0 %2149  ;;  %6420 = vmatprep.subr.bf16.mxu1 %v6419_v31  ;;  %v1992_v62 = vmul.f32 %v9238_v36, %v1976_v32  ;;  %v1994_v36 = vmul.f32 %v9241_v58, %v1978_v25 }
 0x5a6   : > { %v1997_v51 = vpop.xlane.xlu1 %1996  ;;  %6422 = vmatpush3.bf16.msra.mxu1 %v6419_v31  ;;  %v6753_v31 = vunpack.i.l.bf16 %v9303_v35 }
 0x5a7   : > { %v2028_v26 = vadd.f32 %v1997_v51, %v1980_v21  ;;  %v6749_v51 = vunpack.i.h.bf16 %v6747_v11  ;;  %6424 = vmatprep.subr.bf16.mxu1 %v6423_v54 }
 0x5a9   : > { %2044 = vst.msk [vmem:[#allocation3 + $0x80] sm:$0xff] %vm307_vm2, %v2028_v26  ;;  %v6748_v26 = vunpack.i.l.bf16 %v6747_v11 }
 0x5aa   : > { %6426 = vmatpush3.bf16.msra.mxu1 %v6423_v54  ;;  %v6764_v54 = vunpack.i.h.bf16 %v9307_v61 }
 0x5ab   : > { %v6427_v11 = vpack.c.bf16 %v6749_v51, %v6748_v26 }
 0x5ad   : > { %6428 = vmatprep.subr.bf16.mxu1 %v6427_v11 }
 0x5ae   : > { %6430 = vmatpush3.bf16.msra.mxu1 %v6427_v11 }
 0x5b9   : > { %v2005_v57 = vpop.xlane.xlu1 %2004 }
 0x5ba   : > { %v2032_v21 = vadd.f32 %v2005_v57, %v1984_v15  ;;  %v6754_v15 = vunpack.i.h.bf16 %v9303_v35  ;;  %v1969_v57 = vld [vmem:[#allocation3 + $0xa8] sm:$0xff]  ;;  %v2061_v35 = vld [vmem:[#allocation4 + $0x80] sm:$0xff] }
 0x5bb   : > { %v1985_v26 = vmul.f32 %v9129_v40, %v1969_v57  ;;  %v1973_v57 = vld [vmem:[#allocation3 + $0xc8] sm:$0xff] }
 0x5bc   : > { %2048 = vst.msk [vmem:[#allocation3 + $0xa0] sm:$0xff] %vm307_vm2, %v2032_v21  ;;  %v6431_v51 = vpack.c.bf16 %v6754_v15, %v6753_v31 }
 0x5bd   : > { %v2009_v39 = vpop.xlane.xlu1 %2008  ;;  %v2003_v2 = vpop.xlane.xlu0 %2002 }
 0x5be   : > { %v2034_v53 = vadd.f32 %v2009_v39, %v1986_v14  ;;  %v2031_v50 = vadd.f32 %v2003_v2, %v1983_v6  ;;  %v2158_v6 = vmul.f32 %v9305_v27, %v2062_v7  ;;  %6432 = vmatprep.subr.bf16.mxu1 %v6431_v51  ;;  %v1987_v27 = vmul.f32 %v9136_v13, %v1971_v22 }
 0x5bf   : > { %6434 = vmatpush3.bf16.msra.mxu1 %v6431_v51  ;;  %v1989_v13 = vmul.f32 %v9168_v20, %v1973_v57 }
 0x5c0   : > { %2050 = vst.msk [vmem:[#allocation3 + $0xb0] sm:$0xff] %vm307_vm2, %v2034_v53  ;;  %2047 = vst.msk [vmem:[#allocation3 + $0x98] sm:$0xff] %vm307_vm2, %v2031_v50  ;;  %v6763_v53 = vunpack.i.l.bf16 %v9307_v61  ;;  %v6759_v50 = vunpack.i.h.bf16 %v9321_v4  ;;  %v2157_v61 = vmul.f32 %v9284_v63, %v2061_v35  ;;  %v1975_v35 = vld [vmem:[#allocation3 + $0xd8] sm:$0xff] }
 0x5c1   : > { %v2013_v5 = vpop.xlane.xlu1 %2012  ;;  %v2001_v8 = vpop.xlane.xlu0 %2000 }
 0x5c2   : > { %v2036_v21 = vadd.f32 %v2013_v5, %v1988_v1  ;;  %v2030_v14 = vadd.f32 %v2001_v8, %v1982_v56  ;;  %v6435_v56 = vpack.c.bf16 %v6759_v50, %v6758_v24  ;;  %v6439_v5 = vpack.c.bf16 %v6764_v54, %v6763_v53 }
 0x5c3   : > { %v1991_v24 = vmul.f32 %v9176_v44, %v1975_v35  ;;  %v2063_v44 = vld [vmem:[#allocation4 + $0x90] sm:$0xff] }
 0x5c4   : > { %2052 = vst.msk [vmem:[#allocation3 + $0xc0] sm:$0xff] %vm307_vm2, %v2036_v21  ;;  %2046 = vst.msk [vmem:[#allocation3 + $0x90] sm:$0xff] %vm307_vm2, %v2030_v14  ;;  %6436 = vmatprep.subr.bf16.mxu1 %v6435_v56 }
 0x5c5   : > { %v2017_v39 = vpop.xlane.xlu1 %2016  ;;  %v2007_v2 = vpop.xlane.xlu0 %2006  ;;  %6438 = vmatpush3.bf16.msra.mxu1 %v6435_v56  ;;  %v2066_v56 = vld [vmem:[#allocation4 + $0xa8] sm:$0xff] }
 0x5c6   : > { %v2038_v11 = vadd.f32 %v2017_v39, %v1990_v55  ;;  %v2033_v4 = vadd.f32 %v2007_v2, %v1985_v26  ;;  %v5965_v15 = vpop.f32.mrb[16].mxu0  ;;  %6440 = vmatprep.subr.bf16.mxu1 %v6439_v5  ;;  %v1977_v55 = vld [vmem:[#allocation3 + $0xe8] sm:$0xff] }
 0x5c7   : > { %v2383_v31 = vadd.f32 %v5965_v15, %v2158_v6  ;;  %v2303_v1 = vpop.f32.mrb[17].mxu0  ;;  %v1993_v58 = vmul.f32 %v9186_v3, %v1977_v55  ;;  %v1979_v6 = vld [vmem:[#allocation3 + $0xf8] sm:$0xff] }
 0x5c8   : > { %2054 = vst.msk [vmem:[#allocation3 + $0xd0] sm:$0xff] %vm307_vm2, %v2038_v11  ;;  %2049 = vst.msk [vmem:[#allocation3 + $0xa8] sm:$0xff] %vm307_vm2, %v2033_v4  ;;  %v2382_v40 = vadd.f32 %v2303_v1, %v2157_v61  ;;  %v1995_v2 = vmul.f32 %v9192_v18, %v1979_v6  ;;  %v2064_v61 = vld [vmem:[#allocation4 + $0x98] sm:$0xff]  ;;  %v2159_v4 = vmul.f32 %v9288_v48, %v2063_v44  ;;  %v2065_v18 = vld [vmem:[#allocation4 + $0xa0] sm:$0xff] }
 0x5c9   : > { %2399 = vst.msk [vmem:[#allocation4 + $0x88] sm:$0xff] %vm436_vm0, %v2383_v31  ;;  %v2021_v63 = vpop.xlane.xlu1 %2020  ;;  %v2011_v8 = vpop.xlane.xlu0 %2010  ;;  %6442 = vmatpush3.bf16.msra.mxu1 %v6439_v5  ;;  %v2160_v11 = vmul.f32 %v9294_v16, %v2064_v61  ;;  %v2162_v5 = vmul.f32 %v9298_v23, %v2066_v56  ;;  %v2074_v6 = vld [vmem:[#allocation4 + $0xe8] sm:$0xff] }
 0x5ca   : > { %2398 = vst.msk [vmem:[#allocation4 + $0x80] sm:$0xff] %vm436_vm0, %v2382_v40  ;;  %v2040_v7 = vadd.f32 %v2021_v63, %v1992_v62  ;;  %v2035_v54 = vadd.f32 %v2011_v8, %v1987_v27  ;;  %v2068_v40 = vld [vmem:[#allocation4 + $0xb8] sm:$0xff]  ;;  %v2161_v62 = vmul.f32 %v9309_v9, %v2065_v18  ;;  %v2067_v63 = vld [vmem:[#allocation4 + $0xb0] sm:$0xff] }
 0x5cb   : > { %v2164_v25 = vmul.f32 %v9301_v47, %v2068_v40  ;;  %v2163_v57 = vmul.f32 %v9313_v28, %v2067_v63 }
 0x5cc   : > { %2056 = vst.msk [vmem:[#allocation3 + $0xe0] sm:$0xff] %vm307_vm2, %v2040_v7  ;;  %2051 = vst.msk [vmem:[#allocation3 + $0xb8] sm:$0xff] %vm307_vm2, %v2035_v54  ;;  %v2070_v54 = vld [vmem:[#allocation4 + $0xc8] sm:$0xff] }
 0x5cd   : > { %v2025_v21 = vpop.xlane.xlu1 %2024  ;;  %v2015_v14 = vpop.xlane.xlu0 %2014  ;;  %v2166_v9 = vmul.f32 %v9311_v52, %v2070_v54  ;;  %v9451_v54 = vld [vmem:[#allocation2 + $0x100] sm:$0xff] }
 0x5ce   : > { %v2042_v53 = vadd.f32 %v2025_v21, %v1994_v36  ;;  %v2037_v50 = vadd.f32 %v2015_v14, %v1989_v13  ;;  %v2069_v13 = vld [vmem:[#allocation4 + $0xc0] sm:$0xff]  ;;  %v2072_v14 = vld [vmem:[#allocation4 + $0xd8] sm:$0xff] }
 0x5cf   : > { %v2165_v47 = vmul.f32 %v9326_v60, %v2069_v13  ;;  %v2073_v60 = vld [vmem:[#allocation4 + $0xe0] sm:$0xff] }
 0x5d0   : > { %2058 = vst.msk [vmem:[#allocation3 + $0xf0] sm:$0xff] %vm307_vm2, %v2042_v53  ;;  %2053 = vst.msk [vmem:[#allocation3 + $0xc8] sm:$0xff] %vm307_vm2, %v2037_v50  ;;  %v2071_v53 = vld [vmem:[#allocation4 + $0xd0] sm:$0xff] }
 0x5d1   : > { %v2019_v51 = vpop.xlane.xlu0 %2018  ;;  %v2167_v55 = vmul.f32 %v9329_v12, %v2071_v53 }
 0x5d2   : > { %v2039_v26 = vadd.f32 %v2019_v51, %v1991_v24  ;;  %v2168_v51 = vmul.f32 %v9315_v19, %v2072_v14  ;;  %v2169_v19 = vmul.f32 %v9331_v43, %v2073_v60  ;;  %v9464_v14 = vld [vmem:[#allocation2 + $0x118] sm:$0xff] }
 0x5d3   : > { %v9589_v60 = vld [vmem:[#allocation2 + $0x178] sm:$0xff] }
 0x5d4   : > { %2055 = vst.msk [vmem:[#allocation3 + $0xd8] sm:$0xff] %vm307_vm2, %v2039_v26 }
 0x5d5   : > { %v2023_v20 = vpop.xlane.xlu0 %2022 }
 0x5d6   : > { %v2041_v39 = vadd.f32 %v2023_v20, %v1993_v58 }
 0x5d8   : > { %2057 = vst.msk [vmem:[#allocation3 + $0xe8] sm:$0xff] %vm307_vm2, %v2041_v39  ;;  %v2170_v39 = vmul.f32 %v9317_v17, %v2074_v6 }
 0x5d9   : > { %v2027_v32 = vpop.xlane.xlu0 %2026 }
 0x5da   : > { %v2043_v22 = vadd.f32 %v2027_v32, %v1995_v2  ;;  %v2076_v2 = vld [vmem:[#allocation4 + $0xf8] sm:$0xff] }
 0x5dc   : > { %2059 = vst.msk [vmem:[#allocation3 + $0xf8] sm:$0xff] %vm307_vm2, %v2043_v22  ;;  %v2075_v22 = vld [vmem:[#allocation4 + $0xf0] sm:$0xff] }
 0x5f8   : > { %v5968_v15 = vpop.f32.mrb[18].mxu0 }
 0x5f9   : > { %v2385_v31 = vadd.f32 %v5968_v15, %v2160_v11  ;;  %v2313_v3 = vpop.f32.mrb[19].mxu0  ;;  %v2172_v11 = vmul.f32 %v9319_v59, %v2076_v2 }
 0x5fa   : > { %v2384_v1 = vadd.f32 %v2313_v3, %v2159_v4  ;;  %v2171_v4 = vmul.f32 %v9334_v0, %v2075_v22  ;;  %v9509_v22 = vld [vmem:[#allocation2 + $0x138] sm:$0xff] }
 0x5fb   : > { %2401 = vst.msk [vmem:[#allocation4 + $0x98] sm:$0xff] %vm436_vm0, %v2385_v31 }
 0x5fc   : > { %2400 = vst.msk [vmem:[#allocation4 + $0x90] sm:$0xff] %vm436_vm0, %v2384_v1 }
 0x600   : > { %v5971_v27 = vpop.f32.mrb[20].mxu0 }
 0x601   : > { %v2387_v16 = vadd.f32 %v5971_v27, %v2162_v5  ;;  %v2323_v8 = vpop.f32.mrb[21].mxu0 }
 0x602   : > { %v2386_v48 = vadd.f32 %v2323_v8, %v2161_v62 }
 0x603   : > { %2403 = vst.msk [vmem:[#allocation4 + $0xa8] sm:$0xff] %vm436_vm0, %v2387_v16 }
 0x604   : > { %2402 = vst.msk [vmem:[#allocation4 + $0xa0] sm:$0xff] %vm436_vm0, %v2386_v48  ;;  %v5974_v7 = vpop.f32.mrb[22].mxu0 }
 0x605   : > { %v2389_v36 = vadd.f32 %v5974_v7, %v2164_v25  ;;  %v2333_v23 = vpop.f32.mrb[23].mxu0  ;;  %v9449_v7 = vld [vmem:[#allocation2 + $0x108] sm:$0xff] }
 0x606   : > { %v2388_v21 = vadd.f32 %v2333_v23, %v2163_v57 }
 0x607   : > { %2405 = vst.msk [vmem:[#allocation4 + $0xb8] sm:$0xff] %vm436_vm0, %v2389_v36 }
 0x608   : > { %2404 = vst.msk [vmem:[#allocation4 + $0xb0] sm:$0xff] %vm436_vm0, %v2388_v21 }
 0x609   : > { %v5977_v35 = vpop.f32.mrb[24].mxu0 }
 0x60a   : > { %v2391_v28 = vadd.f32 %v5977_v35, %v2166_v9  ;;  %v2343_v50 = vpop.f32.mrb[25].mxu0 }
 0x60b   : > { %v2390_v24 = vadd.f32 %v2343_v50, %v2165_v47  ;;  %v9476_v50 = vld [vmem:[#allocation2 + $0x120] sm:$0xff] }
 0x60c   : > { %2407 = vst.msk [vmem:[#allocation4 + $0xc8] sm:$0xff] %vm436_vm0, %v2391_v28  ;;  %v9474_v28 = vld [vmem:[#allocation2 + $0x110] sm:$0xff]  ;;  %v7277_v47 = vld [vmem:[%s7740_s9] sm:$0xff] }
 0x60d   : > { %2406 = vst.msk [vmem:[#allocation4 + $0xc0] sm:$0xff] %vm436_vm0, %v2390_v24  ;;  %v5980_v26 = vpop.f32.mrb[26].mxu0  ;;  %v9571_v24 = vld [vmem:[#allocation2 + $0x170] sm:$0xff] }
 0x60e   : > { %v2393_v52 = vadd.f32 %v5980_v26, %v2168_v51  ;;  %v2353_v58 = vpop.f32.mrb[27].mxu0 }
 0x60f   : > { %v2392_v20 = vadd.f32 %v2353_v58, %v2167_v55  ;;  %v9489_v58 = vld [vmem:[#allocation2 + $0x128] sm:$0xff] }
 0x610   : > { %2409 = vst.msk [vmem:[#allocation4 + $0xd8] sm:$0xff] %vm436_vm0, %v2393_v52 }
 0x611   : > { %2408 = vst.msk [vmem:[#allocation4 + $0xd0] sm:$0xff] %vm436_vm0, %v2392_v20  ;;  %v9491_v20 = vld [vmem:[#allocation2 + $0x130] sm:$0xff] }
 0x614   : > { %v5983_v32 = vpop.f32.mrb[28].mxu0 }
 0x615   : > { %v2395_v12 = vadd.f32 %v5983_v32, %v2170_v39  ;;  %v2363_v61 = vpop.f32.mrb[29].mxu0 }
 0x616   : > { %v2394_v44 = vadd.f32 %v2363_v61, %v2169_v19  ;;  %v9569_v61 = vld [vmem:[#allocation2 + $0x168] sm:$0xff] }
 0x617   : > { %2411 = vst.msk [vmem:[#allocation4 + $0xe8] sm:$0xff] %vm436_vm0, %v2395_v12  ;;  %v9511_v12 = vld [vmem:[#allocation2 + $0x140] sm:$0xff] }
 0x618   : > { %2410 = vst.msk [vmem:[#allocation4 + $0xe0] sm:$0xff] %vm436_vm0, %v2394_v44  ;;  %v5986_v15 = vpop.f32.mrb[30].mxu0 }
 0x619   : > { %v2397_v31 = vadd.f32 %v5986_v15, %v2172_v11  ;;  %v2373_v3 = vpop.f32.mrb[31].mxu0 }
 0x61a   : > { %v2396_v17 = vadd.f32 %v2373_v3, %v2171_v4  ;;  %v9529_v3 = vld [vmem:[#allocation2 + $0x148] sm:$0xff] }
 0x61b   : > { %2413 = vst.msk [vmem:[#allocation4 + $0xf8] sm:$0xff] %vm436_vm0, %v2397_v31 }
 0x61c   : > { %2412 = vst.msk [vmem:[#allocation4 + $0xf0] sm:$0xff] %vm436_vm0, %v2396_v17  ;;  %v9531_v17 = vld [vmem:[#allocation2 + $0x150] sm:$0xff] }
 0x625   : > { %v9401_v43 = vpop.f32.mrb[32].mxu0 }
 0x626   : > { %2722 = vmax.xlane.f32.xlu1 %v9401_v43  ;;  %v9404_v1 = vpop.f32.mrb[33].mxu0 }
 0x627   : > { %2720 = vmax.xlane.f32.xlu0 %v9404_v1 }
 0x629   : > { %v9407_v59 = vpop.f32.mrb[34].mxu0 }
 0x62a   : > { %v9409_v0 = vpop.f32.mrb[35].mxu0 }
 0x62b   : > { %2726 = vmax.xlane.f32.xlu0 %v9407_v59 }
 0x62d   : > { %v9412_v56 = vpop.f32.mrb[36].mxu0 }
 0x62e   : > { %v9414_v18 = vpop.f32.mrb[37].mxu0 }
 0x62f   : > { %2724 = vmax.xlane.f32.xlu0 %v9409_v0  ;;  %2728 = vmax.xlane.f32.xlu1 %v9414_v18 }
 0x631   : > { %v9418_v5 = vpop.f32.mrb[38].mxu0 }
 0x632   : > { %v9420_v40 = vpop.f32.mrb[39].mxu0 }
 0x633   : > { %10876 = vst [vmem:[#allocation36_spill] sm:$0xff] %v9420_v40  ;;  %2730 = vmax.xlane.f32.xlu0 %v9412_v56  ;;  %2732 = vmax.xlane.f32.xlu1 %v9420_v40 }
 0x635   : > { %v9424_v62 = vpop.f32.mrb[40].mxu0 }
 0x636   : > { %v9426_v27 = vpop.f32.mrb[41].mxu0 }
 0x637   : > { %10877 = vst [vmem:[#allocation23_spill] sm:$0xff] %v9426_v27  ;;  %2734 = vmax.xlane.f32.xlu0 %v9418_v5  ;;  %2736 = vmax.xlane.f32.xlu1 %v9426_v27 }
 0x639   : > { %v9430_v63 = vpop.f32.mrb[42].mxu0 }
 0x63a   : > { %10878 = vst [vmem:[#allocation24_spill] sm:$0xff] %v9430_v63  ;;  %v9432_v16 = vpop.f32.mrb[43].mxu0 }
 0x63b   : > { %10879 = vst [vmem:[#allocation25_spill] sm:$0xff] %v9432_v16  ;;  %2738 = vmax.xlane.f32.xlu0 %v9424_v62  ;;  %2740 = vmax.xlane.f32.xlu1 %v9432_v16 }
 0x63d   : > { %v9436_v8 = vpop.f32.mrb[44].mxu0 }
 0x63e   : > { %10880 = vst [vmem:[#allocation27_spill] sm:$0xff] %v9436_v8  ;;  %v9438_v48 = vpop.f32.mrb[45].mxu0 }
 0x63f   : > { %10881 = vst [vmem:[#allocation26_spill] sm:$0xff] %v9438_v48  ;;  %2742 = vmax.xlane.f32.xlu0 %v9430_v63  ;;  %2744 = vmax.xlane.f32.xlu1 %v9438_v48  ;;  %v7279_v63 = vld [vmem:[%s7740_s9 + $0x70] sm:$0xff] }
 0x641   : > { %v9442_v25 = vpop.f32.mrb[46].mxu0 }
 0x642   : > { %10882 = vst [vmem:[#allocation29_spill] sm:$0xff] %v9442_v25  ;;  %v9444_v57 = vpop.f32.mrb[47].mxu0 }
 0x643   : > { %10883 = vst [vmem:[#allocation30_spill] sm:$0xff] %v9444_v57  ;;  %2746 = vmax.xlane.f32.xlu0 %v9436_v8  ;;  %2748 = vmax.xlane.f32.xlu1 %v9444_v57  ;;  %v7278_v8 = vld [vmem:[%s7740_s9 + $0x8] sm:$0xff] }
 0x644   : > { %v6775_v27 = vpack.i.bf16 %v7278_v8, %v7277_v47  ;;  %v7284_v8 = vld [vmem:[%s7740_s9 + $0x28] sm:$0xff] }
 0x647   : > { %2750 = vmax.xlane.f32.xlu0 %v9442_v25  ;;  %v7276_v25 = vld [vmem:[%s7740_s9 + $0x68] sm:$0xff] }
 0x6b3   : > { %v2723_v36 = vpop.xlane.xlu1 %2722 }
 0x6b4   : > { %v9454_v23 = vmax.f32 %v9449_v7, %v2723_v36  ;;  %v2721_v13 = vpop.xlane.xlu0 %2720 }
 0x6b5   : > { %v9457_v21 = vmax.f32 %v9451_v54, %v2721_v13 }
 0x6b6   : > { %3380 = vst.msk [vmem:[#allocation2 + $0x108] sm:$0xff] %vm307_vm2, %v9454_v23  ;;  %2823 = vperm.xlu0 %6613, %v9454_v23  }
 0x6b7   : > { %3379 = vst.msk [vmem:[#allocation2 + $0x100] sm:$0xff] %vm307_vm2, %v9457_v21  ;;  %2818 = vperm.xlu1 %6614, %v9457_v21  }
 0x6b8   : > { %v2727_v35 = vpop.xlane.xlu0 %2726 }
 0x6b9   : > { %v9472_v53 = vmax.f32 %v9464_v14, %v2727_v35 }
 0x6bb   : > { %3382 = vst.msk [vmem:[#allocation2 + $0x118] sm:$0xff] %vm307_vm2, %v9472_v53  ;;  %2833 = vperm.xlu1 %6614, %v9472_v53  }
 0x6bc   : > { %v2725_v51 = vpop.xlane.xlu0 %2724  ;;  %v2729_v55 = vpop.xlane.xlu1 %2728 }
 0x6bd   : > { %v9484_v26 = vmax.f32 %v9474_v28, %v2725_v51  ;;  %v9487_v52 = vmax.f32 %v9476_v50, %v2729_v55 }
 0x6bf   : > { %3381 = vst.msk [vmem:[#allocation2 + $0x110] sm:$0xff] %vm307_vm2, %v9484_v26  ;;  %3383 = vst.msk [vmem:[#allocation2 + $0x120] sm:$0xff] %vm307_vm2, %v9487_v52  ;;  %2838 = vperm.xlu0 %6613, %v9487_v52   ;;  %2828 = vperm.xlu1 %6614, %v9484_v26  }
 0x6c0   : > { %v2731_v39 = vpop.xlane.xlu0 %2730  ;;  %v2733_v2 = vpop.xlane.xlu1 %2732 }
 0x6c1   : > { %v9504_v19 = vmax.f32 %v9489_v58, %v2731_v39  ;;  %v9507_v32 = vmax.f32 %v9491_v20, %v2733_v2  ;;  %v9549_v2 = vld [vmem:[#allocation2 + $0x158] sm:$0xff] }
 0x6c3   : > { %3384 = vst.msk [vmem:[#allocation2 + $0x128] sm:$0xff] %vm307_vm2, %v9504_v19  ;;  %3385 = vst.msk [vmem:[#allocation2 + $0x130] sm:$0xff] %vm307_vm2, %v9507_v32  ;;  %2848 = vperm.xlu0 %6613, %v9507_v32   ;;  %2843 = vperm.xlu1 %6614, %v9504_v19  }
 0x6c4   : > { %v2735_v11 = vpop.xlane.xlu0 %2734  ;;  %v2737_v4 = vpop.xlane.xlu1 %2736 }
 0x6c5   : > { %v9524_v15 = vmax.f32 %v9509_v22, %v2735_v11  ;;  %v9527_v31 = vmax.f32 %v9511_v12, %v2737_v4  ;;  %v9551_v11 = vld [vmem:[#allocation2 + $0x160] sm:$0xff] }
 0x6c7   : > { %3386 = vst.msk [vmem:[#allocation2 + $0x138] sm:$0xff] %vm307_vm2, %v9524_v15  ;;  %3387 = vst.msk [vmem:[#allocation2 + $0x140] sm:$0xff] %vm307_vm2, %v9527_v31  ;;  %2858 = vperm.xlu0 %6613, %v9527_v31   ;;  %2853 = vperm.xlu1 %6614, %v9524_v15  }
 0x6c8   : > { %v2739_v35 = vpop.xlane.xlu0 %2738  ;;  %v2741_v51 = vpop.xlane.xlu1 %2740 }
 0x6c9   : > { %v9544_v55 = vmax.f32 %v9529_v3, %v2739_v35  ;;  %v9547_v39 = vmax.f32 %v9531_v17, %v2741_v51 }
 0x6cb   : > { %3388 = vst.msk [vmem:[#allocation2 + $0x148] sm:$0xff] %vm307_vm2, %v9544_v55  ;;  %3389 = vst.msk [vmem:[#allocation2 + $0x150] sm:$0xff] %vm307_vm2, %v9547_v39  ;;  %2868 = vperm.xlu0 %6613, %v9547_v39   ;;  %2863 = vperm.xlu1 %6614, %v9544_v55  }
 0x6cc   : > { %v2743_v35 = vpop.xlane.xlu0 %2742  ;;  %v2745_v51 = vpop.xlane.xlu1 %2744 }
 0x6cd   : > { %v9564_v36 = vmax.f32 %v9549_v2, %v2743_v35  ;;  %v9567_v4 = vmax.f32 %v9551_v11, %v2745_v51 }
 0x6cf   : > { %3390 = vst.msk [vmem:[#allocation2 + $0x158] sm:$0xff] %vm307_vm2, %v9564_v36  ;;  %3391 = vst.msk [vmem:[#allocation2 + $0x160] sm:$0xff] %vm307_vm2, %v9567_v4  ;;  %2878 = vperm.xlu0 %6613, %v9567_v4   ;;  %2873 = vperm.xlu1 %6614, %v9564_v36  }
 0x6d0   : > { %v2747_v35 = vpop.xlane.xlu0 %2746  ;;  %v2749_v51 = vpop.xlane.xlu1 %2748 }
 0x6d1   : > { %v9584_v6 = vmax.f32 %v9569_v61, %v2747_v35  ;;  %v9587_v13 = vmax.f32 %v9571_v24, %v2749_v51  ;;  %v7271_v35 = vld [vmem:[%s8361_s18 + $0x60] sm:$0xff]  ;;  %v7272_v51 = vld [vmem:[%s8361_s18 + $0x68] sm:$0xff] }
 0x6d2   : > { %v9603_v9 = vpack.i.bf16 %v7272_v51, %v7271_v35  ;;  %v7273_v35 = vld [vmem:[%s8361_s18 + $0x70] sm:$0xff]  ;;  %v7274_v51 = vld [vmem:[%s8361_s18 + $0x78] sm:$0xff] }
 0x6d3   : > { %3392 = vst.msk [vmem:[#allocation2 + $0x168] sm:$0xff] %vm307_vm2, %v9584_v6  ;;  %3393 = vst.msk [vmem:[#allocation2 + $0x170] sm:$0xff] %vm307_vm2, %v9587_v13  ;;  %2883 = vperm.xlu1 %6614, %v9584_v6   ;;  %2888 = vperm.xlu0 %6613, %v9587_v13   ;;  %v9617_v48 = vpack.i.bf16 %v7274_v51, %v7273_v35  ;;  %v7280_v35 = vld [vmem:[%s7740_s9 + $0x78] sm:$0xff] }
 0x6d4   : > { %v2751_v44 = vpop.xlane.xlu0 %2750  ;;  %v6810_v51 = vpack.i.bf16 %v7280_v35, %v7279_v63  ;;  %v7286_v63 = vld [vmem:[%s7740_s9 + $0x38] sm:$0xff] }
 0x6d5   : > { %v9606_v57 = vmax.f32 %v9589_v60, %v2751_v44  ;;  %v7275_v44 = vld [vmem:[%s7740_s9 + $0x60] sm:$0xff] }
 0x6d6   : > { %v6805_v16 = vpack.i.bf16 %v7276_v25, %v7275_v44  ;;  %v7281_v25 = vld [vmem:[%s7740_s9 + $0x10] sm:$0xff]  ;;  %v7282_v44 = vld [vmem:[%s7740_s9 + $0x18] sm:$0xff] }
 0x6d7   : > { %3394 = vst.msk [vmem:[#allocation2 + $0x178] sm:$0xff] %vm307_vm2, %v9606_v57  ;;  %2893 = vperm.xlu1 %6614, %v9606_v57   ;;  %6766 = vrot.lane.b32.xlu0 %v9603_v9, %s7490_s16  ;;  %v6780_v40 = vpack.i.bf16 %v7282_v44, %v7281_v25  ;;  %v7289_v25 = vld [vmem:[%s7740_s9 + $0x50] sm:$0xff]  ;;  %v7290_v44 = vld [vmem:[%s7740_s9 + $0x58] sm:$0xff] }
 0x6db   : > { %6771 = vrot.lane.b32.xlu1 %v9617_v48, %s7490_s16  ;;  %6806 = vrot.lane.b32.xlu0 %v6805_v16, %s7491_s20  ;;  %v7283_v16 = vld [vmem:[%s7740_s9 + $0x20] sm:$0xff] }
 0x6dc   : > { %v6785_v47 = vpack.i.bf16 %v7284_v8, %v7283_v16  ;;  %v6800_v16 = vpack.i.bf16 %v7290_v44, %v7289_v25  ;;  %v10896_v25 = vsub.f32 %v9511_v12, %v9527_v31  ;;  %v7297_v12 = vld [vmem:[%s8361_s18 + $0x20] sm:$0xff]  ;;  %v7298_v31 = vld [vmem:[%s8361_s18 + $0x28] sm:$0xff] }
 0x6de   : > { %v2800_v44 = vmul.f32 1.442695, %v10896_v25 }
 0x6df   : > { %6776 = vrot.lane.b32.xlu1 %v6775_v27, %s7491_s20  ;;  %6811 = vrot.lane.b32.xlu0 %v6810_v51, %s7491_s20  ;;  %v7285_v27 = vld [vmem:[%s7740_s9 + $0x30] sm:$0xff] }
 0x6e0   : > { %v6790_v35 = vpack.i.bf16 %v7286_v63, %v7285_v27  ;;  %v4363_v63 = vld [vmem:[#allocation3] sm:$0xff] }
 0x6e3   : > { %6781 = vrot.lane.b32.xlu1 %v6780_v40, %s7491_s20  ;;  %3395 = vrot.lane.b32.xlu0 %v7781_v10, %s7491_s20  ;;  %v7287_v40 = vld [vmem:[%s7740_s9 + $0x40] sm:$0xff]  ;;  %v7288_v10 = vld [vmem:[%s7740_s9 + $0x48] sm:$0xff] }
 0x6e4   : > { %v6795_v51 = vpack.i.bf16 %v7288_v10, %v7287_v40  ;;  %v4365_v10 = vld [vmem:[#allocation3 + $0x10] sm:$0xff] }
 0x6e7   : > { %6786 = vrot.lane.b32.xlu1 %v6785_v47, %s7491_s20  ;;  %3397 = vrot.lane.b32.xlu0 %v7855_v29, %s7491_s20  ;;  %v10884_v29 = vsub.f32 %v9449_v7, %v9454_v23  ;;  %v10888_v7 = vld [vmem:[#allocation19_spill] sm:$0xff]  ;;  %v10891_v23 = vld [vmem:[#allocation21_spill] sm:$0xff] }
 0x6eb   : > { %6791 = vrot.lane.b32.xlu1 %v6790_v35, %s7491_s20  ;;  %3401 = vrot.lane.b32.xlu0 %v7863_v33, %s7491_s20  ;;  %v2786_v33 = vmul.f32 1.442695, %v10884_v29  ;;  %v7295_v29 = vld [vmem:[%s8361_s18] sm:$0xff] }
 0x6ed   : > { %6983 = vpow2.f32 %v2786_v33  ;;  %v7296_v33 = vld [vmem:[%s8361_s18 + $0x8] sm:$0xff] }
 0x6ef   : > { %6796 = vrot.lane.b32.xlu1 %v6795_v51, %s7491_s20  ;;  %3403 = vrot.lane.b32.xlu0 %v7867_v34, %s7491_s20  ;;  %v10885_v34 = vsub.f32 %v9451_v54, %v9457_v21  ;;  %v10890_v54 = vld [vmem:[#allocation20_spill] sm:$0xff]  ;;  %v10892_v21 = vsub.f32 %v9464_v14, %v9472_v53  ;;  %v10895_v14 = vsub.f32 %v9509_v22, %v9524_v15  ;;  %v7293_v22 = vld [vmem:[%s8361_s18 + $0x40] sm:$0xff]  ;;  %v7294_v15 = vld [vmem:[%s8361_s18 + $0x48] sm:$0xff] }
 0x6f0   : > { %v6835_v40 = vpack.i.bf16 %v7294_v15, %v7293_v22 }
 0x6f1   : > { %v2798_v53 = vmul.f32 1.442695, %v10895_v14 }
 0x6f3   : > { %6801 = vrot.lane.b32.xlu1 %v6800_v16, %s7491_s20  ;;  %3405 = vrot.lane.b32.xlu0 %v7873_v37, %s7491_s20  ;;  %v2784_v37 = vmul.f32 1.442695, %v10885_v34  ;;  %v6815_v34 = vpack.i.bf16 %v7296_v33, %v7295_v29 }
 0x6f5   : > { %6985 = vpow2.f32 %v2784_v37  ;;  %v10897_v37 = vsub.f32 %v9531_v17, %v9547_v39  ;;  %v7299_v17 = vld [vmem:[%s8361_s18 + $0x30] sm:$0xff]  ;;  %v7300_v39 = vld [vmem:[%s8361_s18 + $0x38] sm:$0xff] }
 0x6f7   : > { %3399 = vrot.lane.b32.xlu1 %v7857_v30, %s7491_s20  ;;  %3407 = vrot.lane.b32.xlu0 %v7877_v38, %s7491_s20  ;;  %v10886_v30 = vsub.f32 %v9476_v50, %v9487_v52  ;;  %v10893_v50 = vld [vmem:[#allocation22_spill] sm:$0xff] }
 0x6f9   : > { %v2792_v38 = vmul.f32 1.442695, %v10886_v30  ;;  %v2804_v30 = vmul.f32 1.442695, %v10897_v37 }
 0x6fb   : > { %3409 = vrot.lane.b32.xlu1 %v7883_v41, %s7491_s20  ;;  %3411 = vrot.lane.b32.xlu0 %v7887_v42, %s7491_s20  ;;  %v10887_v41 = vsub.f32 %v9474_v28, %v9484_v26  ;;  %6987 = vpow2.f32 %v2792_v38  ;;  %v2790_v28 = vmul.f32 1.442695, %v10892_v21  ;;  %v10894_v26 = vsub.f32 %v9489_v58, %v9504_v19  ;;  %v7291_v58 = vld [vmem:[%s8361_s18 + $0x10] sm:$0xff]  ;;  %v7292_v19 = vld [vmem:[%s8361_s18 + $0x18] sm:$0xff] }
 0x6fc   : > { %v6820_v27 = vpack.i.bf16 %v7292_v19, %v7291_v58 }
 0x6fd   : > { %v2788_v42 = vmul.f32 1.442695, %v10887_v41  ;;  %v2794_v52 = vmul.f32 1.442695, %v10894_v26  ;;  %v6825_v41 = vpack.i.bf16 %v7298_v31, %v7297_v12 }
 0x6ff   : > { %3413 = vrot.lane.b32.xlu1 %v7893_v45, %s7491_s20  ;;  %3415 = vrot.lane.b32.xlu0 %v7897_v46, %s7491_s20  ;;  %v10889_v45 = vsub.f32 %v9491_v20, %v9507_v32  ;;  %6989 = vpow2.f32 %v2788_v42 }
 0x701   : > { %v2796_v46 = vmul.f32 1.442695, %v10889_v45  ;;  %v6830_v45 = vpack.i.bf16 %v7300_v39, %v7299_v17 }
 0x703   : > { %3417 = vrot.lane.b32.xlu1 %v7903_v49, %s7491_s20  ;;  %3419 = vrot.lane.b32.xlu0 %v10888_v7, %s7491_s20  ;;  %6991 = vpow2.f32 %v2796_v46  ;;  %v9693_v49 = vpop.eup %6983  ;;  %v4364_v46 = vld [vmem:[#allocation3 + $0x8] sm:$0xff] }
 0x704   : > { %6993 = vpow2.f32 %v2790_v28  ;;  %v9701_v20 = vpop.eup %6985 }
 0x705   : > { %v9703_v32 = vpop.eup %6987  ;;  %6995 = vpow2.f32 %v2794_v52 }
 0x706   : > { %6997 = vpow2.f32 %v2798_v53 }
 0x707   : > { %3421 = vrot.lane.b32.xlu1 %v10890_v54, %s7491_s20  ;;  %3423 = vrot.lane.b32.xlu0 %v10891_v23, %s7491_s20  ;;  %6999 = vrcp.f32 %v4363_v63  ;;  %v10899_v54 = vsub.f32 %v9571_v24, %v9587_v13  ;;  %v10901_v24 = vsub.f32 %v9549_v2, %v9564_v36 }
 0x708   : > { %7001 = vrcp.f32 %v4365_v10 }
 0x709   : > { %v9710_v8 = vpop.eup %6989  ;;  %7003 = vpow2.f32 %v2800_v44  ;;  %v2812_v23 = vmul.f32 1.442695, %v10899_v54  ;;  %v2806_v13 = vmul.f32 1.442695, %v10901_v24 }
 0x70a   : > { %7005 = vpow2.f32 %v2804_v30 }
 0x70b   : > { %3425 = vrot.lane.b32.xlu1 %v10893_v50, %s7491_s20  ;;  %3065 = vperm.xlu0 %6613, %v9693_v49   ;;  %v10900_v50 = vsub.f32 %v9529_v3, %v9544_v55  ;;  %v10902_v3 = vsub.f32 %v9569_v61, %v9584_v6 }
 0x70d   : > { %v9712_v47 = vpop.eup %6991  ;;  %v2802_v26 = vmul.f32 1.442695, %v10900_v50  ;;  %v2810_v55 = vmul.f32 1.442695, %v10902_v3  ;;  %v10904_v50 = vld [vmem:[#allocation36_spill] sm:$0xff] }
 0x70e   : > { %v9718_v35 = vpop.eup %6993 }
 0x70f   : > { %3060 = vperm.xlu1 %6614, %v9701_v20   ;;  %3080 = vperm.xlu0 %6613, %v9703_v32   ;;  %v9724_v51 = vpop.eup %6995 }
 0x710   : > { %v9731_v16 = vpop.eup %6997 }
 0x711   : > { %v7000_v38 = vpop.eup %6999 }
 0x712   : > { %v7002_v7 = vpop.eup %7001 }
 0x713   : > { %3070 = vperm.xlu1 %6614, %v9710_v8   ;;  %3090 = vperm.xlu0 %6613, %v9712_v47   ;;  %v9753_v21 = vpop.eup %7003 }
 0x714   : > { %v9762_v52 = vpop.eup %7005 }
 0x717   : > { %3075 = vperm.xlu1 %6614, %v9718_v35   ;;  %6821 = vrot.lane.b32.xlu0 %v6820_v27, %s7491_s20 }
 0x71b   : > { %3085 = vperm.xlu1 %6614, %v9724_v51   ;;  %6836 = vrot.lane.b32.xlu0 %v6835_v40, %s7491_s20 }
 0x71f   : > { %3095 = vperm.xlu1 %6614, %v9731_v16   ;;  %6846 = vrot.lane.b32.xlu0 %v9603_v9, %s7491_s20  ;;  %v10898_v9 = vsub.f32 %v9551_v11, %v9567_v4  ;;  %v7301_v11 = vld [vmem:[%s8361_s18 + $0x50] sm:$0xff]  ;;  %v7302_v4 = vld [vmem:[%s8361_s18 + $0x58] sm:$0xff] }
 0x720   : > { %v6840_v28 = vpack.i.bf16 %v7302_v4, %v7301_v11 }
 0x721   : > { %v2808_v42 = vmul.f32 1.442695, %v10898_v9 }
 0x723   : > { %6816 = vrot.lane.b32.xlu1 %v6815_v34, %s7491_s20  ;;  %4413 = vperm.xlu0 %6613, %v7000_v38   ;;  %7007 = vpow2.f32 %v2808_v42 }
 0x724   : > { %7009 = vrcp.f32 %v4364_v46 }
 0x725   : > { %7011 = vpow2.f32 %v2812_v23 }
 0x726   : > { %7013 = vpow2.f32 %v2802_v26 }
 0x727   : > { %6826 = vrot.lane.b32.xlu1 %v6825_v41, %s7491_s20  ;;  %4423 = vperm.xlu0 %6613, %v7002_v7   ;;  %7015 = vpow2.f32 %v2806_v13  ;;  %v10905_v13 = vld [vmem:[#allocation24_spill] sm:$0xff] }
 0x728   : > { %7017 = vpow2.f32 %v2810_v55 }
 0x72b   : > { %6831 = vrot.lane.b32.xlu1 %v6830_v45, %s7491_s20  ;;  %3100 = vperm.xlu0 %6613, %v9753_v21  }
 0x72d   : > { %v9769_v14 = vpop.eup %7007 }
 0x72e   : > { %v7010_v53 = vpop.eup %7009 }
 0x72f   : > { %6841 = vrot.lane.b32.xlu1 %v6840_v28, %s7491_s20  ;;  %3110 = vperm.xlu0 %6613, %v9762_v52   ;;  %v9777_v58 = vpop.eup %7011 }
 0x730   : > { %v9784_v63 = vpop.eup %7013 }
 0x731   : > { %v9787_v61 = vpop.eup %7015 }
 0x732   : > { %v9790_v40 = vpop.eup %7017 }
 0x733   : > { %6851 = vrot.lane.b32.xlu1 %v9617_v48, %s7491_s20  ;;  %3120 = vperm.xlu0 %6613, %v9769_v14   ;;  %v10903_v48 = vsub.f32 %v9589_v60, %v9606_v57 }
 0x735   : > { %v2814_v36 = vmul.f32 1.442695, %v10903_v48  ;;  %v2824_v22 = vpop.permute.xlu0 %2823  ;;  %v10906_v48 = vld [vmem:[#allocation23_spill] sm:$0xff] }
 0x736   : > { %v2819_v19 = vpop.permute.xlu1 %2818  ;;  %v2897_v42 = vsub.f32 %v9401_v43, %v2824_v22 }
 0x737   : > { %v2896_v27 = vsub.f32 %v9404_v1, %v2819_v19  ;;  %4418 = vperm.xlu1 %6614, %v7010_v53   ;;  %3130 = vperm.xlu0 %6613, %v9777_v58  }
 0x738   : > { %v2914_v45 = vmul.f32 1.442695, %v2897_v42  ;;  %v10909_v42 = vld [vmem:[#allocation29_spill] sm:$0xff] }
 0x739   : > { %v2912_v2 = vmul.f32 1.442695, %v2896_v27 }
 0x73a   : > { %v2834_v6 = vpop.permute.xlu1 %2833 }
 0x73b   : > { %7019 = vpow2.f32 %v2912_v2  ;;  %3105 = vperm.xlu1 %6614, %v9784_v63   ;;  %v2899_v46 = vsub.f32 %v9407_v59, %v2834_v6 }
 0x73c   : > { %7021 = vpow2.f32 %v2814_v36 }
 0x73d   : > { %v2918_v28 = vmul.f32 1.442695, %v2899_v46 }
 0x73e   : > { %v2839_v1 = vpop.permute.xlu0 %2838  ;;  %v2829_v15 = vpop.permute.xlu1 %2828 }
 0x73f   : > { %3115 = vperm.xlu1 %6614, %v9787_v61   ;;  %v2898_v33 = vsub.f32 %v9409_v0, %v2829_v15  ;;  %v2900_v12 = vsub.f32 %v9414_v18, %v2839_v1  ;;  %v10907_v15 = vld [vmem:[#allocation27_spill] sm:$0xff] }
 0x741   : > { %v2916_v30 = vmul.f32 1.442695, %v2898_v33  ;;  %v2920_v7 = vmul.f32 1.442695, %v2900_v12 }
 0x742   : > { %v2849_v10 = vpop.permute.xlu0 %2848  ;;  %v2844_v57 = vpop.permute.xlu1 %2843 }
 0x743   : > { %3125 = vperm.xlu1 %6614, %v9790_v40   ;;  %v2901_v38 = vsub.f32 %v9412_v56, %v2844_v57  ;;  %7023 = vpow2.f32 %v2916_v30  ;;  %v2902_v26 = vsub.f32 %v10904_v50, %v2849_v10  ;;  %v10908_v30 = vld [vmem:[#allocation25_spill] sm:$0xff] }
 0x745   : > { %v7020_v60 = vpop.eup %7019  ;;  %v2922_v9 = vmul.f32 1.442695, %v2901_v38  ;;  %v2924_v27 = vmul.f32 1.442695, %v2902_v26 }
 0x746   : > { %v9793_v25 = vpop.eup %7021  ;;  %v9795_v44 = vpop.permute.xlu0 %2858  ;;  %6075 = vmatprep.mubr.f32.mxu1 %v7020_v60 }
 0x747   : > { %v2854_v29 = vpop.permute.xlu1 %2853  ;;  %3135 = vperm.xlu1 %6614, %v9793_v25   ;;  %7025 = vpow2.f32 %v2922_v9  ;;  %v2904_v36 = vsub.f32 %v10906_v48, %v9795_v44 }
 0x748   : > { %v2903_v39 = vsub.f32 %v9418_v5, %v2854_v29  ;;  %7027 = vpow2.f32 %v2920_v7 }
 0x749   : > { %7029 = vpow2.f32 %v2914_v45 }
 0x74a   : > { %v9799_v34 = vpop.permute.xlu0 %2868  ;;  %v2926_v54 = vmul.f32 1.442695, %v2903_v39 }
 0x74b   : > { %v2864_v37 = vpop.permute.xlu1 %2863  ;;  %v2906_v44 = vsub.f32 %v10908_v30, %v9799_v34  ;;  %v10911_v34 = vld [vmem:[#allocation26_spill] sm:$0xff] }
 0x74c   : > { %v2905_v23 = vsub.f32 %v9424_v62, %v2864_v37  ;;  %7031 = vpow2.f32 %v2926_v54  ;;  %v2928_v37 = vmul.f32 1.442695, %v2904_v36 }
 0x74d   : > { %v7024_v43 = vpop.eup %7023  ;;  %7033 = vpow2.f32 %v2918_v28 }
 0x74e   : > { %v9803_v31 = vpop.permute.xlu0 %2878  ;;  %v2930_v55 = vmul.f32 1.442695, %v2905_v23 }
 0x74f   : > { %v2874_v41 = vpop.permute.xlu1 %2873  ;;  %v2908_v54 = vsub.f32 %v10911_v34, %v9803_v31 }
 0x750   : > { %v2907_v5 = vsub.f32 %v10905_v13, %v2874_v41  ;;  %7035 = vpow2.f32 %v2930_v55 }
 0x751   : > { %v7026_v62 = vpop.eup %7025  ;;  %7037 = vpow2.f32 %v2924_v27  ;;  %v2936_v26 = vmul.f32 1.442695, %v2908_v54 }
 0x752   : > { %v9806_v17 = vpop.permute.xlu0 %2888  ;;  %v2934_v2 = vmul.f32 1.442695, %v2907_v5  ;;  %v7028_v29 = vpop.eup %7027 }
 0x753   : > { %v2884_v0 = vpop.permute.xlu1 %2883  ;;  %v7030_v41 = vpop.eup %7029 }
 0x754   : > { %v2909_v10 = vsub.f32 %v10907_v15, %v2884_v0  ;;  %7039 = vpow2.f32 %v2934_v2 }
 0x755   : > { %7041 = vpow2.f32 %v2928_v37 }
 0x756   : > { %v6767_v56 = vpop.permute.xlu0 %6766  ;;  %2977 = vadd.xlane.f32.xlu0 %v7020_v60  ;;  %v2938_v9 = vmul.f32 1.442695, %v2909_v10  ;;  %v7032_v46 = vpop.eup %7031 }
 0x757   : > { %v2894_v18 = vpop.permute.xlu1 %2893  ;;  %v6769_v11 = vunpack.i.h.bf16 %v6767_v56  ;;  %v6768_v4 = vunpack.i.l.bf16 %v6767_v56  ;;  %v2932_v56 = vmul.f32 1.442695, %v2906_v44 }
 0x758   : > { %v2911_v7 = vsub.f32 %v10909_v42, %v2894_v18  ;;  %7043 = vpow2.f32 %v2938_v9 }
 0x759   : > { %v6443_v24 = vpack.c.bf16 %v6769_v11, %v6768_v4  ;;  %v7034_v11 = vpop.eup %7033  ;;  %7045 = vpow2.f32 %v2932_v56 }
 0x75a   : > { %v9813_v3 = vpop.permute.xlu0 %6806  ;;  %2981 = vadd.xlane.f32.xlu0 %v7024_v43  ;;  %v2942_v4 = vmul.f32 1.442695, %v2911_v7  ;;  %v7036_v50 = vpop.eup %7035 }
 0x75b   : > { %v6772_v59 = vpop.permute.xlu1 %6771  ;;  %6444 = vmatprep.subr.bf16.mxu1 %v6443_v24  ;;  %v7038_v13 = vpop.eup %7037  ;;  %v6809_v56 = vunpack.i.h.bf16 %v9813_v3 }
 0x75c   : > { %v6774_v53 = vunpack.i.h.bf16 %v6772_v59  ;;  %v6773_v19 = vunpack.i.l.bf16 %v6772_v59  ;;  %6446 = vmatpush3.bf16.msra.mxu1 %v6443_v24  ;;  %7047 = vpow2.f32 %v2942_v4 }
 0x75d   : > { %7049 = vpow2.f32 %v2936_v26 }
 0x75e   : > { %v9817_v22 = vpop.permute.xlu0 %6811  ;;  %2987 = vadd.xlane.f32.xlu0 %v7026_v62  ;;  %v6447_v1 = vpack.c.bf16 %v6774_v53, %v6773_v19  ;;  %v7040_v55 = vpop.eup %7039 }
 0x75f   : > { %v6777_v6 = vpop.permute.xlu1 %6776  ;;  %v7042_v27 = vpop.eup %7041  ;;  %v6814_v4 = vunpack.i.h.bf16 %v9817_v22 }
 0x760   : > { %v6779_v57 = vunpack.i.h.bf16 %v6777_v6  ;;  %v6778_v60 = vunpack.i.l.bf16 %v6777_v6  ;;  %6448 = vmatprep.subr.bf16.mxu1 %v6447_v1 }
 0x761   : > { %6450 = vmatpush3.bf16.msra.mxu1 %v6447_v1 }
 0x762   : > { %v6451_v33 = vpack.c.bf16 %v6779_v57, %v6778_v60  ;;  %v9822_v38 = vpop.permute.xlu0 %3395  ;;  %2985 = vadd.xlane.f32.xlu0 %v7028_v29  ;;  %v7044_v36 = vpop.eup %7043 }
 0x763   : > { %v6782_v12 = vpop.permute.xlu1 %6781  ;;  %v7046_v1 = vpop.eup %7045 }
 0x764   : > { %v6784_v0 = vunpack.i.h.bf16 %v6782_v12  ;;  %v6783_v39 = vunpack.i.l.bf16 %v6782_v12  ;;  %6453 = vmatprep.subr.msk.bf16.mxu1 %vm7748_vm1, %v6451_v33  ;;  %6076 = vmatmul.mubr.f32.vlgmr.msra.gmra.mrb[32].mxu1 %v7030_v41 }
 0x765   : > { %6078 = vmatprep.mubr.f32.mxu1 %v7024_v43  ;;  %v10912_v43 = vld [vmem:[#allocation30_spill] sm:$0xff] }
 0x766   : > { %2991 = vadd.xlane.f32.xlu0 %v7032_v46  ;;  %v6457_v28 = vpack.c.bf16 %v6784_v0, %v6783_v39  ;;  %v9829_v18 = vpop.permute.xlu0 %3397  ;;  %v2910_v24 = vsub.f32 %v10912_v43, %v9806_v17  ;;  %v7048_v15 = vpop.eup %7047 }
 0x767   : > { %v6787_v23 = vpop.permute.xlu1 %6786  ;;  %v7050_v60 = vpop.eup %7049 }
 0x768   : > { %6079 = vmatmul.mubr.f32.gmra.mrb[34].mxu1 %v7034_v11  ;;  %v6789_v5 = vunpack.i.h.bf16 %v6787_v23  ;;  %v6788_v59 = vunpack.i.l.bf16 %v6787_v23  ;;  %v2940_v17 = vmul.f32 1.442695, %v2910_v24 }
 0x769   : > { %6081 = vmatprep.mubr.f32.mxu1 %v7028_v29 }
 0x76a   : > { %6456 = vmatpush3.bf16.xpose.msk.msra.mxu1 %vm7748_vm1, %v6451_v33  ;;  %2995 = vadd.xlane.f32.xlu0 %v7036_v50  ;;  %v9837_v53 = vpop.permute.xlu0 %3401  ;;  %v6463_v19 = vpack.c.bf16 %v6789_v5, %v6788_v59  ;;  %7051 = vpow2.f32 %v2940_v17 }
 0x76b   : > { %v6792_v31 = vpop.permute.xlu1 %6791  ;;  %2979 = vadd.xlane.f32.xlu1 %v7030_v41  ;;  %6459 = vmatprep.subr.msk.bf16.mxu1 %vm7748_vm1, %v6457_v28 }
 0x76c   : > { %6082 = vmatmul.mubr.f32.gmra.mrb[36].mxu1 %v7026_v62  ;;  %v6794_v2 = vunpack.i.h.bf16 %v6792_v31  ;;  %v6793_v62 = vunpack.i.l.bf16 %v6792_v31 }
 0x76d   : > { %6084 = vmatprep.mubr.f32.mxu1 %v7038_v13 }
 0x76e   : > { %2999 = vadd.xlane.f32.xlu0 %v7040_v55  ;;  %v9841_v6 = vpop.permute.xlu0 %3403  ;;  %v6469_v57 = vpack.c.bf16 %v6794_v2, %v6793_v62 }
 0x76f   : > { %2983 = vadd.xlane.f32.xlu1 %v7034_v11  ;;  %v6797_v48 = vpop.permute.xlu1 %6796 }
 0x770   : > { %6085 = vmatmul.mubr.f32.gmra.mrb[38].mxu1 %v7032_v46  ;;  %v6799_v33 = vunpack.i.h.bf16 %v6797_v48  ;;  %v6798_v37 = vunpack.i.l.bf16 %v6797_v48 }
 0x771   : > { %6087 = vmatprep.mubr.f32.mxu1 %v7042_v27 }
 0x772   : > { %6462 = vmatpush3.bf16.xpose.msk.msra.mxu1 %vm7748_vm1, %v6457_v28  ;;  %3003 = vadd.xlane.f32.xlu0 %v7044_v36  ;;  %v3406_v29 = vpop.permute.xlu0 %3405  ;;  %v6475_v12 = vpack.c.bf16 %v6799_v33, %v6798_v37  ;;  %v6813_v28 = vunpack.i.l.bf16 %v9817_v22 }
 0x773   : > { %2989 = vadd.xlane.f32.xlu1 %v7038_v13  ;;  %6465 = vmatprep.subr.msk.bf16.mxu1 %vm7748_vm1, %v6463_v19  ;;  %v6802_v10 = vpop.permute.xlu1 %6801 }
 0x774   : > { %6088 = vmatmul.mubr.f32.gmra.mrb[40].mxu1 %v7036_v50  ;;  %v7052_v30 = vpop.eup %7051  ;;  %v6804_v42 = vunpack.i.h.bf16 %v6802_v10  ;;  %v6803_v7 = vunpack.i.l.bf16 %v6802_v10  ;;  %v6493_v26 = vpack.c.bf16 %v6814_v4, %v6813_v28  ;;  %v2954_v28 = vld [vmem:[#allocation3 + $0x148] sm:$0xff] }
 0x775   : > { %6090 = vmatprep.mubr.f32.mxu1 %v7046_v1 }
 0x776   : > { %3007 = vadd.xlane.f32.xlu0 %v7048_v15  ;;  %v3408_v41 = vpop.permute.xlu0 %3407  ;;  %v6481_v39 = vpack.c.bf16 %v6804_v42, %v6803_v7  ;;  %v2950_v42 = vld [vmem:[#allocation3 + $0x128] sm:$0xff] }
 0x777   : > { %2993 = vadd.xlane.f32.xlu1 %v7042_v27  ;;  %v3400_v44 = vpop.permute.xlu1 %3399 }
 0x778   : > { %6091 = vmatmul.mubr.f32.gmra.mrb[42].mxu1 %v7040_v55 }
 0x779   : > { %6093 = vmatprep.mubr.f32.mxu1 %v7050_v60 }
 0x77a   : > { %6468 = vmatpush3.bf16.xpose.msk.msra.mxu1 %vm7748_vm1, %v6463_v19  ;;  %v3412_v0 = vpop.permute.xlu0 %3411 }
 0x77b   : > { %2997 = vadd.xlane.f32.xlu1 %v7046_v1  ;;  %6471 = vmatprep.subr.msk.bf16.mxu1 %vm7748_vm1, %v6469_v57  ;;  %v3410_v9 = vpop.permute.xlu1 %3409 }
 0x77c   : > { %6094 = vmatmul.mubr.f32.gmra.mrb[44].mxu1 %v7044_v36 }
 0x77d   : > { %6096 = vmatprep.mubr.f32.mxu1 %v7052_v30 }
 0x77e   : > { %v3416_v34 = vpop.permute.xlu0 %3415 }
 0x77f   : > { %3001 = vadd.xlane.f32.xlu1 %v7050_v60  ;;  %v3414_v46 = vpop.permute.xlu1 %3413 }
 0x780   : > { %6097 = vmatmul.mubr.f32.gmra.mrb[46].mxu1 %v7048_v15 }
 0x781   : > { %6131 = vmatprep.mubr.msk.f32.mxu1 %vm436_vm0, %v9822_v38  ;;  %v6808_v38 = vunpack.i.l.bf16 %v9813_v3 }
 0x782   : > { %6474 = vmatpush3.bf16.xpose.msk.msra.mxu1 %vm7748_vm1, %v6469_v57  ;;  %v3420_v11 = vpop.permute.xlu0 %3419 }
 0x783   : > { %3005 = vadd.xlane.f32.xlu1 %v7052_v30  ;;  %6477 = vmatprep.subr.msk.bf16.mxu1 %vm7748_vm1, %v6475_v12  ;;  %v3418_v54 = vpop.permute.xlu1 %3417  ;;  %v6487_v23 = vpack.c.bf16 %v6809_v56, %v6808_v38  ;;  %v2949_v56 = vld [vmem:[#allocation3 + $0x120] sm:$0xff] }
 0x786   : > { %v3424_v3 = vpop.permute.xlu0 %3423 }
 0x787   : > { %v3422_v50 = vpop.permute.xlu1 %3421 }
 0x78a   : > { %6480 = vmatpush3.bf16.xpose.msk.msra.mxu1 %vm7748_vm1, %v6475_v12  ;;  %v9871_v24 = vpop.permute.xlu0 %3065 }
 0x78b   : > { %6483 = vmatprep.subr.msk.bf16.mxu1 %vm7748_vm1, %v6481_v39  ;;  %v3426_v43 = vpop.permute.xlu1 %3425 }
 0x78e   : > { %v9877_v22 = vpop.permute.xlu0 %3080 }
 0x78f   : > { %v9873_v31 = vpop.permute.xlu1 %3060 }
 0x792   : > { %6486 = vmatpush3.bf16.xpose.msk.msra.mxu1 %vm7748_vm1, %v6481_v39  ;;  %v9881_v5 = vpop.permute.xlu0 %3090  ;;  %v2966_v39 = vmul.f32 %v9724_v51, %v2950_v42 }
 0x793   : > { %6489 = vmatprep.subr.msk.bf16.mxu1 %vm7748_vm1, %v6487_v23  ;;  %v9879_v13 = vpop.permute.xlu1 %3070 }
 0x796   : > { %v9892_v45 = vpop.permute.xlu0 %6821 }
 0x797   : > { %v9886_v59 = vpop.permute.xlu1 %3075 }
 0x79a   : > { %6492 = vmatpush3.bf16.xpose.msk.msra.mxu1 %vm7748_vm1, %v6487_v23  ;;  %v9898_v17 = vpop.permute.xlu0 %6836 }
 0x79b   : > { %6495 = vmatprep.subr.msk.bf16.mxu1 %vm7748_vm1, %v6493_v26  ;;  %v9895_v55 = vpop.permute.xlu1 %3085 }
 0x7a2   : > { %6498 = vmatpush3.bf16.xpose.msk.msra.mxu1 %vm7748_vm1, %v6493_v26  ;;  %v2946_v26 = vld [vmem:[#allocation3 + $0x108] sm:$0xff] }
 0x7a9   : > { %6132 = vmatmul.mubr.msk.f32.vlgmr.msra.gmra.mrb[48].mxu1 %vm436_vm0, %v9829_v18  ;;  %v9902_v18 = vpop.permute.xlu1 %3095 }
 0x7aa   : > { %6134 = vmatprep.mubr.msk.f32.mxu1 %vm436_vm0, %v3400_v44  ;;  %v2947_v44 = vld [vmem:[#allocation3 + $0x110] sm:$0xff] }
 0x7ad   : > { %6135 = vmatmul.mubr.msk.f32.gmra.mrb[50].mxu1 %vm436_vm0, %v9837_v53  ;;  %v9906_v53 = vpop.permute.xlu0 %6846  ;;  %v9909_v19 = vpop.permute.xlu1 %6816 }
 0x7ae   : > { %6137 = vmatprep.mubr.msk.f32.mxu1 %vm436_vm0, %v9841_v6 }
 0x7b1   : > { %6138 = vmatmul.mubr.msk.f32.gmra.mrb[52].mxu1 %vm436_vm0, %v3406_v29  ;;  %v9912_v27 = vpop.permute.xlu0 %4413  ;;  %v9916_v48 = vpop.permute.xlu1 %6826  ;;  %v2945_v29 = vld [vmem:[#allocation3 + $0x100] sm:$0xff] }
 0x7b2   : > { %6140 = vmatprep.mubr.msk.f32.mxu1 %vm436_vm0, %v3408_v41  ;;  %v2961_v37 = vmul.f32 %v9701_v20, %v2945_v29  ;;  %v2963_v41 = vmul.f32 %v9710_v8, %v2947_v44  ;;  %v2952_v8 = vld [vmem:[#allocation3 + $0x138] sm:$0xff] }
 0x7b3   : > { %v2956_v29 = vld [vmem:[#allocation3 + $0x158] sm:$0xff] }
 0x7b4   : > { %v2948_v44 = vld [vmem:[#allocation3 + $0x118] sm:$0xff] }
 0x7b5   : > { %6141 = vmatmul.mubr.msk.f32.gmra.mrb[54].mxu1 %vm436_vm0, %v3410_v9  ;;  %v9919_v36 = vpop.permute.xlu0 %4423  ;;  %v9921_v2 = vpop.permute.xlu1 %6831 }
 0x7b6   : > { %6143 = vmatprep.mubr.msk.f32.mxu1 %vm436_vm0, %v3412_v0 }
 0x7b9   : > { %6144 = vmatmul.mubr.msk.f32.gmra.mrb[56].mxu1 %vm436_vm0, %v3414_v46  ;;  %v9923_v62 = vpop.permute.xlu0 %3100  ;;  %v9925_v6 = vpop.permute.xlu1 %6841 }
 0x7ba   : > { %6146 = vmatprep.mubr.msk.f32.mxu1 %vm436_vm0, %v3416_v34  ;;  %v2965_v34 = vmul.f32 %v9703_v32, %v2949_v56  ;;  %v2962_v32 = vmul.f32 %v9693_v49, %v2946_v26 }
 0x7bd   : > { %6147 = vmatmul.mubr.msk.f32.gmra.mrb[58].mxu1 %vm436_vm0, %v3418_v54  ;;  %v9927_v1 = vpop.permute.xlu0 %3110  ;;  %v9929_v15 = vpop.permute.xlu1 %6851 }
 0x7be   : > { %6149 = vmatprep.mubr.msk.f32.mxu1 %vm436_vm0, %v3420_v11  ;;  %v2968_v11 = vmul.f32 %v9731_v16, %v2952_v8  ;;  %v2972_v16 = vmul.f32 %v9787_v61, %v2956_v29  ;;  %v6824_v61 = vunpack.i.h.bf16 %v9892_v45  ;;  %v2960_v8 = vld [vmem:[#allocation3 + $0x178] sm:$0xff]  ;;  %v2955_v29 = vld [vmem:[#allocation3 + $0x150] sm:$0xff] }
 0x7c1   : > { %6150 = vmatmul.mubr.msk.f32.gmra.mrb[60].mxu1 %vm436_vm0, %v3422_v50  ;;  %v9931_v10 = vpop.permute.xlu0 %3120  ;;  %v9933_v57 = vpop.permute.xlu1 %4418 }
 0x7c2   : > { %6152 = vmatprep.mubr.msk.f32.mxu1 %vm436_vm0, %v3424_v3  ;;  %v2970_v3 = vmul.f32 %v9784_v63, %v2954_v28  ;;  %v2964_v63 = vmul.f32 %v9718_v35, %v2948_v44 }
 0x7c5   : > { %6153 = vmatmul.mubr.msk.f32.gmra.mrb[62].mxu1 %vm436_vm0, %v3426_v43  ;;  %v9935_v60 = vpop.permute.xlu0 %3130  ;;  %v9937_v33 = vpop.permute.xlu1 %3105 }
 0x7c9   : > { %v9942_v7 = vpop.permute.xlu1 %3115 }
 0x7cd   : > { %v9946_v20 = vpop.permute.xlu1 %3125 }
 0x7d1   : > { %v9952_v50 = vpop.permute.xlu1 %3135 }
 0x7e3   : > { %v2978_v30 = vpop.xlane.xlu0 %2977 }
 0x7e4   : > { %v3009_v12 = vadd.f32 %v2978_v30, %v2961_v37 }
 0x7e6   : > { %3025 = vst.msk [vmem:[#allocation3 + $0x100] sm:$0xff] %vm307_vm2, %v3009_v12 }
 0x7e7   : > { %v2982_v9 = vpop.xlane.xlu0 %2981 }
 0x7e8   : > { %v3011_v0 = vadd.f32 %v2982_v9, %v2963_v41  ;;  %v6819_v41 = vunpack.i.h.bf16 %v9909_v19  ;;  %v6818_v9 = vunpack.i.l.bf16 %v9909_v19 }
 0x7ea   : > { %3027 = vst.msk [vmem:[#allocation3 + $0x110] sm:$0xff] %vm307_vm2, %v3011_v0  ;;  %v2958_v0 = vld [vmem:[#allocation3 + $0x168] sm:$0xff]  ;;  %v6499_v35 = vpack.c.bf16 %v6819_v41, %v6818_v9  ;;  %v6839_v41 = vunpack.i.h.bf16 %v9898_v17  ;;  %v6838_v9 = vunpack.i.l.bf16 %v9898_v17  ;;  %v6848_v17 = vunpack.i.l.bf16 %v9906_v53 }
 0x7eb   : > { %v2988_v46 = vpop.xlane.xlu0 %2987 }
 0x7ec   : > { %v3014_v38 = vadd.f32 %v2988_v46, %v2966_v39  ;;  %v2951_v46 = vld [vmem:[#allocation3 + $0x130] sm:$0xff]  ;;  %6500 = vmatprep.subr.bf16.mxu0 %v6499_v35 }
 0x7ed   : > { %6502 = vmatpush3.bf16.msra.mxu0 %v6499_v35 }
 0x7ee   : > { %3030 = vst.msk [vmem:[#allocation3 + $0x128] sm:$0xff] %vm307_vm2, %v3014_v38  ;;  %v2974_v38 = vmul.f32 %v9790_v40, %v2958_v0  ;;  %v2976_v40 = vmul.f32 %v9793_v25, %v2960_v8  ;;  %v6833_v25 = vunpack.i.l.bf16 %v9921_v2  ;;  %v2959_v0 = vld [vmem:[#allocation3 + $0x170] sm:$0xff]  ;;  %v3042_v8 = vld [vmem:[#allocation4 + $0x100] sm:$0xff] }
 0x7ef   : > { %v2986_v54 = vpop.xlane.xlu0 %2985 }
 0x7f0   : > { %v3013_v23 = vadd.f32 %v2986_v54, %v2965_v34  ;;  %v6823_v34 = vunpack.i.l.bf16 %v9892_v45  ;;  %v2967_v54 = vmul.f32 %v9712_v47, %v2951_v46  ;;  %v6828_v45 = vunpack.i.l.bf16 %v9916_v48 }
 0x7f1   : > { %v6515_v46 = vpack.c.bf16 %v6839_v41, %v6838_v9  ;;  %v3050_v41 = vld [vmem:[#allocation4 + $0x140] sm:$0xff] }
 0x7f2   : > { %3029 = vst.msk [vmem:[#allocation3 + $0x120] sm:$0xff] %vm307_vm2, %v3013_v23 }
 0x7f3   : > { %v2992_v4 = vpop.xlane.xlu0 %2991 }
 0x7f4   : > { %v3016_v51 = vadd.f32 %v2992_v4, %v2968_v11  ;;  %v2953_v4 = vld [vmem:[#allocation3 + $0x140] sm:$0xff] }
 0x7f5   : > { %v2969_v47 = vmul.f32 %v9753_v21, %v2953_v4  ;;  %v2957_v21 = vld [vmem:[#allocation3 + $0x160] sm:$0xff] }
 0x7f6   : > { %3032 = vst.msk [vmem:[#allocation3 + $0x138] sm:$0xff] %vm307_vm2, %v3016_v51  ;;  %v6829_v51 = vunpack.i.h.bf16 %v9916_v48  ;;  %v2971_v48 = vmul.f32 %v9762_v52, %v2955_v29  ;;  %v6844_v52 = vunpack.i.h.bf16 %v9925_v6 }
 0x7f7   : > { %v2996_v43 = vpop.xlane.xlu0 %2995 }
 0x7f8   : > { %v3018_v37 = vadd.f32 %v2996_v43, %v2970_v3  ;;  %v2980_v30 = vpop.xlane.xlu1 %2979  ;;  %v6503_v3 = vpack.c.bf16 %v6824_v61, %v6823_v34  ;;  %v6507_v44 = vpack.c.bf16 %v6829_v51, %v6828_v45 }
 0x7f9   : > { %v3010_v12 = vadd.f32 %v2980_v30, %v2962_v32  ;;  %v6834_v30 = vunpack.i.h.bf16 %v9921_v2  ;;  %v2973_v2 = vmul.f32 %v9769_v14, %v2957_v21 }
 0x7fa   : > { %3034 = vst.msk [vmem:[#allocation3 + $0x148] sm:$0xff] %vm307_vm2, %v3018_v37  ;;  %6504 = vmatprep.subr.bf16.mxu0 %v6503_v3 }
 0x7fb   : > { %3026 = vst.msk [vmem:[#allocation3 + $0x108] sm:$0xff] %vm307_vm2, %v3010_v12  ;;  %v3000_v42 = vpop.xlane.xlu0 %2999  ;;  %6506 = vmatpush3.bf16.msra.mxu0 %v6503_v3 }
 0x7fc   : > { %v3020_v49 = vadd.f32 %v3000_v42, %v2972_v16  ;;  %v2984_v39 = vpop.xlane.xlu1 %2983  ;;  %6508 = vmatprep.subr.bf16.mxu0 %v6507_v44  ;;  %v6511_v42 = vpack.c.bf16 %v6834_v30, %v6833_v25  ;;  %v3049_v30 = vld [vmem:[#allocation4 + $0x138] sm:$0xff]  ;;  %v3048_v25 = vld [vmem:[#allocation4 + $0x130] sm:$0xff] }
 0x7fd   : > { %v3012_v56 = vadd.f32 %v2984_v39, %v2964_v63  ;;  %v6843_v39 = vunpack.i.l.bf16 %v9925_v6  ;;  %v6854_v6 = vunpack.i.h.bf16 %v9929_v15  ;;  %v3144_v21 = vmul.f32 %v9881_v5, %v3048_v25 }
 0x7fe   : > { %3036 = vst.msk [vmem:[#allocation3 + $0x158] sm:$0xff] %vm307_vm2, %v3020_v49 }
 0x7ff   : > { %3028 = vst.msk [vmem:[#allocation3 + $0x118] sm:$0xff] %vm307_vm2, %v3012_v56  ;;  %v3004_v19 = vpop.xlane.xlu0 %3003  ;;  %6510 = vmatpush3.bf16.msra.mxu0 %v6507_v44  ;;  %v6849_v56 = vunpack.i.h.bf16 %v9906_v53  ;;  %v6519_v34 = vpack.c.bf16 %v6844_v52, %v6843_v39 }
 0x800   : > { %v3022_v23 = vadd.f32 %v3004_v19, %v2974_v38  ;;  %v2990_v11 = vpop.xlane.xlu1 %2989  ;;  %6512 = vmatprep.subr.bf16.mxu0 %v6511_v42  ;;  %v2975_v38 = vmul.f32 %v9777_v58, %v2959_v0  ;;  %v3043_v58 = vld [vmem:[#allocation4 + $0x108] sm:$0xff]  ;;  %v3053_v0 = vld [vmem:[#allocation4 + $0x158] sm:$0xff] }
 0x801   : > { %v3015_v28 = vadd.f32 %v2990_v11, %v2967_v54  ;;  %v6523_v19 = vpack.c.bf16 %v6849_v56, %v6848_v17  ;;  %v6853_v54 = vunpack.i.l.bf16 %v9929_v15  ;;  %v3139_v35 = vmul.f32 %v9871_v24, %v3043_v58  ;;  %v3045_v11 = vld [vmem:[#allocation4 + $0x118] sm:$0xff]  ;;  %v3055_v17 = vld [vmem:[#allocation4 + $0x168] sm:$0xff] }
 0x802   : > { %3038 = vst.msk [vmem:[#allocation3 + $0x168] sm:$0xff] %vm307_vm2, %v3022_v23  ;;  %v3138_v23 = vmul.f32 %v9873_v31, %v3042_v8  ;;  %v3141_v15 = vmul.f32 %v9886_v59, %v3045_v11 }
 0x803   : > { %3031 = vst.msk [vmem:[#allocation3 + $0x130] sm:$0xff] %vm307_vm2, %v3015_v28  ;;  %v3008_v26 = vpop.xlane.xlu0 %3007  ;;  %6514 = vmatpush3.bf16.msra.mxu0 %v6511_v42  ;;  %v6527_v53 = vpack.c.bf16 %v6854_v6, %v6853_v54  ;;  %v3044_v28 = vld [vmem:[#allocation4 + $0x110] sm:$0xff]  ;;  %v3057_v6 = vld [vmem:[#allocation4 + $0x178] sm:$0xff] }
 0x804   : > { %v3024_v43 = vadd.f32 %v3008_v26, %v2976_v40  ;;  %v2994_v32 = vpop.xlane.xlu1 %2993  ;;  %6516 = vmatprep.subr.bf16.mxu0 %v6515_v46  ;;  %v3140_v26 = vmul.f32 %v9879_v13, %v3044_v28  ;;  %v3056_v54 = vld [vmem:[#allocation4 + $0x170] sm:$0xff]  ;;  %v3153_v8 = vmul.f32 %v9952_v50, %v3057_v6 }
 0x805   : > { %v3017_v37 = vadd.f32 %v2994_v32, %v2969_v47  ;;  %v3047_v47 = vld [vmem:[#allocation4 + $0x128] sm:$0xff] }
 0x806   : > { %3040 = vst.msk [vmem:[#allocation3 + $0x178] sm:$0xff] %vm307_vm2, %v3024_v43  ;;  %v3046_v43 = vld [vmem:[#allocation4 + $0x120] sm:$0xff]  ;;  %v3143_v29 = vmul.f32 %v9895_v55, %v3047_v47 }
 0x807   : > { %3033 = vst.msk [vmem:[#allocation3 + $0x140] sm:$0xff] %vm307_vm2, %v3017_v37  ;;  %6518 = vmatpush3.bf16.msra.mxu0 %v6515_v46  ;;  %v3142_v37 = vmul.f32 %v9877_v22, %v3046_v43  ;;  %v3149_v46 = vmul.f32 %v9942_v7, %v3053_v0 }
 0x808   : > { %v2998_v12 = vpop.xlane.xlu1 %2997  ;;  %6520 = vmatprep.subr.bf16.mxu0 %v6519_v34 }
 0x809   : > { %v3019_v16 = vadd.f32 %v2998_v12, %v2971_v48  ;;  %v3145_v12 = vmul.f32 %v9902_v18, %v3049_v30  ;;  %v3669_v30 = vld [vmem:[#allocation2 + $0x180] sm:$0xff] }
 0x80b   : > { %3035 = vst.msk [vmem:[#allocation3 + $0x150] sm:$0xff] %vm307_vm2, %v3019_v16  ;;  %6522 = vmatpush3.bf16.msra.mxu0 %v6519_v34  ;;  %v3051_v16 = vld [vmem:[#allocation4 + $0x148] sm:$0xff]  ;;  %v3151_v34 = vmul.f32 %v9946_v20, %v3055_v17 }
 0x80c   : > { %v3002_v63 = vpop.xlane.xlu1 %3001  ;;  %6524 = vmatprep.subr.bf16.mxu0 %v6523_v19 }
 0x80d   : > { %v3021_v49 = vadd.f32 %v3002_v63, %v2973_v2  ;;  %v3147_v2 = vmul.f32 %v9937_v33, %v3051_v16  ;;  %v3146_v63 = vmul.f32 %v9923_v62, %v3050_v41  ;;  %v3673_v41 = vld [vmem:[#allocation2 + $0x1a0] sm:$0xff] }
 0x80f   : > { %3037 = vst.msk [vmem:[#allocation3 + $0x160] sm:$0xff] %vm307_vm2, %v3021_v49  ;;  %6526 = vmatpush3.bf16.msra.mxu0 %v6523_v19  ;;  %v3052_v49 = vld [vmem:[#allocation4 + $0x150] sm:$0xff] }
 0x810   : > { %v3006_v61 = vpop.xlane.xlu1 %3005  ;;  %6528 = vmatprep.subr.bf16.mxu0 %v6527_v53  ;;  %v3148_v56 = vmul.f32 %v9927_v1, %v3052_v49  ;;  %v10078_v49 = vld [vmem:[#allocation2 + $0x1a8] sm:$0xff] }
 0x811   : > { %v3023_v14 = vadd.f32 %v3006_v61, %v2975_v38  ;;  %v3054_v38 = vld [vmem:[#allocation4 + $0x160] sm:$0xff] }
 0x812   : > { %v3150_v19 = vmul.f32 %v9931_v10, %v3054_v38  ;;  %v10086_v38 = vld [vmem:[#allocation2 + $0x1b8] sm:$0xff] }
 0x813   : > { %3039 = vst.msk [vmem:[#allocation3 + $0x170] sm:$0xff] %vm307_vm2, %v3023_v14  ;;  %6530 = vmatpush3.bf16.msra.mxu0 %v6527_v53 }
 0x837   : > { %v6077_v4 = vpop.f32.mrb[32].mxu1 }
 0x838   : > { %v3348_v40 = vadd.f32 %v6077_v4, %v3139_v35  ;;  %v3268_v51 = vpop.f32.mrb[33].mxu1  ;;  %v3152_v35 = vmul.f32 %v9935_v60, %v3056_v54 }
 0x839   : > { %v3347_v45 = vadd.f32 %v3268_v51, %v3138_v23 }
 0x83a   : > { %3364 = vst.msk [vmem:[#allocation4 + $0x108] sm:$0xff] %vm436_vm0, %v3348_v40 }
 0x83b   : > { %3363 = vst.msk [vmem:[#allocation4 + $0x100] sm:$0xff] %vm436_vm0, %v3347_v45  ;;  %v6080_v3 = vpop.f32.mrb[34].mxu1 }
 0x83c   : > { %v3350_v24 = vadd.f32 %v6080_v3, %v3141_v15  ;;  %v3278_v32 = vpop.f32.mrb[35].mxu1 }
 0x83d   : > { %v3349_v31 = vadd.f32 %v3278_v32, %v3140_v26 }
 0x83e   : > { %3366 = vst.msk [vmem:[#allocation4 + $0x118] sm:$0xff] %vm436_vm0, %v3350_v24 }
 0x83f   : > { %3365 = vst.msk [vmem:[#allocation4 + $0x110] sm:$0xff] %vm436_vm0, %v3349_v31  ;;  %v6083_v59 = vpop.f32.mrb[36].mxu1 }
 0x840   : > { %v3352_v13 = vadd.f32 %v6083_v59, %v3143_v29  ;;  %v3288_v48 = vpop.f32.mrb[37].mxu1 }
 0x841   : > { %v3351_v44 = vadd.f32 %v3288_v48, %v3142_v37  ;;  %v3670_v37 = vld [vmem:[#allocation2 + $0x188] sm:$0xff] }
 0x842   : > { %3368 = vst.msk [vmem:[#allocation4 + $0x128] sm:$0xff] %vm436_vm0, %v3352_v13 }
 0x843   : > { %3367 = vst.msk [vmem:[#allocation4 + $0x120] sm:$0xff] %vm436_vm0, %v3351_v44  ;;  %v6086_v55 = vpop.f32.mrb[38].mxu1 }
 0x844   : > { %v3354_v22 = vadd.f32 %v6086_v55, %v3145_v12  ;;  %v3298_v9 = vpop.f32.mrb[39].mxu1  ;;  %v3672_v12 = vld [vmem:[#allocation2 + $0x198] sm:$0xff] }
 0x845   : > { %v3353_v42 = vadd.f32 %v3298_v9, %v3144_v21 }
 0x846   : > { %3370 = vst.msk [vmem:[#allocation4 + $0x138] sm:$0xff] %vm436_vm0, %v3354_v22  ;;  %v3671_v22 = vld [vmem:[#allocation2 + $0x190] sm:$0xff] }
 0x847   : > { %3369 = vst.msk [vmem:[#allocation4 + $0x130] sm:$0xff] %vm436_vm0, %v3353_v42  ;;  %v6089_v18 = vpop.f32.mrb[40].mxu1 }
 0x848   : > { %v3356_v5 = vadd.f32 %v6089_v18, %v3147_v2  ;;  %v3308_v52 = vpop.f32.mrb[41].mxu1  ;;  %v10076_v18 = vld [vmem:[#allocation2 + $0x1b0] sm:$0xff] }
 0x849   : > { %v3355_v39 = vadd.f32 %v3308_v52, %v3146_v63 }
 0x84a   : > { %3372 = vst.msk [vmem:[#allocation4 + $0x148] sm:$0xff] %vm436_vm0, %v3356_v5 }
 0x84b   : > { %3371 = vst.msk [vmem:[#allocation4 + $0x140] sm:$0xff] %vm436_vm0, %v3355_v39  ;;  %v6092_v33 = vpop.f32.mrb[42].mxu1 }
 0x84c   : > { %v3358_v62 = vadd.f32 %v6092_v33, %v3149_v46  ;;  %v3318_v61 = vpop.f32.mrb[43].mxu1 }
 0x84d   : > { %v3357_v14 = vadd.f32 %v3318_v61, %v3148_v56 }
 0x84e   : > { %3374 = vst.msk [vmem:[#allocation4 + $0x158] sm:$0xff] %vm436_vm0, %v3358_v62  ;;  %v10088_v62 = vld [vmem:[#allocation2 + $0x1c0] sm:$0xff] }
 0x84f   : > { %3373 = vst.msk [vmem:[#allocation4 + $0x150] sm:$0xff] %vm436_vm0, %v3357_v14  ;;  %v6095_v7 = vpop.f32.mrb[44].mxu1 }
 0x850   : > { %v3360_v1 = vadd.f32 %v6095_v7, %v3151_v34  ;;  %v3328_v53 = vpop.f32.mrb[45].mxu1 }
 0x851   : > { %v3359_v58 = vadd.f32 %v3328_v53, %v3150_v19  ;;  %v10104_v53 = vld [vmem:[#allocation2 + $0x1d0] sm:$0xff] }
 0x852   : > { %3376 = vst.msk [vmem:[#allocation4 + $0x168] sm:$0xff] %vm436_vm0, %v3360_v1  ;;  %v10102_v1 = vld [vmem:[#allocation2 + $0x1c8] sm:$0xff] }
 0x853   : > { %3375 = vst.msk [vmem:[#allocation4 + $0x160] sm:$0xff] %vm436_vm0, %v3359_v58  ;;  %v6098_v20 = vpop.f32.mrb[46].mxu1 }
 0x854   : > { %v3362_v23 = vadd.f32 %v6098_v20, %v3153_v8  ;;  %v3338_v11 = vpop.f32.mrb[47].mxu1 }
 0x855   : > { %v3361_v10 = vadd.f32 %v3338_v11, %v3152_v35 }
 0x856   : > { %3378 = vst.msk [vmem:[#allocation4 + $0x178] sm:$0xff] %vm436_vm0, %v3362_v23 }
 0x857   : > { %3377 = vst.msk [vmem:[#allocation4 + $0x170] sm:$0xff] %vm436_vm0, %v3361_v10  ;;  %v10120_v10 = vld [vmem:[#allocation2 + $0x1e0] sm:$0xff] }
 0x87c   : > { %v10025_v4 = vpop.f32.mrb[48].mxu1 }
 0x87d   : > { %3687 = vmax.xlane.f32.xlu1 %v10025_v4  ;;  %v10028_v28 = vpop.f32.mrb[49].mxu1 }
 0x87e   : > { %3685 = vmax.xlane.f32.xlu0 %v10028_v28 }
 0x880   : > { %v10031_v50 = vpop.f32.mrb[50].mxu1 }
 0x881   : > { %v10033_v60 = vpop.f32.mrb[51].mxu1 }
 0x882   : > { %3691 = vmax.xlane.f32.xlu0 %v10031_v50 }
 0x884   : > { %v10036_v40 = vpop.f32.mrb[52].mxu1 }
 0x885   : > { %v10038_v51 = vpop.f32.mrb[53].mxu1 }
 0x886   : > { %3693 = vmax.xlane.f32.xlu1 %v10038_v51  ;;  %3689 = vmax.xlane.f32.xlu0 %v10033_v60 }
 0x888   : > { %v10042_v45 = vpop.f32.mrb[54].mxu1 }
 0x889   : > { %v10044_v15 = vpop.f32.mrb[55].mxu1 }
 0x88a   : > { %3697 = vmax.xlane.f32.xlu1 %v10044_v15  ;;  %3695 = vmax.xlane.f32.xlu0 %v10036_v40 }
 0x88c   : > { %v10048_v26 = vpop.f32.mrb[56].mxu1 }
 0x88d   : > { %v10050_v47 = vpop.f32.mrb[57].mxu1 }
 0x88e   : > { %3699 = vmax.xlane.f32.xlu0 %v10042_v45  ;;  %3701 = vmax.xlane.f32.xlu1 %v10050_v47 }
 0x890   : > { %v10054_v3 = vpop.f32.mrb[58].mxu1 }
 0x891   : > { %v10056_v43 = vpop.f32.mrb[59].mxu1 }
 0x892   : > { %3703 = vmax.xlane.f32.xlu0 %v10048_v26  ;;  %3705 = vmax.xlane.f32.xlu1 %v10056_v43 }
 0x894   : > { %v10060_v24 = vpop.f32.mrb[60].mxu1 }
 0x895   : > { %v10062_v32 = vpop.f32.mrb[61].mxu1 }
 0x896   : > { %3709 = vmax.xlane.f32.xlu1 %v10062_v32  ;;  %3707 = vmax.xlane.f32.xlu0 %v10054_v3 }
 0x898   : > { %v10066_v31 = vpop.f32.mrb[62].mxu1 }
 0x899   : > { %v10068_v29 = vpop.f32.mrb[63].mxu1 }
 0x89a   : > { %3711 = vmax.xlane.f32.xlu0 %v10060_v24  ;;  %3713 = vmax.xlane.f32.xlu1 %v10068_v29 }
 0x89e   : > { %3715 = vmax.xlane.f32.xlu0 %v10066_v31 }
 0x90a   : > { %v3688_v59 = vpop.xlane.xlu1 %3687 }
 0x90b   : > { %v3718_v25 = vmax.f32 %v3670_v37, %v3688_v59  ;;  %v3686_v13 = vpop.xlane.xlu0 %3685 }
 0x90c   : > { %v3717_v48 = vmax.f32 %v3669_v30, %v3686_v13 }
 0x90d   : > { %v3734_v44 = vsub.f32 %v3670_v37, %v3718_v25  ;;  %4345 = vst.msk [vmem:[#allocation2 + $0x188] sm:$0xff] %vm307_vm2, %v3718_v25  ;;  %3788 = vperm.xlu0 %6613, %v3718_v25   ;;  %v10122_v37 = vld [vmem:[#allocation2 + $0x1d8] sm:$0xff]  ;;  %v4367_v25 = vld [vmem:[#allocation3 + $0x20] sm:$0xff] }
 0x90e   : > { %4344 = vst.msk [vmem:[#allocation2 + $0x180] sm:$0xff] %vm307_vm2, %v3717_v48  ;;  %3783 = vperm.xlu1 %6614, %v3717_v48   ;;  %v3733_v9 = vsub.f32 %v3669_v30, %v3717_v48 }
 0x90f   : > { %v3751_v21 = vmul.f32 1.442695, %v3734_v44  ;;  %v3692_v16 = vpop.xlane.xlu0 %3691 }
 0x910   : > { %v3720_v55 = vmax.f32 %v3672_v12, %v3692_v16  ;;  %v3749_v52 = vmul.f32 1.442695, %v3733_v9 }
 0x911   : > { %7053 = vpow2.f32 %v3751_v21 }
 0x912   : > { %4347 = vst.msk [vmem:[#allocation2 + $0x198] sm:$0xff] %vm307_vm2, %v3720_v55  ;;  %3798 = vperm.xlu1 %6614, %v3720_v55   ;;  %v3736_v5 = vsub.f32 %v3672_v12, %v3720_v55  ;;  %7055 = vpow2.f32 %v3749_v52 }
 0x913   : > { %v3694_v42 = vpop.xlane.xlu1 %3693  ;;  %v3690_v2 = vpop.xlane.xlu0 %3689 }
 0x914   : > { %v3721_v63 = vmax.f32 %v3673_v41, %v3694_v42  ;;  %v3719_v0 = vmax.f32 %v3671_v22, %v3690_v2  ;;  %v3755_v61 = vmul.f32 1.442695, %v3736_v5  ;;  %v4369_v2 = vld [vmem:[#allocation3 + $0x30] sm:$0xff] }
 0x916   : > { %4348 = vst.msk [vmem:[#allocation2 + $0x1a0] sm:$0xff] %vm307_vm2, %v3721_v63  ;;  %4346 = vst.msk [vmem:[#allocation2 + $0x190] sm:$0xff] %vm307_vm2, %v3719_v0  ;;  %3803 = vperm.xlu0 %6613, %v3721_v63   ;;  %3793 = vperm.xlu1 %6614, %v3719_v0   ;;  %v3737_v39 = vsub.f32 %v3673_v41, %v3721_v63  ;;  %7057 = vpow2.f32 %v3755_v61  ;;  %v3735_v8 = vsub.f32 %v3671_v22, %v3719_v0  ;;  %v10143_v41 = vld [vmem:[#allocation2 + $0x1e8] sm:$0xff]  ;;  %v10145_v22 = vld [vmem:[#allocation2 + $0x1f0] sm:$0xff] }
 0x917   : > { %v3698_v46 = vpop.xlane.xlu1 %3697  ;;  %v3696_v56 = vpop.xlane.xlu0 %3695 }
 0x918   : > { %v10083_v17 = vmax.f32 %v10076_v18, %v3698_v46  ;;  %v3722_v33 = vmax.f32 %v10078_v49, %v3696_v56  ;;  %v3757_v14 = vmul.f32 1.442695, %v3737_v39  ;;  %v3753_v13 = vmul.f32 1.442695, %v3735_v8  ;;  %v10167_v56 = vld [vmem:[#allocation2 + $0x1f8] sm:$0xff] }
 0x91a   : > { %4350 = vst.msk [vmem:[#allocation2 + $0x1b0] sm:$0xff] %vm307_vm2, %v10083_v17  ;;  %4349 = vst.msk [vmem:[#allocation2 + $0x1a8] sm:$0xff] %vm307_vm2, %v3722_v33  ;;  %3813 = vperm.xlu0 %6613, %v10083_v17   ;;  %3808 = vperm.xlu1 %6614, %v3722_v33   ;;  %7059 = vpow2.f32 %v3757_v14  ;;  %v3738_v48 = vsub.f32 %v10078_v49, %v3722_v33  ;;  %v3739_v33 = vsub.f32 %v10076_v18, %v10083_v17 }
 0x91b   : > { %v3700_v34 = vpop.xlane.xlu0 %3699  ;;  %v3702_v19 = vpop.xlane.xlu1 %3701  ;;  %7061 = vrcp.f32 %v4367_v25 }
 0x91c   : > { %v10095_v6 = vmax.f32 %v10086_v38, %v3700_v34  ;;  %v10098_v7 = vmax.f32 %v10088_v62, %v3702_v19  ;;  %v10100_v54 = vpop.eup %7053  ;;  %7063 = vpow2.f32 %v3753_v13  ;;  %v3759_v63 = vmul.f32 1.442695, %v3738_v48  ;;  %v4371_v34 = vld [vmem:[#allocation3 + $0x40] sm:$0xff]  ;;  %v4366_v48 = vld [vmem:[#allocation3 + $0x18] sm:$0xff] }
 0x91d   : > { %v10141_v55 = vpop.eup %7055  ;;  %7065 = vrcp.f32 %v4369_v2  ;;  %v3761_v8 = vmul.f32 1.442695, %v3739_v33  ;;  %v4368_v2 = vld [vmem:[#allocation3 + $0x28] sm:$0xff]  ;;  %v4370_v33 = vld [vmem:[#allocation3 + $0x38] sm:$0xff] }
 0x91e   : > { %4351 = vst.msk [vmem:[#allocation2 + $0x1b8] sm:$0xff] %vm307_vm2, %v10095_v6  ;;  %4030 = vperm.xlu0 %6613, %v10100_v54   ;;  %3818 = vperm.xlu1 %6614, %v10095_v6   ;;  %v3741_v58 = vsub.f32 %v10088_v62, %v10098_v7  ;;  %4352 = vst.msk [vmem:[#allocation2 + $0x1c0] sm:$0xff] %vm307_vm2, %v10098_v7  ;;  %7067 = vpow2.f32 %v3759_v63  ;;  %v3740_v18 = vsub.f32 %v10086_v38, %v10095_v6 }
 0x91f   : > { %v3704_v35 = vpop.xlane.xlu0 %3703  ;;  %v3706_v20 = vpop.xlane.xlu1 %3705  ;;  %7069 = vrcp.f32 %v4371_v34 }
 0x920   : > { %v10115_v23 = vmax.f32 %v10102_v1, %v3704_v35  ;;  %v10118_v11 = vmax.f32 %v10104_v53, %v3706_v20  ;;  %v10157_v5 = vpop.eup %7057  ;;  %v3763_v20 = vmul.f32 1.442695, %v3740_v18  ;;  %7071 = vpow2.f32 %v3761_v8  ;;  %v4377_v18 = vld [vmem:[#allocation3 + $0x70] sm:$0xff]  ;;  %v4507_v8 = vld [vmem:[#allocation3 + $0x80] sm:$0xff] }
 0x922   : > { %v3742_v30 = vsub.f32 %v10102_v1, %v10115_v23  ;;  %4353 = vst.msk [vmem:[#allocation2 + $0x1c8] sm:$0xff] %vm307_vm2, %v10115_v23  ;;  %3823 = vperm.xlu0 %6613, %v10098_v7   ;;  %3828 = vperm.xlu1 %6614, %v10115_v23   ;;  %v3743_v59 = vsub.f32 %v10104_v53, %v10118_v11  ;;  %4354 = vst.msk [vmem:[#allocation2 + $0x1d0] sm:$0xff] %vm307_vm2, %v10118_v11  ;;  %7073 = vpow2.f32 %v3763_v20 }
 0x923   : > { %v3710_v44 = vpop.xlane.xlu1 %3709  ;;  %v3708_v12 = vpop.xlane.xlu0 %3707  ;;  %7075 = vrcp.f32 %v4366_v48  ;;  %v4509_v48 = vld [vmem:[#allocation3 + $0x90] sm:$0xff] }
 0x924   : > { %v10136_v21 = vmax.f32 %v10120_v10, %v3710_v44  ;;  %v10139_v16 = vmax.f32 %v10122_v37, %v3708_v12  ;;  %v10165_v46 = vpop.eup %7059  ;;  %v4373_v44 = vld [vmem:[#allocation3 + $0x50] sm:$0xff] }
 0x925   : > { %v7062_v25 = vpop.eup %7061  ;;  %7077 = vrcp.f32 %v4373_v44 }
 0x926   : > { %3833 = vperm.xlu0 %6613, %v10118_v11   ;;  %4025 = vperm.xlu1 %6614, %v10141_v55   ;;  %v3745_v9 = vsub.f32 %v10120_v10, %v10136_v21  ;;  %4356 = vst.msk [vmem:[#allocation2 + $0x1e0] sm:$0xff] %vm307_vm2, %v10136_v21  ;;  %v3744_v42 = vsub.f32 %v10122_v37, %v10139_v16  ;;  %4355 = vst.msk [vmem:[#allocation2 + $0x1d8] sm:$0xff] %vm307_vm2, %v10139_v16  ;;  %v10192_v38 = vpop.eup %7063  ;;  %7079 = vrcp.f32 %v4368_v2 }
 0x927   : > { %v3712_v0 = vpop.xlane.xlu0 %3711  ;;  %v3714_v49 = vpop.xlane.xlu1 %3713  ;;  %v3767_v10 = vmul.f32 1.442695, %v3742_v30 }
 0x928   : > { %v10160_v52 = vmax.f32 %v10143_v41, %v3712_v0  ;;  %v10163_v39 = vmax.f32 %v10145_v22, %v3714_v49  ;;  %v7066_v6 = vpop.eup %7065  ;;  %v4375_v0 = vld [vmem:[#allocation3 + $0x60] sm:$0xff]  ;;  %v3773_v62 = vmul.f32 1.442695, %v3745_v9 }
 0x929   : > { %v10195_v13 = vpop.eup %7067  ;;  %7081 = vrcp.f32 %v4375_v0  ;;  %v4511_v0 = vld [vmem:[#allocation3 + $0xa0] sm:$0xff] }
 0x92a   : > { %4045 = vperm.xlu0 %6613, %v10165_v46   ;;  %4040 = vperm.xlu1 %6614, %v10157_v5   ;;  %v3746_v61 = vsub.f32 %v10143_v41, %v10160_v52  ;;  %4357 = vst.msk [vmem:[#allocation2 + $0x1e8] sm:$0xff] %vm307_vm2, %v10160_v52  ;;  %v3747_v14 = vsub.f32 %v10145_v22, %v10163_v39  ;;  %4358 = vst.msk [vmem:[#allocation2 + $0x1f0] sm:$0xff] %vm307_vm2, %v10163_v39  ;;  %v7070_v12 = vpop.eup %7069  ;;  %7083 = vrcp.f32 %v4370_v33 }
 0x92b   : > { %v3716_v17 = vpop.xlane.xlu0 %3715  ;;  %v10199_v63 = vpop.eup %7071  ;;  %7085 = vrcp.f32 %v4377_v18  ;;  %v4378_v18 = vld [vmem:[#allocation3 + $0x78] sm:$0xff] }
 0x92c   : > { %v10184_v19 = vmax.f32 %v10167_v56, %v3716_v17  ;;  %v10201_v49 = vpop.eup %7073  ;;  %v4372_v17 = vld [vmem:[#allocation3 + $0x48] sm:$0xff]  ;;  %v3777_v53 = vmul.f32 1.442695, %v3747_v14  ;;  %v3775_v30 = vmul.f32 1.442695, %v3746_v61 }
 0x92d   : > { %v7076_v34 = vpop.eup %7075  ;;  %7087 = vrcp.f32 %v4372_v17 }
 0x92e   : > { %3843 = vperm.xlu0 %6613, %v10136_v21   ;;  %3838 = vperm.xlu1 %6614, %v10139_v16   ;;  %v3748_v35 = vsub.f32 %v10167_v56, %v10184_v19  ;;  %4359 = vst.msk [vmem:[#allocation2 + $0x1f8] sm:$0xff] %vm307_vm2, %v10184_v19  ;;  %7089 = vrcp.f32 %v4507_v8  ;;  %v4508_v8 = vld [vmem:[#allocation3 + $0x88] sm:$0xff] }
 0x92f   : > { %v7078_v20 = vpop.eup %7077 }
 0x930   : > { %v3779_v61 = vmul.f32 1.442695, %v3748_v35 }
 0x932   : > { %4433 = vperm.xlu0 %6613, %v7062_v25   ;;  %4035 = vperm.xlu1 %6614, %v10192_v38   ;;  %v4374_v25 = vld [vmem:[#allocation3 + $0x58] sm:$0xff] }
 0x933   : > { %7091 = vrcp.f32 %v4374_v25 }
 0x934   : > { %7093 = vrcp.f32 %v4509_v48  ;;  %v4510_v48 = vld [vmem:[#allocation3 + $0x98] sm:$0xff] }
 0x936   : > { %4443 = vperm.xlu0 %6613, %v7066_v6   ;;  %4050 = vperm.xlu1 %6614, %v10195_v13   ;;  %v7080_v6 = vpop.eup %7079 }
 0x937   : > { %v7082_v44 = vpop.eup %7081 }
 0x938   : > { %v7084_v2 = vpop.eup %7083 }
 0x939   : > { %v7086_v33 = vpop.eup %7085 }
 0x93a   : > { %4453 = vperm.xlu0 %6613, %v7070_v12   ;;  %3848 = vperm.xlu1 %6614, %v10160_v52   ;;  %v4376_v12 = vld [vmem:[#allocation3 + $0x68] sm:$0xff]  ;;  %v7088_v17 = vpop.eup %7087 }
 0x93b   : > { %7095 = vrcp.f32 %v4376_v12 }
 0x93c   : > { %7097 = vrcp.f32 %v4511_v0  ;;  %v4512_v0 = vld [vmem:[#allocation3 + $0xa8] sm:$0xff] }
 0x93d   : > { %7099 = vrcp.f32 %v4378_v18 }
 0x93e   : > { %4055 = vperm.xlu0 %6613, %v10199_v63   ;;  %4060 = vperm.xlu1 %6614, %v10201_v49  }
 0x942   : > { %3853 = vperm.xlu0 %6613, %v10163_v39   ;;  %3858 = vperm.xlu1 %6614, %v10184_v19  }
 0x946   : > { %4463 = vperm.xlu0 %6613, %v7078_v20   ;;  %4428 = vperm.xlu1 %6614, %v7076_v34   ;;  %v4513_v34 = vld [vmem:[#allocation3 + $0xb0] sm:$0xff]  ;;  %v7090_v20 = vpop.eup %7089 }
 0x947   : > { %7101 = vrcp.f32 %v4513_v34  ;;  %v7092_v25 = vpop.eup %7091  ;;  %v4514_v34 = vld [vmem:[#allocation3 + $0xb8] sm:$0xff] }
 0x948   : > { %7103 = vrcp.f32 %v4508_v8 }
 0x94a   : > { %4473 = vperm.xlu0 %6613, %v7082_v44   ;;  %4438 = vperm.xlu1 %6614, %v7080_v6   ;;  %v4515_v6 = vld [vmem:[#allocation3 + $0xc0] sm:$0xff]  ;;  %v7094_v44 = vpop.eup %7093 }
 0x94b   : > { %7105 = vrcp.f32 %v4515_v6  ;;  %v7096_v12 = vpop.eup %7095  ;;  %v4516_v6 = vld [vmem:[#allocation3 + $0xc8] sm:$0xff] }
 0x94c   : > { %7107 = vrcp.f32 %v4510_v48 }
 0x94e   : > { %4483 = vperm.xlu0 %6613, %v7086_v33   ;;  %4448 = vperm.xlu1 %6614, %v7084_v2   ;;  %v4517_v2 = vld [vmem:[#allocation3 + $0xd0] sm:$0xff]  ;;  %v7098_v33 = vpop.eup %7097 }
 0x94f   : > { %7109 = vrcp.f32 %v4517_v2  ;;  %v7100_v18 = vpop.eup %7099 }
 0x950   : > { %7111 = vrcp.f32 %v4512_v0 }
 0x952   : > { %4557 = vperm.xlu0 %6613, %v7090_v20   ;;  %4458 = vperm.xlu1 %6614, %v7088_v17   ;;  %v4519_v17 = vld [vmem:[#allocation3 + $0xe0] sm:$0xff]  ;;  %v7102_v20 = vpop.eup %7101 }
 0x953   : > { %7113 = vrcp.f32 %v4519_v17  ;;  %v7104_v8 = vpop.eup %7103 }
 0x954   : > { %7115 = vrcp.f32 %v4514_v34 }
 0x956   : > { %4567 = vperm.xlu0 %6613, %v7094_v44   ;;  %4468 = vperm.xlu1 %6614, %v7092_v25   ;;  %v4521_v25 = vld [vmem:[#allocation3 + $0xf0] sm:$0xff]  ;;  %v7106_v44 = vpop.eup %7105 }
 0x957   : > { %7117 = vrcp.f32 %v4521_v25  ;;  %v7108_v48 = vpop.eup %7107 }
 0x958   : > { %7119 = vrcp.f32 %v4516_v6 }
 0x959   : > { %v7110_v2 = vpop.eup %7109 }
 0x95a   : > { %4577 = vperm.xlu0 %6613, %v7098_v33   ;;  %4478 = vperm.xlu1 %6614, %v7096_v12   ;;  %v4651_v12 = vld [vmem:[#allocation3 + $0x100] sm:$0xff]  ;;  %v4518_v33 = vld [vmem:[#allocation3 + $0xd8] sm:$0xff]  ;;  %v7112_v0 = vpop.eup %7111 }
 0x95b   : > { %7121 = vrcp.f32 %v4651_v12  ;;  %v4652_v12 = vld [vmem:[#allocation3 + $0x108] sm:$0xff] }
 0x95c   : > { %7123 = vrcp.f32 %v4518_v33 }
 0x95d   : > { %v7114_v17 = vpop.eup %7113 }
 0x95e   : > { %4587 = vperm.xlu0 %6613, %v7102_v20   ;;  %4488 = vperm.xlu1 %6614, %v7100_v18   ;;  %v4653_v18 = vld [vmem:[#allocation3 + $0x110] sm:$0xff]  ;;  %v4520_v20 = vld [vmem:[#allocation3 + $0xe8] sm:$0xff]  ;;  %v7116_v34 = vpop.eup %7115 }
 0x95f   : > { %7125 = vrcp.f32 %v4653_v18  ;;  %v4654_v18 = vld [vmem:[#allocation3 + $0x118] sm:$0xff] }
 0x960   : > { %7127 = vrcp.f32 %v4520_v20 }
 0x961   : > { %v7118_v25 = vpop.eup %7117 }
 0x962   : > { %4597 = vperm.xlu0 %6613, %v7106_v44   ;;  %4562 = vperm.xlu1 %6614, %v7104_v8   ;;  %v4655_v8 = vld [vmem:[#allocation3 + $0x120] sm:$0xff]  ;;  %v4522_v44 = vld [vmem:[#allocation3 + $0xf8] sm:$0xff]  ;;  %v7120_v6 = vpop.eup %7119 }
 0x963   : > { %7129 = vrcp.f32 %v4655_v8  ;;  %v4656_v8 = vld [vmem:[#allocation3 + $0x128] sm:$0xff] }
 0x964   : > { %7131 = vrcp.f32 %v4522_v44 }
 0x966   : > { %4607 = vperm.xlu0 %6613, %v7110_v2   ;;  %4572 = vperm.xlu1 %6614, %v7108_v48   ;;  %v4657_v48 = vld [vmem:[#allocation3 + $0x130] sm:$0xff]  ;;  %v7122_v2 = vpop.eup %7121 }
 0x967   : > { %7133 = vrcp.f32 %v4657_v48  ;;  %v7124_v33 = vpop.eup %7123  ;;  %v4658_v48 = vld [vmem:[#allocation3 + $0x138] sm:$0xff] }
 0x968   : > { %7135 = vrcp.f32 %v4652_v12  ;;  %v3765_v12 = vmul.f32 1.442695, %v3741_v58 }
 0x96a   : > { %4617 = vperm.xlu0 %6613, %v7114_v17   ;;  %4582 = vperm.xlu1 %6614, %v7112_v0   ;;  %v4659_v0 = vld [vmem:[#allocation3 + $0x140] sm:$0xff]  ;;  %v7126_v17 = vpop.eup %7125 }
 0x96b   : > { %7137 = vrcp.f32 %v4659_v0  ;;  %v7128_v20 = vpop.eup %7127 }
 0x96c   : > { %7139 = vrcp.f32 %v4654_v18  ;;  %v3769_v18 = vmul.f32 1.442695, %v3743_v59 }
 0x96e   : > { %4627 = vperm.xlu0 %6613, %v7118_v25   ;;  %4592 = vperm.xlu1 %6614, %v7116_v34   ;;  %v4661_v34 = vld [vmem:[#allocation3 + $0x150] sm:$0xff]  ;;  %v7130_v25 = vpop.eup %7129 }
 0x96f   : > { %7141 = vrcp.f32 %v4661_v34  ;;  %v7132_v44 = vpop.eup %7131 }
 0x970   : > { %7143 = vrcp.f32 %v4656_v8  ;;  %v4664_v8 = vld [vmem:[#allocation3 + $0x168] sm:$0xff] }
 0x972   : > { %4701 = vperm.xlu0 %6613, %v7122_v2   ;;  %4602 = vperm.xlu1 %6614, %v7120_v6   ;;  %v4663_v6 = vld [vmem:[#allocation3 + $0x160] sm:$0xff]  ;;  %v7134_v2 = vpop.eup %7133 }
 0x973   : > { %7145 = vrcp.f32 %v4663_v6 }
 0x974   : > { %7147 = vrcp.f32 %v4658_v48 }
 0x975   : > { %7149 = vpow2.f32 %v3765_v12 }
 0x976   : > { %4711 = vperm.xlu0 %6613, %v7126_v17   ;;  %4612 = vperm.xlu1 %6614, %v7124_v33   ;;  %v7136_v33 = vpop.eup %7135  ;;  %v4660_v17 = vld [vmem:[#allocation3 + $0x148] sm:$0xff] }
 0x977   : > { %v7138_v0 = vpop.eup %7137  ;;  %7151 = vrcp.f32 %v4660_v17 }
 0x978   : > { %7153 = vpow2.f32 %v3769_v18 }
 0x97a   : > { %4721 = vperm.xlu0 %6613, %v7130_v25   ;;  %4622 = vperm.xlu1 %6614, %v7128_v20   ;;  %v7140_v20 = vpop.eup %7139  ;;  %v4662_v25 = vld [vmem:[#allocation3 + $0x158] sm:$0xff] }
 0x97b   : > { %v7142_v34 = vpop.eup %7141  ;;  %7155 = vrcp.f32 %v4662_v25 }
 0x97c   : > { %v7144_v7 = vpop.eup %7143  ;;  %7157 = vpow2.f32 %v3773_v62 }
 0x97d   : > { %v7146_v58 = vpop.eup %7145  ;;  %7159 = vrcp.f32 %v4664_v8 }
 0x97e   : > { %4731 = vperm.xlu0 %6613, %v7134_v2   ;;  %4632 = vperm.xlu1 %6614, %v7132_v44   ;;  %v7148_v11 = vpop.eup %7147  ;;  %7161 = vpow2.f32 %v3777_v53 }
 0x97f   : > { %v10219_v44 = vpop.eup %7149  ;;  %7163 = vpow2.f32 %v3767_v10 }
 0x981   : > { %v7152_v39 = vpop.eup %7151 }
 0x982   : > { %4741 = vperm.xlu0 %6613, %v7138_v0   ;;  %4706 = vperm.xlu1 %6614, %v7136_v33   ;;  %v10227_v2 = vpop.eup %7153 }
 0x985   : > { %v7156_v1 = vpop.eup %7155 }
 0x986   : > { %4751 = vperm.xlu0 %6613, %v7142_v34   ;;  %4716 = vperm.xlu1 %6614, %v7140_v20   ;;  %v10234_v23 = vpop.eup %7157 }
 0x987   : > { %v7160_v16 = vpop.eup %7159 }
 0x988   : > { %v10242_v18 = vpop.eup %7161 }
 0x98a   : > { %4761 = vperm.xlu0 %6613, %v7146_v58   ;;  %4726 = vperm.xlu1 %6614, %v7144_v7  }
 0x98c   : > { %v3789_v59 = vpop.permute.xlu0 %3788 }
 0x98d   : > { %v3862_v21 = vsub.f32 %v10025_v4, %v3789_v59  ;;  %v3784_v9 = vpop.permute.xlu1 %3783  ;;  %v3771_v4 = vmul.f32 1.442695, %v3744_v42 }
 0x98e   : > { %v3861_v6 = vsub.f32 %v10028_v28, %v3784_v9  ;;  %4065 = vperm.xlu0 %6613, %v10219_v44   ;;  %4736 = vperm.xlu1 %6614, %v7148_v11  }
 0x98f   : > { %v3879_v22 = vmul.f32 1.442695, %v3862_v21 }
 0x990   : > { %v3877_v14 = vmul.f32 1.442695, %v3861_v6 }
 0x991   : > { %v3799_v48 = vpop.permute.xlu1 %3798 }
 0x992   : > { %7165 = vpow2.f32 %v3877_v14  ;;  %4075 = vperm.xlu0 %6613, %v10227_v2   ;;  %4746 = vperm.xlu1 %6614, %v7152_v39   ;;  %v3864_v28 = vsub.f32 %v10031_v50, %v3799_v48 }
 0x993   : > { %7167 = vpow2.f32 %v3879_v22 }
 0x994   : > { %7169 = vpow2.f32 %v3771_v4  ;;  %v3883_v37 = vmul.f32 1.442695, %v3864_v28 }
 0x995   : > { %v3794_v12 = vpop.permute.xlu1 %3793  ;;  %v3804_v33 = vpop.permute.xlu0 %3803  ;;  %7171 = vpow2.f32 %v3775_v30 }
 0x996   : > { %v3863_v0 = vsub.f32 %v10033_v60, %v3794_v12  ;;  %v3865_v17 = vsub.f32 %v10038_v51, %v3804_v33  ;;  %4085 = vperm.xlu0 %6613, %v10234_v23   ;;  %4756 = vperm.xlu1 %6614, %v7156_v1   ;;  %v10247_v51 = vpop.eup %7163 }
 0x998   : > { %v3881_v50 = vmul.f32 1.442695, %v3863_v0  ;;  %v3885_v42 = vmul.f32 1.442695, %v3865_v17 }
 0x999   : > { %v3809_v20 = vpop.permute.xlu1 %3808  ;;  %v3814_v41 = vpop.permute.xlu0 %3813 }
 0x99a   : > { %7173 = vpow2.f32 %v3881_v50  ;;  %v3866_v52 = vsub.f32 %v10036_v40, %v3809_v20  ;;  %v3867_v60 = vsub.f32 %v10044_v15, %v3814_v41  ;;  %4095 = vperm.xlu0 %6613, %v10242_v18   ;;  %4766 = vperm.xlu1 %6614, %v7160_v16  }
 0x99b   : > { %7175 = vpow2.f32 %v3883_v37 }
 0x99c   : > { %v10252_v34 = vpop.eup %7165  ;;  %7177 = vpow2.f32 %v3885_v42  ;;  %v3887_v25 = vmul.f32 1.442695, %v3866_v52  ;;  %v3889_v62 = vmul.f32 1.442695, %v3867_v60 }
 0x99d   : > { %v10254_v7 = vpop.eup %7167  ;;  %6187 = vmatprep.mubr.f32.mxu0 %v10252_v34  ;;  %v3819_v40 = vpop.permute.xlu1 %3818 }
 0x99e   : > { %v10257_v15 = vpop.permute.xlu0 %4030  ;;  %7179 = vpow2.f32 %v3887_v25  ;;  %v3868_v58 = vsub.f32 %v10042_v45, %v3819_v40  ;;  %4070 = vperm.xlu1 %6614, %v10247_v51   ;;  %6188 = vmatmul.mubr.f32.vlgmr.msra.gmra.mrb[48].mxu0 %v10254_v7  ;;  %v10262_v19 = vpop.eup %7169 }
 0x99f   : > { %7181 = vpow2.f32 %v3779_v61  ;;  %v10267_v59 = vpop.eup %7171 }
 0x9a0   : > { %7183 = vpow2.f32 %v3889_v62  ;;  %v3891_v56 = vmul.f32 1.442695, %v3868_v58 }
 0x9a1   : > { %v3829_v35 = vpop.permute.xlu1 %3828 }
 0x9a2   : > { %v3824_v8 = vpop.permute.xlu0 %3823  ;;  %7185 = vpow2.f32 %v3891_v56  ;;  %v3870_v53 = vsub.f32 %v10048_v26, %v3829_v35  ;;  %4080 = vperm.xlu1 %6614, %v10262_v19  }
 0x9a3   : > { %v3869_v11 = vsub.f32 %v10050_v47, %v3824_v8 }
 0x9a4   : > { %v7174_v45 = vpop.eup %7173  ;;  %v3895_v10 = vmul.f32 1.442695, %v3870_v53 }
 0x9a5   : > { %v3893_v21 = vmul.f32 1.442695, %v3869_v11  ;;  %v7176_v9 = vpop.eup %7175  ;;  %v10269_v6 = vpop.permute.xlu1 %4025  ;;  %6190 = vmatprep.mubr.f32.mxu0 %v7174_v45 }
 0x9a6   : > { %v3834_v22 = vpop.permute.xlu0 %3833  ;;  %v10271_v39 = vpop.eup %7177  ;;  %7187 = vpow2.f32 %v3895_v10  ;;  %4090 = vperm.xlu1 %6614, %v10267_v59   ;;  %6191 = vmatmul.mubr.f32.gmra.mrb[50].mxu0 %v7176_v9 }
 0x9a7   : > { %v3871_v14 = vsub.f32 %v10056_v43, %v3834_v22  ;;  %7189 = vpow2.f32 %v3893_v21  ;;  %6193 = vmatprep.mubr.f32.mxu0 %v10271_v39 }
 0x9a8   : > { %v7180_v26 = vpop.eup %7179 }
 0x9a9   : > { %v3897_v47 = vmul.f32 1.442695, %v3871_v14  ;;  %v10276_v48 = vpop.eup %7181  ;;  %v10278_v4 = vpop.permute.xlu1 %4040 }
 0x9aa   : > { %v10280_v28 = vpop.permute.xlu0 %4045  ;;  %v10282_v1 = vpop.eup %7183  ;;  %4100 = vperm.xlu1 %6614, %v10276_v48   ;;  %6194 = vmatmul.mubr.f32.gmra.mrb[52].mxu0 %v7180_v26 }
 0x9ab   : > { %7191 = vpow2.f32 %v3897_v47  ;;  %6196 = vmatprep.mubr.f32.mxu0 %v10282_v1 }
 0x9ac   : > { %v7186_v43 = vpop.eup %7185 }
 0x9ad   : > { %v3839_v30 = vpop.permute.xlu1 %3838 }
 0x9ae   : > { %v3844_v12 = vpop.permute.xlu0 %3843  ;;  %v3872_v33 = vsub.f32 %v10054_v3, %v3839_v30  ;;  %6197 = vmatmul.mubr.f32.gmra.mrb[54].mxu0 %v7186_v43 }
 0x9af   : > { %v3873_v0 = vsub.f32 %v10062_v32, %v3844_v12 }
 0x9b0   : > { %v7188_v17 = vpop.eup %7187  ;;  %v3899_v37 = vmul.f32 1.442695, %v3872_v33 }
 0x9b1   : > { %v3901_v16 = vmul.f32 1.442695, %v3873_v0  ;;  %v7190_v50 = vpop.eup %7189  ;;  %v10288_v42 = vpop.permute.xlu1 %4035 }
 0x9b2   : > { %v10290_v20 = vpop.permute.xlu0 %4433  ;;  %7193 = vpow2.f32 %v3899_v37  ;;  %6199 = vmatprep.mubr.f32.mxu0 %v7190_v50 }
 0x9b3   : > { %7195 = vpow2.f32 %v3901_v16  ;;  %6200 = vmatmul.mubr.f32.gmra.mrb[56].mxu0 %v7188_v17 }
 0x9b5   : > { %v7192_v41 = vpop.eup %7191  ;;  %v10292_v52 = vpop.permute.xlu1 %4050 }
 0x9b6   : > { %6202 = vmatprep.mubr.f32.mxu0 %v7192_v41  ;;  %v10294_v3 = vpop.permute.xlu0 %4443 }
 0x9b9   : > { %3942 = vadd.xlane.f32.xlu0 %v10252_v34  ;;  %v3849_v32 = vpop.permute.xlu1 %3848 }
 0x9ba   : > { %v10297_v60 = vpop.permute.xlu0 %4453  ;;  %v3874_v61 = vsub.f32 %v10060_v24, %v3849_v32 }
 0x9bb   : > { %10913 = vst [vmem:[#allocation28_spill] sm:$0xff] %v10297_v60  ;;  %v3915_v60 = vld [vmem:[#allocation3 + $0x1a8] sm:$0xff] }
 0x9bc   : > { %v7194_v25 = vpop.eup %7193  ;;  %v3903_v62 = vmul.f32 1.442695, %v3874_v61 }
 0x9bd   : > { %v7196_v40 = vpop.eup %7195  ;;  %3948 = vadd.xlane.f32.xlu0 %v7176_v9  ;;  %v10300_v58 = vpop.permute.xlu1 %4060  ;;  %6203 = vmatmul.mubr.f32.gmra.mrb[58].mxu0 %v7194_v25 }
 0x9be   : > { %v10302_v56 = vpop.permute.xlu0 %4055  ;;  %7197 = vpow2.f32 %v3903_v62  ;;  %6205 = vmatprep.mubr.f32.mxu0 %v7196_v40 }
 0x9c1   : > { %3946 = vadd.xlane.f32.xlu0 %v7174_v45  ;;  %v3859_v35 = vpop.permute.xlu1 %3858 }
 0x9c2   : > { %v3854_v8 = vpop.permute.xlu0 %3853  ;;  %v3876_v34 = vsub.f32 %v10066_v31, %v3859_v35 }
 0x9c3   : > { %v3875_v53 = vsub.f32 %v10068_v29, %v3854_v8 }
 0x9c4   : > { %v3907_v11 = vmul.f32 1.442695, %v3876_v34  ;;  %v4541_v34 = vld [vmem:[#allocation4 + $0x90] sm:$0xff] }
 0x9c5   : > { %v3905_v24 = vmul.f32 1.442695, %v3875_v53  ;;  %3952 = vadd.xlane.f32.xlu0 %v7180_v26  ;;  %v10306_v10 = vpop.permute.xlu1 %4428  ;;  %v4542_v53 = vld [vmem:[#allocation4 + $0x98] sm:$0xff] }
 0x9c6   : > { %v10308_v21 = vpop.permute.xlu0 %4463  ;;  %7199 = vpow2.f32 %v3907_v11 }
 0x9c7   : > { %10914 = vst [vmem:[#allocation32_spill] sm:$0xff] %v10308_v21  ;;  %7201 = vpow2.f32 %v3905_v24 }
 0x9c8   : > { %v7198_v9 = vpop.eup %7197 }
 0x9c9   : > { %3956 = vadd.xlane.f32.xlu0 %v7186_v43  ;;  %v10310_v22 = vpop.permute.xlu1 %4438  ;;  %6206 = vmatmul.mubr.f32.gmra.mrb[60].mxu0 %v7198_v9 }
 0x9ca   : > { %10915 = vst [vmem:[#allocation33_spill] sm:$0xff] %v10310_v22  ;;  %v10312_v45 = vpop.permute.xlu0 %4473 }
 0x9cb   : > { %10916 = vst [vmem:[#allocation31_spill] sm:$0xff] %v10312_v45 }
 0x9cd   : > { %3960 = vadd.xlane.f32.xlu0 %v7188_v17  ;;  %v10314_v31 = vpop.permute.xlu1 %4448  ;;  %v4666_v17 = vld [vmem:[#allocation3 + $0x178] sm:$0xff] }
 0x9ce   : > { %10917 = vst [vmem:[#allocation34_spill] sm:$0xff] %v10314_v31  ;;  %3944 = vadd.xlane.f32.xlu1 %v10254_v7  ;;  %v10317_v14 = vpop.permute.xlu0 %4483  ;;  %7203 = vrcp.f32 %v4666_v17  ;;  %v4544_v17 = vld [vmem:[#allocation4 + $0xa8] sm:$0xff] }
 0x9cf   : > { %10918 = vst [vmem:[#allocation35_spill] sm:$0xff] %v10317_v14 }
 0x9d0   : > { %v7200_v29 = vpop.eup %7199 }
 0x9d1   : > { %v7202_v26 = vpop.eup %7201  ;;  %3964 = vadd.xlane.f32.xlu0 %v7194_v25  ;;  %v10319_v47 = vpop.permute.xlu1 %4458 }
 0x9d2   : > { %10919 = vst [vmem:[#allocation37_spill] sm:$0xff] %v10319_v47  ;;  %6208 = vmatprep.mubr.f32.mxu0 %v7202_v26  ;;  %3950 = vadd.xlane.f32.xlu1 %v10271_v39  ;;  %v4558_v30 = vpop.permute.xlu0 %4557  ;;  %v4665_v39 = vld [vmem:[#allocation3 + $0x170] sm:$0xff] }
 0x9d3   : > { %6209 = vmatmul.mubr.f32.gmra.mrb[62].mxu0 %v7200_v29  ;;  %7205 = vrcp.f32 %v4665_v39 }
 0x9d5   : > { %v10322_v43 = vpop.permute.xlu1 %4468  ;;  %3966 = vadd.xlane.f32.xlu0 %v7196_v40  ;;  %v4540_v40 = vld [vmem:[#allocation4 + $0x88] sm:$0xff] }
 0x9d6   : > { %10920 = vst [vmem:[#allocation19_spill] sm:$0xff] %v10322_v43  ;;  %3954 = vadd.xlane.f32.xlu1 %v10282_v1  ;;  %v4568_v7 = vpop.permute.xlu0 %4567  ;;  %v3912_v43 = vld [vmem:[#allocation3 + $0x190] sm:$0xff] }
 0x9d7   : > { %v4637_v24 = vmul.f32 %v4568_v7, %v4541_v34  ;;  %v3928_v21 = vmul.f32 %v10192_v38, %v3912_v43  ;;  %v3919_v38 = vld [vmem:[#allocation3 + $0x1c8] sm:$0xff] }
 0x9d8   : > { %v7204_v1 = vpop.eup %7203 }
 0x9d9   : > { %3972 = vadd.xlane.f32.xlu0 %v7200_v29  ;;  %v10325_v12 = vpop.permute.xlu1 %4478 }
 0x9da   : > { %10921 = vst [vmem:[#allocation20_spill] sm:$0xff] %v10325_v12  ;;  %3958 = vadd.xlane.f32.xlu1 %v7190_v50  ;;  %v4578_v0 = vpop.permute.xlu0 %4577  ;;  %v4539_v50 = vld [vmem:[#allocation4 + $0x80] sm:$0xff] }
 0x9db   : > { %v4635_v35 = vmul.f32 %v4558_v30, %v4539_v50 }
 0x9dd   : > { %3970 = vadd.xlane.f32.xlu0 %v7202_v26  ;;  %v10327_v33 = vpop.permute.xlu1 %4488  ;;  %v7206_v25 = vpop.eup %7205  ;;  %v4543_v26 = vld [vmem:[#allocation4 + $0xa0] sm:$0xff] }
 0x9de   : > { %3962 = vadd.xlane.f32.xlu1 %v7192_v41  ;;  %10922 = vst [vmem:[#allocation21_spill] sm:$0xff] %v10327_v33  ;;  %v4588_v16 = vpop.permute.xlu0 %4587  ;;  %v4639_v39 = vmul.f32 %v4578_v0, %v4543_v26  ;;  %v4551_v26 = vld [vmem:[#allocation4 + $0xe0] sm:$0xff] }
 0x9e1   : > { %v4563_v37 = vpop.permute.xlu1 %4562 }
 0x9e2   : > { %3968 = vadd.xlane.f32.xlu1 %v7198_v9  ;;  %v4598_v61 = vpop.permute.xlu0 %4597  ;;  %v4636_v8 = vmul.f32 %v4563_v37, %v4540_v40  ;;  %v4545_v37 = vld [vmem:[#allocation4 + $0xb0] sm:$0xff] }
 0x9e3   : > { %v4641_v40 = vmul.f32 %v4588_v16, %v4545_v37 }
 0x9e5   : > { %v4573_v32 = vpop.permute.xlu1 %4572 }
 0x9e6   : > { %v4608_v41 = vpop.permute.xlu0 %4607  ;;  %v4638_v9 = vmul.f32 %v4573_v32, %v4542_v53  ;;  %v4547_v32 = vld [vmem:[#allocation4 + $0xc0] sm:$0xff]  ;;  %v4549_v53 = vld [vmem:[#allocation4 + $0xd0] sm:$0xff] }
 0x9e7   : > { %v4643_v34 = vmul.f32 %v4598_v61, %v4547_v32  ;;  %v4552_v61 = vld [vmem:[#allocation4 + $0xe8] sm:$0xff] }
 0x9e9   : > { %v4583_v62 = vpop.permute.xlu1 %4582 }
 0x9ea   : > { %v4618_v29 = vpop.permute.xlu0 %4617 }
 0x9ed   : > { %v4593_v11 = vpop.permute.xlu1 %4592 }
 0x9ee   : > { %v4628_v50 = vpop.permute.xlu0 %4627 }
 0x9f1   : > { %v4603_v30 = vpop.permute.xlu1 %4602 }
 0x9f3   : > { %4776 = vperm.xlu1 %6614, %v7204_v1   ;;  %4771 = vperm.xlu0 %6613, %v7206_v25   ;;  %v4640_v1 = vmul.f32 %v4583_v62, %v4544_v17  ;;  %v4546_v25 = vld [vmem:[#allocation4 + $0xb8] sm:$0xff]  ;;  %v10337_v62 = vpop.permute.xlu0 %4701 }
 0x9f4   : > { %v4642_v7 = vmul.f32 %v4593_v11, %v4546_v25 }
 0x9f7   : > { %4957 = vrot.lane.b32.xlu1 %v4636_v8, %s7491_s20  ;;  %4955 = vrot.lane.b32.xlu0 %v4635_v35, %s7491_s20  ;;  %v4548_v35 = vld [vmem:[#allocation4 + $0xc8] sm:$0xff]  ;;  %v4613_v8 = vpop.permute.xlu1 %4612  ;;  %v10343_v17 = vpop.permute.xlu0 %4711 }
 0x9f8   : > { %v4644_v0 = vmul.f32 %v4603_v30, %v4548_v35  ;;  %v4553_v30 = vld [vmem:[#allocation4 + $0xf0] sm:$0xff] }
 0x9f9   : > { %v4649_v37 = vmul.f32 %v4628_v50, %v4553_v30 }
 0x9fb   : > { %4961 = vrot.lane.b32.xlu1 %v4638_v9, %s7491_s20  ;;  %4959 = vrot.lane.b32.xlu0 %v4637_v24, %s7491_s20  ;;  %v4550_v24 = vld [vmem:[#allocation4 + $0xd8] sm:$0xff]  ;;  %v4645_v9 = vmul.f32 %v4608_v41, %v4549_v53  ;;  %v4623_v11 = vpop.permute.xlu1 %4622  ;;  %v10347_v25 = vpop.permute.xlu0 %4721 }
 0x9fc   : > { %v4646_v16 = vmul.f32 %v4613_v8, %v4550_v24 }
 0x9ff   : > { %4965 = vrot.lane.b32.xlu1 %v4640_v1, %s7491_s20  ;;  %4963 = vrot.lane.b32.xlu0 %v4639_v39, %s7491_s20  ;;  %v4647_v39 = vmul.f32 %v4618_v29, %v4551_v26  ;;  %v4648_v1 = vmul.f32 %v4623_v11, %v4552_v61  ;;  %v10350_v41 = vpop.permute.xlu1 %4632  ;;  %v3910_v61 = vld [vmem:[#allocation3 + $0x180] sm:$0xff] }
 0xa03   : > { %4969 = vrot.lane.b32.xlu1 %v4642_v7, %s7491_s20  ;;  %4967 = vrot.lane.b32.xlu0 %v4641_v40, %s7491_s20  ;;  %v10352_v40 = vpop.permute.xlu0 %4731  ;;  %v10354_v7 = vpop.permute.xlu1 %4706 }
 0xa07   : > { %4973 = vrot.lane.b32.xlu1 %v4644_v0, %s7491_s20  ;;  %4971 = vrot.lane.b32.xlu0 %v4643_v34, %s7491_s20  ;;  %v10356_v32 = vpop.permute.xlu0 %4741  ;;  %v10358_v29 = vpop.permute.xlu1 %4716 }
 0xa0b   : > { %4977 = vrot.lane.b32.xlu1 %v4646_v16, %s7491_s20  ;;  %4975 = vrot.lane.b32.xlu0 %v4645_v9, %s7491_s20  ;;  %v10360_v35 = vpop.permute.xlu0 %4751  ;;  %v10362_v8 = vpop.permute.xlu1 %4726 }
 0xa0f   : > { %4981 = vrot.lane.b32.xlu1 %v4648_v1, %s7491_s20  ;;  %4979 = vrot.lane.b32.xlu0 %v4647_v39, %s7491_s20  ;;  %v10364_v34 = vpop.permute.xlu0 %4761  ;;  %v10366_v50 = vpop.permute.xlu1 %4736  ;;  %v3926_v1 = vmul.f32 %v10141_v55, %v3910_v61 }
 0xa13   : > { %4983 = vrot.lane.b32.xlu0 %v4649_v37, %s7491_s20  ;;  %v10368_v0 = vpop.permute.xlu0 %4065  ;;  %v10370_v53 = vpop.permute.xlu1 %4746  ;;  %v3913_v37 = vld [vmem:[#allocation3 + $0x198] sm:$0xff] }
 0xa14   : > { %v3929_v12 = vmul.f32 %v10157_v5, %v3913_v37  ;;  %v3931_v5 = vmul.f32 %v10195_v13, %v3915_v60  ;;  %v3921_v37 = vld [vmem:[#allocation3 + $0x1d8] sm:$0xff] }
 0xa17   : > { %v10372_v24 = vpop.permute.xlu0 %4075  ;;  %v10374_v9 = vpop.permute.xlu1 %4756 }
 0xa1b   : > { %v10376_v16 = vpop.permute.xlu0 %4085  ;;  %v10378_v11 = vpop.permute.xlu1 %4766 }
 0xa1f   : > { %v10380_v26 = vpop.permute.xlu0 %4095  ;;  %v10382_v39 = vpop.permute.xlu1 %4070 }
 0xa23   : > { %v10387_v45 = vpop.permute.xlu1 %4080 }
 0xa27   : > { %v10391_v61 = vpop.permute.xlu1 %4090 }
 0xa2b   : > { %v10397_v43 = vpop.permute.xlu1 %4100 }
 0xa46   : > { %v3943_v30 = vpop.xlane.xlu0 %3942 }
 0xa47   : > { %v3974_v33 = vadd.f32 %v3943_v30, %v3926_v1  ;;  %v3917_v1 = vld [vmem:[#allocation3 + $0x1b8] sm:$0xff] }
 0xa49   : > { %3990 = vst.msk [vmem:[#allocation3 + $0x180] sm:$0xff] %vm307_vm2, %v3974_v33 }
 0xa4a   : > { %v3949_v14 = vpop.xlane.xlu0 %3948 }
 0xa4b   : > { %v3977_v47 = vadd.f32 %v3949_v14, %v3929_v12  ;;  %v3933_v14 = vmul.f32 %v10201_v49, %v3917_v1  ;;  %v3914_v49 = vld [vmem:[#allocation3 + $0x1a0] sm:$0xff] }
 0xa4d   : > { %3993 = vst.msk [vmem:[#allocation3 + $0x198] sm:$0xff] %vm307_vm2, %v3977_v47 }
 0xa4e   : > { %v3947_v31 = vpop.xlane.xlu0 %3946 }
 0xa4f   : > { %v3976_v22 = vadd.f32 %v3947_v31, %v3928_v21  ;;  %v3911_v31 = vld [vmem:[#allocation3 + $0x188] sm:$0xff] }
 0xa50   : > { %v4795_v55 = vld [vmem:[#allocation3 + $0x180] sm:$0xff]  ;;  %v3927_v60 = vmul.f32 %v10100_v54, %v3911_v31  ;;  %v3916_v54 = vld [vmem:[#allocation3 + $0x1b0] sm:$0xff] }
 0xa51   : > { %7207 = vrcp.f32 %v4795_v55  ;;  %3992 = vst.msk [vmem:[#allocation3 + $0x190] sm:$0xff] %vm307_vm2, %v3976_v22  ;;  %v3935_v22 = vmul.f32 %v10247_v51, %v3919_v38  ;;  %v3922_v51 = vld [vmem:[#allocation3 + $0x1e0] sm:$0xff] }
 0xa52   : > { %v3953_v33 = vpop.xlane.xlu0 %3952 }
 0xa53   : > { %v3979_v30 = vadd.f32 %v3953_v33, %v3931_v5 }
 0xa55   : > { %3995 = vst.msk [vmem:[#allocation3 + $0x1a8] sm:$0xff] %vm307_vm2, %v3979_v30  ;;  %v3937_v30 = vmul.f32 %v10262_v19, %v3921_v37  ;;  %v3925_v19 = vld [vmem:[#allocation3 + $0x1f8] sm:$0xff] }
 0xa56   : > { %v3957_v47 = vpop.xlane.xlu0 %3956 }
 0xa57   : > { %v3981_v21 = vadd.f32 %v3957_v47, %v3933_v14  ;;  %v3930_v47 = vmul.f32 %v10165_v46, %v3914_v49  ;;  %v3941_v49 = vmul.f32 %v10276_v48, %v3925_v19 }
 0xa58   : > { %v4797_v12 = vld [vmem:[#allocation3 + $0x190] sm:$0xff] }
 0xa59   : > { %7209 = vrcp.f32 %v4797_v12  ;;  %3997 = vst.msk [vmem:[#allocation3 + $0x1b8] sm:$0xff] %vm307_vm2, %v3981_v21  ;;  %v3938_v12 = vmul.f32 %v10234_v23, %v3922_v51  ;;  %v3920_v51 = vld [vmem:[#allocation3 + $0x1d0] sm:$0xff] }
 0xa5a   : > { %v3961_v13 = vpop.xlane.xlu0 %3960 }
 0xa5b   : > { %v7208_v55 = vpop.eup %7207  ;;  %v3983_v5 = vadd.f32 %v3961_v13, %v3935_v22  ;;  %v3945_v33 = vpop.xlane.xlu1 %3944  ;;  %v3932_v13 = vmul.f32 %v10199_v63, %v3916_v54  ;;  %v3924_v63 = vld [vmem:[#allocation3 + $0x1f0] sm:$0xff] }
 0xa5c   : > { %v3975_v1 = vadd.f32 %v3945_v33, %v3927_v60  ;;  %4845 = vperm.xlu0 %6613, %v7208_v55   ;;  %v3940_v54 = vmul.f32 %v10242_v18, %v3924_v63 }
 0xa5d   : > { %3999 = vst.msk [vmem:[#allocation3 + $0x1c8] sm:$0xff] %vm307_vm2, %v3983_v5  ;;  %v3918_v5 = vld [vmem:[#allocation3 + $0x1c0] sm:$0xff] }
 0xa5e   : > { %3991 = vst.msk [vmem:[#allocation3 + $0x188] sm:$0xff] %vm307_vm2, %v3975_v1  ;;  %v3965_v14 = vpop.xlane.xlu0 %3964  ;;  %v4798_v1 = vld [vmem:[#allocation3 + $0x198] sm:$0xff] }
 0xa5f   : > { %v3985_v38 = vadd.f32 %v3965_v14, %v3937_v30  ;;  %v3951_v21 = vpop.xlane.xlu1 %3950  ;;  %v3934_v30 = vmul.f32 %v10219_v44, %v3918_v5 }
 0xa60   : > { %v3978_v31 = vadd.f32 %v3951_v21, %v3930_v47  ;;  %v4802_v5 = vld [vmem:[#allocation3 + $0x1b8] sm:$0xff] }
 0xa61   : > { %4001 = vst.msk [vmem:[#allocation3 + $0x1d8] sm:$0xff] %vm307_vm2, %v3985_v38 }
 0xa62   : > { %3994 = vst.msk [vmem:[#allocation3 + $0x1a0] sm:$0xff] %vm307_vm2, %v3978_v31  ;;  %v3967_v22 = vpop.xlane.xlu0 %3966  ;;  %v4800_v31 = vld [vmem:[#allocation3 + $0x1a8] sm:$0xff] }
 0xa63   : > { %v7210_v60 = vpop.eup %7209  ;;  %v3986_v37 = vadd.f32 %v3967_v22, %v3938_v12  ;;  %v3955_v55 = vpop.xlane.xlu1 %3954  ;;  %v3936_v12 = vmul.f32 %v10227_v2, %v3920_v51 }
 0xa64   : > { %v3980_v46 = vadd.f32 %v3955_v55, %v3932_v13  ;;  %4855 = vperm.xlu0 %6613, %v7210_v60   ;;  %v3923_v13 = vld [vmem:[#allocation3 + $0x1e8] sm:$0xff]  ;;  %v4007_v55 = vld [vmem:[#allocation4 + $0x180] sm:$0xff] }
 0xa65   : > { %v4796_v33 = vld [vmem:[#allocation3 + $0x188] sm:$0xff]  ;;  %4002 = vst.msk [vmem:[#allocation3 + $0x1e0] sm:$0xff] %vm307_vm2, %v3986_v37  ;;  %v3939_v18 = vmul.f32 %v10267_v59, %v3923_v13 }
 0xa66   : > { %7211 = vrcp.f32 %v4796_v33  ;;  %3996 = vst.msk [vmem:[#allocation3 + $0x1b0] sm:$0xff] %vm307_vm2, %v3980_v46  ;;  %v3973_v23 = vpop.xlane.xlu0 %3972  ;;  %v4008_v60 = vld [vmem:[#allocation4 + $0x188] sm:$0xff] }
 0xa67   : > { %v3989_v14 = vadd.f32 %v3973_v23, %v3941_v49  ;;  %v3959_v47 = vpop.xlane.xlu1 %3958  ;;  %7213 = vrcp.f32 %v4798_v1  ;;  %v4104_v2 = vmul.f32 %v10257_v15, %v4008_v60  ;;  %v4103_v1 = vmul.f32 %v10269_v6, %v4007_v55  ;;  %v4804_v63 = vld [vmem:[#allocation3 + $0x1c8] sm:$0xff]  ;;  %v4009_v6 = vld [vmem:[#allocation4 + $0x190] sm:$0xff]  ;;  %v4011_v60 = vld [vmem:[#allocation4 + $0x1a0] sm:$0xff] }
 0xa68   : > { %v3982_v38 = vadd.f32 %v3959_v47, %v3934_v30  ;;  %v4012_v13 = vld [vmem:[#allocation4 + $0x1a8] sm:$0xff] }
 0xa69   : > { %v4799_v21 = vld [vmem:[#allocation3 + $0x1a0] sm:$0xff]  ;;  %4005 = vst.msk [vmem:[#allocation3 + $0x1f8] sm:$0xff] %vm307_vm2, %v3989_v14 }
 0xa6a   : > { %7215 = vrcp.f32 %v4799_v21  ;;  %3998 = vst.msk [vmem:[#allocation3 + $0x1c0] sm:$0xff] %vm307_vm2, %v3982_v38  ;;  %v3971_v48 = vpop.xlane.xlu0 %3970  ;;  %v4010_v21 = vld [vmem:[#allocation4 + $0x198] sm:$0xff] }
 0xa6b   : > { %v3988_v22 = vadd.f32 %v3971_v48, %v3940_v54  ;;  %v3963_v44 = vpop.xlane.xlu1 %3962  ;;  %7217 = vrcp.f32 %v4800_v31  ;;  %v4806_v54 = vld [vmem:[#allocation3 + $0x1d8] sm:$0xff] }
 0xa6c   : > { %v3984_v19 = vadd.f32 %v3963_v44, %v3936_v12  ;;  %v4807_v48 = vld [vmem:[#allocation3 + $0x1e0] sm:$0xff]  ;;  %v4105_v44 = vmul.f32 %v10288_v42, %v4009_v6  ;;  %v4014_v42 = vld [vmem:[#allocation4 + $0x1b8] sm:$0xff] }
 0xa6d   : > { %v4801_v37 = vld [vmem:[#allocation3 + $0x1b0] sm:$0xff]  ;;  %4004 = vst.msk [vmem:[#allocation3 + $0x1f0] sm:$0xff] %vm307_vm2, %v3988_v22  ;;  %v4106_v22 = vmul.f32 %v10278_v4, %v4010_v21  ;;  %v4107_v4 = vmul.f32 %v10280_v28, %v4011_v60  ;;  %v4016_v21 = vld [vmem:[#allocation4 + $0x1c8] sm:$0xff] }
 0xa6e   : > { %7219 = vrcp.f32 %v4801_v37  ;;  %4000 = vst.msk [vmem:[#allocation3 + $0x1d0] sm:$0xff] %vm307_vm2, %v3984_v19 }
 0xa6f   : > { %v3969_v46 = vpop.xlane.xlu1 %3968  ;;  %7221 = vrcp.f32 %v4802_v5 }
 0xa70   : > { %v7212_v33 = vpop.eup %7211  ;;  %v3987_v49 = vadd.f32 %v3969_v46, %v3939_v18 }
 0xa71   : > { %v4803_v23 = vld [vmem:[#allocation3 + $0x1c0] sm:$0xff]  ;;  %v6189_v30 = vpop.f32.mrb[48].mxu0  ;;  %4850 = vperm.xlu1 %6614, %v7212_v33   ;;  %v7214_v51 = vpop.eup %7213 }
 0xa72   : > { %7223 = vrcp.f32 %v4803_v23  ;;  %4003 = vst.msk [vmem:[#allocation3 + $0x1e8] sm:$0xff] %vm307_vm2, %v3987_v49  ;;  %v4313_v14 = vadd.f32 %v6189_v30, %v4104_v2  ;;  %v4233_v47 = vpop.f32.mrb[49].mxu0  ;;  %v4108_v49 = vmul.f32 %v10292_v52, %v4012_v13  ;;  %v4013_v23 = vld [vmem:[#allocation4 + $0x1b0] sm:$0xff]  ;;  %v4110_v52 = vmul.f32 %v10300_v58, %v4014_v42 }
 0xa73   : > { %v4312_v38 = vadd.f32 %v4233_v47, %v4103_v1  ;;  %7225 = vrcp.f32 %v4804_v63  ;;  %v4810_v47 = vld [vmem:[#allocation3 + $0x1f8] sm:$0xff]  ;;  %v4109_v28 = vmul.f32 %v10302_v56, %v4013_v23  ;;  %v4112_v58 = vmul.f32 %v10382_v39, %v4016_v21 }
 0xa74   : > { %v7216_v59 = vpop.eup %7215  ;;  %4329 = vst.msk [vmem:[#allocation4 + $0x188] sm:$0xff] %vm436_vm0, %v4313_v14  ;;  %v4809_v37 = vld [vmem:[#allocation3 + $0x1f0] sm:$0xff] }
 0xa75   : > { %v4805_v15 = vld [vmem:[#allocation3 + $0x1d0] sm:$0xff]  ;;  %4328 = vst.msk [vmem:[#allocation4 + $0x180] sm:$0xff] %vm436_vm0, %v4312_v38  ;;  %4860 = vperm.xlu1 %6614, %v7214_v51   ;;  %4865 = vperm.xlu0 %6613, %v7216_v59   ;;  %v7218_v31 = vpop.eup %7217 }
 0xa76   : > { %7227 = vrcp.f32 %v4805_v15 }
 0xa77   : > { %7229 = vrcp.f32 %v4806_v54 }
 0xa78   : > { %v7220_v12 = vpop.eup %7219  ;;  %7231 = vrcp.f32 %v4807_v48 }
 0xa79   : > { %v6192_v19 = vpop.f32.mrb[50].mxu0  ;;  %4875 = vperm.xlu0 %6613, %v7220_v12   ;;  %4870 = vperm.xlu1 %6614, %v7218_v31   ;;  %v7222_v18 = vpop.eup %7221  ;;  %v4808_v46 = vld [vmem:[#allocation3 + $0x1e8] sm:$0xff]  ;;  %7233 = vrcp.f32 %v4809_v37  ;;  %v4015_v31 = vld [vmem:[#allocation4 + $0x1c0] sm:$0xff] }
 0xa7a   : > { %v4315_v55 = vadd.f32 %v6192_v19, %v4106_v22  ;;  %v4243_v5 = vpop.f32.mrb[51].mxu0  ;;  %7235 = vrcp.f32 %v4808_v46  ;;  %v4111_v56 = vmul.f32 %v10368_v0, %v4015_v31  ;;  %v4017_v46 = vld [vmem:[#allocation4 + $0x1d0] sm:$0xff]  ;;  %v4690_v31 = vld [vmem:[#allocation4 + $0x138] sm:$0xff] }
 0xa7b   : > { %v4314_v33 = vadd.f32 %v4243_v5, %v4105_v44  ;;  %7237 = vrcp.f32 %v4810_v47  ;;  %v4685_v0 = vld [vmem:[#allocation4 + $0x110] sm:$0xff]  ;;  %v4113_v42 = vmul.f32 %v10372_v24, %v4017_v46 }
 0xa7c   : > { %v7224_v2 = vpop.eup %7223  ;;  %4331 = vst.msk [vmem:[#allocation4 + $0x198] sm:$0xff] %vm436_vm0, %v4315_v55  ;;  %v4683_v55 = vld [vmem:[#allocation4 + $0x100] sm:$0xff] }
 0xa7d   : > { %4330 = vst.msk [vmem:[#allocation4 + $0x190] sm:$0xff] %vm436_vm0, %v4314_v33  ;;  %v6195_v1 = vpop.f32.mrb[52].mxu0  ;;  %4885 = vperm.xlu0 %6613, %v7224_v2   ;;  %4880 = vperm.xlu1 %6614, %v7222_v18   ;;  %v7226_v14 = vpop.eup %7225  ;;  %v4779_v39 = vmul.f32 %v10337_v62, %v4683_v55  ;;  %v4018_v18 = vld [vmem:[#allocation4 + $0x1d8] sm:$0xff]  ;;  %v4781_v2 = vmul.f32 %v10343_v17, %v4685_v0  ;;  %v4687_v62 = vld [vmem:[#allocation4 + $0x120] sm:$0xff] }
 0xa7e   : > { %v4317_v30 = vadd.f32 %v6195_v1, %v4108_v49  ;;  %v4253_v63 = vpop.f32.mrb[53].mxu0  ;;  %v4554_v33 = vld [vmem:[#allocation4 + $0xf8] sm:$0xff]  ;;  %v4783_v47 = vmul.f32 %v10347_v25, %v4687_v62  ;;  %v4691_v25 = vld [vmem:[#allocation4 + $0x140] sm:$0xff] }
 0xa7f   : > { %v4316_v51 = vadd.f32 %v4253_v63, %v4107_v4  ;;  %v4650_v49 = vmul.f32 %v10350_v41, %v4554_v33  ;;  %v4114_v4 = vmul.f32 %v10387_v45, %v4018_v18  ;;  %v4684_v63 = vld [vmem:[#allocation4 + $0x108] sm:$0xff]  ;;  %v4689_v45 = vld [vmem:[#allocation4 + $0x130] sm:$0xff]  ;;  %v4686_v41 = vld [vmem:[#allocation4 + $0x118] sm:$0xff] }
 0xa80   : > { %v7228_v38 = vpop.eup %7227  ;;  %4333 = vst.msk [vmem:[#allocation4 + $0x1a8] sm:$0xff] %vm436_vm0, %v4317_v30  ;;  %v4780_v17 = vmul.f32 %v10354_v7, %v4684_v63  ;;  %v4785_v24 = vmul.f32 %v10352_v40, %v4689_v45  ;;  %v4688_v7 = vld [vmem:[#allocation4 + $0x128] sm:$0xff]  ;;  %v4827_v63 = vld [vmem:[#allocation4 + $0x180] sm:$0xff] }
 0xa81   : > { %4332 = vst.msk [vmem:[#allocation4 + $0x1a0] sm:$0xff] %vm436_vm0, %v4316_v51  ;;  %v6198_v59 = vpop.f32.mrb[54].mxu0  ;;  %4895 = vperm.xlu0 %6613, %v7228_v38   ;;  %4890 = vperm.xlu1 %6614, %v7226_v14   ;;  %v7230_v54 = vpop.eup %7229  ;;  %v4782_v51 = vmul.f32 %v10358_v29, %v4686_v41  ;;  %v4020_v38 = vld [vmem:[#allocation4 + $0x1e8] sm:$0xff]  ;;  %v4693_v29 = vld [vmem:[#allocation4 + $0x150] sm:$0xff] }
 0xa82   : > { %v4319_v15 = vadd.f32 %v6198_v59, %v4110_v52  ;;  %v4263_v6 = vpop.f32.mrb[55].mxu0  ;;  %v7232_v12 = vpop.eup %7231  ;;  %v4019_v52 = vld [vmem:[#allocation4 + $0x1e0] sm:$0xff]  ;;  %v4784_v59 = vmul.f32 %v10362_v8, %v4688_v7  ;;  %v4116_v21 = vmul.f32 %v10391_v61, %v4020_v38  ;;  %v4022_v61 = vld [vmem:[#allocation4 + $0x1f8] sm:$0xff] }
 0xa83   : > { %v4318_v48 = vadd.f32 %v4263_v6, %v4109_v28  ;;  %v7234_v44 = vpop.eup %7233  ;;  %v4787_v28 = vmul.f32 %v10356_v32, %v4691_v25  ;;  %v4786_v32 = vmul.f32 %v10366_v50, %v4690_v31  ;;  %v4695_v8 = vld [vmem:[#allocation4 + $0x160] sm:$0xff]  ;;  %v4694_v50 = vld [vmem:[#allocation4 + $0x158] sm:$0xff] }
 0xa84   : > { %4335 = vst.msk [vmem:[#allocation4 + $0x1b8] sm:$0xff] %vm436_vm0, %v4319_v15  ;;  %v7236_v60 = vpop.eup %7235  ;;  %v4115_v15 = vmul.f32 %v10376_v16, %v4019_v52  ;;  %v4692_v16 = vld [vmem:[#allocation4 + $0x148] sm:$0xff]  ;;  %v4829_v45 = vld [vmem:[#allocation4 + $0x190] sm:$0xff] }
 0xa85   : > { %4334 = vst.msk [vmem:[#allocation4 + $0x1b0] sm:$0xff] %vm436_vm0, %v4318_v48  ;;  %4900 = vperm.xlu1 %6614, %v7230_v54   ;;  %4905 = vperm.xlu0 %6613, %v7232_v12   ;;  %v7238_v5 = vpop.eup %7237  ;;  %v4789_v12 = vmul.f32 %v10360_v35, %v4693_v29  ;;  %v4118_v35 = vmul.f32 %v10397_v43, %v4022_v61  ;;  %v4828_v52 = vld [vmem:[#allocation4 + $0x188] sm:$0xff] }
 0xa86   : > { %v6201_v22 = vpop.f32.mrb[56].mxu0 }
 0xa87   : > { %v4321_v13 = vadd.f32 %v6201_v22, %v4112_v58  ;;  %v4273_v19 = vpop.f32.mrb[57].mxu0  ;;  %v4791_v58 = vmul.f32 %v10364_v34, %v4695_v8  ;;  %v4021_v22 = vld [vmem:[#allocation4 + $0x1f0] sm:$0xff] }
 0xa88   : > { %v4320_v37 = vadd.f32 %v4273_v19, %v4111_v56  ;;  %v4788_v56 = vmul.f32 %v10370_v53, %v4692_v16  ;;  %v4697_v19 = vld [vmem:[#allocation4 + $0x170] sm:$0xff]  ;;  %v4696_v53 = vld [vmem:[#allocation4 + $0x168] sm:$0xff] }
 0xa89   : > { %4337 = vst.msk [vmem:[#allocation4 + $0x1c8] sm:$0xff] %vm436_vm0, %v4321_v13  ;;  %4910 = vperm.xlu1 %6614, %v7236_v60   ;;  %4915 = vperm.xlu0 %6613, %v7234_v44   ;;  %v4772_v44 = vpop.permute.xlu0 %4771  ;;  %v4117_v13 = vmul.f32 %v10380_v26, %v4021_v22  ;;  %v4792_v43 = vmul.f32 %v10378_v11, %v4696_v53  ;;  %v4777_v26 = vpop.permute.xlu1 %4776 }
 0xa8a   : > { %4336 = vst.msk [vmem:[#allocation4 + $0x1c0] sm:$0xff] %vm436_vm0, %v4320_v37  ;;  %v4790_v37 = vmul.f32 %v10374_v9, %v4694_v50  ;;  %v4793_v55 = vmul.f32 %v4772_v44, %v4697_v19  ;;  %v4698_v9 = vld [vmem:[#allocation4 + $0x178] sm:$0xff] }
 0xa8b   : > { %v4794_v46 = vmul.f32 %v4777_v26, %v4698_v9  ;;  %v4834_v8 = vld [vmem:[#allocation4 + $0x1b8] sm:$0xff] }
 0xa8c   : > { %v4833_v31 = vld [vmem:[#allocation4 + $0x1b0] sm:$0xff] }
 0xa8d   : > { %4920 = vperm.xlu1 %6614, %v7238_v5   ;;  %5019 = vrot.lane.b32.xlu0 %v4779_v39, %s7490_s16  ;;  %v10484_v18 = vpop.permute.xlu0 %4955 }
 0xa90   : > { %v6204_v1 = vpop.f32.mrb[58].mxu0  ;;  %v4836_v44 = vld [vmem:[#allocation4 + $0x1c8] sm:$0xff] }
 0xa91   : > { %v4323_v23 = vadd.f32 %v6204_v1, %v4114_v4  ;;  %v4283_v30 = vpop.f32.mrb[59].mxu0  ;;  %4985 = vrot.lane.b32.xlu1 %v4650_v49, %s7491_s20  ;;  %5023 = vrot.lane.b32.xlu0 %v4781_v2, %s7490_s16  ;;  %v10488_v0 = vpop.permute.xlu0 %4959  ;;  %v4835_v61 = vld [vmem:[#allocation4 + $0x1c0] sm:$0xff] }
 0xa92   : > { %v4322_v14 = vadd.f32 %v4283_v30, %v4113_v42  ;;  %v10496_v4 = vpop.permute.xlu1 %4957 }
 0xa93   : > { %4339 = vst.msk [vmem:[#allocation4 + $0x1d8] sm:$0xff] %vm436_vm0, %v4323_v23 }
 0xa94   : > { %4338 = vst.msk [vmem:[#allocation4 + $0x1d0] sm:$0xff] %vm436_vm0, %v4322_v14 }
 0xa95   : > { %5021 = vrot.lane.b32.xlu1 %v4780_v17, %s7490_s16  ;;  %5027 = vrot.lane.b32.xlu0 %v4783_v47, %s7490_s16  ;;  %v10490_v33 = vpop.permute.xlu0 %4963 }
 0xa96   : > { %v10500_v42 = vpop.permute.xlu1 %4961 }
 0xa99   : > { %5025 = vrot.lane.b32.xlu1 %v4782_v51, %s7490_s16  ;;  %5031 = vrot.lane.b32.xlu0 %v4785_v24, %s7490_s16  ;;  %v10492_v2 = vpop.permute.xlu0 %4967 }
 0xa9a   : > { %v10504_v23 = vpop.permute.xlu1 %4965 }
 0xa9b   : > { %v4837_v50 = vld [vmem:[#allocation4 + $0x1d0] sm:$0xff] }
 0xa9c   : > { %v6207_v6 = vpop.f32.mrb[60].mxu0 }
 0xa9d   : > { %v4325_v40 = vadd.f32 %v6207_v6, %v4116_v21  ;;  %v4293_v54 = vpop.f32.mrb[61].mxu0  ;;  %5029 = vrot.lane.b32.xlu1 %v4784_v59, %s7490_s16  ;;  %5035 = vrot.lane.b32.xlu0 %v4787_v28, %s7490_s16  ;;  %v10494_v49 = vpop.permute.xlu0 %4971  ;;  %v4830_v28 = vld [vmem:[#allocation4 + $0x198] sm:$0xff]  ;;  %v4831_v21 = vld [vmem:[#allocation4 + $0x1a0] sm:$0xff] }
 0xa9e   : > { %v4324_v48 = vadd.f32 %v4293_v54, %v4115_v15  ;;  %v10508_v62 = vpop.permute.xlu1 %4969  ;;  %v4832_v54 = vld [vmem:[#allocation4 + $0x1a8] sm:$0xff] }
 0xa9f   : > { %4341 = vst.msk [vmem:[#allocation4 + $0x1e8] sm:$0xff] %vm436_vm0, %v4325_v40 }
 0xaa0   : > { %4340 = vst.msk [vmem:[#allocation4 + $0x1e0] sm:$0xff] %vm436_vm0, %v4324_v48 }
 0xaa1   : > { %5033 = vrot.lane.b32.xlu1 %v4786_v32, %s7490_s16  ;;  %5039 = vrot.lane.b32.xlu0 %v4789_v12, %s7490_s16  ;;  %v10498_v11 = vpop.permute.xlu0 %4975 }
 0xaa2   : > { %v10511_v17 = vpop.permute.xlu1 %4973 }
 0xaa5   : > { %5037 = vrot.lane.b32.xlu1 %v4788_v56, %s7490_s16  ;;  %5043 = vrot.lane.b32.xlu0 %v4791_v58, %s7490_s16  ;;  %v10502_v1 = vpop.permute.xlu0 %4979 }
 0xaa6   : > { %v6210_v60 = vpop.f32.mrb[62].mxu0  ;;  %v10513_v51 = vpop.permute.xlu1 %4977 }
 0xaa7   : > { %v4327_v39 = vadd.f32 %v6210_v60, %v4118_v35  ;;  %v4303_v34 = vpop.f32.mrb[63].mxu0 }
 0xaa8   : > { %v4326_v5 = vadd.f32 %v4303_v34, %v4117_v13 }
 0xaa9   : > { %4343 = vst.msk [vmem:[#allocation4 + $0x1f8] sm:$0xff] %vm436_vm0, %v4327_v39  ;;  %5041 = vrot.lane.b32.xlu1 %v4790_v37, %s7490_s16  ;;  %5047 = vrot.lane.b32.xlu0 %v4793_v55, %s7490_s16  ;;  %v10506_v30 = vpop.permute.xlu0 %4983  ;;  %v4838_v37 = vld [vmem:[#allocation4 + $0x1d8] sm:$0xff]  ;;  %v4839_v39 = vld [vmem:[#allocation4 + $0x1e0] sm:$0xff] }
 0xaaa   : > { %4342 = vst.msk [vmem:[#allocation4 + $0x1f0] sm:$0xff] %vm436_vm0, %v4326_v5  ;;  %v10516_v38 = vpop.permute.xlu1 %4981 }
 0xaad   : > { %5045 = vrot.lane.b32.xlu1 %v4792_v43, %s7490_s16  ;;  %v4840_v43 = vld [vmem:[#allocation4 + $0x1e8] sm:$0xff] }
 0xab1   : > { %5049 = vrot.lane.b32.xlu1 %v4794_v46, %s7490_s16  ;;  %v4841_v9 = vld [vmem:[#allocation4 + $0x1f0] sm:$0xff] }
 0xadb   : > { %v4846_v14 = vpop.permute.xlu0 %4845 }
 0xadc   : > { %v4923_v47 = vmul.f32 %v4846_v14, %v4827_v63 }
 0xade   : > { %5083 = vrot.lane.b32.xlu0 %v4923_v47, %s7489_s24  ;;  %v4842_v47 = vld [vmem:[#allocation4 + $0x1f8] sm:$0xff] }
 0xae3   : > { %v4856_v41 = vpop.permute.xlu0 %4855 }
 0xae4   : > { %v4925_v24 = vmul.f32 %v4856_v41, %v4829_v45 }
 0xae6   : > { %5087 = vrot.lane.b32.xlu0 %v4925_v24, %s7489_s24 }
 0xaf0   : > { %v4851_v25 = vpop.permute.xlu1 %4850 }
 0xaf1   : > { %v4924_v7 = vmul.f32 %v4851_v25, %v4828_v52 }
 0xaf3   : > { %5085 = vrot.lane.b32.xlu1 %v4924_v7, %s7489_s24 }
 0xaf4   : > { %v4861_v59 = vpop.permute.xlu1 %4860  ;;  %v4866_v15 = vpop.permute.xlu0 %4865 }
 0xaf5   : > { %v4926_v6 = vmul.f32 %v4861_v59, %v4830_v28  ;;  %v4927_v40 = vmul.f32 %v4866_v15, %v4831_v21 }
 0xaf7   : > { %5089 = vrot.lane.b32.xlu1 %v4926_v6, %s7489_s24  ;;  %5091 = vrot.lane.b32.xlu0 %v4927_v40, %s7489_s24 }
 0xaf8   : > { %v4871_v29 = vpop.permute.xlu1 %4870  ;;  %v4876_v48 = vpop.permute.xlu0 %4875 }
 0xaf9   : > { %v4928_v12 = vmul.f32 %v4871_v29, %v4832_v54  ;;  %v4929_v32 = vmul.f32 %v4876_v48, %v4833_v31  ;;  %v4395_v31 = vld [vmem:[#allocation4] sm:$0xff] }
 0xafb   : > { %5093 = vrot.lane.b32.xlu1 %v4928_v12, %s7489_s24  ;;  %5095 = vrot.lane.b32.xlu0 %v4929_v32, %s7489_s24  ;;  %v4491_v12 = vmul.f32 %v9912_v27, %v4395_v31 }
 0xafc   : > { %v4881_v16 = vpop.permute.xlu1 %4880  ;;  %v4886_v58 = vpop.permute.xlu0 %4885 }
 0xafd   : > { %v4930_v56 = vmul.f32 %v4881_v16, %v4834_v8  ;;  %v4931_v22 = vmul.f32 %v4886_v58, %v4835_v61  ;;  %v5131_v32 = vsel %vm436_vm0, %v4491_v12, %v10484_v18  ;;  %v10924_v12 = vld [vmem:[#allocation28_spill] sm:$0xff] }
 0xaff   : > { %5097 = vrot.lane.b32.xlu1 %v4930_v56, %s7489_s24  ;;  %5099 = vrot.lane.b32.xlu0 %v4931_v22, %s7489_s24  ;;  %v4397_v56 = vld [vmem:[#allocation4 + $0x10] sm:$0xff] }
 0xb00   : > { %v4891_v35 = vpop.permute.xlu1 %4890  ;;  %v4896_v13 = vpop.permute.xlu0 %4895  ;;  %v4493_v27 = vmul.f32 %v9919_v36, %v4397_v56  ;;  %v4404_v56 = vld [vmem:[#allocation4 + $0x48] sm:$0xff] }
 0xb01   : > { %v4932_v19 = vmul.f32 %v4891_v35, %v4836_v44  ;;  %v4933_v60 = vmul.f32 %v4896_v13, %v4837_v50 }
 0xb02   : > { %v5133_v18 = vsel %vm436_vm0, %v4493_v27, %v10488_v0 }
 0xb03   : > { %5101 = vrot.lane.b32.xlu1 %v4932_v19, %s7489_s24  ;;  %5103 = vrot.lane.b32.xlu0 %v4933_v60, %s7489_s24  ;;  %v4396_v19 = vld [vmem:[#allocation4 + $0x8] sm:$0xff] }
 0xb04   : > { %v4901_v55 = vpop.permute.xlu1 %4900  ;;  %v4906_v34 = vpop.permute.xlu0 %4905 }
 0xb05   : > { %v4934_v5 = vmul.f32 %v4901_v55, %v4838_v37  ;;  %v4935_v53 = vmul.f32 %v4906_v34, %v4839_v39  ;;  %v4492_v37 = vmul.f32 %v9933_v57, %v4396_v19  ;;  %v4399_v55 = vld [vmem:[#allocation4 + $0x20] sm:$0xff]  ;;  %v4398_v39 = vld [vmem:[#allocation4 + $0x18] sm:$0xff] }
 0xb07   : > { %5105 = vrot.lane.b32.xlu1 %v4934_v5, %s7489_s24  ;;  %5107 = vrot.lane.b32.xlu0 %v4935_v53, %s7489_s24  ;;  %v5132_v36 = vsel %vm436_vm0, %v4492_v37, %v10496_v4  ;;  %v4495_v5 = vmul.f32 %v10290_v20, %v4399_v55  ;;  %v4494_v53 = vmul.f32 %v10306_v10, %v4398_v39  ;;  %v10927_v37 = vld [vmem:[#allocation37_spill] sm:$0xff] }
 0xb08   : > { %v4911_v26 = vpop.permute.xlu1 %4910  ;;  %v4916_v46 = vpop.permute.xlu0 %4915  ;;  %v4406_v39 = vld [vmem:[#allocation4 + $0x58] sm:$0xff] }
 0xb09   : > { %v4936_v63 = vmul.f32 %v4911_v26, %v4840_v43  ;;  %v4937_v14 = vmul.f32 %v4916_v46, %v4841_v9  ;;  %v5134_v57 = vsel %vm436_vm0, %v4494_v53, %v10500_v42  ;;  %v5135_v4 = vsel %vm436_vm0, %v4495_v5, %v10490_v33  ;;  %v4401_v26 = vld [vmem:[#allocation4 + $0x30] sm:$0xff]  ;;  %v4400_v9 = vld [vmem:[#allocation4 + $0x28] sm:$0xff] }
 0xb0a   : > { %v4497_v10 = vmul.f32 %v10294_v3, %v4401_v26 }
 0xb0b   : > { %5109 = vrot.lane.b32.xlu1 %v4936_v63, %s7489_s24  ;;  %5111 = vrot.lane.b32.xlu0 %v4937_v14, %s7489_s24 }
 0xb0c   : > { %v4921_v45 = vpop.permute.xlu1 %4920  ;;  %v5020_v24 = vpop.permute.xlu0 %5019 }
 0xb0d   : > { %v4938_v41 = vmul.f32 %v4921_v45, %v4842_v47  ;;  %v5148_v16 = vsel %vm5147_vm3, %v5131_v32, %v5020_v24  ;;  %v10923_v47 = vld [vmem:[#allocation33_spill] sm:$0xff]  ;;  %v5137_v24 = vsel %vm436_vm0, %v4497_v10, %v10492_v2 }
 0xb0e   : > { %v4496_v45 = vmul.f32 %v10923_v47, %v4400_v9  ;;  %v10930_v47 = vld [vmem:[#allocation35_spill] sm:$0xff] }
 0xb0f   : > { %5113 = vrot.lane.b32.xlu1 %v4938_v41, %s7489_s24 }
 0xb10   : > { %v5024_v52 = vpop.permute.xlu0 %5023  ;;  %v10532_v7 = vpop.permute.xlu1 %4985  ;;  %v5136_v33 = vsel %vm436_vm0, %v4496_v45, %v10504_v23 }
 0xb11   : > { %v5150_v44 = vsel %vm5147_vm3, %v5133_v18, %v5024_v52  ;;  %v4403_v52 = vld [vmem:[#allocation4 + $0x40] sm:$0xff] }
 0xb12   : > { %v4499_v32 = vmul.f32 %v10924_v12, %v4403_v52 }
 0xb14   : > { %v5028_v25 = vpop.permute.xlu0 %5027  ;;  %v5022_v59 = vpop.permute.xlu1 %5021 }
 0xb15   : > { %v5149_v0 = vsel %vm5147_vm3, %v5132_v36, %v5022_v59  ;;  %v5152_v46 = vsel %vm5147_vm3, %v5135_v4, %v5028_v25  ;;  %v4402_v25 = vld [vmem:[#allocation4 + $0x38] sm:$0xff]  ;;  %v4500_v36 = vmul.f32 %v10927_v37, %v4404_v56  ;;  %v10929_v4 = vld [vmem:[#allocation19_spill] sm:$0xff] }
 0xb16   : > { %v4502_v26 = vmul.f32 %v10929_v4, %v4406_v39 }
 0xb18   : > { %v5032_v28 = vpop.permute.xlu0 %5031  ;;  %v5026_v15 = vpop.permute.xlu1 %5025 }
 0xb19   : > { %v5151_v63 = vsel %vm5147_vm3, %v5134_v57, %v5026_v15  ;;  %v5154_v3 = vsel %vm5147_vm3, %v5137_v24, %v5032_v28  ;;  %v5139_v28 = vsel %vm436_vm0, %v4499_v32, %v10494_v49  ;;  %v5140_v49 = vsel %vm436_vm0, %v4500_v36, %v10511_v17 }
 0xb1c   : > { %v10534_v21 = vpop.permute.xlu0 %5035  ;;  %v5030_v40 = vpop.permute.xlu1 %5029 }
 0xb1d   : > { %v5153_v59 = vsel %vm5147_vm3, %v5136_v33, %v5030_v40  ;;  %v4405_v40 = vld [vmem:[#allocation4 + $0x50] sm:$0xff]  ;;  %v5156_v27 = vsel %vm5147_vm3, %v5139_v28, %v10534_v21  ;;  %v4410_v33 = vld [vmem:[#allocation4 + $0x78] sm:$0xff] }
 0xb20   : > { %v10536_v6 = vpop.permute.xlu0 %5039  ;;  %v10540_v29 = vpop.permute.xlu1 %5033 }
 0xb24   : > { %v10538_v54 = vpop.permute.xlu0 %5043  ;;  %v10547_v8 = vpop.permute.xlu1 %5037 }
 0xb28   : > { %v10542_v48 = vpop.permute.xlu0 %5047  ;;  %v10556_v22 = vpop.permute.xlu1 %5041 }
 0xb2c   : > { %v10563_v13 = vpop.permute.xlu1 %5045 }
 0xb30   : > { %v10565_v60 = vpop.permute.xlu1 %5049 }
 0xb50   : > { %v5084_v61 = vpop.permute.xlu0 %5083 }
 0xb51   : > { %v5165_v58 = vsel %vm5164_vm4, %v5148_v16, %v5084_v61  ;;  %v10925_v16 = vld [vmem:[#allocation34_spill] sm:$0xff] }
 0xb52   : > { %5181 = vst [vmem:[%s10552_s5] sm:$0xff] %v5165_v58  ;;  %v4498_v61 = vmul.f32 %v10925_v16, %v4402_v25 }
 0xb54   : > { %v5138_v2 = vsel %vm436_vm0, %v4498_v61, %v10508_v62 }
 0xb55   : > { %v5155_v18 = vsel %vm5147_vm3, %v5138_v2, %v10540_v29  ;;  %v4407_v29 = vld [vmem:[#allocation4 + $0x60] sm:$0xff] }
 0xb58   : > { %v5088_v35 = vpop.permute.xlu0 %5087 }
 0xb59   : > { %v5167_v50 = vsel %vm5164_vm4, %v5150_v44, %v5088_v35 }
 0xb5a   : > { %5183 = vst [vmem:[%s10552_s5 + $0x10] sm:$0xff] %v5167_v50  ;;  %v10926_v50 = vld [vmem:[#allocation32_spill] sm:$0xff] }
 0xb5b   : > { %v4501_v19 = vmul.f32 %v10926_v50, %v4405_v40 }
 0xb5d   : > { %v5141_v21 = vsel %vm436_vm0, %v4501_v19, %v10498_v11  ;;  %v5142_v11 = vsel %vm436_vm0, %v4502_v26, %v10513_v51 }
 0xb65   : > { %v5086_v34 = vpop.permute.xlu1 %5085 }
 0xb66   : > { %v5166_v43 = vsel %vm5164_vm4, %v5149_v0, %v5086_v34  ;;  %v5158_v0 = vsel %vm5147_vm3, %v5141_v21, %v10536_v6  ;;  %v5157_v34 = vsel %vm5147_vm3, %v5140_v49, %v10547_v8  ;;  %v4409_v8 = vld [vmem:[#allocation4 + $0x70] sm:$0xff] }
 0xb67   : > { %5182 = vst [vmem:[%s10552_s5 + $0x8] sm:$0xff] %v5166_v43  ;;  %v10928_v43 = vld [vmem:[#allocation31_spill] sm:$0xff]  ;;  %v4505_v45 = vmul.f32 %v10930_v47, %v4409_v8 }
 0xb68   : > { %v4503_v57 = vmul.f32 %v10928_v43, %v4407_v29 }
 0xb69   : > { %v5090_v20 = vpop.permute.xlu1 %5089  ;;  %v5092_v14 = vpop.permute.xlu0 %5091 }
 0xb6a   : > { %v5168_v41 = vsel %vm5164_vm4, %v5151_v63, %v5090_v20  ;;  %v5169_v42 = vsel %vm5164_vm4, %v5152_v46, %v5092_v14  ;;  %v5143_v6 = vsel %vm436_vm0, %v4503_v57, %v10502_v1  ;;  %v4408_v46 = vld [vmem:[#allocation4 + $0x68] sm:$0xff]  ;;  %v5159_v20 = vsel %vm5147_vm3, %v5142_v11, %v10556_v22 }
 0xb6b   : > { %5184 = vst [vmem:[%s10552_s5 + $0x18] sm:$0xff] %v5168_v41  ;;  %5185 = vst [vmem:[%s10552_s5 + $0x20] sm:$0xff] %v5169_v42  ;;  %v5160_v63 = vsel %vm5147_vm3, %v5143_v6, %v10538_v54  ;;  %v10931_v41 = vld [vmem:[#allocation20_spill] sm:$0xff]  ;;  %v5145_v22 = vsel %vm436_vm0, %v4505_v45, %v10506_v30 }
 0xb6c   : > { %v4504_v42 = vmul.f32 %v10931_v41, %v4408_v46  ;;  %v5162_v24 = vsel %vm5147_vm3, %v5145_v22, %v10542_v48 }
 0xb6d   : > { %v5094_v15 = vpop.permute.xlu1 %5093  ;;  %v5096_v31 = vpop.permute.xlu0 %5095 }
 0xb6e   : > { %v5170_v58 = vsel %vm5164_vm4, %v5153_v59, %v5094_v15  ;;  %v5171_v23 = vsel %vm5164_vm4, %v5154_v3, %v5096_v31  ;;  %v5144_v54 = vsel %vm436_vm0, %v4504_v42, %v10516_v38  ;;  %v10932_v59 = vld [vmem:[#allocation21_spill] sm:$0xff] }
 0xb6f   : > { %5186 = vst [vmem:[%s10552_s5 + $0x28] sm:$0xff] %v5170_v58  ;;  %5187 = vst [vmem:[%s10552_s5 + $0x30] sm:$0xff] %v5171_v23  ;;  %v5161_v52 = vsel %vm5147_vm3, %v5144_v54, %v10563_v13  ;;  %v4506_v15 = vmul.f32 %v10932_v59, %v4410_v33 }
 0xb71   : > { %v5098_v44 = vpop.permute.xlu1 %5097  ;;  %v5100_v35 = vpop.permute.xlu0 %5099  ;;  %v5146_v48 = vsel %vm436_vm0, %v4506_v15, %v10532_v7 }
 0xb72   : > { %v5172_v55 = vsel %vm5164_vm4, %v5155_v18, %v5098_v44  ;;  %v5173_v62 = vsel %vm5164_vm4, %v5156_v27, %v5100_v35  ;;  %v5163_v13 = vsel %vm5147_vm3, %v5146_v48, %v10565_v60 }
 0xb73   : > { %5188 = vst [vmem:[%s10552_s5 + $0x38] sm:$0xff] %v5172_v55  ;;  %5189 = vst [vmem:[%s10552_s5 + $0x40] sm:$0xff] %v5173_v62 }
 0xb75   : > { %v5102_v5 = vpop.permute.xlu1 %5101  ;;  %v5104_v53 = vpop.permute.xlu0 %5103 }
 0xb76   : > { %v5174_v9 = vsel %vm5164_vm4, %v5157_v34, %v5102_v5  ;;  %v5175_v17 = vsel %vm5164_vm4, %v5158_v0, %v5104_v53 }
 0xb77   : > { %5190 = vst [vmem:[%s10552_s5 + $0x48] sm:$0xff] %v5174_v9  ;;  %5191 = vst [vmem:[%s10552_s5 + $0x50] sm:$0xff] %v5175_v17 }
 0xb79   : > { %v5106_v14 = vpop.permute.xlu1 %5105  ;;  %v5108_v10 = vpop.permute.xlu0 %5107 }
 0xb7a   : > { %v5176_v51 = vsel %vm5164_vm4, %v5159_v20, %v5106_v14  ;;  %v5177_v1 = vsel %vm5164_vm4, %v5160_v63, %v5108_v10 }
 0xb7b   : > { %5192 = vst [vmem:[%s10552_s5 + $0x58] sm:$0xff] %v5176_v51  ;;  %5193 = vst [vmem:[%s10552_s5 + $0x60] sm:$0xff] %v5177_v1 }
 0xb7d   : > { %v5110_v25 = vpop.permute.xlu1 %5109  ;;  %v5112_v3 = vpop.permute.xlu0 %5111 }
 0xb7e   : > { %v5178_v38 = vsel %vm5164_vm4, %v5161_v52, %v5110_v25  ;;  %v5179_v30 = vsel %vm5164_vm4, %v5162_v24, %v5112_v3 }
 0xb7f   : > { %5194 = vst [vmem:[%s10552_s5 + $0x68] sm:$0xff] %v5178_v38  ;;  %5195 = vst [vmem:[%s10552_s5 + $0x70] sm:$0xff] %v5179_v30 }
 0xb81   : > { %v5114_v31 = vpop.permute.xlu1 %5113 }
 0xb82   : > { %v5180_v12 = vsel %vm5164_vm4, %v5163_v13, %v5114_v31 }
 0xb83   : > { %5196 = vst [vmem:[%s10552_s5 + $0x78] sm:$0xff] %v5180_v12 }
 0xb84   : > { %7406 = shalt.err (!%p7403_p13)
}
 0xb85   : > { %s7407_s10 = scalar_lea.hbm %s10661_s26, 2048  ;;  %s7411_s11 = scalar_lea.hbm %s10719_s3, 4096 }
 0xb86   : > { %p7408_p11 = scmp.ne.s32.totalorder %s10661_s26, %s7407_s10  ;;  %p7412_p7 = scmp.lt.u32.totalorder %s10661_s26, %s10719_s3 }
 0xb87   : > { %p7413_p4 = scmp.lt.u32.totalorder %s7411_s11, %s7407_s10  ;;  %p7415_p0 = scmp.lt.u32.totalorder %s7407_s10, %s10661_s26 }
 0xb88   : > { %p7409_p2 = pnand %p7408_p11, %p10933_p10 }
 0xb89   : > { %p7414_p3 = por %p7413_p4, %p7412_p7 }
 0xb8a   : > { %p7410_p5 = pneg %p7409_p2 }
 0xb8b   : > { %p7416_p8 = por %p7415_p0, %p7414_p3 }
 0xb8d   : > { %p7417_p9 = pnand %p7416_p8, %p7410_p5 }
 0xb8f   : > { %7420 = shalt.err (!%p7417_p9)
}
 0xb90   : > { %s7493_s18 = smov 128   ;;  %s7494_s24 = smov 8  }
 0xb91   : > { %6537 = dma.vmem_to_hbm [thread:$0]  (%p10933_p10), %s10663_s30, 2048, %s10661_s26, %s5198_s15, %s7493_s18, %s7493_s18, %s7494_s24  }
 0xb92 PF: > { %s5228_s16 = sand.u32 1, %s7459_s12   ;;  %p10934_p12 = scmp.ne.s32.totalorder %s10781_s27, 0 }
 0xb93   : > { %p10935_p1 = scmp.ge.s32.totalorder %s7479_s17, 2  ;;  %s5229_s20 = scalar_lea.sflag [#allocation7], %s5228_s16 }
 0xb95   : > { %p6550_p6 = pnand %p10935_p1, %p10934_p12 }
 0xb97   : > { %7454 = dma.done.wait (!%p6550_p6), %s5229_s20, 2048  }
 0xb98   : > { %7456 = vsyncadd (!%p6550_p6), %s5229_s20, 4294965248  ;;  %s22_s17 = sadd.s32 1, %s7479_s17   ;;  %s10936_s5 = sld [smem:[#allocation17_spill]] }
 0xb99   : > { %p19_p13 = scmp.ge.s32.totalorder %s22_s17, 4   ;;  %s10937_s15 = sld [smem:[#allocation15_spill]] }
 0xb9a   : > { %s10938_s16 = sld [smem:[#allocation16_spill]]  ;;  %s10939_s12 = smov %s7463_s13 }
 0xb9b   : > { %s10940_s13 = smov %s7467_s14  ;;  %21 = sbr.rel (!%p19_p13) target bundleno = 10 (0xa), region = 118 }
 0xb9e   : > { %s10941_s14 = smov %s10936_s5 }
 0xba2   :  { %5234 = vsyncpa [#allocation6], 1 }
 0xba3   :  { %5236 = vsyncpa [#allocation6 + $0x1], 1 }
 0xba4   :  { %5237 = vsyncpa [#allocation9], 1 }
 0xba5   :  { %5239 = vsyncpa [#allocation9 + $0x1], 1 }
 0xba6   :  { %5240 = vsyncpa [#allocation7], 1 }
 0xba7   :  { %5242 = vsyncpa [#allocation7 + $0x1], 1 }

</bundles_post_ra>
